<compile_context>
chip_gen: v7x
topology: tpu7x:2x2x1
jax: 0.10.0
libtpu: 0.0.40
codegen_flags: <defaults>
</compile_context>

<pallas_src>
import jax
import jax.numpy as jnp
from jax import lax
from jax.experimental import pallas as pl
from jax.experimental.pallas import tpu as pltpu

INPUT_SIZE = 300
HIDDEN_SIZE = 100
OUTPUT_SIZE = 2
NUM_LAYERS = 2
SEQ_LEN = 8
BATCH = 2

H = HIDDEN_SIZE
HP = 128               # hidden padded to a lane boundary
GP = 3 * HP            # padded gate width: r | z | n at lane offsets 0 / 128 / 256
BP = 8                 # batch padded to f32 sublane count

_VMEM = pl.BlockSpec(memory_space=pltpu.MemorySpace.VMEM)


# ----------------------------------------------------------------------------
# Fused Pallas kernel: whole forward pass in one launch
# ----------------------------------------------------------------------------
def _bigru_fused_kernel(x_ref, h0_ref,
                        wih0f_ref, whh0f_ref, bih0f_ref, bhh0f_ref,
                        wih0b_ref, whh0b_ref, bih0b_ref, bhh0b_ref,
                        wih1f_ref, whh1f_ref, bih1f_ref, bhh1f_ref,
                        wih1b_ref, whh1b_ref, bih1b_ref, bhh1b_ref,
                        fcw_ref, fcb_ref,
                        out_ref, hT_ref):
    """x_ref: (T*BP, D0) padded input; h0_ref: (2L, BP, HP) padded initial hidden.

    Weight layout (prepared outside): W_ih^T / W_hh^T with gate columns at lane
    offsets 0/128/256 (zero padded 100->128), hidden rows padded to 128,
    layer-1 / FC input rows remapped to the padded [fwd 0:128 | bwd 128:256] layout.
    """
    T = SEQ_LEN

    def cell(h, gi, whh_ref, bhh_ref):
        # One GRU cell step (PyTorch gate order r, z, n; r applied inside tanh).
        gh = jnp.dot(h, whh_ref[...], preferred_element_type=jnp.float32) + bhh_ref[...]
        rz = jax.nn.sigmoid(gi[:, :2 * HP] + gh[:, :2 * HP])
        r = rz[:, :HP]
        z = rz[:, HP:2 * HP]
        n = jnp.tanh(gi[:, 2 * HP:] + r * gh[:, 2 * HP:])
        return (1.0 - z) * n + z * h

    def run_layer(x2d,
                  wihf_ref, bihf_ref, whhf_ref, bhhf_ref,
                  wihb_ref, bihb_ref, whhb_ref, bhhb_ref,
                  hf0, hb0):
        # Hoisted input-hidden GEMMs: (T*BP, Din) @ (Din, GP) once per direction.
        gif = jnp.dot(x2d, wihf_ref[...], preferred_element_type=jnp.float32) + bihf_ref[...]
        gib = jnp.dot(x2d, wihb_ref[...], preferred_element_type=jnp.float32) + bihb_ref[...]
        hf, hb = hf0, hb0
        out_f = [None] * T
        out_b = [None] * T
        # Fully unrolled; fwd and bwd recurrences interleaved (bwd walks t = T-1 .. 0).
        for s in range(T):
            tf = s
            tb = T - 1 - s
            hf = cell(hf, gif[tf * BP:(tf + 1) * BP, :], whhf_ref, bhhf_ref)
            hb = cell(hb, gib[tb * BP:(tb + 1) * BP, :], whhb_ref, bhhb_ref)
            out_f[tf] = hf
            out_b[tb] = hb
        return out_f, out_b, hf, hb

    # ---------------- layer 0 ----------------
    x2d = x_ref[...]                                             # (T*BP, D0)
    of0, ob0, hf0T, hb0T = run_layer(
        x2d,
        wih0f_ref, bih0f_ref, whh0f_ref, bhh0f_ref,
        wih0b_ref, bih0b_ref, whh0b_ref, bhh0b_ref,
        h0_ref[0], h0_ref[1])
    hT_ref[0] = hf0T[:BATCH, :H]
    hT_ref[1] = hb0T[:BATCH, :H]

    # Layer-1 input: [fwd | bwd] per timestep (lane-aligned concat), stacked along rows.
    l1 = jnp.concatenate(
        [jnp.concatenate([of0[t], ob0[t]], axis=1) for t in range(T)], axis=0)   # (T*BP, 2*HP)

    # ---------------- layer 1 ----------------
    of1, ob1, hf1T, hb1T = run_layer(
        l1,
        wih1f_ref, bih1f_ref, whh1f_ref, bhh1f_ref,
        wih1b_ref, bih1b_ref, whh1b_ref, bhh1b_ref,
        h0_ref[2], h0_ref[3])
    hT_ref[2] = hf1T[:BATCH, :H]
    hT_ref[3] = hb1T[:BATCH, :H]

    # ---------------- head: ReLU -> FC -> LogSoftmax (fed straight from VMEM values) -------
    # out[-1] of the top layer = [fwd hidden at t=T-1 (final), bwd hidden at t=T-1 (first step)]
    head_in = jnp.concatenate([of1[T - 1], ob1[T - 1]], axis=1)   # (BP, 2*HP)
    relu = jnp.maximum(head_in, 0.0)
    logits = jnp.dot(relu, fcw_ref[...], preferred_element_type=jnp.float32) + fcb_ref[...]
    m = jnp.max(logits, axis=1, keepdims=True)
    shifted = logits - m
    lse = jnp.log(jnp.sum(jnp.exp(shifted), axis=1, keepdims=True))
    out_ref[...] = (shifted - lse)[:BATCH, :]


# ----------------------------------------------------------------------------
# One-time parameter preparation (transpose + pad to the lane-aligned layout)
# ----------------------------------------------------------------------------
def _gate_pad_cols(wt):
    """wt: (Din, 3H) -> (Din, GP) with gate g at lanes [g*HP, g*HP+H)."""
    out = jnp.zeros((wt.shape[0], GP), jnp.float32)
    for g in range(3):
        out = out.at[:, g * HP:g * HP + H].set(wt[:, g * H:(g + 1) * H])
    return out


def _pad_bias(b):
    out = jnp.zeros((1, GP), jnp.float32)
    for g in range(3):
        out = out.at[0, g * HP:g * HP + H].set(b[g * H:(g + 1) * H])
    return out


def _remap_bidir_rows(w):
    """w: (2H, N) rows [fwd 0:H | bwd H:2H] -> (2*HP, N) rows at [0:H] and [HP:HP+H]."""
    out = jnp.zeros((2 * HP, w.shape[1]), jnp.float32)
    out = out.at[0:H, :].set(w[0:H, :])
    out = out.at[HP:HP + H, :].set(w[H:2 * H, :])
    return out


def prepare_params(params):
    gru = []
    for layer in range(NUM_LAYERS):
        lp = {}
        for dname in ('fwd', 'bwd'):
            w_ih, w_hh, b_ih, b_hh = params['gru'][layer][dname]
            wih_t = _gate_pad_cols(w_ih.T)                 # (Din, GP)
            if layer > 0:
                wih_t = _remap_bidir_rows(wih_t)           # (2*HP, GP)
            whh_t = jnp.zeros((HP, GP), jnp.float32).at[:H, :].set(_gate_pad_cols(w_hh.T))
            lp[dname] = (wih_t, whh_t, _pad_bias(b_ih), _pad_bias(b_hh))
        gru.append(lp)
    fcw = _remap_bidir_rows(params['fc_w'].T)              # (2*HP, O)
    fcb = params['fc_b'].reshape(1, -1)
    return {'gru': gru, 'fcw': fcw, 'fcb': fcb}


# ----------------------------------------------------------------------------
# Forward wrapper: one pallas_call for the whole network
# ----------------------------------------------------------------------------
def bigru_forward(prep, x, h0):
    """Equivalent of BiGRUnetWithEmbeddings.forward(x, h). x: (T,B,D), h0: (2L,B,H)."""
    T, B, D = x.shape
    x_p = jnp.pad(x, ((0, 0), (0, BP - B), (0, 0))).reshape(T * BP, D)
    h0_p = jnp.pad(h0, ((0, 0), (0, BP - B), (0, HP - H)))
    g0f = prep['gru'][0]['fwd']
    g0b = prep['gru'][0]['bwd']
    g1f = prep['gru'][1]['fwd']
    g1b = prep['gru'][1]['bwd']
    out, hT = pl.pallas_call(
        _bigru_fused_kernel,
        out_shape=(jax.ShapeDtypeStruct((B, OUTPUT_SIZE), jnp.float32),
                   jax.ShapeDtypeStruct((2 * NUM_LAYERS, B, H), jnp.float32)),
        in_specs=[_VMEM] * 20,
        out_specs=(_VMEM, _VMEM),
    )(x_p, h0_p,
      g0f[0], g0f[1], g0f[2], g0f[3],
      g0b[0], g0b[1], g0b[2], g0b[3],
      g1f[0], g1f[1], g1f[2], g1f[3],
      g1b[0], g1b[1], g1b[2], g1b[3],
      prep['fcw'], prep['fcb'])
    return out, hT


# ----------------------------------------------------------------------------
# Pure-JAX reference (same math, lax.scan) for correctness check
# ----------------------------------------------------------------------------
def _ref_gru_dir(x, h0, w_ih, w_hh, b_ih, b_hh):
    Hs = h0.shape[-1]

    def step(h, x_t):
        gi = x_t @ w_ih.T + b_ih
        gh = h @ w_hh.T + b_hh
        r = jax.nn.sigmoid(gi[:, :Hs] + gh[:, :Hs])
        z = jax.nn.sigmoid(gi[:, Hs:2 * Hs] + gh[:, Hs:2 * Hs])
        n = jnp.tanh(gi[:, 2 * Hs:] + r * gh[:, 2 * Hs:])
        h_new = (1.0 - z) * n + z * h
        return h_new, h_new

    hT, out = lax.scan(step, h0, x)
    return out, hT


def ref_forward(params, x, h0):
    layer_in = x
    h_finals = []
    for layer in range(NUM_LAYERS):
        pf = params['gru'][layer]['fwd']
        pb = params['gru'][layer]['bwd']
        out_f, hT_f = _ref_gru_dir(layer_in, h0[2 * layer], *pf)
        out_b_rev, hT_b = _ref_gru_dir(jnp.flip(layer_in, 0), h0[2 * layer + 1], *pb)
        out_b = jnp.flip(out_b_rev, 0)
        layer_in = jnp.concatenate([out_f, out_b], axis=-1)
        h_finals.extend([hT_f, hT_b])
    h_out = jnp.stack(h_finals, 0)
    last = jnp.maximum(layer_in[-1], 0.0)
    logits = last @ params['fc_w'].T + params['fc_b']
    return jax.nn.log_softmax(logits, axis=1), h_out


# ----------------------------------------------------------------------------
# Deterministic parameter init (matching nn.GRU / nn.Linear shapes)
# ----------------------------------------------------------------------------
def init_params(key):
    std = 1.0 / (HIDDEN_SIZE ** 0.5)
    keys = iter(jax.random.split(key, 64))

    def u(shape):
        return jax.random.uniform(next(keys), shape, jnp.float32, -std, std)

    gru = []
    for layer in range(NUM_LAYERS):
        d_in = INPUT_SIZE if layer == 0 else 2 * HIDDEN_SIZE
        layer_p = {}
        for dname in ('fwd', 'bwd'):
            layer_p[dname] = (u((3 * HIDDEN_SIZE, d_in)),         # weight_ih
                              u((3 * HIDDEN_SIZE, HIDDEN_SIZE)),  # weight_hh
                              u((3 * HIDDEN_SIZE,)),              # bias_ih
                              u((3 * HIDDEN_SIZE,)))              # bias_hh
        gru.append(layer_p)
    fc_w = u((OUTPUT_SIZE, 2 * HIDDEN_SIZE))
    fc_b = u((OUTPUT_SIZE,))
    return {'gru': gru, 'fc_w': fc_w, 'fc_b': fc_b}


if __name__ == "__main__":
    key = jax.random.PRNGKey(0)
    pkey, xkey = jax.random.split(key)
    params = init_params(pkey)
    prep = jax.tree_util.tree_map(lambda a: a, prepare_params(params))  # one-time weight prep

    x = jax.random.normal(xkey, (SEQ_LEN, BATCH, INPUT_SIZE), jnp.float32)
    # init_hidden() zeros, extended to batch=BATCH
    h0 = jnp.zeros((2 * NUM_LAYERS, BATCH, HIDDEN_SIZE), jnp.float32)

    fwd = jax.jit(bigru_forward)
    out, h = fwd(prep, x, h0)
    out = jax.block_until_ready(out)
    h = jax.block_until_ready(h)

    out_ref, h_ref = ref_forward(params, x, h0)
    assert out.shape == (BATCH, OUTPUT_SIZE)
    assert h.shape == (2 * NUM_LAYERS, BATCH, HIDDEN_SIZE)
    assert jnp.allclose(out, out_ref, atol=1e-3, rtol=1e-3), "logits mismatch"
    assert jnp.allclose(h, h_ref, atol=1e-3, rtol=1e-3), "hidden mismatch"

    print("KERNEL_OK")
</pallas_src>

<mosaic_0001>
module attributes {stable_mosaic.version = 11 : i64} {
  func.func @_bigru_fused_kernel(%arg0: memref<64x300xf32, #tpu.memory_space<vmem>>, %arg1: memref<4x8x128xf32, #tpu.memory_space<vmem>>, %arg2: memref<300x384xf32, #tpu.memory_space<vmem>>, %arg3: memref<128x384xf32, #tpu.memory_space<vmem>>, %arg4: memref<1x384xf32, #tpu.memory_space<vmem>>, %arg5: memref<1x384xf32, #tpu.memory_space<vmem>>, %arg6: memref<300x384xf32, #tpu.memory_space<vmem>>, %arg7: memref<128x384xf32, #tpu.memory_space<vmem>>, %arg8: memref<1x384xf32, #tpu.memory_space<vmem>>, %arg9: memref<1x384xf32, #tpu.memory_space<vmem>>, %arg10: memref<256x384xf32, #tpu.memory_space<vmem>>, %arg11: memref<128x384xf32, #tpu.memory_space<vmem>>, %arg12: memref<1x384xf32, #tpu.memory_space<vmem>>, %arg13: memref<1x384xf32, #tpu.memory_space<vmem>>, %arg14: memref<256x384xf32, #tpu.memory_space<vmem>>, %arg15: memref<128x384xf32, #tpu.memory_space<vmem>>, %arg16: memref<1x384xf32, #tpu.memory_space<vmem>>, %arg17: memref<1x384xf32, #tpu.memory_space<vmem>>, %arg18: memref<256x2xf32, #tpu.memory_space<vmem>>, %arg19: memref<1x2xf32, #tpu.memory_space<vmem>>, %arg20: memref<2x2xf32, #tpu.memory_space<vmem>>, %arg21: memref<4x2x100xf32, #tpu.memory_space<vmem>>) attributes {dimension_semantics = [], scalar_prefetch = 0 : i64, scratch_operands = 0 : i64, tpu.core_type = #tpu.core_type<tc>} {
    %c0 = arith.constant 0 : index
    %c0_0 = arith.constant 0 : index
    %0 = vector.load %arg0[%c0, %c0_0] : memref<64x300xf32, #tpu.memory_space<vmem>>, vector<64x300xf32>
    %c0_1 = arith.constant 0 : index
    %c0_2 = arith.constant 0 : index
    %c0_3 = arith.constant 0 : index
    %1 = vector.load %arg1[%c0_1, %c0_2, %c0_3] : memref<4x8x128xf32, #tpu.memory_space<vmem>>, vector<1x8x128xf32>
    %2 = vector.shape_cast %1 : vector<1x8x128xf32> to vector<8x128xf32>
    %c1 = arith.constant 1 : index
    %c0_4 = arith.constant 0 : index
    %c0_5 = arith.constant 0 : index
    %3 = vector.load %arg1[%c1, %c0_4, %c0_5] : memref<4x8x128xf32, #tpu.memory_space<vmem>>, vector<1x8x128xf32>
    %4 = vector.shape_cast %3 : vector<1x8x128xf32> to vector<8x128xf32>
    %c0_6 = arith.constant 0 : index
    %c0_7 = arith.constant 0 : index
    %5 = vector.load %arg2[%c0_6, %c0_7] : memref<300x384xf32, #tpu.memory_space<vmem>>, vector<300x384xf32>
    %cst = arith.constant dense<0.000000e+00> : vector<64x384xf32>
    %6 = tpu.matmul %0, %5, %cst {dimension_numbers = #tpu.dot_dimension_numbers<[1], [0], [0], [1], [0, 0, 1, 1], [], []>} : vector<64x300xf32>, vector<300x384xf32>, vector<64x384xf32> -> vector<64x384xf32>
    %c0_8 = arith.constant 0 : index
    %c0_9 = arith.constant 0 : index
    %7 = vector.load %arg4[%c0_8, %c0_9] : memref<1x384xf32, #tpu.memory_space<vmem>>, vector<1x384xf32>
    %8 = vector.broadcast %7 : vector<1x384xf32> to vector<64x384xf32>
    %9 = arith.addf %6, %8 : vector<64x384xf32>
    %c0_10 = arith.constant 0 : index
    %c0_11 = arith.constant 0 : index
    %10 = vector.load %arg6[%c0_10, %c0_11] : memref<300x384xf32, #tpu.memory_space<vmem>>, vector<300x384xf32>
    %cst_12 = arith.constant dense<0.000000e+00> : vector<64x384xf32>
    %11 = tpu.matmul %0, %10, %cst_12 {dimension_numbers = #tpu.dot_dimension_numbers<[1], [0], [0], [1], [0, 0, 1, 1], [], []>} : vector<64x300xf32>, vector<300x384xf32>, vector<64x384xf32> -> vector<64x384xf32>
    %c0_13 = arith.constant 0 : index
    %c0_14 = arith.constant 0 : index
    %12 = vector.load %arg8[%c0_13, %c0_14] : memref<1x384xf32, #tpu.memory_space<vmem>>, vector<1x384xf32>
    %13 = vector.broadcast %12 : vector<1x384xf32> to vector<64x384xf32>
    %14 = arith.addf %11, %13 : vector<64x384xf32>
    %15 = vector.extract_strided_slice %9 {offsets = [0, 0], sizes = [8, 384], strides = [1, 1]} : vector<64x384xf32> to vector<8x384xf32>
    %c0_15 = arith.constant 0 : index
    %c0_16 = arith.constant 0 : index
    %16 = vector.load %arg3[%c0_15, %c0_16] : memref<128x384xf32, #tpu.memory_space<vmem>>, vector<128x384xf32>
    %cst_17 = arith.constant dense<0.000000e+00> : vector<8x384xf32>
    %17 = tpu.matmul %2, %16, %cst_17 {dimension_numbers = #tpu.dot_dimension_numbers<[1], [0], [0], [1], [0, 0, 1, 1], [], []>} : vector<8x128xf32>, vector<128x384xf32>, vector<8x384xf32> -> vector<8x384xf32>
    %c0_18 = arith.constant 0 : index
    %c0_19 = arith.constant 0 : index
    %18 = vector.load %arg5[%c0_18, %c0_19] : memref<1x384xf32, #tpu.memory_space<vmem>>, vector<1x384xf32>
    %19 = vector.broadcast %18 : vector<1x384xf32> to vector<8x384xf32>
    %20 = arith.addf %17, %19 : vector<8x384xf32>
    %21 = vector.extract_strided_slice %15 {offsets = [0, 0], sizes = [8, 256], strides = [1, 1]} : vector<8x384xf32> to vector<8x256xf32>
    %22 = vector.extract_strided_slice %20 {offsets = [0, 0], sizes = [8, 256], strides = [1, 1]} : vector<8x384xf32> to vector<8x256xf32>
    %23 = arith.addf %21, %22 : vector<8x256xf32>
    %24 = arith.negf %23 : vector<8x256xf32>
    %25 = math.exp %24 : vector<8x256xf32>
    %cst_20 = arith.constant 1.000000e+00 : f32
    %26 = vector.broadcast %cst_20 : f32 to vector<8x256xf32>
    %27 = arith.addf %26, %25 : vector<8x256xf32>
    %28 = arith.divf %26, %27 : vector<8x256xf32>
    %29 = vector.extract_strided_slice %28 {offsets = [0, 0], sizes = [8, 128], strides = [1, 1]} : vector<8x256xf32> to vector<8x128xf32>
    %30 = vector.extract_strided_slice %28 {offsets = [0, 128], sizes = [8, 128], strides = [1, 1]} : vector<8x256xf32> to vector<8x128xf32>
    %31 = vector.extract_strided_slice %15 {offsets = [0, 256], sizes = [8, 128], strides = [1, 1]} : vector<8x384xf32> to vector<8x128xf32>
    %32 = vector.extract_strided_slice %20 {offsets = [0, 256], sizes = [8, 128], strides = [1, 1]} : vector<8x384xf32> to vector<8x128xf32>
    %33 = arith.mulf %29, %32 : vector<8x128xf32>
    %34 = arith.addf %31, %33 : vector<8x128xf32>
    %35 = math.tanh %34 : vector<8x128xf32>
    %cst_21 = arith.constant 1.000000e+00 : f32
    %36 = vector.broadcast %cst_21 : f32 to vector<8x128xf32>
    %37 = arith.subf %36, %30 : vector<8x128xf32>
    %38 = arith.mulf %37, %35 : vector<8x128xf32>
    %39 = arith.mulf %30, %2 : vector<8x128xf32>
    %40 = arith.addf %38, %39 : vector<8x128xf32>
    %41 = vector.extract_strided_slice %14 {offsets = [56, 0], sizes = [8, 384], strides = [1, 1]} : vector<64x384xf32> to vector<8x384xf32>
    %c0_22 = arith.constant 0 : index
    %c0_23 = arith.constant 0 : index
    %42 = vector.load %arg7[%c0_22, %c0_23] : memref<128x384xf32, #tpu.memory_space<vmem>>, vector<128x384xf32>
    %cst_24 = arith.constant dense<0.000000e+00> : vector<8x384xf32>
    %43 = tpu.matmul %4, %42, %cst_24 {dimension_numbers = #tpu.dot_dimension_numbers<[1], [0], [0], [1], [0, 0, 1, 1], [], []>} : vector<8x128xf32>, vector<128x384xf32>, vector<8x384xf32> -> vector<8x384xf32>
    %c0_25 = arith.constant 0 : index
    %c0_26 = arith.constant 0 : index
    %44 = vector.load %arg9[%c0_25, %c0_26] : memref<1x384xf32, #tpu.memory_space<vmem>>, vector<1x384xf32>
    %45 = vector.broadcast %44 : vector<1x384xf32> to vector<8x384xf32>
    %46 = arith.addf %43, %45 : vector<8x384xf32>
    %47 = vector.extract_strided_slice %41 {offsets = [0, 0], sizes = [8, 256], strides = [1, 1]} : vector<8x384xf32> to vector<8x256xf32>
    %48 = vector.extract_strided_slice %46 {offsets = [0, 0], sizes = [8, 256], strides = [1, 1]} : vector<8x384xf32> to vector<8x256xf32>
    %49 = arith.addf %47, %48 : vector<8x256xf32>
    %50 = arith.negf %49 : vector<8x256xf32>
    %51 = math.exp %50 : vector<8x256xf32>
    %cst_27 = arith.constant 1.000000e+00 : f32
    %52 = vector.broadcast %cst_27 : f32 to vector<8x256xf32>
    %53 = arith.addf %52, %51 : vector<8x256xf32>
    %54 = arith.divf %52, %53 : vector<8x256xf32>
    %55 = vector.extract_strided_slice %54 {offsets = [0, 0], sizes = [8, 128], strides = [1, 1]} : vector<8x256xf32> to vector<8x128xf32>
    %56 = vector.extract_strided_slice %54 {offsets = [0, 128], sizes = [8, 128], strides = [1, 1]} : vector<8x256xf32> to vector<8x128xf32>
    %57 = vector.extract_strided_slice %41 {offsets = [0, 256], sizes = [8, 128], strides = [1, 1]} : vector<8x384xf32> to vector<8x128xf32>
    %58 = vector.extract_strided_slice %46 {offsets = [0, 256], sizes = [8, 128], strides = [1, 1]} : vector<8x384xf32> to vector<8x128xf32>
    %59 = arith.mulf %55, %58 : vector<8x128xf32>
    %60 = arith.addf %57, %59 : vector<8x128xf32>
    %61 = math.tanh %60 : vector<8x128xf32>
    %cst_28 = arith.constant 1.000000e+00 : f32
    %62 = vector.broadcast %cst_28 : f32 to vector<8x128xf32>
    %63 = arith.subf %62, %56 : vector<8x128xf32>
    %64 = arith.mulf %63, %61 : vector<8x128xf32>
    %65 = arith.mulf %56, %4 : vector<8x128xf32>
    %66 = arith.addf %64, %65 : vector<8x128xf32>
    %67 = vector.extract_strided_slice %9 {offsets = [8, 0], sizes = [8, 384], strides = [1, 1]} : vector<64x384xf32> to vector<8x384xf32>
    %c0_29 = arith.constant 0 : index
    %c0_30 = arith.constant 0 : index
    %68 = vector.load %arg3[%c0_29, %c0_30] : memref<128x384xf32, #tpu.memory_space<vmem>>, vector<128x384xf32>
    %cst_31 = arith.constant dense<0.000000e+00> : vector<8x384xf32>
    %69 = tpu.matmul %40, %68, %cst_31 {dimension_numbers = #tpu.dot_dimension_numbers<[1], [0], [0], [1], [0, 0, 1, 1], [], []>} : vector<8x128xf32>, vector<128x384xf32>, vector<8x384xf32> -> vector<8x384xf32>
    %c0_32 = arith.constant 0 : index
    %c0_33 = arith.constant 0 : index
    %70 = vector.load %arg5[%c0_32, %c0_33] : memref<1x384xf32, #tpu.memory_space<vmem>>, vector<1x384xf32>
    %71 = vector.broadcast %70 : vector<1x384xf32> to vector<8x384xf32>
    %72 = arith.addf %69, %71 : vector<8x384xf32>
    %73 = vector.extract_strided_slice %67 {offsets = [0, 0], sizes = [8, 256], strides = [1, 1]} : vector<8x384xf32> to vector<8x256xf32>
    %74 = vector.extract_strided_slice %72 {offsets = [0, 0], sizes = [8, 256], strides = [1, 1]} : vector<8x384xf32> to vector<8x256xf32>
    %75 = arith.addf %73, %74 : vector<8x256xf32>
    %76 = arith.negf %75 : vector<8x256xf32>
    %77 = math.exp %76 : vector<8x256xf32>
    %cst_34 = arith.constant 1.000000e+00 : f32
    %78 = vector.broadcast %cst_34 : f32 to vector<8x256xf32>
    %79 = arith.addf %78, %77 : vector<8x256xf32>
    %80 = arith.divf %78, %79 : vector<8x256xf32>
    %81 = vector.extract_strided_slice %80 {offsets = [0, 0], sizes = [8, 128], strides = [1, 1]} : vector<8x256xf32> to vector<8x128xf32>
    %82 = vector.extract_strided_slice %80 {offsets = [0, 128], sizes = [8, 128], strides = [1, 1]} : vector<8x256xf32> to vector<8x128xf32>
    %83 = vector.extract_strided_slice %67 {offsets = [0, 256], sizes = [8, 128], strides = [1, 1]} : vector<8x384xf32> to vector<8x128xf32>
    %84 = vector.extract_strided_slice %72 {offsets = [0, 256], sizes = [8, 128], strides = [1, 1]} : vector<8x384xf32> to vector<8x128xf32>
    %85 = arith.mulf %81, %84 : vector<8x128xf32>
    %86 = arith.addf %83, %85 : vector<8x128xf32>
    %87 = math.tanh %86 : vector<8x128xf32>
    %cst_35 = arith.constant 1.000000e+00 : f32
    %88 = vector.broadcast %cst_35 : f32 to vector<8x128xf32>
    %89 = arith.subf %88, %82 : vector<8x128xf32>
    %90 = arith.mulf %89, %87 : vector<8x128xf32>
    %91 = arith.mulf %82, %40 : vector<8x128xf32>
    %92 = arith.addf %90, %91 : vector<8x128xf32>
    %93 = vector.extract_strided_slice %14 {offsets = [48, 0], sizes = [8, 384], strides = [1, 1]} : vector<64x384xf32> to vector<8x384xf32>
    %c0_36 = arith.constant 0 : index
    %c0_37 = arith.constant 0 : index
    %94 = vector.load %arg7[%c0_36, %c0_37] : memref<128x384xf32, #tpu.memory_space<vmem>>, vector<128x384xf32>
    %cst_38 = arith.constant dense<0.000000e+00> : vector<8x384xf32>
    %95 = tpu.matmul %66, %94, %cst_38 {dimension_numbers = #tpu.dot_dimension_numbers<[1], [0], [0], [1], [0, 0, 1, 1], [], []>} : vector<8x128xf32>, vector<128x384xf32>, vector<8x384xf32> -> vector<8x384xf32>
    %c0_39 = arith.constant 0 : index
    %c0_40 = arith.constant 0 : index
    %96 = vector.load %arg9[%c0_39, %c0_40] : memref<1x384xf32, #tpu.memory_space<vmem>>, vector<1x384xf32>
    %97 = vector.broadcast %96 : vector<1x384xf32> to vector<8x384xf32>
    %98 = arith.addf %95, %97 : vector<8x384xf32>
    %99 = vector.extract_strided_slice %93 {offsets = [0, 0], sizes = [8, 256], strides = [1, 1]} : vector<8x384xf32> to vector<8x256xf32>
    %100 = vector.extract_strided_slice %98 {offsets = [0, 0], sizes = [8, 256], strides = [1, 1]} : vector<8x384xf32> to vector<8x256xf32>
    %101 = arith.addf %99, %100 : vector<8x256xf32>
    %102 = arith.negf %101 : vector<8x256xf32>
    %103 = math.exp %102 : vector<8x256xf32>
    %cst_41 = arith.constant 1.000000e+00 : f32
    %104 = vector.broadcast %cst_41 : f32 to vector<8x256xf32>
    %105 = arith.addf %104, %103 : vector<8x256xf32>
    %106 = arith.divf %104, %105 : vector<8x256xf32>
    %107 = vector.extract_strided_slice %106 {offsets = [0, 0], sizes = [8, 128], strides = [1, 1]} : vector<8x256xf32> to vector<8x128xf32>
    %108 = vector.extract_strided_slice %106 {offsets = [0, 128], sizes = [8, 128], strides = [1, 1]} : vector<8x256xf32> to vector<8x128xf32>
    %109 = vector.extract_strided_slice %93 {offsets = [0, 256], sizes = [8, 128], strides = [1, 1]} : vector<8x384xf32> to vector<8x128xf32>
    %110 = vector.extract_strided_slice %98 {offsets = [0, 256], sizes = [8, 128], strides = [1, 1]} : vector<8x384xf32> to vector<8x128xf32>
    %111 = arith.mulf %107, %110 : vector<8x128xf32>
    %112 = arith.addf %109, %111 : vector<8x128xf32>
    %113 = math.tanh %112 : vector<8x128xf32>
    %cst_42 = arith.constant 1.000000e+00 : f32
    %114 = vector.broadcast %cst_42 : f32 to vector<8x128xf32>
    %115 = arith.subf %114, %108 : vector<8x128xf32>
    %116 = arith.mulf %115, %113 : vector<8x128xf32>
    %117 = arith.mulf %108, %66 : vector<8x128xf32>
    %118 = arith.addf %116, %117 : vector<8x128xf32>
    %119 = vector.extract_strided_slice %9 {offsets = [16, 0], sizes = [8, 384], strides = [1, 1]} : vector<64x384xf32> to vector<8x384xf32>
    %c0_43 = arith.constant 0 : index
    %c0_44 = arith.constant 0 : index
    %120 = vector.load %arg3[%c0_43, %c0_44] : memref<128x384xf32, #tpu.memory_space<vmem>>, vector<128x384xf32>
    %cst_45 = arith.constant dense<0.000000e+00> : vector<8x384xf32>
    %121 = tpu.matmul %92, %120, %cst_45 {dimension_numbers = #tpu.dot_dimension_numbers<[1], [0], [0], [1], [0, 0, 1, 1], [], []>} : vector<8x128xf32>, vector<128x384xf32>, vector<8x384xf32> -> vector<8x384xf32>
    %c0_46 = arith.constant 0 : index
    %c0_47 = arith.constant 0 : index
    %122 = vector.load %arg5[%c0_46, %c0_47] : memref<1x384xf32, #tpu.memory_space<vmem>>, vector<1x384xf32>
    %123 = vector.broadcast %122 : vector<1x384xf32> to vector<8x384xf32>
    %124 = arith.addf %121, %123 : vector<8x384xf32>
    %125 = vector.extract_strided_slice %119 {offsets = [0, 0], sizes = [8, 256], strides = [1, 1]} : vector<8x384xf32> to vector<8x256xf32>
    %126 = vector.extract_strided_slice %124 {offsets = [0, 0], sizes = [8, 256], strides = [1, 1]} : vector<8x384xf32> to vector<8x256xf32>
    %127 = arith.addf %125, %126 : vector<8x256xf32>
    %128 = arith.negf %127 : vector<8x256xf32>
    %129 = math.exp %128 : vector<8x256xf32>
    %cst_48 = arith.constant 1.000000e+00 : f32
    %130 = vector.broadcast %cst_48 : f32 to vector<8x256xf32>
    %131 = arith.addf %130, %129 : vector<8x256xf32>
    %132 = arith.divf %130, %131 : vector<8x256xf32>
    %133 = vector.extract_strided_slice %132 {offsets = [0, 0], sizes = [8, 128], strides = [1, 1]} : vector<8x256xf32> to vector<8x128xf32>
    %134 = vector.extract_strided_slice %132 {offsets = [0, 128], sizes = [8, 128], strides = [1, 1]} : vector<8x256xf32> to vector<8x128xf32>
    %135 = vector.extract_strided_slice %119 {offsets = [0, 256], sizes = [8, 128], strides = [1, 1]} : vector<8x384xf32> to vector<8x128xf32>
    %136 = vector.extract_strided_slice %124 {offsets = [0, 256], sizes = [8, 128], strides = [1, 1]} : vector<8x384xf32> to vector<8x128xf32>
    %137 = arith.mulf %133, %136 : vector<8x128xf32>
    %138 = arith.addf %135, %137 : vector<8x128xf32>
    %139 = math.tanh %138 : vector<8x128xf32>
    %cst_49 = arith.constant 1.000000e+00 : f32
    %140 = vector.broadcast %cst_49 : f32 to vector<8x128xf32>
    %141 = arith.subf %140, %134 : vector<8x128xf32>
    %142 = arith.mulf %141, %139 : vector<8x128xf32>
    %143 = arith.mulf %134, %92 : vector<8x128xf32>
    %144 = arith.addf %142, %143 : vector<8x128xf32>
    %145 = vector.extract_strided_slice %14 {offsets = [40, 0], sizes = [8, 384], strides = [1, 1]} : vector<64x384xf32> to vector<8x384xf32>
    %c0_50 = arith.constant 0 : index
    %c0_51 = arith.constant 0 : index
    %146 = vector.load %arg7[%c0_50, %c0_51] : memref<128x384xf32, #tpu.memory_space<vmem>>, vector<128x384xf32>
    %cst_52 = arith.constant dense<0.000000e+00> : vector<8x384xf32>
    %147 = tpu.matmul %118, %146, %cst_52 {dimension_numbers = #tpu.dot_dimension_numbers<[1], [0], [0], [1], [0, 0, 1, 1], [], []>} : vector<8x128xf32>, vector<128x384xf32>, vector<8x384xf32> -> vector<8x384xf32>
    %c0_53 = arith.constant 0 : index
    %c0_54 = arith.constant 0 : index
    %148 = vector.load %arg9[%c0_53, %c0_54] : memref<1x384xf32, #tpu.memory_space<vmem>>, vector<1x384xf32>
    %149 = vector.broadcast %148 : vector<1x384xf32> to vector<8x384xf32>
    %150 = arith.addf %147, %149 : vector<8x384xf32>
    %151 = vector.extract_strided_slice %145 {offsets = [0, 0], sizes = [8, 256], strides = [1, 1]} : vector<8x384xf32> to vector<8x256xf32>
    %152 = vector.extract_strided_slice %150 {offsets = [0, 0], sizes = [8, 256], strides = [1, 1]} : vector<8x384xf32> to vector<8x256xf32>
    %153 = arith.addf %151, %152 : vector<8x256xf32>
    %154 = arith.negf %153 : vector<8x256xf32>
    %155 = math.exp %154 : vector<8x256xf32>
    %cst_55 = arith.constant 1.000000e+00 : f32
    %156 = vector.broadcast %cst_55 : f32 to vector<8x256xf32>
    %157 = arith.addf %156, %155 : vector<8x256xf32>
    %158 = arith.divf %156, %157 : vector<8x256xf32>
    %159 = vector.extract_strided_slice %158 {offsets = [0, 0], sizes = [8, 128], strides = [1, 1]} : vector<8x256xf32> to vector<8x128xf32>
    %160 = vector.extract_strided_slice %158 {offsets = [0, 128], sizes = [8, 128], strides = [1, 1]} : vector<8x256xf32> to vector<8x128xf32>
    %161 = vector.extract_strided_slice %145 {offsets = [0, 256], sizes = [8, 128], strides = [1, 1]} : vector<8x384xf32> to vector<8x128xf32>
    %162 = vector.extract_strided_slice %150 {offsets = [0, 256], sizes = [8, 128], strides = [1, 1]} : vector<8x384xf32> to vector<8x128xf32>
    %163 = arith.mulf %159, %162 : vector<8x128xf32>
    %164 = arith.addf %161, %163 : vector<8x128xf32>
    %165 = math.tanh %164 : vector<8x128xf32>
    %cst_56 = arith.constant 1.000000e+00 : f32
    %166 = vector.broadcast %cst_56 : f32 to vector<8x128xf32>
    %167 = arith.subf %166, %160 : vector<8x128xf32>
    %168 = arith.mulf %167, %165 : vector<8x128xf32>
    %169 = arith.mulf %160, %118 : vector<8x128xf32>
    %170 = arith.addf %168, %169 : vector<8x128xf32>
    %171 = vector.extract_strided_slice %9 {offsets = [24, 0], sizes = [8, 384], strides = [1, 1]} : vector<64x384xf32> to vector<8x384xf32>
    %c0_57 = arith.constant 0 : index
    %c0_58 = arith.constant 0 : index
    %172 = vector.load %arg3[%c0_57, %c0_58] : memref<128x384xf32, #tpu.memory_space<vmem>>, vector<128x384xf32>
    %cst_59 = arith.constant dense<0.000000e+00> : vector<8x384xf32>
    %173 = tpu.matmul %144, %172, %cst_59 {dimension_numbers = #tpu.dot_dimension_numbers<[1], [0], [0], [1], [0, 0, 1, 1], [], []>} : vector<8x128xf32>, vector<128x384xf32>, vector<8x384xf32> -> vector<8x384xf32>
    %c0_60 = arith.constant 0 : index
    %c0_61 = arith.constant 0 : index
    %174 = vector.load %arg5[%c0_60, %c0_61] : memref<1x384xf32, #tpu.memory_space<vmem>>, vector<1x384xf32>
    %175 = vector.broadcast %174 : vector<1x384xf32> to vector<8x384xf32>
    %176 = arith.addf %173, %175 : vector<8x384xf32>
    %177 = vector.extract_strided_slice %171 {offsets = [0, 0], sizes = [8, 256], strides = [1, 1]} : vector<8x384xf32> to vector<8x256xf32>
    %178 = vector.extract_strided_slice %176 {offsets = [0, 0], sizes = [8, 256], strides = [1, 1]} : vector<8x384xf32> to vector<8x256xf32>
    %179 = arith.addf %177, %178 : vector<8x256xf32>
    %180 = arith.negf %179 : vector<8x256xf32>
    %181 = math.exp %180 : vector<8x256xf32>
    %cst_62 = arith.constant 1.000000e+00 : f32
    %182 = vector.broadcast %cst_62 : f32 to vector<8x256xf32>
    %183 = arith.addf %182, %181 : vector<8x256xf32>
    %184 = arith.divf %182, %183 : vector<8x256xf32>
    %185 = vector.extract_strided_slice %184 {offsets = [0, 0], sizes = [8, 128], strides = [1, 1]} : vector<8x256xf32> to vector<8x128xf32>
    %186 = vector.extract_strided_slice %184 {offsets = [0, 128], sizes = [8, 128], strides = [1, 1]} : vector<8x256xf32> to vector<8x128xf32>
    %187 = vector.extract_strided_slice %171 {offsets = [0, 256], sizes = [8, 128], strides = [1, 1]} : vector<8x384xf32> to vector<8x128xf32>
    %188 = vector.extract_strided_slice %176 {offsets = [0, 256], sizes = [8, 128], strides = [1, 1]} : vector<8x384xf32> to vector<8x128xf32>
    %189 = arith.mulf %185, %188 : vector<8x128xf32>
    %190 = arith.addf %187, %189 : vector<8x128xf32>
    %191 = math.tanh %190 : vector<8x128xf32>
    %cst_63 = arith.constant 1.000000e+00 : f32
    %192 = vector.broadcast %cst_63 : f32 to vector<8x128xf32>
    %193 = arith.subf %192, %186 : vector<8x128xf32>
    %194 = arith.mulf %193, %191 : vector<8x128xf32>
    %195 = arith.mulf %186, %144 : vector<8x128xf32>
    %196 = arith.addf %194, %195 : vector<8x128xf32>
    %197 = vector.extract_strided_slice %14 {offsets = [32, 0], sizes = [8, 384], strides = [1, 1]} : vector<64x384xf32> to vector<8x384xf32>
    %c0_64 = arith.constant 0 : index
    %c0_65 = arith.constant 0 : index
    %198 = vector.load %arg7[%c0_64, %c0_65] : memref<128x384xf32, #tpu.memory_space<vmem>>, vector<128x384xf32>
    %cst_66 = arith.constant dense<0.000000e+00> : vector<8x384xf32>
    %199 = tpu.matmul %170, %198, %cst_66 {dimension_numbers = #tpu.dot_dimension_numbers<[1], [0], [0], [1], [0, 0, 1, 1], [], []>} : vector<8x128xf32>, vector<128x384xf32>, vector<8x384xf32> -> vector<8x384xf32>
    %c0_67 = arith.constant 0 : index
    %c0_68 = arith.constant 0 : index
    %200 = vector.load %arg9[%c0_67, %c0_68] : memref<1x384xf32, #tpu.memory_space<vmem>>, vector<1x384xf32>
    %201 = vector.broadcast %200 : vector<1x384xf32> to vector<8x384xf32>
    %202 = arith.addf %199, %201 : vector<8x384xf32>
    %203 = vector.extract_strided_slice %197 {offsets = [0, 0], sizes = [8, 256], strides = [1, 1]} : vector<8x384xf32> to vector<8x256xf32>
    %204 = vector.extract_strided_slice %202 {offsets = [0, 0], sizes = [8, 256], strides = [1, 1]} : vector<8x384xf32> to vector<8x256xf32>
    %205 = arith.addf %203, %204 : vector<8x256xf32>
    %206 = arith.negf %205 : vector<8x256xf32>
    %207 = math.exp %206 : vector<8x256xf32>
    %cst_69 = arith.constant 1.000000e+00 : f32
    %208 = vector.broadcast %cst_69 : f32 to vector<8x256xf32>
    %209 = arith.addf %208, %207 : vector<8x256xf32>
    %210 = arith.divf %208, %209 : vector<8x256xf32>
    %211 = vector.extract_strided_slice %210 {offsets = [0, 0], sizes = [8, 128], strides = [1, 1]} : vector<8x256xf32> to vector<8x128xf32>
    %212 = vector.extract_strided_slice %210 {offsets = [0, 128], sizes = [8, 128], strides = [1, 1]} : vector<8x256xf32> to vector<8x128xf32>
    %213 = vector.extract_strided_slice %197 {offsets = [0, 256], sizes = [8, 128], strides = [1, 1]} : vector<8x384xf32> to vector<8x128xf32>
    %214 = vector.extract_strided_slice %202 {offsets = [0, 256], sizes = [8, 128], strides = [1, 1]} : vector<8x384xf32> to vector<8x128xf32>
    %215 = arith.mulf %211, %214 : vector<8x128xf32>
    %216 = arith.addf %213, %215 : vector<8x128xf32>
    %217 = math.tanh %216 : vector<8x128xf32>
    %cst_70 = arith.constant 1.000000e+00 : f32
    %218 = vector.broadcast %cst_70 : f32 to vector<8x128xf32>
    %219 = arith.subf %218, %212 : vector<8x128xf32>
    %220 = arith.mulf %219, %217 : vector<8x128xf32>
    %221 = arith.mulf %212, %170 : vector<8x128xf32>
    %222 = arith.addf %220, %221 : vector<8x128xf32>
    %223 = vector.extract_strided_slice %9 {offsets = [32, 0], sizes = [8, 384], strides = [1, 1]} : vector<64x384xf32> to vector<8x384xf32>
    %c0_71 = arith.constant 0 : index
    %c0_72 = arith.constant 0 : index
    %224 = vector.load %arg3[%c0_71, %c0_72] : memref<128x384xf32, #tpu.memory_space<vmem>>, vector<128x384xf32>
    %cst_73 = arith.constant dense<0.000000e+00> : vector<8x384xf32>
    %225 = tpu.matmul %196, %224, %cst_73 {dimension_numbers = #tpu.dot_dimension_numbers<[1], [0], [0], [1], [0, 0, 1, 1], [], []>} : vector<8x128xf32>, vector<128x384xf32>, vector<8x384xf32> -> vector<8x384xf32>
    %c0_74 = arith.constant 0 : index
    %c0_75 = arith.constant 0 : index
    %226 = vector.load %arg5[%c0_74, %c0_75] : memref<1x384xf32, #tpu.memory_space<vmem>>, vector<1x384xf32>
    %227 = vector.broadcast %226 : vector<1x384xf32> to vector<8x384xf32>
    %228 = arith.addf %225, %227 : vector<8x384xf32>
    %229 = vector.extract_strided_slice %223 {offsets = [0, 0], sizes = [8, 256], strides = [1, 1]} : vector<8x384xf32> to vector<8x256xf32>
    %230 = vector.extract_strided_slice %228 {offsets = [0, 0], sizes = [8, 256], strides = [1, 1]} : vector<8x384xf32> to vector<8x256xf32>
    %231 = arith.addf %229, %230 : vector<8x256xf32>
    %232 = arith.negf %231 : vector<8x256xf32>
    %233 = math.exp %232 : vector<8x256xf32>
    %cst_76 = arith.constant 1.000000e+00 : f32
    %234 = vector.broadcast %cst_76 : f32 to vector<8x256xf32>
    %235 = arith.addf %234, %233 : vector<8x256xf32>
    %236 = arith.divf %234, %235 : vector<8x256xf32>
    %237 = vector.extract_strided_slice %236 {offsets = [0, 0], sizes = [8, 128], strides = [1, 1]} : vector<8x256xf32> to vector<8x128xf32>
    %238 = vector.extract_strided_slice %236 {offsets = [0, 128], sizes = [8, 128], strides = [1, 1]} : vector<8x256xf32> to vector<8x128xf32>
    %239 = vector.extract_strided_slice %223 {offsets = [0, 256], sizes = [8, 128], strides = [1, 1]} : vector<8x384xf32> to vector<8x128xf32>
    %240 = vector.extract_strided_slice %228 {offsets = [0, 256], sizes = [8, 128], strides = [1, 1]} : vector<8x384xf32> to vector<8x128xf32>
    %241 = arith.mulf %237, %240 : vector<8x128xf32>
    %242 = arith.addf %239, %241 : vector<8x128xf32>
    %243 = math.tanh %242 : vector<8x128xf32>
    %cst_77 = arith.constant 1.000000e+00 : f32
    %244 = vector.broadcast %cst_77 : f32 to vector<8x128xf32>
    %245 = arith.subf %244, %238 : vector<8x128xf32>
    %246 = arith.mulf %245, %243 : vector<8x128xf32>
    %247 = arith.mulf %238, %196 : vector<8x128xf32>
    %248 = arith.addf %246, %247 : vector<8x128xf32>
    %249 = vector.extract_strided_slice %14 {offsets = [24, 0], sizes = [8, 384], strides = [1, 1]} : vector<64x384xf32> to vector<8x384xf32>
    %c0_78 = arith.constant 0 : index
    %c0_79 = arith.constant 0 : index
    %250 = vector.load %arg7[%c0_78, %c0_79] : memref<128x384xf32, #tpu.memory_space<vmem>>, vector<128x384xf32>
    %cst_80 = arith.constant dense<0.000000e+00> : vector<8x384xf32>
    %251 = tpu.matmul %222, %250, %cst_80 {dimension_numbers = #tpu.dot_dimension_numbers<[1], [0], [0], [1], [0, 0, 1, 1], [], []>} : vector<8x128xf32>, vector<128x384xf32>, vector<8x384xf32> -> vector<8x384xf32>
    %c0_81 = arith.constant 0 : index
    %c0_82 = arith.constant 0 : index
    %252 = vector.load %arg9[%c0_81, %c0_82] : memref<1x384xf32, #tpu.memory_space<vmem>>, vector<1x384xf32>
    %253 = vector.broadcast %252 : vector<1x384xf32> to vector<8x384xf32>
    %254 = arith.addf %251, %253 : vector<8x384xf32>
    %255 = vector.extract_strided_slice %249 {offsets = [0, 0], sizes = [8, 256], strides = [1, 1]} : vector<8x384xf32> to vector<8x256xf32>
    %256 = vector.extract_strided_slice %254 {offsets = [0, 0], sizes = [8, 256], strides = [1, 1]} : vector<8x384xf32> to vector<8x256xf32>
    %257 = arith.addf %255, %256 : vector<8x256xf32>
    %258 = arith.negf %257 : vector<8x256xf32>
    %259 = math.exp %258 : vector<8x256xf32>
    %cst_83 = arith.constant 1.000000e+00 : f32
    %260 = vector.broadcast %cst_83 : f32 to vector<8x256xf32>
    %261 = arith.addf %260, %259 : vector<8x256xf32>
    %262 = arith.divf %260, %261 : vector<8x256xf32>
    %263 = vector.extract_strided_slice %262 {offsets = [0, 0], sizes = [8, 128], strides = [1, 1]} : vector<8x256xf32> to vector<8x128xf32>
    %264 = vector.extract_strided_slice %262 {offsets = [0, 128], sizes = [8, 128], strides = [1, 1]} : vector<8x256xf32> to vector<8x128xf32>
    %265 = vector.extract_strided_slice %249 {offsets = [0, 256], sizes = [8, 128], strides = [1, 1]} : vector<8x384xf32> to vector<8x128xf32>
    %266 = vector.extract_strided_slice %254 {offsets = [0, 256], sizes = [8, 128], strides = [1, 1]} : vector<8x384xf32> to vector<8x128xf32>
    %267 = arith.mulf %263, %266 : vector<8x128xf32>
    %268 = arith.addf %265, %267 : vector<8x128xf32>
    %269 = math.tanh %268 : vector<8x128xf32>
    %cst_84 = arith.constant 1.000000e+00 : f32
    %270 = vector.broadcast %cst_84 : f32 to vector<8x128xf32>
    %271 = arith.subf %270, %264 : vector<8x128xf32>
    %272 = arith.mulf %271, %269 : vector<8x128xf32>
    %273 = arith.mulf %264, %222 : vector<8x128xf32>
    %274 = arith.addf %272, %273 : vector<8x128xf32>
    %275 = vector.extract_strided_slice %9 {offsets = [40, 0], sizes = [8, 384], strides = [1, 1]} : vector<64x384xf32> to vector<8x384xf32>
    %c0_85 = arith.constant 0 : index
    %c0_86 = arith.constant 0 : index
    %276 = vector.load %arg3[%c0_85, %c0_86] : memref<128x384xf32, #tpu.memory_space<vmem>>, vector<128x384xf32>
    %cst_87 = arith.constant dense<0.000000e+00> : vector<8x384xf32>
    %277 = tpu.matmul %248, %276, %cst_87 {dimension_numbers = #tpu.dot_dimension_numbers<[1], [0], [0], [1], [0, 0, 1, 1], [], []>} : vector<8x128xf32>, vector<128x384xf32>, vector<8x384xf32> -> vector<8x384xf32>
    %c0_88 = arith.constant 0 : index
    %c0_89 = arith.constant 0 : index
    %278 = vector.load %arg5[%c0_88, %c0_89] : memref<1x384xf32, #tpu.memory_space<vmem>>, vector<1x384xf32>
    %279 = vector.broadcast %278 : vector<1x384xf32> to vector<8x384xf32>
    %280 = arith.addf %277, %279 : vector<8x384xf32>
    %281 = vector.extract_strided_slice %275 {offsets = [0, 0], sizes = [8, 256], strides = [1, 1]} : vector<8x384xf32> to vector<8x256xf32>
    %282 = vector.extract_strided_slice %280 {offsets = [0, 0], sizes = [8, 256], strides = [1, 1]} : vector<8x384xf32> to vector<8x256xf32>
    %283 = arith.addf %281, %282 : vector<8x256xf32>
    %284 = arith.negf %283 : vector<8x256xf32>
    %285 = math.exp %284 : vector<8x256xf32>
    %cst_90 = arith.constant 1.000000e+00 : f32
    %286 = vector.broadcast %cst_90 : f32 to vector<8x256xf32>
    %287 = arith.addf %286, %285 : vector<8x256xf32>
    %288 = arith.divf %286, %287 : vector<8x256xf32>
    %289 = vector.extract_strided_slice %288 {offsets = [0, 0], sizes = [8, 128], strides = [1, 1]} : vector<8x256xf32> to vector<8x128xf32>
    %290 = vector.extract_strided_slice %288 {offsets = [0, 128], sizes = [8, 128], strides = [1, 1]} : vector<8x256xf32> to vector<8x128xf32>
    %291 = vector.extract_strided_slice %275 {offsets = [0, 256], sizes = [8, 128], strides = [1, 1]} : vector<8x384xf32> to vector<8x128xf32>
    %292 = vector.extract_strided_slice %280 {offsets = [0, 256], sizes = [8, 128], strides = [1, 1]} : vector<8x384xf32> to vector<8x128xf32>
    %293 = arith.mulf %289, %292 : vector<8x128xf32>
    %294 = arith.addf %291, %293 : vector<8x128xf32>
    %295 = math.tanh %294 : vector<8x128xf32>
    %cst_91 = arith.constant 1.000000e+00 : f32
    %296 = vector.broadcast %cst_91 : f32 to vector<8x128xf32>
    %297 = arith.subf %296, %290 : vector<8x128xf32>
    %298 = arith.mulf %297, %295 : vector<8x128xf32>
    %299 = arith.mulf %290, %248 : vector<8x128xf32>
    %300 = arith.addf %298, %299 : vector<8x128xf32>
    %301 = vector.extract_strided_slice %14 {offsets = [16, 0], sizes = [8, 384], strides = [1, 1]} : vector<64x384xf32> to vector<8x384xf32>
    %c0_92 = arith.constant 0 : index
    %c0_93 = arith.constant 0 : index
    %302 = vector.load %arg7[%c0_92, %c0_93] : memref<128x384xf32, #tpu.memory_space<vmem>>, vector<128x384xf32>
    %cst_94 = arith.constant dense<0.000000e+00> : vector<8x384xf32>
    %303 = tpu.matmul %274, %302, %cst_94 {dimension_numbers = #tpu.dot_dimension_numbers<[1], [0], [0], [1], [0, 0, 1, 1], [], []>} : vector<8x128xf32>, vector<128x384xf32>, vector<8x384xf32> -> vector<8x384xf32>
    %c0_95 = arith.constant 0 : index
    %c0_96 = arith.constant 0 : index
    %304 = vector.load %arg9[%c0_95, %c0_96] : memref<1x384xf32, #tpu.memory_space<vmem>>, vector<1x384xf32>
    %305 = vector.broadcast %304 : vector<1x384xf32> to vector<8x384xf32>
    %306 = arith.addf %303, %305 : vector<8x384xf32>
    %307 = vector.extract_strided_slice %301 {offsets = [0, 0], sizes = [8, 256], strides = [1, 1]} : vector<8x384xf32> to vector<8x256xf32>
    %308 = vector.extract_strided_slice %306 {offsets = [0, 0], sizes = [8, 256], strides = [1, 1]} : vector<8x384xf32> to vector<8x256xf32>
    %309 = arith.addf %307, %308 : vector<8x256xf32>
    %310 = arith.negf %309 : vector<8x256xf32>
    %311 = math.exp %310 : vector<8x256xf32>
    %cst_97 = arith.constant 1.000000e+00 : f32
    %312 = vector.broadcast %cst_97 : f32 to vector<8x256xf32>
    %313 = arith.addf %312, %311 : vector<8x256xf32>
    %314 = arith.divf %312, %313 : vector<8x256xf32>
    %315 = vector.extract_strided_slice %314 {offsets = [0, 0], sizes = [8, 128], strides = [1, 1]} : vector<8x256xf32> to vector<8x128xf32>
    %316 = vector.extract_strided_slice %314 {offsets = [0, 128], sizes = [8, 128], strides = [1, 1]} : vector<8x256xf32> to vector<8x128xf32>
    %317 = vector.extract_strided_slice %301 {offsets = [0, 256], sizes = [8, 128], strides = [1, 1]} : vector<8x384xf32> to vector<8x128xf32>
    %318 = vector.extract_strided_slice %306 {offsets = [0, 256], sizes = [8, 128], strides = [1, 1]} : vector<8x384xf32> to vector<8x128xf32>
    %319 = arith.mulf %315, %318 : vector<8x128xf32>
    %320 = arith.addf %317, %319 : vector<8x128xf32>
    %321 = math.tanh %320 : vector<8x128xf32>
    %cst_98 = arith.constant 1.000000e+00 : f32
    %322 = vector.broadcast %cst_98 : f32 to vector<8x128xf32>
    %323 = arith.subf %322, %316 : vector<8x128xf32>
    %324 = arith.mulf %323, %321 : vector<8x128xf32>
    %325 = arith.mulf %316, %274 : vector<8x128xf32>
    %326 = arith.addf %324, %325 : vector<8x128xf32>
    %327 = vector.extract_strided_slice %9 {offsets = [48, 0], sizes = [8, 384], strides = [1, 1]} : vector<64x384xf32> to vector<8x384xf32>
    %c0_99 = arith.constant 0 : index
    %c0_100 = arith.constant 0 : index
    %328 = vector.load %arg3[%c0_99, %c0_100] : memref<128x384xf32, #tpu.memory_space<vmem>>, vector<128x384xf32>
    %cst_101 = arith.constant dense<0.000000e+00> : vector<8x384xf32>
    %329 = tpu.matmul %300, %328, %cst_101 {dimension_numbers = #tpu.dot_dimension_numbers<[1], [0], [0], [1], [0, 0, 1, 1], [], []>} : vector<8x128xf32>, vector<128x384xf32>, vector<8x384xf32> -> vector<8x384xf32>
    %c0_102 = arith.constant 0 : index
    %c0_103 = arith.constant 0 : index
    %330 = vector.load %arg5[%c0_102, %c0_103] : memref<1x384xf32, #tpu.memory_space<vmem>>, vector<1x384xf32>
    %331 = vector.broadcast %330 : vector<1x384xf32> to vector<8x384xf32>
    %332 = arith.addf %329, %331 : vector<8x384xf32>
    %333 = vector.extract_strided_slice %327 {offsets = [0, 0], sizes = [8, 256], strides = [1, 1]} : vector<8x384xf32> to vector<8x256xf32>
    %334 = vector.extract_strided_slice %332 {offsets = [0, 0], sizes = [8, 256], strides = [1, 1]} : vector<8x384xf32> to vector<8x256xf32>
    %335 = arith.addf %333, %334 : vector<8x256xf32>
    %336 = arith.negf %335 : vector<8x256xf32>
    %337 = math.exp %336 : vector<8x256xf32>
    %cst_104 = arith.constant 1.000000e+00 : f32
    %338 = vector.broadcast %cst_104 : f32 to vector<8x256xf32>
    %339 = arith.addf %338, %337 : vector<8x256xf32>
    %340 = arith.divf %338, %339 : vector<8x256xf32>
    %341 = vector.extract_strided_slice %340 {offsets = [0, 0], sizes = [8, 128], strides = [1, 1]} : vector<8x256xf32> to vector<8x128xf32>
    %342 = vector.extract_strided_slice %340 {offsets = [0, 128], sizes = [8, 128], strides = [1, 1]} : vector<8x256xf32> to vector<8x128xf32>
    %343 = vector.extract_strided_slice %327 {offsets = [0, 256], sizes = [8, 128], strides = [1, 1]} : vector<8x384xf32> to vector<8x128xf32>
    %344 = vector.extract_strided_slice %332 {offsets = [0, 256], sizes = [8, 128], strides = [1, 1]} : vector<8x384xf32> to vector<8x128xf32>
    %345 = arith.mulf %341, %344 : vector<8x128xf32>
    %346 = arith.addf %343, %345 : vector<8x128xf32>
    %347 = math.tanh %346 : vector<8x128xf32>
    %cst_105 = arith.constant 1.000000e+00 : f32
    %348 = vector.broadcast %cst_105 : f32 to vector<8x128xf32>
    %349 = arith.subf %348, %342 : vector<8x128xf32>
    %350 = arith.mulf %349, %347 : vector<8x128xf32>
    %351 = arith.mulf %342, %300 : vector<8x128xf32>
    %352 = arith.addf %350, %351 : vector<8x128xf32>
    %353 = vector.extract_strided_slice %14 {offsets = [8, 0], sizes = [8, 384], strides = [1, 1]} : vector<64x384xf32> to vector<8x384xf32>
    %c0_106 = arith.constant 0 : index
    %c0_107 = arith.constant 0 : index
    %354 = vector.load %arg7[%c0_106, %c0_107] : memref<128x384xf32, #tpu.memory_space<vmem>>, vector<128x384xf32>
    %cst_108 = arith.constant dense<0.000000e+00> : vector<8x384xf32>
    %355 = tpu.matmul %326, %354, %cst_108 {dimension_numbers = #tpu.dot_dimension_numbers<[1], [0], [0], [1], [0, 0, 1, 1], [], []>} : vector<8x128xf32>, vector<128x384xf32>, vector<8x384xf32> -> vector<8x384xf32>
    %c0_109 = arith.constant 0 : index
    %c0_110 = arith.constant 0 : index
    %356 = vector.load %arg9[%c0_109, %c0_110] : memref<1x384xf32, #tpu.memory_space<vmem>>, vector<1x384xf32>
    %357 = vector.broadcast %356 : vector<1x384xf32> to vector<8x384xf32>
    %358 = arith.addf %355, %357 : vector<8x384xf32>
    %359 = vector.extract_strided_slice %353 {offsets = [0, 0], sizes = [8, 256], strides = [1, 1]} : vector<8x384xf32> to vector<8x256xf32>
    %360 = vector.extract_strided_slice %358 {offsets = [0, 0], sizes = [8, 256], strides = [1, 1]} : vector<8x384xf32> to vector<8x256xf32>
    %361 = arith.addf %359, %360 : vector<8x256xf32>
    %362 = arith.negf %361 : vector<8x256xf32>
    %363 = math.exp %362 : vector<8x256xf32>
    %cst_111 = arith.constant 1.000000e+00 : f32
    %364 = vector.broadcast %cst_111 : f32 to vector<8x256xf32>
    %365 = arith.addf %364, %363 : vector<8x256xf32>
    %366 = arith.divf %364, %365 : vector<8x256xf32>
    %367 = vector.extract_strided_slice %366 {offsets = [0, 0], sizes = [8, 128], strides = [1, 1]} : vector<8x256xf32> to vector<8x128xf32>
    %368 = vector.extract_strided_slice %366 {offsets = [0, 128], sizes = [8, 128], strides = [1, 1]} : vector<8x256xf32> to vector<8x128xf32>
    %369 = vector.extract_strided_slice %353 {offsets = [0, 256], sizes = [8, 128], strides = [1, 1]} : vector<8x384xf32> to vector<8x128xf32>
    %370 = vector.extract_strided_slice %358 {offsets = [0, 256], sizes = [8, 128], strides = [1, 1]} : vector<8x384xf32> to vector<8x128xf32>
    %371 = arith.mulf %367, %370 : vector<8x128xf32>
    %372 = arith.addf %369, %371 : vector<8x128xf32>
    %373 = math.tanh %372 : vector<8x128xf32>
    %cst_112 = arith.constant 1.000000e+00 : f32
    %374 = vector.broadcast %cst_112 : f32 to vector<8x128xf32>
    %375 = arith.subf %374, %368 : vector<8x128xf32>
    %376 = arith.mulf %375, %373 : vector<8x128xf32>
    %377 = arith.mulf %368, %326 : vector<8x128xf32>
    %378 = arith.addf %376, %377 : vector<8x128xf32>
    %379 = vector.extract_strided_slice %9 {offsets = [56, 0], sizes = [8, 384], strides = [1, 1]} : vector<64x384xf32> to vector<8x384xf32>
    %c0_113 = arith.constant 0 : index
    %c0_114 = arith.constant 0 : index
    %380 = vector.load %arg3[%c0_113, %c0_114] : memref<128x384xf32, #tpu.memory_space<vmem>>, vector<128x384xf32>
    %cst_115 = arith.constant dense<0.000000e+00> : vector<8x384xf32>
    %381 = tpu.matmul %352, %380, %cst_115 {dimension_numbers = #tpu.dot_dimension_numbers<[1], [0], [0], [1], [0, 0, 1, 1], [], []>} : vector<8x128xf32>, vector<128x384xf32>, vector<8x384xf32> -> vector<8x384xf32>
    %c0_116 = arith.constant 0 : index
    %c0_117 = arith.constant 0 : index
    %382 = vector.load %arg5[%c0_116, %c0_117] : memref<1x384xf32, #tpu.memory_space<vmem>>, vector<1x384xf32>
    %383 = vector.broadcast %382 : vector<1x384xf32> to vector<8x384xf32>
    %384 = arith.addf %381, %383 : vector<8x384xf32>
    %385 = vector.extract_strided_slice %379 {offsets = [0, 0], sizes = [8, 256], strides = [1, 1]} : vector<8x384xf32> to vector<8x256xf32>
    %386 = vector.extract_strided_slice %384 {offsets = [0, 0], sizes = [8, 256], strides = [1, 1]} : vector<8x384xf32> to vector<8x256xf32>
    %387 = arith.addf %385, %386 : vector<8x256xf32>
    %388 = arith.negf %387 : vector<8x256xf32>
    %389 = math.exp %388 : vector<8x256xf32>
    %cst_118 = arith.constant 1.000000e+00 : f32
    %390 = vector.broadcast %cst_118 : f32 to vector<8x256xf32>
    %391 = arith.addf %390, %389 : vector<8x256xf32>
    %392 = arith.divf %390, %391 : vector<8x256xf32>
    %393 = vector.extract_strided_slice %392 {offsets = [0, 0], sizes = [8, 128], strides = [1, 1]} : vector<8x256xf32> to vector<8x128xf32>
    %394 = vector.extract_strided_slice %392 {offsets = [0, 128], sizes = [8, 128], strides = [1, 1]} : vector<8x256xf32> to vector<8x128xf32>
    %395 = vector.extract_strided_slice %379 {offsets = [0, 256], sizes = [8, 128], strides = [1, 1]} : vector<8x384xf32> to vector<8x128xf32>
    %396 = vector.extract_strided_slice %384 {offsets = [0, 256], sizes = [8, 128], strides = [1, 1]} : vector<8x384xf32> to vector<8x128xf32>
    %397 = arith.mulf %393, %396 : vector<8x128xf32>
    %398 = arith.addf %395, %397 : vector<8x128xf32>
    %399 = math.tanh %398 : vector<8x128xf32>
    %cst_119 = arith.constant 1.000000e+00 : f32
    %400 = vector.broadcast %cst_119 : f32 to vector<8x128xf32>
    %401 = arith.subf %400, %394 : vector<8x128xf32>
    %402 = arith.mulf %401, %399 : vector<8x128xf32>
    %403 = arith.mulf %394, %352 : vector<8x128xf32>
    %404 = arith.addf %402, %403 : vector<8x128xf32>
    %405 = vector.extract_strided_slice %14 {offsets = [0, 0], sizes = [8, 384], strides = [1, 1]} : vector<64x384xf32> to vector<8x384xf32>
    %c0_120 = arith.constant 0 : index
    %c0_121 = arith.constant 0 : index
    %406 = vector.load %arg7[%c0_120, %c0_121] : memref<128x384xf32, #tpu.memory_space<vmem>>, vector<128x384xf32>
    %cst_122 = arith.constant dense<0.000000e+00> : vector<8x384xf32>
    %407 = tpu.matmul %378, %406, %cst_122 {dimension_numbers = #tpu.dot_dimension_numbers<[1], [0], [0], [1], [0, 0, 1, 1], [], []>} : vector<8x128xf32>, vector<128x384xf32>, vector<8x384xf32> -> vector<8x384xf32>
    %c0_123 = arith.constant 0 : index
    %c0_124 = arith.constant 0 : index
    %408 = vector.load %arg9[%c0_123, %c0_124] : memref<1x384xf32, #tpu.memory_space<vmem>>, vector<1x384xf32>
    %409 = vector.broadcast %408 : vector<1x384xf32> to vector<8x384xf32>
    %410 = arith.addf %407, %409 : vector<8x384xf32>
    %411 = vector.extract_strided_slice %405 {offsets = [0, 0], sizes = [8, 256], strides = [1, 1]} : vector<8x384xf32> to vector<8x256xf32>
    %412 = vector.extract_strided_slice %410 {offsets = [0, 0], sizes = [8, 256], strides = [1, 1]} : vector<8x384xf32> to vector<8x256xf32>
    %413 = arith.addf %411, %412 : vector<8x256xf32>
    %414 = arith.negf %413 : vector<8x256xf32>
    %415 = math.exp %414 : vector<8x256xf32>
    %cst_125 = arith.constant 1.000000e+00 : f32
    %416 = vector.broadcast %cst_125 : f32 to vector<8x256xf32>
    %417 = arith.addf %416, %415 : vector<8x256xf32>
    %418 = arith.divf %416, %417 : vector<8x256xf32>
    %419 = vector.extract_strided_slice %418 {offsets = [0, 0], sizes = [8, 128], strides = [1, 1]} : vector<8x256xf32> to vector<8x128xf32>
    %420 = vector.extract_strided_slice %418 {offsets = [0, 128], sizes = [8, 128], strides = [1, 1]} : vector<8x256xf32> to vector<8x128xf32>
    %421 = vector.extract_strided_slice %405 {offsets = [0, 256], sizes = [8, 128], strides = [1, 1]} : vector<8x384xf32> to vector<8x128xf32>
    %422 = vector.extract_strided_slice %410 {offsets = [0, 256], sizes = [8, 128], strides = [1, 1]} : vector<8x384xf32> to vector<8x128xf32>
    %423 = arith.mulf %419, %422 : vector<8x128xf32>
    %424 = arith.addf %421, %423 : vector<8x128xf32>
    %425 = math.tanh %424 : vector<8x128xf32>
    %cst_126 = arith.constant 1.000000e+00 : f32
    %426 = vector.broadcast %cst_126 : f32 to vector<8x128xf32>
    %427 = arith.subf %426, %420 : vector<8x128xf32>
    %428 = arith.mulf %427, %425 : vector<8x128xf32>
    %429 = arith.mulf %420, %378 : vector<8x128xf32>
    %430 = arith.addf %428, %429 : vector<8x128xf32>
    %431 = vector.extract_strided_slice %404 {offsets = [0, 0], sizes = [2, 100], strides = [1, 1]} : vector<8x128xf32> to vector<2x100xf32>
    %c0_127 = arith.constant 0 : index
    %c0_128 = arith.constant 0 : index
    %c0_129 = arith.constant 0 : index
    %432 = vector.load %arg21[%c0_127, %c0_128, %c0_129] : memref<4x2x100xf32, #tpu.memory_space<vmem>>, vector<1x2x100xf32>
    %433 = vector.shape_cast %432 : vector<1x2x100xf32> to vector<2x100xf32>
    %434 = vector.shape_cast %431 : vector<2x100xf32> to vector<1x2x100xf32>
    tpu.vector_store %arg21[%c0_127, %c0_128, %c0_129], %434 {strides = array<i32>} : memref<4x2x100xf32, #tpu.memory_space<vmem>>, vector<1x2x100xf32>,
    %435 = vector.extract_strided_slice %430 {offsets = [0, 0], sizes = [2, 100], strides = [1, 1]} : vector<8x128xf32> to vector<2x100xf32>
    %c1_130 = arith.constant 1 : index
    %c0_131 = arith.constant 0 : index
    %c0_132 = arith.constant 0 : index
    %436 = vector.load %arg21[%c1_130, %c0_131, %c0_132] : memref<4x2x100xf32, #tpu.memory_space<vmem>>, vector<1x2x100xf32>
    %437 = vector.shape_cast %436 : vector<1x2x100xf32> to vector<2x100xf32>
    %438 = vector.shape_cast %435 : vector<2x100xf32> to vector<1x2x100xf32>
    tpu.vector_store %arg21[%c1_130, %c0_131, %c0_132], %438 {strides = array<i32>} : memref<4x2x100xf32, #tpu.memory_space<vmem>>, vector<1x2x100xf32>,
    %439 = tpu.concatenate %40, %430 in 1 : vector<8x128xf32>, vector<8x128xf32> -> vector<8x256xf32>
    %440 = tpu.concatenate %92, %378 in 1 : vector<8x128xf32>, vector<8x128xf32> -> vector<8x256xf32>
    %441 = tpu.concatenate %144, %326 in 1 : vector<8x128xf32>, vector<8x128xf32> -> vector<8x256xf32>
    %442 = tpu.concatenate %196, %274 in 1 : vector<8x128xf32>, vector<8x128xf32> -> vector<8x256xf32>
    %443 = tpu.concatenate %248, %222 in 1 : vector<8x128xf32>, vector<8x128xf32> -> vector<8x256xf32>
    %444 = tpu.concatenate %300, %170 in 1 : vector<8x128xf32>, vector<8x128xf32> -> vector<8x256xf32>
    %445 = tpu.concatenate %352, %118 in 1 : vector<8x128xf32>, vector<8x128xf32> -> vector<8x256xf32>
    %446 = tpu.concatenate %404, %66 in 1 : vector<8x128xf32>, vector<8x128xf32> -> vector<8x256xf32>
    %447 = tpu.concatenate %439, %440, %441, %442, %443, %444, %445, %446 in 0 : vector<8x256xf32>, vector<8x256xf32>, vector<8x256xf32>, vector<8x256xf32>, vector<8x256xf32>, vector<8x256xf32>, vector<8x256xf32>, vector<8x256xf32> -> vector<64x256xf32>
    %c2 = arith.constant 2 : index
    %c0_133 = arith.constant 0 : index
    %c0_134 = arith.constant 0 : index
    %448 = vector.load %arg1[%c2, %c0_133, %c0_134] : memref<4x8x128xf32, #tpu.memory_space<vmem>>, vector<1x8x128xf32>
    %449 = vector.shape_cast %448 : vector<1x8x128xf32> to vector<8x128xf32>
    %c3 = arith.constant 3 : index
    %c0_135 = arith.constant 0 : index
    %c0_136 = arith.constant 0 : index
    %450 = vector.load %arg1[%c3, %c0_135, %c0_136] : memref<4x8x128xf32, #tpu.memory_space<vmem>>, vector<1x8x128xf32>
    %451 = vector.shape_cast %450 : vector<1x8x128xf32> to vector<8x128xf32>
    %c0_137 = arith.constant 0 : index
    %c0_138 = arith.constant 0 : index
    %452 = vector.load %arg10[%c0_137, %c0_138] : memref<256x384xf32, #tpu.memory_space<vmem>>, vector<256x384xf32>
    %cst_139 = arith.constant dense<0.000000e+00> : vector<64x384xf32>
    %453 = tpu.matmul %447, %452, %cst_139 {dimension_numbers = #tpu.dot_dimension_numbers<[1], [0], [0], [1], [0, 0, 1, 1], [], []>} : vector<64x256xf32>, vector<256x384xf32>, vector<64x384xf32> -> vector<64x384xf32>
    %c0_140 = arith.constant 0 : index
    %c0_141 = arith.constant 0 : index
    %454 = vector.load %arg12[%c0_140, %c0_141] : memref<1x384xf32, #tpu.memory_space<vmem>>, vector<1x384xf32>
    %455 = vector.broadcast %454 : vector<1x384xf32> to vector<64x384xf32>
    %456 = arith.addf %453, %455 : vector<64x384xf32>
    %c0_142 = arith.constant 0 : index
    %c0_143 = arith.constant 0 : index
    %457 = vector.load %arg14[%c0_142, %c0_143] : memref<256x384xf32, #tpu.memory_space<vmem>>, vector<256x384xf32>
    %cst_144 = arith.constant dense<0.000000e+00> : vector<64x384xf32>
    %458 = tpu.matmul %447, %457, %cst_144 {dimension_numbers = #tpu.dot_dimension_numbers<[1], [0], [0], [1], [0, 0, 1, 1], [], []>} : vector<64x256xf32>, vector<256x384xf32>, vector<64x384xf32> -> vector<64x384xf32>
    %c0_145 = arith.constant 0 : index
    %c0_146 = arith.constant 0 : index
    %459 = vector.load %arg16[%c0_145, %c0_146] : memref<1x384xf32, #tpu.memory_space<vmem>>, vector<1x384xf32>
    %460 = vector.broadcast %459 : vector<1x384xf32> to vector<64x384xf32>
    %461 = arith.addf %458, %460 : vector<64x384xf32>
    %462 = vector.extract_strided_slice %456 {offsets = [0, 0], sizes = [8, 384], strides = [1, 1]} : vector<64x384xf32> to vector<8x384xf32>
    %c0_147 = arith.constant 0 : index
    %c0_148 = arith.constant 0 : index
    %463 = vector.load %arg11[%c0_147, %c0_148] : memref<128x384xf32, #tpu.memory_space<vmem>>, vector<128x384xf32>
    %cst_149 = arith.constant dense<0.000000e+00> : vector<8x384xf32>
    %464 = tpu.matmul %449, %463, %cst_149 {dimension_numbers = #tpu.dot_dimension_numbers<[1], [0], [0], [1], [0, 0, 1, 1], [], []>} : vector<8x128xf32>, vector<128x384xf32>, vector<8x384xf32> -> vector<8x384xf32>
    %c0_150 = arith.constant 0 : index
    %c0_151 = arith.constant 0 : index
    %465 = vector.load %arg13[%c0_150, %c0_151] : memref<1x384xf32, #tpu.memory_space<vmem>>, vector<1x384xf32>
    %466 = vector.broadcast %465 : vector<1x384xf32> to vector<8x384xf32>
    %467 = arith.addf %464, %466 : vector<8x384xf32>
    %468 = vector.extract_strided_slice %462 {offsets = [0, 0], sizes = [8, 256], strides = [1, 1]} : vector<8x384xf32> to vector<8x256xf32>
    %469 = vector.extract_strided_slice %467 {offsets = [0, 0], sizes = [8, 256], strides = [1, 1]} : vector<8x384xf32> to vector<8x256xf32>
    %470 = arith.addf %468, %469 : vector<8x256xf32>
    %471 = arith.negf %470 : vector<8x256xf32>
    %472 = math.exp %471 : vector<8x256xf32>
    %cst_152 = arith.constant 1.000000e+00 : f32
    %473 = vector.broadcast %cst_152 : f32 to vector<8x256xf32>
    %474 = arith.addf %473, %472 : vector<8x256xf32>
    %475 = arith.divf %473, %474 : vector<8x256xf32>
    %476 = vector.extract_strided_slice %475 {offsets = [0, 0], sizes = [8, 128], strides = [1, 1]} : vector<8x256xf32> to vector<8x128xf32>
    %477 = vector.extract_strided_slice %475 {offsets = [0, 128], sizes = [8, 128], strides = [1, 1]} : vector<8x256xf32> to vector<8x128xf32>
    %478 = vector.extract_strided_slice %462 {offsets = [0, 256], sizes = [8, 128], strides = [1, 1]} : vector<8x384xf32> to vector<8x128xf32>
    %479 = vector.extract_strided_slice %467 {offsets = [0, 256], sizes = [8, 128], strides = [1, 1]} : vector<8x384xf32> to vector<8x128xf32>
    %480 = arith.mulf %476, %479 : vector<8x128xf32>
    %481 = arith.addf %478, %480 : vector<8x128xf32>
    %482 = math.tanh %481 : vector<8x128xf32>
    %cst_153 = arith.constant 1.000000e+00 : f32
    %483 = vector.broadcast %cst_153 : f32 to vector<8x128xf32>
    %484 = arith.subf %483, %477 : vector<8x128xf32>
    %485 = arith.mulf %484, %482 : vector<8x128xf32>
    %486 = arith.mulf %477, %449 : vector<8x128xf32>
    %487 = arith.addf %485, %486 : vector<8x128xf32>
    %488 = vector.extract_strided_slice %461 {offsets = [56, 0], sizes = [8, 384], strides = [1, 1]} : vector<64x384xf32> to vector<8x384xf32>
    %c0_154 = arith.constant 0 : index
    %c0_155 = arith.constant 0 : index
    %489 = vector.load %arg15[%c0_154, %c0_155] : memref<128x384xf32, #tpu.memory_space<vmem>>, vector<128x384xf32>
    %cst_156 = arith.constant dense<0.000000e+00> : vector<8x384xf32>
    %490 = tpu.matmul %451, %489, %cst_156 {dimension_numbers = #tpu.dot_dimension_numbers<[1], [0], [0], [1], [0, 0, 1, 1], [], []>} : vector<8x128xf32>, vector<128x384xf32>, vector<8x384xf32> -> vector<8x384xf32>
    %c0_157 = arith.constant 0 : index
    %c0_158 = arith.constant 0 : index
    %491 = vector.load %arg17[%c0_157, %c0_158] : memref<1x384xf32, #tpu.memory_space<vmem>>, vector<1x384xf32>
    %492 = vector.broadcast %491 : vector<1x384xf32> to vector<8x384xf32>
    %493 = arith.addf %490, %492 : vector<8x384xf32>
    %494 = vector.extract_strided_slice %488 {offsets = [0, 0], sizes = [8, 256], strides = [1, 1]} : vector<8x384xf32> to vector<8x256xf32>
    %495 = vector.extract_strided_slice %493 {offsets = [0, 0], sizes = [8, 256], strides = [1, 1]} : vector<8x384xf32> to vector<8x256xf32>
    %496 = arith.addf %494, %495 : vector<8x256xf32>
    %497 = arith.negf %496 : vector<8x256xf32>
    %498 = math.exp %497 : vector<8x256xf32>
    %cst_159 = arith.constant 1.000000e+00 : f32
    %499 = vector.broadcast %cst_159 : f32 to vector<8x256xf32>
    %500 = arith.addf %499, %498 : vector<8x256xf32>
    %501 = arith.divf %499, %500 : vector<8x256xf32>
    %502 = vector.extract_strided_slice %501 {offsets = [0, 0], sizes = [8, 128], strides = [1, 1]} : vector<8x256xf32> to vector<8x128xf32>
    %503 = vector.extract_strided_slice %501 {offsets = [0, 128], sizes = [8, 128], strides = [1, 1]} : vector<8x256xf32> to vector<8x128xf32>
    %504 = vector.extract_strided_slice %488 {offsets = [0, 256], sizes = [8, 128], strides = [1, 1]} : vector<8x384xf32> to vector<8x128xf32>
    %505 = vector.extract_strided_slice %493 {offsets = [0, 256], sizes = [8, 128], strides = [1, 1]} : vector<8x384xf32> to vector<8x128xf32>
    %506 = arith.mulf %502, %505 : vector<8x128xf32>
    %507 = arith.addf %504, %506 : vector<8x128xf32>
    %508 = math.tanh %507 : vector<8x128xf32>
    %cst_160 = arith.constant 1.000000e+00 : f32
    %509 = vector.broadcast %cst_160 : f32 to vector<8x128xf32>
    %510 = arith.subf %509, %503 : vector<8x128xf32>
    %511 = arith.mulf %510, %508 : vector<8x128xf32>
    %512 = arith.mulf %503, %451 : vector<8x128xf32>
    %513 = arith.addf %511, %512 : vector<8x128xf32>
    %514 = vector.extract_strided_slice %456 {offsets = [8, 0], sizes = [8, 384], strides = [1, 1]} : vector<64x384xf32> to vector<8x384xf32>
    %c0_161 = arith.constant 0 : index
    %c0_162 = arith.constant 0 : index
    %515 = vector.load %arg11[%c0_161, %c0_162] : memref<128x384xf32, #tpu.memory_space<vmem>>, vector<128x384xf32>
    %cst_163 = arith.constant dense<0.000000e+00> : vector<8x384xf32>
    %516 = tpu.matmul %487, %515, %cst_163 {dimension_numbers = #tpu.dot_dimension_numbers<[1], [0], [0], [1], [0, 0, 1, 1], [], []>} : vector<8x128xf32>, vector<128x384xf32>, vector<8x384xf32> -> vector<8x384xf32>
    %c0_164 = arith.constant 0 : index
    %c0_165 = arith.constant 0 : index
    %517 = vector.load %arg13[%c0_164, %c0_165] : memref<1x384xf32, #tpu.memory_space<vmem>>, vector<1x384xf32>
    %518 = vector.broadcast %517 : vector<1x384xf32> to vector<8x384xf32>
    %519 = arith.addf %516, %518 : vector<8x384xf32>
    %520 = vector.extract_strided_slice %514 {offsets = [0, 0], sizes = [8, 256], strides = [1, 1]} : vector<8x384xf32> to vector<8x256xf32>
    %521 = vector.extract_strided_slice %519 {offsets = [0, 0], sizes = [8, 256], strides = [1, 1]} : vector<8x384xf32> to vector<8x256xf32>
    %522 = arith.addf %520, %521 : vector<8x256xf32>
    %523 = arith.negf %522 : vector<8x256xf32>
    %524 = math.exp %523 : vector<8x256xf32>
    %cst_166 = arith.constant 1.000000e+00 : f32
    %525 = vector.broadcast %cst_166 : f32 to vector<8x256xf32>
    %526 = arith.addf %525, %524 : vector<8x256xf32>
    %527 = arith.divf %525, %526 : vector<8x256xf32>
    %528 = vector.extract_strided_slice %527 {offsets = [0, 0], sizes = [8, 128], strides = [1, 1]} : vector<8x256xf32> to vector<8x128xf32>
    %529 = vector.extract_strided_slice %527 {offsets = [0, 128], sizes = [8, 128], strides = [1, 1]} : vector<8x256xf32> to vector<8x128xf32>
    %530 = vector.extract_strided_slice %514 {offsets = [0, 256], sizes = [8, 128], strides = [1, 1]} : vector<8x384xf32> to vector<8x128xf32>
    %531 = vector.extract_strided_slice %519 {offsets = [0, 256], sizes = [8, 128], strides = [1, 1]} : vector<8x384xf32> to vector<8x128xf32>
    %532 = arith.mulf %528, %531 : vector<8x128xf32>
    %533 = arith.addf %530, %532 : vector<8x128xf32>
    %534 = math.tanh %533 : vector<8x128xf32>
    %cst_167 = arith.constant 1.000000e+00 : f32
    %535 = vector.broadcast %cst_167 : f32 to vector<8x128xf32>
    %536 = arith.subf %535, %529 : vector<8x128xf32>
    %537 = arith.mulf %536, %534 : vector<8x128xf32>
    %538 = arith.mulf %529, %487 : vector<8x128xf32>
    %539 = arith.addf %537, %538 : vector<8x128xf32>
    %540 = vector.extract_strided_slice %461 {offsets = [48, 0], sizes = [8, 384], strides = [1, 1]} : vector<64x384xf32> to vector<8x384xf32>
    %c0_168 = arith.constant 0 : index
    %c0_169 = arith.constant 0 : index
    %541 = vector.load %arg15[%c0_168, %c0_169] : memref<128x384xf32, #tpu.memory_space<vmem>>, vector<128x384xf32>
    %cst_170 = arith.constant dense<0.000000e+00> : vector<8x384xf32>
    %542 = tpu.matmul %513, %541, %cst_170 {dimension_numbers = #tpu.dot_dimension_numbers<[1], [0], [0], [1], [0, 0, 1, 1], [], []>} : vector<8x128xf32>, vector<128x384xf32>, vector<8x384xf32> -> vector<8x384xf32>
    %c0_171 = arith.constant 0 : index
    %c0_172 = arith.constant 0 : index
    %543 = vector.load %arg17[%c0_171, %c0_172] : memref<1x384xf32, #tpu.memory_space<vmem>>, vector<1x384xf32>
    %544 = vector.broadcast %543 : vector<1x384xf32> to vector<8x384xf32>
    %545 = arith.addf %542, %544 : vector<8x384xf32>
    %546 = vector.extract_strided_slice %540 {offsets = [0, 0], sizes = [8, 256], strides = [1, 1]} : vector<8x384xf32> to vector<8x256xf32>
    %547 = vector.extract_strided_slice %545 {offsets = [0, 0], sizes = [8, 256], strides = [1, 1]} : vector<8x384xf32> to vector<8x256xf32>
    %548 = arith.addf %546, %547 : vector<8x256xf32>
    %549 = arith.negf %548 : vector<8x256xf32>
    %550 = math.exp %549 : vector<8x256xf32>
    %cst_173 = arith.constant 1.000000e+00 : f32
    %551 = vector.broadcast %cst_173 : f32 to vector<8x256xf32>
    %552 = arith.addf %551, %550 : vector<8x256xf32>
    %553 = arith.divf %551, %552 : vector<8x256xf32>
    %554 = vector.extract_strided_slice %553 {offsets = [0, 0], sizes = [8, 128], strides = [1, 1]} : vector<8x256xf32> to vector<8x128xf32>
    %555 = vector.extract_strided_slice %553 {offsets = [0, 128], sizes = [8, 128], strides = [1, 1]} : vector<8x256xf32> to vector<8x128xf32>
    %556 = vector.extract_strided_slice %540 {offsets = [0, 256], sizes = [8, 128], strides = [1, 1]} : vector<8x384xf32> to vector<8x128xf32>
    %557 = vector.extract_strided_slice %545 {offsets = [0, 256], sizes = [8, 128], strides = [1, 1]} : vector<8x384xf32> to vector<8x128xf32>
    %558 = arith.mulf %554, %557 : vector<8x128xf32>
    %559 = arith.addf %556, %558 : vector<8x128xf32>
    %560 = math.tanh %559 : vector<8x128xf32>
    %cst_174 = arith.constant 1.000000e+00 : f32
    %561 = vector.broadcast %cst_174 : f32 to vector<8x128xf32>
    %562 = arith.subf %561, %555 : vector<8x128xf32>
    %563 = arith.mulf %562, %560 : vector<8x128xf32>
    %564 = arith.mulf %555, %513 : vector<8x128xf32>
    %565 = arith.addf %563, %564 : vector<8x128xf32>
    %566 = vector.extract_strided_slice %456 {offsets = [16, 0], sizes = [8, 384], strides = [1, 1]} : vector<64x384xf32> to vector<8x384xf32>
    %c0_175 = arith.constant 0 : index
    %c0_176 = arith.constant 0 : index
    %567 = vector.load %arg11[%c0_175, %c0_176] : memref<128x384xf32, #tpu.memory_space<vmem>>, vector<128x384xf32>
    %cst_177 = arith.constant dense<0.000000e+00> : vector<8x384xf32>
    %568 = tpu.matmul %539, %567, %cst_177 {dimension_numbers = #tpu.dot_dimension_numbers<[1], [0], [0], [1], [0, 0, 1, 1], [], []>} : vector<8x128xf32>, vector<128x384xf32>, vector<8x384xf32> -> vector<8x384xf32>
    %c0_178 = arith.constant 0 : index
    %c0_179 = arith.constant 0 : index
    %569 = vector.load %arg13[%c0_178, %c0_179] : memref<1x384xf32, #tpu.memory_space<vmem>>, vector<1x384xf32>
    %570 = vector.broadcast %569 : vector<1x384xf32> to vector<8x384xf32>
    %571 = arith.addf %568, %570 : vector<8x384xf32>
    %572 = vector.extract_strided_slice %566 {offsets = [0, 0], sizes = [8, 256], strides = [1, 1]} : vector<8x384xf32> to vector<8x256xf32>
    %573 = vector.extract_strided_slice %571 {offsets = [0, 0], sizes = [8, 256], strides = [1, 1]} : vector<8x384xf32> to vector<8x256xf32>
    %574 = arith.addf %572, %573 : vector<8x256xf32>
    %575 = arith.negf %574 : vector<8x256xf32>
    %576 = math.exp %575 : vector<8x256xf32>
    %cst_180 = arith.constant 1.000000e+00 : f32
    %577 = vector.broadcast %cst_180 : f32 to vector<8x256xf32>
    %578 = arith.addf %577, %576 : vector<8x256xf32>
    %579 = arith.divf %577, %578 : vector<8x256xf32>
    %580 = vector.extract_strided_slice %579 {offsets = [0, 0], sizes = [8, 128], strides = [1, 1]} : vector<8x256xf32> to vector<8x128xf32>
    %581 = vector.extract_strided_slice %579 {offsets = [0, 128], sizes = [8, 128], strides = [1, 1]} : vector<8x256xf32> to vector<8x128xf32>
    %582 = vector.extract_strided_slice %566 {offsets = [0, 256], sizes = [8, 128], strides = [1, 1]} : vector<8x384xf32> to vector<8x128xf32>
    %583 = vector.extract_strided_slice %571 {offsets = [0, 256], sizes = [8, 128], strides = [1, 1]} : vector<8x384xf32> to vector<8x128xf32>
    %584 = arith.mulf %580, %583 : vector<8x128xf32>
    %585 = arith.addf %582, %584 : vector<8x128xf32>
    %586 = math.tanh %585 : vector<8x128xf32>
    %cst_181 = arith.constant 1.000000e+00 : f32
    %587 = vector.broadcast %cst_181 : f32 to vector<8x128xf32>
    %588 = arith.subf %587, %581 : vector<8x128xf32>
    %589 = arith.mulf %588, %586 : vector<8x128xf32>
    %590 = arith.mulf %581, %539 : vector<8x128xf32>
    %591 = arith.addf %589, %590 : vector<8x128xf32>
    %592 = vector.extract_strided_slice %461 {offsets = [40, 0], sizes = [8, 384], strides = [1, 1]} : vector<64x384xf32> to vector<8x384xf32>
    %c0_182 = arith.constant 0 : index
    %c0_183 = arith.constant 0 : index
    %593 = vector.load %arg15[%c0_182, %c0_183] : memref<128x384xf32, #tpu.memory_space<vmem>>, vector<128x384xf32>
    %cst_184 = arith.constant dense<0.000000e+00> : vector<8x384xf32>
    %594 = tpu.matmul %565, %593, %cst_184 {dimension_numbers = #tpu.dot_dimension_numbers<[1], [0], [0], [1], [0, 0, 1, 1], [], []>} : vector<8x128xf32>, vector<128x384xf32>, vector<8x384xf32> -> vector<8x384xf32>
    %c0_185 = arith.constant 0 : index
    %c0_186 = arith.constant 0 : index
    %595 = vector.load %arg17[%c0_185, %c0_186] : memref<1x384xf32, #tpu.memory_space<vmem>>, vector<1x384xf32>
    %596 = vector.broadcast %595 : vector<1x384xf32> to vector<8x384xf32>
    %597 = arith.addf %594, %596 : vector<8x384xf32>
    %598 = vector.extract_strided_slice %592 {offsets = [0, 0], sizes = [8, 256], strides = [1, 1]} : vector<8x384xf32> to vector<8x256xf32>
    %599 = vector.extract_strided_slice %597 {offsets = [0, 0], sizes = [8, 256], strides = [1, 1]} : vector<8x384xf32> to vector<8x256xf32>
    %600 = arith.addf %598, %599 : vector<8x256xf32>
    %601 = arith.negf %600 : vector<8x256xf32>
    %602 = math.exp %601 : vector<8x256xf32>
    %cst_187 = arith.constant 1.000000e+00 : f32
    %603 = vector.broadcast %cst_187 : f32 to vector<8x256xf32>
    %604 = arith.addf %603, %602 : vector<8x256xf32>
    %605 = arith.divf %603, %604 : vector<8x256xf32>
    %606 = vector.extract_strided_slice %605 {offsets = [0, 0], sizes = [8, 128], strides = [1, 1]} : vector<8x256xf32> to vector<8x128xf32>
    %607 = vector.extract_strided_slice %605 {offsets = [0, 128], sizes = [8, 128], strides = [1, 1]} : vector<8x256xf32> to vector<8x128xf32>
    %608 = vector.extract_strided_slice %592 {offsets = [0, 256], sizes = [8, 128], strides = [1, 1]} : vector<8x384xf32> to vector<8x128xf32>
    %609 = vector.extract_strided_slice %597 {offsets = [0, 256], sizes = [8, 128], strides = [1, 1]} : vector<8x384xf32> to vector<8x128xf32>
    %610 = arith.mulf %606, %609 : vector<8x128xf32>
    %611 = arith.addf %608, %610 : vector<8x128xf32>
    %612 = math.tanh %611 : vector<8x128xf32>
    %cst_188 = arith.constant 1.000000e+00 : f32
    %613 = vector.broadcast %cst_188 : f32 to vector<8x128xf32>
    %614 = arith.subf %613, %607 : vector<8x128xf32>
    %615 = arith.mulf %614, %612 : vector<8x128xf32>
    %616 = arith.mulf %607, %565 : vector<8x128xf32>
    %617 = arith.addf %615, %616 : vector<8x128xf32>
    %618 = vector.extract_strided_slice %456 {offsets = [24, 0], sizes = [8, 384], strides = [1, 1]} : vector<64x384xf32> to vector<8x384xf32>
    %c0_189 = arith.constant 0 : index
    %c0_190 = arith.constant 0 : index
    %619 = vector.load %arg11[%c0_189, %c0_190] : memref<128x384xf32, #tpu.memory_space<vmem>>, vector<128x384xf32>
    %cst_191 = arith.constant dense<0.000000e+00> : vector<8x384xf32>
    %620 = tpu.matmul %591, %619, %cst_191 {dimension_numbers = #tpu.dot_dimension_numbers<[1], [0], [0], [1], [0, 0, 1, 1], [], []>} : vector<8x128xf32>, vector<128x384xf32>, vector<8x384xf32> -> vector<8x384xf32>
    %c0_192 = arith.constant 0 : index
    %c0_193 = arith.constant 0 : index
    %621 = vector.load %arg13[%c0_192, %c0_193] : memref<1x384xf32, #tpu.memory_space<vmem>>, vector<1x384xf32>
    %622 = vector.broadcast %621 : vector<1x384xf32> to vector<8x384xf32>
    %623 = arith.addf %620, %622 : vector<8x384xf32>
    %624 = vector.extract_strided_slice %618 {offsets = [0, 0], sizes = [8, 256], strides = [1, 1]} : vector<8x384xf32> to vector<8x256xf32>
    %625 = vector.extract_strided_slice %623 {offsets = [0, 0], sizes = [8, 256], strides = [1, 1]} : vector<8x384xf32> to vector<8x256xf32>
    %626 = arith.addf %624, %625 : vector<8x256xf32>
    %627 = arith.negf %626 : vector<8x256xf32>
    %628 = math.exp %627 : vector<8x256xf32>
    %cst_194 = arith.constant 1.000000e+00 : f32
    %629 = vector.broadcast %cst_194 : f32 to vector<8x256xf32>
    %630 = arith.addf %629, %628 : vector<8x256xf32>
    %631 = arith.divf %629, %630 : vector<8x256xf32>
    %632 = vector.extract_strided_slice %631 {offsets = [0, 0], sizes = [8, 128], strides = [1, 1]} : vector<8x256xf32> to vector<8x128xf32>
    %633 = vector.extract_strided_slice %631 {offsets = [0, 128], sizes = [8, 128], strides = [1, 1]} : vector<8x256xf32> to vector<8x128xf32>
    %634 = vector.extract_strided_slice %618 {offsets = [0, 256], sizes = [8, 128], strides = [1, 1]} : vector<8x384xf32> to vector<8x128xf32>
    %635 = vector.extract_strided_slice %623 {offsets = [0, 256], sizes = [8, 128], strides = [1, 1]} : vector<8x384xf32> to vector<8x128xf32>
    %636 = arith.mulf %632, %635 : vector<8x128xf32>
    %637 = arith.addf %634, %636 : vector<8x128xf32>
    %638 = math.tanh %637 : vector<8x128xf32>
    %cst_195 = arith.constant 1.000000e+00 : f32
    %639 = vector.broadcast %cst_195 : f32 to vector<8x128xf32>
    %640 = arith.subf %639, %633 : vector<8x128xf32>
    %641 = arith.mulf %640, %638 : vector<8x128xf32>
    %642 = arith.mulf %633, %591 : vector<8x128xf32>
    %643 = arith.addf %641, %642 : vector<8x128xf32>
    %644 = vector.extract_strided_slice %461 {offsets = [32, 0], sizes = [8, 384], strides = [1, 1]} : vector<64x384xf32> to vector<8x384xf32>
    %c0_196 = arith.constant 0 : index
    %c0_197 = arith.constant 0 : index
    %645 = vector.load %arg15[%c0_196, %c0_197] : memref<128x384xf32, #tpu.memory_space<vmem>>, vector<128x384xf32>
    %cst_198 = arith.constant dense<0.000000e+00> : vector<8x384xf32>
    %646 = tpu.matmul %617, %645, %cst_198 {dimension_numbers = #tpu.dot_dimension_numbers<[1], [0], [0], [1], [0, 0, 1, 1], [], []>} : vector<8x128xf32>, vector<128x384xf32>, vector<8x384xf32> -> vector<8x384xf32>
    %c0_199 = arith.constant 0 : index
    %c0_200 = arith.constant 0 : index
    %647 = vector.load %arg17[%c0_199, %c0_200] : memref<1x384xf32, #tpu.memory_space<vmem>>, vector<1x384xf32>
    %648 = vector.broadcast %647 : vector<1x384xf32> to vector<8x384xf32>
    %649 = arith.addf %646, %648 : vector<8x384xf32>
    %650 = vector.extract_strided_slice %644 {offsets = [0, 0], sizes = [8, 256], strides = [1, 1]} : vector<8x384xf32> to vector<8x256xf32>
    %651 = vector.extract_strided_slice %649 {offsets = [0, 0], sizes = [8, 256], strides = [1, 1]} : vector<8x384xf32> to vector<8x256xf32>
    %652 = arith.addf %650, %651 : vector<8x256xf32>
    %653 = arith.negf %652 : vector<8x256xf32>
    %654 = math.exp %653 : vector<8x256xf32>
    %cst_201 = arith.constant 1.000000e+00 : f32
    %655 = vector.broadcast %cst_201 : f32 to vector<8x256xf32>
    %656 = arith.addf %655, %654 : vector<8x256xf32>
    %657 = arith.divf %655, %656 : vector<8x256xf32>
    %658 = vector.extract_strided_slice %657 {offsets = [0, 0], sizes = [8, 128], strides = [1, 1]} : vector<8x256xf32> to vector<8x128xf32>
    %659 = vector.extract_strided_slice %657 {offsets = [0, 128], sizes = [8, 128], strides = [1, 1]} : vector<8x256xf32> to vector<8x128xf32>
    %660 = vector.extract_strided_slice %644 {offsets = [0, 256], sizes = [8, 128], strides = [1, 1]} : vector<8x384xf32> to vector<8x128xf32>
    %661 = vector.extract_strided_slice %649 {offsets = [0, 256], sizes = [8, 128], strides = [1, 1]} : vector<8x384xf32> to vector<8x128xf32>
    %662 = arith.mulf %658, %661 : vector<8x128xf32>
    %663 = arith.addf %660, %662 : vector<8x128xf32>
    %664 = math.tanh %663 : vector<8x128xf32>
    %cst_202 = arith.constant 1.000000e+00 : f32
    %665 = vector.broadcast %cst_202 : f32 to vector<8x128xf32>
    %666 = arith.subf %665, %659 : vector<8x128xf32>
    %667 = arith.mulf %666, %664 : vector<8x128xf32>
    %668 = arith.mulf %659, %617 : vector<8x128xf32>
    %669 = arith.addf %667, %668 : vector<8x128xf32>
    %670 = vector.extract_strided_slice %456 {offsets = [32, 0], sizes = [8, 384], strides = [1, 1]} : vector<64x384xf32> to vector<8x384xf32>
    %c0_203 = arith.constant 0 : index
    %c0_204 = arith.constant 0 : index
    %671 = vector.load %arg11[%c0_203, %c0_204] : memref<128x384xf32, #tpu.memory_space<vmem>>, vector<128x384xf32>
    %cst_205 = arith.constant dense<0.000000e+00> : vector<8x384xf32>
    %672 = tpu.matmul %643, %671, %cst_205 {dimension_numbers = #tpu.dot_dimension_numbers<[1], [0], [0], [1], [0, 0, 1, 1], [], []>} : vector<8x128xf32>, vector<128x384xf32>, vector<8x384xf32> -> vector<8x384xf32>
    %c0_206 = arith.constant 0 : index
    %c0_207 = arith.constant 0 : index
    %673 = vector.load %arg13[%c0_206, %c0_207] : memref<1x384xf32, #tpu.memory_space<vmem>>, vector<1x384xf32>
    %674 = vector.broadcast %673 : vector<1x384xf32> to vector<8x384xf32>
    %675 = arith.addf %672, %674 : vector<8x384xf32>
    %676 = vector.extract_strided_slice %670 {offsets = [0, 0], sizes = [8, 256], strides = [1, 1]} : vector<8x384xf32> to vector<8x256xf32>
    %677 = vector.extract_strided_slice %675 {offsets = [0, 0], sizes = [8, 256], strides = [1, 1]} : vector<8x384xf32> to vector<8x256xf32>
    %678 = arith.addf %676, %677 : vector<8x256xf32>
    %679 = arith.negf %678 : vector<8x256xf32>
    %680 = math.exp %679 : vector<8x256xf32>
    %cst_208 = arith.constant 1.000000e+00 : f32
    %681 = vector.broadcast %cst_208 : f32 to vector<8x256xf32>
    %682 = arith.addf %681, %680 : vector<8x256xf32>
    %683 = arith.divf %681, %682 : vector<8x256xf32>
    %684 = vector.extract_strided_slice %683 {offsets = [0, 0], sizes = [8, 128], strides = [1, 1]} : vector<8x256xf32> to vector<8x128xf32>
    %685 = vector.extract_strided_slice %683 {offsets = [0, 128], sizes = [8, 128], strides = [1, 1]} : vector<8x256xf32> to vector<8x128xf32>
    %686 = vector.extract_strided_slice %670 {offsets = [0, 256], sizes = [8, 128], strides = [1, 1]} : vector<8x384xf32> to vector<8x128xf32>
    %687 = vector.extract_strided_slice %675 {offsets = [0, 256], sizes = [8, 128], strides = [1, 1]} : vector<8x384xf32> to vector<8x128xf32>
    %688 = arith.mulf %684, %687 : vector<8x128xf32>
    %689 = arith.addf %686, %688 : vector<8x128xf32>
    %690 = math.tanh %689 : vector<8x128xf32>
    %cst_209 = arith.constant 1.000000e+00 : f32
    %691 = vector.broadcast %cst_209 : f32 to vector<8x128xf32>
    %692 = arith.subf %691, %685 : vector<8x128xf32>
    %693 = arith.mulf %692, %690 : vector<8x128xf32>
    %694 = arith.mulf %685, %643 : vector<8x128xf32>
    %695 = arith.addf %693, %694 : vector<8x128xf32>
    %696 = vector.extract_strided_slice %461 {offsets = [24, 0], sizes = [8, 384], strides = [1, 1]} : vector<64x384xf32> to vector<8x384xf32>
    %c0_210 = arith.constant 0 : index
    %c0_211 = arith.constant 0 : index
    %697 = vector.load %arg15[%c0_210, %c0_211] : memref<128x384xf32, #tpu.memory_space<vmem>>, vector<128x384xf32>
    %cst_212 = arith.constant dense<0.000000e+00> : vector<8x384xf32>
    %698 = tpu.matmul %669, %697, %cst_212 {dimension_numbers = #tpu.dot_dimension_numbers<[1], [0], [0], [1], [0, 0, 1, 1], [], []>} : vector<8x128xf32>, vector<128x384xf32>, vector<8x384xf32> -> vector<8x384xf32>
    %c0_213 = arith.constant 0 : index
    %c0_214 = arith.constant 0 : index
    %699 = vector.load %arg17[%c0_213, %c0_214] : memref<1x384xf32, #tpu.memory_space<vmem>>, vector<1x384xf32>
    %700 = vector.broadcast %699 : vector<1x384xf32> to vector<8x384xf32>
    %701 = arith.addf %698, %700 : vector<8x384xf32>
    %702 = vector.extract_strided_slice %696 {offsets = [0, 0], sizes = [8, 256], strides = [1, 1]} : vector<8x384xf32> to vector<8x256xf32>
    %703 = vector.extract_strided_slice %701 {offsets = [0, 0], sizes = [8, 256], strides = [1, 1]} : vector<8x384xf32> to vector<8x256xf32>
    %704 = arith.addf %702, %703 : vector<8x256xf32>
    %705 = arith.negf %704 : vector<8x256xf32>
    %706 = math.exp %705 : vector<8x256xf32>
    %cst_215 = arith.constant 1.000000e+00 : f32
    %707 = vector.broadcast %cst_215 : f32 to vector<8x256xf32>
    %708 = arith.addf %707, %706 : vector<8x256xf32>
    %709 = arith.divf %707, %708 : vector<8x256xf32>
    %710 = vector.extract_strided_slice %709 {offsets = [0, 0], sizes = [8, 128], strides = [1, 1]} : vector<8x256xf32> to vector<8x128xf32>
    %711 = vector.extract_strided_slice %709 {offsets = [0, 128], sizes = [8, 128], strides = [1, 1]} : vector<8x256xf32> to vector<8x128xf32>
    %712 = vector.extract_strided_slice %696 {offsets = [0, 256], sizes = [8, 128], strides = [1, 1]} : vector<8x384xf32> to vector<8x128xf32>
    %713 = vector.extract_strided_slice %701 {offsets = [0, 256], sizes = [8, 128], strides = [1, 1]} : vector<8x384xf32> to vector<8x128xf32>
    %714 = arith.mulf %710, %713 : vector<8x128xf32>
    %715 = arith.addf %712, %714 : vector<8x128xf32>
    %716 = math.tanh %715 : vector<8x128xf32>
    %cst_216 = arith.constant 1.000000e+00 : f32
    %717 = vector.broadcast %cst_216 : f32 to vector<8x128xf32>
    %718 = arith.subf %717, %711 : vector<8x128xf32>
    %719 = arith.mulf %718, %716 : vector<8x128xf32>
    %720 = arith.mulf %711, %669 : vector<8x128xf32>
    %721 = arith.addf %719, %720 : vector<8x128xf32>
    %722 = vector.extract_strided_slice %456 {offsets = [40, 0], sizes = [8, 384], strides = [1, 1]} : vector<64x384xf32> to vector<8x384xf32>
    %c0_217 = arith.constant 0 : index
    %c0_218 = arith.constant 0 : index
    %723 = vector.load %arg11[%c0_217, %c0_218] : memref<128x384xf32, #tpu.memory_space<vmem>>, vector<128x384xf32>
    %cst_219 = arith.constant dense<0.000000e+00> : vector<8x384xf32>
    %724 = tpu.matmul %695, %723, %cst_219 {dimension_numbers = #tpu.dot_dimension_numbers<[1], [0], [0], [1], [0, 0, 1, 1], [], []>} : vector<8x128xf32>, vector<128x384xf32>, vector<8x384xf32> -> vector<8x384xf32>
    %c0_220 = arith.constant 0 : index
    %c0_221 = arith.constant 0 : index
    %725 = vector.load %arg13[%c0_220, %c0_221] : memref<1x384xf32, #tpu.memory_space<vmem>>, vector<1x384xf32>
    %726 = vector.broadcast %725 : vector<1x384xf32> to vector<8x384xf32>
    %727 = arith.addf %724, %726 : vector<8x384xf32>
    %728 = vector.extract_strided_slice %722 {offsets = [0, 0], sizes = [8, 256], strides = [1, 1]} : vector<8x384xf32> to vector<8x256xf32>
    %729 = vector.extract_strided_slice %727 {offsets = [0, 0], sizes = [8, 256], strides = [1, 1]} : vector<8x384xf32> to vector<8x256xf32>
    %730 = arith.addf %728, %729 : vector<8x256xf32>
    %731 = arith.negf %730 : vector<8x256xf32>
    %732 = math.exp %731 : vector<8x256xf32>
    %cst_222 = arith.constant 1.000000e+00 : f32
    %733 = vector.broadcast %cst_222 : f32 to vector<8x256xf32>
    %734 = arith.addf %733, %732 : vector<8x256xf32>
    %735 = arith.divf %733, %734 : vector<8x256xf32>
    %736 = vector.extract_strided_slice %735 {offsets = [0, 0], sizes = [8, 128], strides = [1, 1]} : vector<8x256xf32> to vector<8x128xf32>
    %737 = vector.extract_strided_slice %735 {offsets = [0, 128], sizes = [8, 128], strides = [1, 1]} : vector<8x256xf32> to vector<8x128xf32>
    %738 = vector.extract_strided_slice %722 {offsets = [0, 256], sizes = [8, 128], strides = [1, 1]} : vector<8x384xf32> to vector<8x128xf32>
    %739 = vector.extract_strided_slice %727 {offsets = [0, 256], sizes = [8, 128], strides = [1, 1]} : vector<8x384xf32> to vector<8x128xf32>
    %740 = arith.mulf %736, %739 : vector<8x128xf32>
    %741 = arith.addf %738, %740 : vector<8x128xf32>
    %742 = math.tanh %741 : vector<8x128xf32>
    %cst_223 = arith.constant 1.000000e+00 : f32
    %743 = vector.broadcast %cst_223 : f32 to vector<8x128xf32>
    %744 = arith.subf %743, %737 : vector<8x128xf32>
    %745 = arith.mulf %744, %742 : vector<8x128xf32>
    %746 = arith.mulf %737, %695 : vector<8x128xf32>
    %747 = arith.addf %745, %746 : vector<8x128xf32>
    %748 = vector.extract_strided_slice %461 {offsets = [16, 0], sizes = [8, 384], strides = [1, 1]} : vector<64x384xf32> to vector<8x384xf32>
    %c0_224 = arith.constant 0 : index
    %c0_225 = arith.constant 0 : index
    %749 = vector.load %arg15[%c0_224, %c0_225] : memref<128x384xf32, #tpu.memory_space<vmem>>, vector<128x384xf32>
    %cst_226 = arith.constant dense<0.000000e+00> : vector<8x384xf32>
    %750 = tpu.matmul %721, %749, %cst_226 {dimension_numbers = #tpu.dot_dimension_numbers<[1], [0], [0], [1], [0, 0, 1, 1], [], []>} : vector<8x128xf32>, vector<128x384xf32>, vector<8x384xf32> -> vector<8x384xf32>
    %c0_227 = arith.constant 0 : index
    %c0_228 = arith.constant 0 : index
    %751 = vector.load %arg17[%c0_227, %c0_228] : memref<1x384xf32, #tpu.memory_space<vmem>>, vector<1x384xf32>
    %752 = vector.broadcast %751 : vector<1x384xf32> to vector<8x384xf32>
    %753 = arith.addf %750, %752 : vector<8x384xf32>
    %754 = vector.extract_strided_slice %748 {offsets = [0, 0], sizes = [8, 256], strides = [1, 1]} : vector<8x384xf32> to vector<8x256xf32>
    %755 = vector.extract_strided_slice %753 {offsets = [0, 0], sizes = [8, 256], strides = [1, 1]} : vector<8x384xf32> to vector<8x256xf32>
    %756 = arith.addf %754, %755 : vector<8x256xf32>
    %757 = arith.negf %756 : vector<8x256xf32>
    %758 = math.exp %757 : vector<8x256xf32>
    %cst_229 = arith.constant 1.000000e+00 : f32
    %759 = vector.broadcast %cst_229 : f32 to vector<8x256xf32>
    %760 = arith.addf %759, %758 : vector<8x256xf32>
    %761 = arith.divf %759, %760 : vector<8x256xf32>
    %762 = vector.extract_strided_slice %761 {offsets = [0, 0], sizes = [8, 128], strides = [1, 1]} : vector<8x256xf32> to vector<8x128xf32>
    %763 = vector.extract_strided_slice %761 {offsets = [0, 128], sizes = [8, 128], strides = [1, 1]} : vector<8x256xf32> to vector<8x128xf32>
    %764 = vector.extract_strided_slice %748 {offsets = [0, 256], sizes = [8, 128], strides = [1, 1]} : vector<8x384xf32> to vector<8x128xf32>
    %765 = vector.extract_strided_slice %753 {offsets = [0, 256], sizes = [8, 128], strides = [1, 1]} : vector<8x384xf32> to vector<8x128xf32>
    %766 = arith.mulf %762, %765 : vector<8x128xf32>
    %767 = arith.addf %764, %766 : vector<8x128xf32>
    %768 = math.tanh %767 : vector<8x128xf32>
    %cst_230 = arith.constant 1.000000e+00 : f32
    %769 = vector.broadcast %cst_230 : f32 to vector<8x128xf32>
    %770 = arith.subf %769, %763 : vector<8x128xf32>
    %771 = arith.mulf %770, %768 : vector<8x128xf32>
    %772 = arith.mulf %763, %721 : vector<8x128xf32>
    %773 = arith.addf %771, %772 : vector<8x128xf32>
    %774 = vector.extract_strided_slice %456 {offsets = [48, 0], sizes = [8, 384], strides = [1, 1]} : vector<64x384xf32> to vector<8x384xf32>
    %c0_231 = arith.constant 0 : index
    %c0_232 = arith.constant 0 : index
    %775 = vector.load %arg11[%c0_231, %c0_232] : memref<128x384xf32, #tpu.memory_space<vmem>>, vector<128x384xf32>
    %cst_233 = arith.constant dense<0.000000e+00> : vector<8x384xf32>
    %776 = tpu.matmul %747, %775, %cst_233 {dimension_numbers = #tpu.dot_dimension_numbers<[1], [0], [0], [1], [0, 0, 1, 1], [], []>} : vector<8x128xf32>, vector<128x384xf32>, vector<8x384xf32> -> vector<8x384xf32>
    %c0_234 = arith.constant 0 : index
    %c0_235 = arith.constant 0 : index
    %777 = vector.load %arg13[%c0_234, %c0_235] : memref<1x384xf32, #tpu.memory_space<vmem>>, vector<1x384xf32>
    %778 = vector.broadcast %777 : vector<1x384xf32> to vector<8x384xf32>
    %779 = arith.addf %776, %778 : vector<8x384xf32>
    %780 = vector.extract_strided_slice %774 {offsets = [0, 0], sizes = [8, 256], strides = [1, 1]} : vector<8x384xf32> to vector<8x256xf32>
    %781 = vector.extract_strided_slice %779 {offsets = [0, 0], sizes = [8, 256], strides = [1, 1]} : vector<8x384xf32> to vector<8x256xf32>
    %782 = arith.addf %780, %781 : vector<8x256xf32>
    %783 = arith.negf %782 : vector<8x256xf32>
    %784 = math.exp %783 : vector<8x256xf32>
    %cst_236 = arith.constant 1.000000e+00 : f32
    %785 = vector.broadcast %cst_236 : f32 to vector<8x256xf32>
    %786 = arith.addf %785, %784 : vector<8x256xf32>
    %787 = arith.divf %785, %786 : vector<8x256xf32>
    %788 = vector.extract_strided_slice %787 {offsets = [0, 0], sizes = [8, 128], strides = [1, 1]} : vector<8x256xf32> to vector<8x128xf32>
    %789 = vector.extract_strided_slice %787 {offsets = [0, 128], sizes = [8, 128], strides = [1, 1]} : vector<8x256xf32> to vector<8x128xf32>
    %790 = vector.extract_strided_slice %774 {offsets = [0, 256], sizes = [8, 128], strides = [1, 1]} : vector<8x384xf32> to vector<8x128xf32>
    %791 = vector.extract_strided_slice %779 {offsets = [0, 256], sizes = [8, 128], strides = [1, 1]} : vector<8x384xf32> to vector<8x128xf32>
    %792 = arith.mulf %788, %791 : vector<8x128xf32>
    %793 = arith.addf %790, %792 : vector<8x128xf32>
    %794 = math.tanh %793 : vector<8x128xf32>
    %cst_237 = arith.constant 1.000000e+00 : f32
    %795 = vector.broadcast %cst_237 : f32 to vector<8x128xf32>
    %796 = arith.subf %795, %789 : vector<8x128xf32>
    %797 = arith.mulf %796, %794 : vector<8x128xf32>
    %798 = arith.mulf %789, %747 : vector<8x128xf32>
    %799 = arith.addf %797, %798 : vector<8x128xf32>
    %800 = vector.extract_strided_slice %461 {offsets = [8, 0], sizes = [8, 384], strides = [1, 1]} : vector<64x384xf32> to vector<8x384xf32>
    %c0_238 = arith.constant 0 : index
    %c0_239 = arith.constant 0 : index
    %801 = vector.load %arg15[%c0_238, %c0_239] : memref<128x384xf32, #tpu.memory_space<vmem>>, vector<128x384xf32>
    %cst_240 = arith.constant dense<0.000000e+00> : vector<8x384xf32>
    %802 = tpu.matmul %773, %801, %cst_240 {dimension_numbers = #tpu.dot_dimension_numbers<[1], [0], [0], [1], [0, 0, 1, 1], [], []>} : vector<8x128xf32>, vector<128x384xf32>, vector<8x384xf32> -> vector<8x384xf32>
    %c0_241 = arith.constant 0 : index
    %c0_242 = arith.constant 0 : index
    %803 = vector.load %arg17[%c0_241, %c0_242] : memref<1x384xf32, #tpu.memory_space<vmem>>, vector<1x384xf32>
    %804 = vector.broadcast %803 : vector<1x384xf32> to vector<8x384xf32>
    %805 = arith.addf %802, %804 : vector<8x384xf32>
    %806 = vector.extract_strided_slice %800 {offsets = [0, 0], sizes = [8, 256], strides = [1, 1]} : vector<8x384xf32> to vector<8x256xf32>
    %807 = vector.extract_strided_slice %805 {offsets = [0, 0], sizes = [8, 256], strides = [1, 1]} : vector<8x384xf32> to vector<8x256xf32>
    %808 = arith.addf %806, %807 : vector<8x256xf32>
    %809 = arith.negf %808 : vector<8x256xf32>
    %810 = math.exp %809 : vector<8x256xf32>
    %cst_243 = arith.constant 1.000000e+00 : f32
    %811 = vector.broadcast %cst_243 : f32 to vector<8x256xf32>
    %812 = arith.addf %811, %810 : vector<8x256xf32>
    %813 = arith.divf %811, %812 : vector<8x256xf32>
    %814 = vector.extract_strided_slice %813 {offsets = [0, 0], sizes = [8, 128], strides = [1, 1]} : vector<8x256xf32> to vector<8x128xf32>
    %815 = vector.extract_strided_slice %813 {offsets = [0, 128], sizes = [8, 128], strides = [1, 1]} : vector<8x256xf32> to vector<8x128xf32>
    %816 = vector.extract_strided_slice %800 {offsets = [0, 256], sizes = [8, 128], strides = [1, 1]} : vector<8x384xf32> to vector<8x128xf32>
    %817 = vector.extract_strided_slice %805 {offsets = [0, 256], sizes = [8, 128], strides = [1, 1]} : vector<8x384xf32> to vector<8x128xf32>
    %818 = arith.mulf %814, %817 : vector<8x128xf32>
    %819 = arith.addf %816, %818 : vector<8x128xf32>
    %820 = math.tanh %819 : vector<8x128xf32>
    %cst_244 = arith.constant 1.000000e+00 : f32
    %821 = vector.broadcast %cst_244 : f32 to vector<8x128xf32>
    %822 = arith.subf %821, %815 : vector<8x128xf32>
    %823 = arith.mulf %822, %820 : vector<8x128xf32>
    %824 = arith.mulf %815, %773 : vector<8x128xf32>
    %825 = arith.addf %823, %824 : vector<8x128xf32>
    %826 = vector.extract_strided_slice %456 {offsets = [56, 0], sizes = [8, 384], strides = [1, 1]} : vector<64x384xf32> to vector<8x384xf32>
    %c0_245 = arith.constant 0 : index
    %c0_246 = arith.constant 0 : index
    %827 = vector.load %arg11[%c0_245, %c0_246] : memref<128x384xf32, #tpu.memory_space<vmem>>, vector<128x384xf32>
    %cst_247 = arith.constant dense<0.000000e+00> : vector<8x384xf32>
    %828 = tpu.matmul %799, %827, %cst_247 {dimension_numbers = #tpu.dot_dimension_numbers<[1], [0], [0], [1], [0, 0, 1, 1], [], []>} : vector<8x128xf32>, vector<128x384xf32>, vector<8x384xf32> -> vector<8x384xf32>
    %c0_248 = arith.constant 0 : index
    %c0_249 = arith.constant 0 : index
    %829 = vector.load %arg13[%c0_248, %c0_249] : memref<1x384xf32, #tpu.memory_space<vmem>>, vector<1x384xf32>
    %830 = vector.broadcast %829 : vector<1x384xf32> to vector<8x384xf32>
    %831 = arith.addf %828, %830 : vector<8x384xf32>
    %832 = vector.extract_strided_slice %826 {offsets = [0, 0], sizes = [8, 256], strides = [1, 1]} : vector<8x384xf32> to vector<8x256xf32>
    %833 = vector.extract_strided_slice %831 {offsets = [0, 0], sizes = [8, 256], strides = [1, 1]} : vector<8x384xf32> to vector<8x256xf32>
    %834 = arith.addf %832, %833 : vector<8x256xf32>
    %835 = arith.negf %834 : vector<8x256xf32>
    %836 = math.exp %835 : vector<8x256xf32>
    %cst_250 = arith.constant 1.000000e+00 : f32
    %837 = vector.broadcast %cst_250 : f32 to vector<8x256xf32>
    %838 = arith.addf %837, %836 : vector<8x256xf32>
    %839 = arith.divf %837, %838 : vector<8x256xf32>
    %840 = vector.extract_strided_slice %839 {offsets = [0, 0], sizes = [8, 128], strides = [1, 1]} : vector<8x256xf32> to vector<8x128xf32>
    %841 = vector.extract_strided_slice %839 {offsets = [0, 128], sizes = [8, 128], strides = [1, 1]} : vector<8x256xf32> to vector<8x128xf32>
    %842 = vector.extract_strided_slice %826 {offsets = [0, 256], sizes = [8, 128], strides = [1, 1]} : vector<8x384xf32> to vector<8x128xf32>
    %843 = vector.extract_strided_slice %831 {offsets = [0, 256], sizes = [8, 128], strides = [1, 1]} : vector<8x384xf32> to vector<8x128xf32>
    %844 = arith.mulf %840, %843 : vector<8x128xf32>
    %845 = arith.addf %842, %844 : vector<8x128xf32>
    %846 = math.tanh %845 : vector<8x128xf32>
    %cst_251 = arith.constant 1.000000e+00 : f32
    %847 = vector.broadcast %cst_251 : f32 to vector<8x128xf32>
    %848 = arith.subf %847, %841 : vector<8x128xf32>
    %849 = arith.mulf %848, %846 : vector<8x128xf32>
    %850 = arith.mulf %841, %799 : vector<8x128xf32>
    %851 = arith.addf %849, %850 : vector<8x128xf32>
    %852 = vector.extract_strided_slice %461 {offsets = [0, 0], sizes = [8, 384], strides = [1, 1]} : vector<64x384xf32> to vector<8x384xf32>
    %c0_252 = arith.constant 0 : index
    %c0_253 = arith.constant 0 : index
    %853 = vector.load %arg15[%c0_252, %c0_253] : memref<128x384xf32, #tpu.memory_space<vmem>>, vector<128x384xf32>
    %cst_254 = arith.constant dense<0.000000e+00> : vector<8x384xf32>
    %854 = tpu.matmul %825, %853, %cst_254 {dimension_numbers = #tpu.dot_dimension_numbers<[1], [0], [0], [1], [0, 0, 1, 1], [], []>} : vector<8x128xf32>, vector<128x384xf32>, vector<8x384xf32> -> vector<8x384xf32>
    %c0_255 = arith.constant 0 : index
    %c0_256 = arith.constant 0 : index
    %855 = vector.load %arg17[%c0_255, %c0_256] : memref<1x384xf32, #tpu.memory_space<vmem>>, vector<1x384xf32>
    %856 = vector.broadcast %855 : vector<1x384xf32> to vector<8x384xf32>
    %857 = arith.addf %854, %856 : vector<8x384xf32>
    %858 = vector.extract_strided_slice %852 {offsets = [0, 0], sizes = [8, 256], strides = [1, 1]} : vector<8x384xf32> to vector<8x256xf32>
    %859 = vector.extract_strided_slice %857 {offsets = [0, 0], sizes = [8, 256], strides = [1, 1]} : vector<8x384xf32> to vector<8x256xf32>
    %860 = arith.addf %858, %859 : vector<8x256xf32>
    %861 = arith.negf %860 : vector<8x256xf32>
    %862 = math.exp %861 : vector<8x256xf32>
    %cst_257 = arith.constant 1.000000e+00 : f32
    %863 = vector.broadcast %cst_257 : f32 to vector<8x256xf32>
    %864 = arith.addf %863, %862 : vector<8x256xf32>
    %865 = arith.divf %863, %864 : vector<8x256xf32>
    %866 = vector.extract_strided_slice %865 {offsets = [0, 0], sizes = [8, 128], strides = [1, 1]} : vector<8x256xf32> to vector<8x128xf32>
    %867 = vector.extract_strided_slice %865 {offsets = [0, 128], sizes = [8, 128], strides = [1, 1]} : vector<8x256xf32> to vector<8x128xf32>
    %868 = vector.extract_strided_slice %852 {offsets = [0, 256], sizes = [8, 128], strides = [1, 1]} : vector<8x384xf32> to vector<8x128xf32>
    %869 = vector.extract_strided_slice %857 {offsets = [0, 256], sizes = [8, 128], strides = [1, 1]} : vector<8x384xf32> to vector<8x128xf32>
    %870 = arith.mulf %866, %869 : vector<8x128xf32>
    %871 = arith.addf %868, %870 : vector<8x128xf32>
    %872 = math.tanh %871 : vector<8x128xf32>
    %cst_258 = arith.constant 1.000000e+00 : f32
    %873 = vector.broadcast %cst_258 : f32 to vector<8x128xf32>
    %874 = arith.subf %873, %867 : vector<8x128xf32>
    %875 = arith.mulf %874, %872 : vector<8x128xf32>
    %876 = arith.mulf %867, %825 : vector<8x128xf32>
    %877 = arith.addf %875, %876 : vector<8x128xf32>
    %878 = vector.extract_strided_slice %851 {offsets = [0, 0], sizes = [2, 100], strides = [1, 1]} : vector<8x128xf32> to vector<2x100xf32>
    %c2_259 = arith.constant 2 : index
    %c0_260 = arith.constant 0 : index
    %c0_261 = arith.constant 0 : index
    %879 = vector.load %arg21[%c2_259, %c0_260, %c0_261] : memref<4x2x100xf32, #tpu.memory_space<vmem>>, vector<1x2x100xf32>
    %880 = vector.shape_cast %879 : vector<1x2x100xf32> to vector<2x100xf32>
    %881 = vector.shape_cast %878 : vector<2x100xf32> to vector<1x2x100xf32>
    tpu.vector_store %arg21[%c2_259, %c0_260, %c0_261], %881 {strides = array<i32>} : memref<4x2x100xf32, #tpu.memory_space<vmem>>, vector<1x2x100xf32>,
    %882 = vector.extract_strided_slice %877 {offsets = [0, 0], sizes = [2, 100], strides = [1, 1]} : vector<8x128xf32> to vector<2x100xf32>
    %c3_262 = arith.constant 3 : index
    %c0_263 = arith.constant 0 : index
    %c0_264 = arith.constant 0 : index
    %883 = vector.load %arg21[%c3_262, %c0_263, %c0_264] : memref<4x2x100xf32, #tpu.memory_space<vmem>>, vector<1x2x100xf32>
    %884 = vector.shape_cast %883 : vector<1x2x100xf32> to vector<2x100xf32>
    %885 = vector.shape_cast %882 : vector<2x100xf32> to vector<1x2x100xf32>
    tpu.vector_store %arg21[%c3_262, %c0_263, %c0_264], %885 {strides = array<i32>} : memref<4x2x100xf32, #tpu.memory_space<vmem>>, vector<1x2x100xf32>,
    %886 = tpu.concatenate %851, %513 in 1 : vector<8x128xf32>, vector<8x128xf32> -> vector<8x256xf32>
    %cst_265 = arith.constant 0.000000e+00 : f32
    %887 = vector.broadcast %cst_265 : f32 to vector<8x256xf32>
    %888 = arith.maximumf %886, %887 : vector<8x256xf32>
    %c0_266 = arith.constant 0 : index
    %c0_267 = arith.constant 0 : index
    %889 = vector.load %arg18[%c0_266, %c0_267] : memref<256x2xf32, #tpu.memory_space<vmem>>, vector<256x2xf32>
    %cst_268 = arith.constant dense<0.000000e+00> : vector<8x2xf32>
    %890 = tpu.matmul %888, %889, %cst_268 {dimension_numbers = #tpu.dot_dimension_numbers<[1], [0], [0], [1], [0, 0, 1, 1], [], []>} : vector<8x256xf32>, vector<256x2xf32>, vector<8x2xf32> -> vector<8x2xf32>
    %c0_269 = arith.constant 0 : index
    %c0_270 = arith.constant 0 : index
    %891 = vector.load %arg19[%c0_269, %c0_270] : memref<1x2xf32, #tpu.memory_space<vmem>>, vector<1x2xf32>
    %892 = vector.broadcast %891 : vector<1x2xf32> to vector<8x2xf32>
    %893 = arith.addf %890, %892 : vector<8x2xf32>
    %cst_271 = arith.constant dense<0xFF800000> : vector<8xf32>
    %894 = vector.multi_reduction <maximumf>, %893, %cst_271 [1] : vector<8x2xf32> to vector<8xf32>
    %895 = vector.shape_cast %894 : vector<8xf32> to vector<8x1xf32>
    %896 = vector.broadcast %895 : vector<8x1xf32> to vector<8x2xf32>
    %897 = arith.subf %893, %896 : vector<8x2xf32>
    %898 = math.exp %897 : vector<8x2xf32>
    %cst_272 = arith.constant dense<0.000000e+00> : vector<8xf32>
    %899 = vector.multi_reduction <add>, %898, %cst_272 [1] : vector<8x2xf32> to vector<8xf32>
    %900 = vector.shape_cast %899 : vector<8xf32> to vector<8x1xf32>
    %901 = math.log %900 : vector<8x1xf32>
    %902 = vector.broadcast %901 : vector<8x1xf32> to vector<8x2xf32>
    %903 = arith.subf %897, %902 : vector<8x2xf32>
    %904 = vector.extract_strided_slice %903 {offsets = [0, 0], sizes = [2, 2], strides = [1, 1]} : vector<8x2xf32> to vector<2x2xf32>
    %c0_273 = arith.constant 0 : index
    %c0_274 = arith.constant 0 : index
    %905 = vector.load %arg20[%c0_273, %c0_274] : memref<2x2xf32, #tpu.memory_space<vmem>>, vector<2x2xf32>
    tpu.vector_store %arg20[%c0_273, %c0_274], %904 {strides = array<i32>} : memref<2x2xf32, #tpu.memory_space<vmem>>, vector<2x2xf32>,
    return
  }
}

</mosaic_0001>

<bundles_post_ra>
// kernel: bigru_forward.1
= control target key start
LH: loop header
LB: loop body
LE: loop exit
PB: predicated region body
PF: predicated region fallthrough
CT: control target
= control target key end

     0   :  { %s15619_s0 = inlined_call_operand.vmem [shape: f32[64,300], index: 0, kind: input, shape index: {}]   ;;  %s15620_s1 = inlined_call_operand.vmem [shape: f32[4,8,128], index: 1, kind: input, shape index: {}]   ;;  %s15621_s2 = inlined_call_operand.hbm [shape: f32[300,384], index: 2, kind: input, shape index: {}]   ;;  %s15622_s3 = inlined_call_operand.vmem [shape: f32[128,384], index: 3, kind: input, shape index: {}]   ;;  %s15623_s4 = inlined_call_operand.vmem [shape: f32[1,384], index: 4, kind: input, shape index: {}]   ;;  %s15624_s5 = inlined_call_operand.vmem [shape: f32[1,384], index: 5, kind: input, shape index: {}]   ;;  %s15625_s6 = inlined_call_operand.hbm [shape: f32[300,384], index: 6, kind: input, shape index: {}]   ;;  %s15626_s7 = inlined_call_operand.hbm [shape: f32[128,384], index: 7, kind: input, shape index: {}]   ;;  %s15627_s8 = inlined_call_operand.vmem [shape: f32[1,384], index: 8, kind: input, shape index: {}]   ;;  %s15628_s9 = inlined_call_operand.vmem [shape: f32[1,384], index: 9, kind: input, shape index: {}]   ;;  %s15629_s10 = inlined_call_operand.hbm [shape: f32[256,384], index: 10, kind: input, shape index: {}]   ;;  %s15630_s11 = inlined_call_operand.hbm [shape: f32[128,384], index: 11, kind: input, shape index: {}]   ;;  %s15631_s12 = inlined_call_operand.vmem [shape: f32[1,384], index: 12, kind: input, shape index: {}]   ;;  %s15632_s13 = inlined_call_operand.vmem [shape: f32[1,384], index: 13, kind: input, shape index: {}]   ;;  %s15633_s14 = inlined_call_operand.hbm [shape: f32[256,384], index: 14, kind: input, shape index: {}]   ;;  %s15634_s15 = inlined_call_operand.hbm [shape: f32[128,384], index: 15, kind: input, shape index: {}]   ;;  %s15635_s16 = inlined_call_operand.vmem [shape: f32[1,384], index: 16, kind: input, shape index: {}]   ;;  %s15636_s17 = inlined_call_operand.vmem [shape: f32[1,384], index: 17, kind: input, shape index: {}]   ;;  %s15637_s18 = inlined_call_operand.vmem [shape: f32[256,2], index: 18, kind: input, shape index: {}]   ;;  %s15638_s19 = inlined_call_operand.vmem [shape: f32[1,2], index: 19, kind: input, shape index: {}]   ;;  %s15639_s20 = inlined_call_operand.hbm [shape: f32[2,2], index: 20, kind: output, shape index: {0}]   ;;  %s15640_s21 = inlined_call_operand.hbm [shape: f32[4,2,100], index: 21, kind: output, shape index: {1}]  }
   0x1   :  { %15767 = sst [smem:[#allocation86_spill]] %s15619_s0 }
   0x2   :  { %15768 = sst [smem:[#allocation87_spill]] %s15620_s1 }
   0x3   :  { %15769 = sst [smem:[#allocation88_spill]] %s15621_s2 }
   0x4   :  { %15770 = sst [smem:[#allocation89_spill]] %s15622_s3 }
   0x5   :  { %15771 = sst [smem:[#allocation90_spill]] %s15623_s4 }
   0x6   :  { %15772 = sst [smem:[#allocation91_spill]] %s15624_s5 }
   0x7   :  { %27 = vsyncpa [#allocation3], 0 }
   0x8   :  { %28 = vsyncpa [#allocation6], 0 }
   0x9   :  { %29 = vsyncpa [#allocation9], 0 }
   0xa   :  { %30 = vsyncpa [#allocation12], 0 }
   0xb   :  { %31 = vsyncpa [#allocation4], 0 }
   0xc   :  { %32 = vsyncpa [#allocation16], 0  ;;  %s12799_s2 = smov [#allocation5]   ;;  %s12800_s26 = smov [#allocation8]  }
   0xd   :  { %s60_s25 = sshll.u32 %s12799_s2, 4  ;;  %s88_s27 = sshll.u32 %s12800_s26, 4  ;;  %s61_s25 = int_to_ptr.vmem [resolvable:$true] %s60_s25  ;;  %s12926_s27 = int_to_ptr.vmem [resolvable:$true] %s88_s27 }
   0xe   :  { %s12589_s29 = scalar_lea.hbm %s15625_s6, 14592 }
   0xf   :  { %p12590_p0 = scmp.ne.s32.totalorder %s15625_s6, %s12589_s29  ;;  %p12593_p1 = scmp.lt.u32.totalorder %s12589_s29, %s15625_s6 }
  0x11   :  { %p12595_p2 = pnand %p12593_p1, %p12590_p0 }
  0x13   :  { %12598 = shalt.err (!%p12595_p2)
}
  0x14   :  { %s12599_s22 = scalar_lea.vmem %s61_s25, 14592  ;;  %p12604_p4 = scmp.lt.s32.totalorder %s61_s25, %s61_s25 }
  0x15   :  { %p12600_p3 = scmp.ne.s32.totalorder %s61_s25, %s12599_s22  ;;  %p12605_p5 = scmp.lt.s32.totalorder %s12599_s22, %s12599_s22 }
  0x17   :  { %p12606_p6 = por %p12605_p5, %p12604_p4 }
  0x19   :  { %p12607_p7 = pnand %p12606_p6, %p12600_p3 }
  0x1b   :  { %12610 = shalt.err (!%p12607_p7)
}
  0x1c   :  { %s12801_s23 = smov 384   ;;  %s12802_s1 = smov 24  }
  0x1d   :  { %66 = dma.hbm_to_vmem [thread:$0]  %s15625_s6, 14592, %s61_s25, [#allocation6], %s12801_s23, %s12801_s23, %s12802_s1  }
  0x1e   :  { %s12611_s28 = scalar_lea.hbm %s15629_s10, 12288 }
  0x1f   :  { %p12612_p8 = scmp.ne.s32.totalorder %s15629_s10, %s12611_s28  ;;  %p12615_p9 = scmp.lt.u32.totalorder %s12611_s28, %s15629_s10 }
  0x21   :  { %p12617_p10 = pnand %p12615_p9, %p12612_p8 }
  0x23   :  { %12620 = shalt.err (!%p12617_p10)
}
  0x24   :  { %s12621_s5 = scalar_lea.vmem %s12926_s27, 12288  ;;  %p12626_p12 = scmp.lt.s32.totalorder %s12926_s27, %s12926_s27 }
  0x25   :  { %p12622_p11 = scmp.ne.s32.totalorder %s12926_s27, %s12621_s5  ;;  %p12627_p13 = scmp.lt.s32.totalorder %s12621_s5, %s12621_s5 }
  0x27   :  { %p12628_p0 = por %p12627_p13, %p12626_p12 }
  0x29   :  { %p12629_p1 = pnand %p12628_p0, %p12622_p11 }
  0x2b   :  { %12632 = shalt.err (!%p12629_p1)
}
  0x2c   :  { %94 = dma.hbm_to_vmem [thread:$0]  %s15629_s10, 12288, %s12926_s27, [#allocation9], %s12801_s23, %s12801_s23, %s12802_s1  }
  0x2d   :  { %s12803_s22 = smov [#allocation11]   ;;  %s12804_s2 = smov [#allocation2]  }
  0x2e   :  { %s116_s24 = sshll.u32 %s12803_s22, 4  ;;  %s42_s26 = sshll.u32 %s12804_s2, 4  ;;  %s117_s24 = int_to_ptr.vmem [resolvable:$true] %s116_s24  ;;  %s12963_s26 = int_to_ptr.vmem [resolvable:$true] %s42_s26 }
  0x2f   :  { %s12633_s29 = scalar_lea.hbm %s15633_s14, 12288 }
  0x30   :  { %p12634_p2 = scmp.ne.s32.totalorder %s15633_s14, %s12633_s29  ;;  %p12637_p3 = scmp.lt.u32.totalorder %s12633_s29, %s15633_s14 }
  0x32   :  { %p12639_p4 = pnand %p12637_p3, %p12634_p2 }
  0x34   :  { %12642 = shalt.err (!%p12639_p4)
}
  0x35   :  { %s12643_s10 = scalar_lea.vmem %s117_s24, 12288  ;;  %p12648_p6 = scmp.lt.s32.totalorder %s117_s24, %s117_s24 }
  0x36   :  { %p12644_p5 = scmp.ne.s32.totalorder %s117_s24, %s12643_s10  ;;  %p12649_p7 = scmp.lt.s32.totalorder %s12643_s10, %s12643_s10 }
  0x38   :  { %p12650_p8 = por %p12649_p7, %p12648_p6 }
  0x3a   :  { %p12651_p9 = pnand %p12650_p8, %p12644_p5 }
  0x3c   :  { %12654 = shalt.err (!%p12651_p9)
}
  0x3d   :  { %122 = dma.hbm_to_vmem [thread:$0]  %s15633_s14, 12288, %s117_s24, [#allocation12], %s12801_s23, %s12801_s23, %s12802_s1  }
  0x3e   :  { %s15773_s2 = sld [smem:[#allocation88_spill]] }
  0x44   :  { %s12655_s3 = scalar_lea.hbm %s15773_s2, 14592 }
  0x45   :  { %p12656_p10 = scmp.ne.s32.totalorder %s15773_s2, %s12655_s3  ;;  %p12659_p11 = scmp.lt.u32.totalorder %s12655_s3, %s15773_s2 }
  0x47   :  { %p12661_p12 = pnand %p12659_p11, %p12656_p10 }
  0x49   :  { %12664 = shalt.err (!%p12661_p12)
}
  0x4a   :  { %s12665_s30 = scalar_lea.vmem %s12963_s26, 14592  ;;  %p12670_p0 = scmp.lt.s32.totalorder %s12963_s26, %s12963_s26 }
  0x4b   :  { %p12666_p13 = scmp.ne.s32.totalorder %s12963_s26, %s12665_s30  ;;  %p12671_p1 = scmp.lt.s32.totalorder %s12665_s30, %s12665_s30 }
  0x4d   :  { %p12672_p2 = por %p12671_p1, %p12670_p0 }
  0x4f   :  { %p12673_p3 = pnand %p12672_p2, %p12666_p13 }
  0x51   :  { %12676 = shalt.err (!%p12673_p3)
}
  0x52   :  { %48 = dma.hbm_to_vmem [thread:$0]  %s15773_s2, 14592, %s12963_s26, [#allocation3], %s12801_s23, %s12801_s23, %s12802_s1  }
  0x53   :  { %s12805_s5 = smov [#allocation7]   ;;  %s12806_s27 = smov [#allocation10]  }
  0x54   :  { %s72_s10 = sshll.u32 %s12805_s5, 4  ;;  %s100_s6 = sshll.u32 %s12806_s27, 4  ;;  %s73_s10 = int_to_ptr.vmem [resolvable:$true] %s72_s10  ;;  %s13000_s6 = int_to_ptr.vmem [resolvable:$true] %s100_s6 }
  0x55   :  { %s12677_s3 = scalar_lea.hbm %s15626_s7, 6144 }
  0x56   :  { %p12678_p4 = scmp.ne.s32.totalorder %s15626_s7, %s12677_s3  ;;  %p12681_p5 = scmp.lt.u32.totalorder %s12677_s3, %s15626_s7 }
  0x58   :  { %p12683_p6 = pnand %p12681_p5, %p12678_p4 }
  0x5a   :  { %12686 = shalt.err (!%p12683_p6)
}
  0x5b   :  { %s12687_s26 = scalar_lea.vmem %s73_s10, 6144  ;;  %p12692_p8 = scmp.lt.s32.totalorder %s73_s10, %s73_s10 }
  0x5c   :  { %p12688_p7 = scmp.ne.s32.totalorder %s73_s10, %s12687_s26  ;;  %p12693_p9 = scmp.lt.s32.totalorder %s12687_s26, %s12687_s26 }
  0x5e   :  { %p12694_p10 = por %p12693_p9, %p12692_p8 }
  0x60   :  { %p12695_p11 = pnand %p12694_p10, %p12688_p7 }
  0x62   :  { %12698 = shalt.err (!%p12695_p11)
}
  0x63   :  { %78 = dma.hbm_to_vmem [thread:$0]  %s15626_s7, 6144, %s73_s10, [#allocation6], %s12801_s23, %s12801_s23, %s12802_s1  }
  0x64   :  { %s12699_s5 = scalar_lea.hbm %s15630_s11, 6144 }
  0x65   :  { %p12700_p12 = scmp.ne.s32.totalorder %s15630_s11, %s12699_s5  ;;  %p12703_p13 = scmp.lt.u32.totalorder %s12699_s5, %s15630_s11 }
  0x67   :  { %p12705_p0 = pnand %p12703_p13, %p12700_p12 }
  0x69   :  { %12708 = shalt.err (!%p12705_p0)
}
  0x6a   :  { %s12709_s28 = scalar_lea.vmem %s13000_s6, 6144  ;;  %p12714_p2 = scmp.lt.s32.totalorder %s13000_s6, %s13000_s6 }
  0x6b   :  { %p12710_p1 = scmp.ne.s32.totalorder %s13000_s6, %s12709_s28  ;;  %p12715_p3 = scmp.lt.s32.totalorder %s12709_s28, %s12709_s28 }
  0x6d   :  { %p12716_p4 = por %p12715_p3, %p12714_p2 }
  0x6f   :  { %p12717_p5 = pnand %p12716_p4, %p12710_p1 }
  0x71   :  { %12720 = shalt.err (!%p12717_p5)
}
  0x72   :  { %106 = dma.hbm_to_vmem [thread:$0]  %s15630_s11, 6144, %s13000_s6, [#allocation9], %s12801_s23, %s12801_s23, %s12802_s1  }
  0x73   :  { %s12807_s29 = smov [#allocation13]   ;;  %s12721_s2 = scalar_lea.hbm %s15634_s15, 6144 }
  0x74   :  { %s128_s0 = sshll.u32 %s12807_s29, 4  ;;  %p12722_p6 = scmp.ne.s32.totalorder %s15634_s15, %s12721_s2  ;;  %s129_s0 = int_to_ptr.vmem [resolvable:$true] %s128_s0 }
  0x75   :  { %p12725_p7 = scmp.lt.u32.totalorder %s12721_s2, %s15634_s15 }
  0x77   :  { %p12727_p8 = pnand %p12725_p7, %p12722_p6 }
  0x79   :  { %12730 = shalt.err (!%p12727_p8)
}
  0x7a   :  { %s12731_s27 = scalar_lea.vmem %s129_s0, 6144  ;;  %p12736_p10 = scmp.lt.s32.totalorder %s129_s0, %s129_s0 }
  0x7b   :  { %p12732_p9 = scmp.ne.s32.totalorder %s129_s0, %s12731_s27  ;;  %p12737_p11 = scmp.lt.s32.totalorder %s12731_s27, %s12731_s27 }
  0x7d   :  { %p12738_p12 = por %p12737_p11, %p12736_p10 }
  0x7f   :  { %p12739_p13 = pnand %p12738_p12, %p12732_p9 }
  0x81   :  { %12742 = shalt.err (!%p12739_p13)
}
  0x82   :  { %134 = dma.hbm_to_vmem [thread:$0]  %s15634_s15, 6144, %s129_s0, [#allocation12], %s12801_s23, %s12801_s23, %s12802_s1  }
  0x83   :  { %12787 = dma.done.wait [#allocation3], 14592  }
  0x84   :  { %12788 = vsyncadd [#allocation3], 4294952704 }
  0x85   :  { %12789 = dma.done.wait [#allocation6], 20736  }
  0x86   :  { %12790 = vsyncadd [#allocation6], 4294946560 }
  0x87   :  { %12791 = dma.done.wait [#allocation9], 18432  }
  0x88   :  { %12792 = vsyncadd [#allocation9], 4294948864 }
  0x89   :  { %12793 = dma.done.wait [#allocation12], 18432  }
  0x8a   :  { %12794 = vsyncadd [#allocation12], 4294948864  ;;  %v15647_v0 = vmov 0.0   ;;  %vm347_vm0 = vcmask 1043456   ;;  %vm12809_vm1 = vmmov 1   ;;  %v192_v2 = vld [vmem:[#allocation2 + $0x8] sm:$0xff] }
  0x8b   :  { %534 = vmatprep.mubr.f32.mxu1 %v15647_v0  ;;  %vm13053_vm2 = vmpackc.low %vm347_vm0, %vm12809_vm1  ;;  %v195_v3 = vld [vmem:[#allocation2 + $0x20] sm:$0xff]  ;;  %v288_v4 = vld [vmem:[#allocation2 + $0x308] sm:$0xff]  ;;  %s15776_s1 = sld [smem:[#allocation86_spill]]  ;;  %vm322_vm3 = vcmask 359424   ;;  %s15777_s4 = sld [smem:[#allocation89_spill]]  ;;  %vm12811_vm4 = vmmov 0  }
  0x8c   :  { %v9752_v5 = vpack.c.bf16 %v195_v3, %v192_v2  ;;  %v291_v6 = vld [vmem:[#allocation2 + $0x320] sm:$0xff]  ;;  %v194_v8 = vld [vmem:[#allocation2 + $0x18] sm:$0xff]  ;;  %v201_v15 = vld [vmem:[#allocation2 + $0x50] sm:$0xff]  ;;  %s15794_s11 = sld [smem:[#allocation87_spill]]  ;;  %s15813_s14 = sld [smem:[#allocation90_spill]]  ;;  %vm4091_vm5 = vcmask 812032  }
  0x8d   :  { %v191_v7 = vld [vmem:[#allocation2] sm:$0xff]  ;;  %v9816_v9 = vpack.c.bf16 %v291_v6, %v288_v4  ;;  %v290_v12 = vld [vmem:[#allocation2 + $0x318] sm:$0xff]  ;;  %v297_v17 = vld [vmem:[#allocation2 + $0x350] sm:$0xff]  ;;  %s15816_s27 = sld [smem:[#allocation91_spill]]  ;;  %vm7598_vm6 = vcmask 15360   ;;  %s12812_s6 = smov [#allocation15]  }
  0x8e   :  { %v9754_v10 = vpack.c.bf16 %v194_v8, %v191_v7  ;;  %v287_v11 = vld [vmem:[#allocation2 + $0x300] sm:$0xff]  ;;  %v198_v13 = vld [vmem:[#allocation2 + $0x38] sm:$0xff]  ;;  %9753 = vmatprep.subr.bf16.mxu0 %v9752_v5  ;;  %v197_v20 = vld [vmem:[#allocation2 + $0x30] sm:$0xff]  ;;  %s7628_s15 = sshll.u32 %s12812_s6, 4  ;;  %s7629_s15 = int_to_ptr.vmem [resolvable:$true] %s7628_s15 }
  0x8f   :  { %v9818_v14 = vpack.c.bf16 %v290_v12, %v287_v11  ;;  %v294_v16 = vld [vmem:[#allocation2 + $0x338] sm:$0xff]  ;;  %9817 = vmatprep.subr.bf16.mxu1 %v9816_v9  ;;  %v9756_v18 = vpack.c.bf16 %v201_v15, %v198_v13  ;;  %v200_v21 = vld [vmem:[#allocation2 + $0x48] sm:$0xff]  ;;  %v293_v22 = vld [vmem:[#allocation2 + $0x330] sm:$0xff]  ;;  %p12748_p1 = scmp.lt.s32.totalorder %s7629_s15, %s7629_s15 }
  0x90   :  { %9755 = vmatpush1.bf16.msra.mxu0 %v9754_v10  ;;  %v9820_v19 = vpack.c.bf16 %v297_v17, %v294_v16  ;;  %v9758_v23 = vpack.c.bf16 %v200_v21, %v197_v20  ;;  %v296_v24 = vld [vmem:[#allocation2 + $0x348] sm:$0xff]  ;;  %v207_v26 = vld [vmem:[#allocation2 + $0x80] sm:$0xff]  ;;  %v206_v33 = vld [vmem:[#allocation2 + $0x78] sm:$0xff] }
  0x91   :  { %9819 = vmatpush1.bf16.msra.mxu1 %v9818_v14  ;;  %v204_v25 = vld [vmem:[#allocation2 + $0x68] sm:$0xff]  ;;  %9757 = vmatprep.subr.bf16.mxu0 %v9756_v18  ;;  %v9822_v27 = vpack.c.bf16 %v296_v24, %v293_v22  ;;  %v303_v30 = vld [vmem:[#allocation2 + $0x380] sm:$0xf]  ;;  %v302_v35 = vld [vmem:[#allocation2 + $0x378] sm:$0xf] }
  0x92   :  { %9821 = vmatprep.subr.bf16.mxu1 %v9820_v19  ;;  %v9760_v28 = vpack.c.bf16 %v207_v26, %v204_v25  ;;  %v300_v29 = vld [vmem:[#allocation2 + $0x368] sm:$0xff]  ;;  %v203_v31 = vld [vmem:[#allocation2 + $0x60] sm:$0xff]  ;;  %v210_v37 = vld [vmem:[#allocation2 + $0x98] sm:$0xff] }
  0x93   :  { %v9824_v32 = vpack.c.bf16 %v303_v30, %v300_v29  ;;  %v299_v34 = vld [vmem:[#allocation2 + $0x360] sm:$0xff]  ;;  %v9762_v36 = vpack.c.bf16 %v206_v33, %v203_v31  ;;  %v213_v38 = vld [vmem:[#allocation2 + $0xb0] sm:$0xff]  ;;  %v244_v42 = vld [vmem:[#allocation2 + $0x1a8] sm:$0xff] }
  0x94   :  { %9759 = vmatpush1.bf16.msra.mxu0 %v9758_v23  ;;  %v9827_v39 = vpack.c.bf16 %v302_v35, %v299_v34  ;;  %v9764_v40 = vpack.c.bf16 %v213_v38, %v210_v37  ;;  %v241_v41 = vld [vmem:[#allocation2 + $0x190] sm:$0xff]  ;;  %v212_v45 = vld [vmem:[#allocation2 + $0xa8] sm:$0xff]  ;;  %v219_v49 = vld [vmem:[#allocation2 + $0xe0] sm:$0xff] }
  0x95   :  { %9823 = vmatpush1.bf16.msra.mxu1 %v9822_v27  ;;  %9761 = vmatprep.subr.bf16.mxu0 %v9760_v28  ;;  %v209_v43 = vld [vmem:[#allocation2 + $0x90] sm:$0xff]  ;;  %v9830_v44 = vpack.c.bf16 %v244_v42, %v241_v41  ;;  %v196_v47 = vld [vmem:[#allocation2 + $0x28] sm:$0xff]  ;;  %v247_v51 = vld [vmem:[#allocation2 + $0x1c0] sm:$0xff] }
  0x96   :  { %9826 = vmatprep.subr.msk.bf16.mxu1 %vm13053_vm2, %v9824_v32  ;;  %v193_v46 = vld [vmem:[#allocation2 + $0x10] sm:$0xff]  ;;  %v216_v48 = vld [vmem:[#allocation2 + $0xc8] sm:$0xff]  ;;  %v9766_v50 = vpack.c.bf16 %v212_v45, %v209_v43  ;;  %v250_v52 = vld [vmem:[#allocation2 + $0x1d8] sm:$0xff] }
  0x97   :  { %v13064_v53 = vld [vmem:[%s15776_s1 + $0x10] sm:$0xff]  ;;  %v9832_v54 = vpack.c.bf16 %v196_v47, %v193_v46  ;;  %v215_v55 = vld [vmem:[#allocation2 + $0xc0] sm:$0xff]  ;;  %v218_v56 = vld [vmem:[#allocation2 + $0xd8] sm:$0xff]  ;;  %v9768_v57 = vpack.c.bf16 %v219_v49, %v216_v48  ;;  %v9834_v58 = vpack.c.bf16 %v250_v52, %v247_v51 }
  0x98   :  { %9763 = vmatpush1.bf16.msra.mxu0 %v9762_v36  ;;  %v199_v59 = vld [vmem:[#allocation2 + $0x40] sm:$0xff]  ;;  %v202_v60 = vld [vmem:[#allocation2 + $0x58] sm:$0xff]  ;;  %v225_v62 = vld [vmem:[#allocation2 + $0x110] sm:$0xff]  ;;  %v9770_v3 = vpack.c.bf16 %v218_v56, %v215_v55 }
  0x99   :  { %9829 = vmatpush1.bf16.msk.msra.mxu1 %vm13053_vm2, %v9827_v39  ;;  %9765 = vmatprep.subr.bf16.mxu0 %v9764_v40  ;;  %v222_v61 = vld [vmem:[#allocation2 + $0xf8] sm:$0xff]  ;;  %v253_v63 = vld [vmem:[#allocation2 + $0x1f0] sm:$0xff]  ;;  %v256_v2 = vld [vmem:[#allocation2 + $0x208] sm:$0xff]  ;;  %v9836_v5 = vpack.c.bf16 %v202_v60, %v199_v59 }
  0x9a   :  { %9831 = vmatprep.subr.bf16.mxu1 %v9830_v44  ;;  %v13072_v4 = vld [vmem:[%s15776_s1 + $0x28] sm:$0xff]  ;;  %v221_v6 = vld [vmem:[#allocation2 + $0xf0] sm:$0xff]  ;;  %v9772_v8 = vpack.c.bf16 %v225_v62, %v222_v61  ;;  %v9838_v9 = vpack.c.bf16 %v256_v2, %v253_v63  ;;  %v231_v13 = vld [vmem:[#allocation2 + $0x140] sm:$0xff] }
  0x9b   :  { %v224_v7 = vld [vmem:[#allocation2 + $0x108] sm:$0xff]  ;;  %v205_v10 = vld [vmem:[#allocation2 + $0x70] sm:$0xff]  ;;  %v259_v14 = vld [vmem:[#allocation2 + $0x220] sm:$0xff] }
  0x9c   :  { %7650 = vmatmul.mubr.msk.f32.vlgmr.msra.gmra.mrb[0].mxu1 %vm322_vm3, %v13064_v53  ;;  %9767 = vmatpush1.bf16.msra.mxu0 %v9766_v50  ;;  %v208_v11 = vld [vmem:[#allocation2 + $0x88] sm:$0xff]  ;;  %v262_v15 = vld [vmem:[#allocation2 + $0x238] sm:$0xff]  ;;  %v9774_v16 = vpack.c.bf16 %v224_v7, %v221_v6  ;;  %v13080_v17 = vld [vmem:[%s15776_s1 + $0x40] sm:$0xff] }
  0x9d   :  { %9833 = vmatpush3.bf16.msra.mxu1 %v9832_v54  ;;  %540 = vmatprep.mubr.f32.mxu1 %v15647_v0  ;;  %v228_v12 = vld [vmem:[#allocation2 + $0x128] sm:$0xff]  ;;  %v9840_v18 = vpack.c.bf16 %v208_v11, %v205_v10  ;;  %v227_v19 = vld [vmem:[#allocation2 + $0x120] sm:$0xff]  ;;  %v230_v20 = vld [vmem:[#allocation2 + $0x138] sm:$0xff]  ;;  %v9842_v22 = vpack.c.bf16 %v262_v15, %v259_v14 }
  0x9e   :  { %9769 = vmatprep.subr.bf16.mxu0 %v9768_v57  ;;  %9835 = vmatprep.subr.bf16.mxu1 %v9834_v58  ;;  %v9776_v21 = vpack.c.bf16 %v231_v13, %v228_v12  ;;  %v211_v23 = vld [vmem:[#allocation2 + $0xa0] sm:$0xff]  ;;  %v214_v24 = vld [vmem:[#allocation2 + $0xb8] sm:$0xff]  ;;  %v237_v26 = vld [vmem:[#allocation2 + $0x170] sm:$0xff]  ;;  %v9778_v29 = vpack.c.bf16 %v230_v20, %v227_v19 }
  0x9f   :  { %v234_v25 = vld [vmem:[#allocation2 + $0x158] sm:$0xff]  ;;  %v265_v27 = vld [vmem:[#allocation2 + $0x250] sm:$0xff]  ;;  %v268_v28 = vld [vmem:[#allocation2 + $0x268] sm:$0xff]  ;;  %v9844_v31 = vpack.c.bf16 %v214_v24, %v211_v23 }
  0xa0   :  { %7651 = vmatmul.mubr.msk.f32.gmra.mrb[2].mxu1 %vm322_vm3, %v13072_v4  ;;  %9771 = vmatpush1.bf16.msra.mxu0 %v9770_v3  ;;  %v13088_v30 = vld [vmem:[%s15776_s1 + $0x58] sm:$0xff]  ;;  %v233_v32 = vld [vmem:[#allocation2 + $0x150] sm:$0xff]  ;;  %v236_v33 = vld [vmem:[#allocation2 + $0x168] sm:$0xff]  ;;  %v9780_v34 = vpack.c.bf16 %v237_v26, %v234_v25  ;;  %v9846_v35 = vpack.c.bf16 %v268_v28, %v265_v27 }
  0xa1   :  { %9837 = vmatpush3.bf16.msra.mxu1 %v9836_v5  ;;  %546 = vmatprep.mubr.f32.mxu1 %v15647_v0  ;;  %v217_v36 = vld [vmem:[#allocation2 + $0xd0] sm:$0xff]  ;;  %v220_v37 = vld [vmem:[#allocation2 + $0xe8] sm:$0xff]  ;;  %v243_v39 = vld [vmem:[#allocation2 + $0x1a0] sm:$0xff]  ;;  %v9782_v42 = vpack.c.bf16 %v236_v33, %v233_v32 }
  0xa2   :  { %9773 = vmatprep.subr.bf16.mxu0 %v9772_v8  ;;  %9839 = vmatprep.subr.bf16.mxu1 %v9838_v9  ;;  %v240_v38 = vld [vmem:[#allocation2 + $0x188] sm:$0xff]  ;;  %v271_v40 = vld [vmem:[#allocation2 + $0x280] sm:$0xff]  ;;  %v274_v41 = vld [vmem:[#allocation2 + $0x298] sm:$0xff]  ;;  %v9848_v44 = vpack.c.bf16 %v220_v37, %v217_v36 }
  0xa3   :  { %v13096_v43 = vld [vmem:[%s15776_s1 + $0x70] sm:$0xff]  ;;  %v239_v45 = vld [vmem:[#allocation2 + $0x180] sm:$0xff]  ;;  %v242_v46 = vld [vmem:[#allocation2 + $0x198] sm:$0xff]  ;;  %v9784_v47 = vpack.c.bf16 %v243_v39, %v240_v38  ;;  %v9850_v48 = vpack.c.bf16 %v274_v41, %v271_v40 }
  0xa4   :  { %7652 = vmatmul.mubr.msk.f32.gmra.mrb[4].mxu1 %vm322_vm3, %v13080_v17  ;;  %9775 = vmatpush1.bf16.msra.mxu0 %v9774_v16  ;;  %v223_v49 = vld [vmem:[#allocation2 + $0x100] sm:$0xff]  ;;  %v226_v50 = vld [vmem:[#allocation2 + $0x118] sm:$0xff]  ;;  %v249_v52 = vld [vmem:[#allocation2 + $0x1d0] sm:$0xff]  ;;  %v9786_v57 = vpack.c.bf16 %v242_v46, %v239_v45 }
  0xa5   :  { %9841 = vmatpush3.bf16.msra.mxu1 %v9840_v18  ;;  %552 = vmatprep.mubr.f32.mxu1 %v15647_v0  ;;  %v246_v51 = vld [vmem:[#allocation2 + $0x1b8] sm:$0xff]  ;;  %v277_v54 = vld [vmem:[#allocation2 + $0x2b0] sm:$0xff]  ;;  %v280_v55 = vld [vmem:[#allocation2 + $0x2c8] sm:$0xff]  ;;  %v9852_v58 = vpack.c.bf16 %v226_v50, %v223_v49 }
  0xa6   :  { %9777 = vmatprep.subr.bf16.mxu0 %v9776_v21  ;;  %9843 = vmatprep.subr.bf16.mxu1 %v9842_v22  ;;  %v13103_v56 = vld [vmem:[%s15776_s1 + $0x88] sm:$0xff]  ;;  %v245_v59 = vld [vmem:[#allocation2 + $0x1b0] sm:$0xff]  ;;  %v9788_v62 = vpack.c.bf16 %v249_v52, %v246_v51  ;;  %v9854_v63 = vpack.c.bf16 %v280_v55, %v277_v54  ;;  %v255_v6 = vld [vmem:[#allocation2 + $0x200] sm:$0xff] }
  0xa7   :  { %v248_v60 = vld [vmem:[#allocation2 + $0x1c8] sm:$0xff]  ;;  %v229_v61 = vld [vmem:[#allocation2 + $0x130] sm:$0xff]  ;;  %v283_v7 = vld [vmem:[#allocation2 + $0x2e0] sm:$0xff] }
  0xa8   :  { %7653 = vmatmul.mubr.msk.f32.gmra.mrb[6].mxu1 %vm322_vm3, %v13088_v30  ;;  %9779 = vmatpush1.bf16.msra.mxu0 %v9778_v29  ;;  %v232_v2 = vld [vmem:[#allocation2 + $0x148] sm:$0xff]  ;;  %v286_v8 = vld [vmem:[#allocation2 + $0x2f8] sm:$0xff]  ;;  %v9790_v9 = vpack.c.bf16 %v248_v60, %v245_v59  ;;  %v13118_v10 = vld [vmem:[%s15776_s1 + $0xa0] sm:$0xff] }
  0xa9   :  { %9845 = vmatpush3.bf16.msra.mxu1 %v9844_v31  ;;  %558 = vmatprep.mubr.f32.mxu1 %v15647_v0  ;;  %v252_v3 = vld [vmem:[#allocation2 + $0x1e8] sm:$0xff]  ;;  %v9856_v11 = vpack.c.bf16 %v232_v2, %v229_v61  ;;  %v251_v12 = vld [vmem:[#allocation2 + $0x1e0] sm:$0xff]  ;;  %v254_v13 = vld [vmem:[#allocation2 + $0x1f8] sm:$0xff]  ;;  %v9858_v15 = vpack.c.bf16 %v286_v8, %v283_v7 }
  0xaa   :  { %9781 = vmatprep.subr.bf16.mxu0 %v9780_v34  ;;  %9847 = vmatprep.subr.bf16.mxu1 %v9846_v35  ;;  %v13109_v5 = vld [vmem:[%s15776_s1 + $0x8] sm:$0xff]  ;;  %v9792_v14 = vpack.c.bf16 %v255_v6, %v252_v3  ;;  %v235_v16 = vld [vmem:[#allocation2 + $0x160] sm:$0xff]  ;;  %v238_v18 = vld [vmem:[#allocation2 + $0x178] sm:$0xff]  ;;  %v9794_v23 = vpack.c.bf16 %v254_v13, %v251_v12 }
  0xab   :  { %421 = vmatprep.mubr.f32.mxu0 %v13109_v5  ;;  %v258_v19 = vld [vmem:[#allocation2 + $0x218] sm:$0xff]  ;;  %v261_v20 = vld [vmem:[#allocation2 + $0x230] sm:$0xff]  ;;  %v292_v22 = vld [vmem:[#allocation2 + $0x328] sm:$0xff]  ;;  %v9860_v25 = vpack.c.bf16 %v238_v18, %v235_v16 }
  0xac   :  { %7654 = vmatmul.mubr.msk.f32.gmra.mrb[8].mxu1 %vm322_vm3, %v13096_v43  ;;  %9783 = vmatpush1.bf16.msra.mxu0 %v9782_v42  ;;  %v289_v21 = vld [vmem:[#allocation2 + $0x310] sm:$0xff]  ;;  %v13126_v24 = vld [vmem:[%s15776_s1 + $0xb8] sm:$0xff]  ;;  %v260_v27 = vld [vmem:[#allocation2 + $0x228] sm:$0xff]  ;;  %v9796_v28 = vpack.c.bf16 %v261_v20, %v258_v19 }
  0xad   :  { %9849 = vmatpush3.bf16.msra.mxu1 %v9848_v44  ;;  %564 = vmatprep.mubr.f32.mxu1 %v15647_v0  ;;  %v257_v26 = vld [vmem:[#allocation2 + $0x210] sm:$0xff]  ;;  %v9862_v29 = vpack.c.bf16 %v292_v22, %v289_v21  ;;  %v264_v31 = vld [vmem:[#allocation2 + $0x248] sm:$0xff]  ;;  %v267_v32 = vld [vmem:[#allocation2 + $0x260] sm:$0xff] }
  0xae   :  { %9785 = vmatprep.subr.bf16.mxu0 %v9784_v47  ;;  %9851 = vmatprep.subr.bf16.mxu1 %v9850_v48  ;;  %v295_v33 = vld [vmem:[#allocation2 + $0x340] sm:$0xff]  ;;  %v298_v34 = vld [vmem:[#allocation2 + $0x358] sm:$0xff]  ;;  %v9798_v35 = vpack.c.bf16 %v260_v27, %v257_v26  ;;  %v9800_v40 = vpack.c.bf16 %v267_v32, %v264_v31  ;;  %v273_v42 = vld [vmem:[#allocation2 + $0x290] sm:$0xff] }
  0xaf   :  { %v13134_v36 = vld [vmem:[%s15776_s1] sm:$0xff]  ;;  %v266_v38 = vld [vmem:[#allocation2 + $0x258] sm:$0xff]  ;;  %v9866_v44 = vpack.c.bf16 %v298_v34, %v295_v33  ;;  %v301_v46 = vld [vmem:[#allocation2 + $0x370] sm:$0xff] }
  0xb0   :  { %7655 = vmatmul.mubr.msk.f32.gmra.mrb[10].mxu1 %vm322_vm3, %v13103_v56  ;;  %9787 = vmatpush1.bf16.msra.mxu0 %v9786_v57  ;;  %v263_v37 = vld [vmem:[#allocation2 + $0x240] sm:$0xff]  ;;  %v270_v41 = vld [vmem:[#allocation2 + $0x278] sm:$0xff]  ;;  %v304_v47 = vld [vmem:[#allocation2 + $0x388] sm:$0xf] }
  0xb1   :  { %9853 = vmatpush3.bf16.msra.mxu1 %v9852_v58  ;;  %570 = vmatprep.mubr.f32.mxu1 %v15647_v0  ;;  %v13139_v39 = vld [vmem:[%s15776_s1 + $0x20] sm:$0xff]  ;;  %v9802_v45 = vpack.c.bf16 %v266_v38, %v263_v37  ;;  %v13146_v48 = vld [vmem:[%s15776_s1 + $0x18] sm:$0xff]  ;;  %v9804_v49 = vpack.c.bf16 %v273_v42, %v270_v41  ;;  %v269_v50 = vld [vmem:[#allocation2 + $0x270] sm:$0xff]  ;;  %v9870_v57 = vpack.c.bf16 %v304_v47, %v301_v46 }
  0xb2   :  { %9789 = vmatprep.subr.bf16.mxu0 %v9788_v62  ;;  %9855 = vmatprep.subr.bf16.mxu1 %v9854_v63  ;;  %v272_v51 = vld [vmem:[#allocation2 + $0x288] sm:$0xff]  ;;  %v13151_v52 = vld [vmem:[%s15776_s1 + $0x38] sm:$0xff]  ;;  %v279_v55 = vld [vmem:[#allocation2 + $0x2c0] sm:$0xff] }
  0xb3   :  { %v276_v54 = vld [vmem:[#allocation2 + $0x2a8] sm:$0xff]  ;;  %v9806_v58 = vpack.c.bf16 %v272_v51, %v269_v50  ;;  %v794_v59 = vld [vmem:[#allocation5 + $0x8] sm:$0xff]  ;;  %v797_v60 = vld [vmem:[#allocation5 + $0x20] sm:$0xff] }
  0xb4   :  { %7656 = vmatmul.mubr.msk.f32.gmra.mrb[12].mxu1 %vm322_vm3, %v13118_v10  ;;  %9791 = vmatpush1.bf16.msra.mxu0 %v9790_v9  ;;  %v13158_v61 = vld [vmem:[%s15776_s1 + $0x30] sm:$0xff]  ;;  %v9808_v62 = vpack.c.bf16 %v279_v55, %v276_v54  ;;  %v275_v63 = vld [vmem:[#allocation2 + $0x2a0] sm:$0xff]  ;;  %v278_v2 = vld [vmem:[#allocation2 + $0x2b8] sm:$0xff]  ;;  %v9876_v8 = vpack.c.bf16 %v797_v60, %v794_v59 }
  0xb5   :  { %9857 = vmatpush3.bf16.msra.mxu1 %v9856_v11  ;;  %576 = vmatprep.mubr.f32.mxu1 %v15647_v0  ;;  %v13163_v3 = vld [vmem:[%s15776_s1 + $0x50] sm:$0xff]  ;;  %v282_v6 = vld [vmem:[#allocation2 + $0x2d8] sm:$0xff]  ;;  %v9810_v9 = vpack.c.bf16 %v278_v2, %v275_v63  ;;  %v13172_v11 = vld [vmem:[%s15776_s1 + $0x48] sm:$0xff] }
  0xb6   :  { %9793 = vmatprep.subr.bf16.mxu0 %v9792_v14  ;;  %9859 = vmatprep.subr.bf16.mxu1 %v9858_v15  ;;  %v285_v7 = vld [vmem:[#allocation2 + $0x2f0] sm:$0xff]  ;;  %v284_v14 = vld [vmem:[#allocation2 + $0x2e8] sm:$0xff]  ;;  %v843_v16 = vld [vmem:[#allocation5 + $0x190] sm:$0xff] }
  0xb7   :  { %v9812_v12 = vpack.c.bf16 %v285_v7, %v282_v6  ;;  %v281_v13 = vld [vmem:[#allocation2 + $0x2d0] sm:$0xff]  ;;  %v13177_v15 = vld [vmem:[%s15776_s1 + $0x68] sm:$0xff]  ;;  %v846_v18 = vld [vmem:[#allocation5 + $0x1a8] sm:$0xff] }
  0xb8   :  { %7657 = vmatmul.mubr.msk.f32.gmra.mrb[14].mxu1 %vm322_vm3, %v13126_v24  ;;  %9795 = vmatpush1.bf16.msra.mxu0 %v9794_v23  ;;  %v9814_v19 = vpack.c.bf16 %v284_v14, %v281_v13  ;;  %v13186_v20 = vld [vmem:[%s15776_s1 + $0x60] sm:$0xff]  ;;  %v9954_v21 = vpack.c.bf16 %v846_v18, %v843_v16  ;;  %v798_v23 = vld [vmem:[#allocation5 + $0x28] sm:$0xff]  ;;  %v849_v26 = vld [vmem:[#allocation5 + $0x1c0] sm:$0xff] }
  0xb9   :  { %9861 = vmatpush3.bf16.msra.mxu1 %v9860_v25  ;;  %647 = vmatprep.mubr.f32.mxu1 %v13109_v5  ;;  %v795_v22 = vld [vmem:[#allocation5 + $0x10] sm:$0xff]  ;;  %v852_v27 = vld [vmem:[#allocation5 + $0x1d8] sm:$0xff]  ;;  %v801_v31 = vld [vmem:[#allocation5 + $0x40] sm:$0xff] }
  0xba   :  { %9797 = vmatprep.subr.bf16.mxu0 %v9796_v28  ;;  %9863 = vmatprep.subr.bf16.mxu1 %v9862_v29  ;;  %v13191_v25 = vld [vmem:[%s15776_s1 + $0x80] sm:$0xff]  ;;  %v9956_v28 = vpack.c.bf16 %v798_v23, %v795_v22  ;;  %v804_v32 = vld [vmem:[#allocation5 + $0x58] sm:$0xff]  ;;  %v13203_v33 = vld [vmem:[%s15776_s1 + $0x98] sm:$0xff]  ;;  %v9958_v34 = vpack.c.bf16 %v852_v27, %v849_v26 }
  0xbb   :  { %v858_v37 = vld [vmem:[#allocation5 + $0x208] sm:$0xff]  ;;  %v9960_v38 = vpack.c.bf16 %v804_v32, %v801_v31  ;;  %v807_v41 = vld [vmem:[#allocation5 + $0x70] sm:$0xff]  ;;  %v861_v46 = vld [vmem:[#allocation5 + $0x220] sm:$0xff] }
  0xbc   :  { %648 = vmatmul.mubr.f32.vlgmr.msra.gmra.mrb[16].mxu1 %v13134_v36  ;;  %9799 = vmatpush1.bf16.msra.mxu0 %v9798_v35  ;;  %v855_v35 = vld [vmem:[#allocation5 + $0x1f0] sm:$0xff]  ;;  %v810_v42 = vld [vmem:[#allocation5 + $0x88] sm:$0xff]  ;;  %v864_v47 = vld [vmem:[#allocation5 + $0x238] sm:$0xff] }
  0xbd   :  { %9865 = vmatpush3.bf16.msra.mxu1 %v9862_v29  ;;  %652 = vmatprep.mubr.f32.mxu1 %v13139_v39  ;;  %v13198_v29 = vld [vmem:[%s15776_s1 + $0x78] sm:$0xff]  ;;  %v13226_v50 = vld [vmem:[%s15776_s1 + $0xa8] sm:$0xff]  ;;  %v813_v51 = vld [vmem:[#allocation5 + $0xa0] sm:$0xff] }
  0xbe   :  { %9801 = vmatprep.subr.bf16.mxu0 %v9800_v40  ;;  %9867 = vmatprep.subr.bf16.mxu1 %v9866_v44  ;;  %v13212_v40 = vld [vmem:[%s15776_s1 + $0x90] sm:$0xff]  ;;  %v816_v54 = vld [vmem:[#allocation5 + $0xb8] sm:$0xff]  ;;  %v803_v60 = vld [vmem:[#allocation5 + $0x50] sm:$0xff] }
  0xbf   :  { %v793_v55 = vld [vmem:[#allocation5] sm:$0xff]  ;;  %v800_v59 = vld [vmem:[#allocation5 + $0x38] sm:$0xff]  ;;  %v867_v63 = vld [vmem:[#allocation5 + $0x250] sm:$0xff] }
  0xc0   :  { %653 = vmatmul.mubr.f32.gmra.mrb[18].mxu1 %v13146_v48  ;;  %9803 = vmatpush1.bf16.msra.mxu0 %v9802_v45  ;;  %v9962_v45 = vpack.c.bf16 %v858_v37, %v855_v35  ;;  %v870_v2 = vld [vmem:[#allocation5 + $0x268] sm:$0xff]  ;;  %v819_v7 = vld [vmem:[#allocation5 + $0xd0] sm:$0xff]  ;;  %v809_v18 = vld [vmem:[#allocation5 + $0x80] sm:$0xff] }
  0xc1   :  { %657 = vmatprep.mubr.f32.mxu1 %v13151_v52  ;;  %9805 = vmatprep.subr.bf16.mxu0 %v9804_v49  ;;  %v9964_v49 = vpack.c.bf16 %v810_v42, %v807_v41  ;;  %v802_v13 = vld [vmem:[#allocation5 + $0x48] sm:$0xff]  ;;  %v9970_v14 = vpack.c.bf16 %v870_v2, %v867_v63  ;;  %v876_v22 = vld [vmem:[#allocation5 + $0x298] sm:$0xff]  ;;  %v825_v26 = vld [vmem:[#allocation5 + $0x100] sm:$0xff] }
  0xc2   :  { %9869 = vmatpush3.bf16.msra.mxu1 %v9866_v44  ;;  %v13217_v44 = vld [vmem:[%s15776_s1 + $0xb0] sm:$0xff]  ;;  %v806_v16 = vld [vmem:[#allocation5 + $0x68] sm:$0xff]  ;;  %v828_v27 = vld [vmem:[#allocation5 + $0x118] sm:$0xff] }
  0xc3   :  { %9872 = vmatprep.subr.msk.bf16.mxu1 %vm13053_vm2, %v9870_v57  ;;  %v805_v31 = vld [vmem:[#allocation5 + $0x60] sm:$0xff]  ;;  %v808_v32 = vld [vmem:[#allocation5 + $0x78] sm:$0xff]  ;;  %v815_v37 = vld [vmem:[#allocation5 + $0xb0] sm:$0xff] }
  0xc4   :  { %658 = vmatmul.mubr.f32.gmra.mrb[20].mxu1 %v13158_v61  ;;  %9807 = vmatpush1.bf16.msra.mxu0 %v9806_v58  ;;  %v9966_v58 = vpack.c.bf16 %v864_v47, %v861_v46  ;;  %v812_v35 = vld [vmem:[#allocation5 + $0x98] sm:$0xff]  ;;  %v879_v41 = vld [vmem:[#allocation5 + $0x2b0] sm:$0xff]  ;;  %v882_v42 = vld [vmem:[#allocation5 + $0x2c8] sm:$0xff] }
  0xc5   :  { %662 = vmatprep.mubr.f32.mxu1 %v13163_v3  ;;  %9809 = vmatprep.subr.bf16.mxu0 %v9808_v62  ;;  %v9968_v62 = vpack.c.bf16 %v816_v54, %v813_v51  ;;  %v831_v46 = vld [vmem:[#allocation5 + $0x130] sm:$0xff]  ;;  %v834_v47 = vld [vmem:[#allocation5 + $0x148] sm:$0xff]  ;;  %v817_v2 = vld [vmem:[#allocation5 + $0xc0] sm:$0xff] }
  0xc6   :  { %9875 = vmatpush3.bf16.msk.msra.mxu1 %vm13053_vm2, %v9870_v57  ;;  %v796_v57 = vld [vmem:[#allocation5 + $0x18] sm:$0xff]  ;;  %v811_v51 = vld [vmem:[#allocation5 + $0x90] sm:$0xff]  ;;  %v814_v54 = vld [vmem:[#allocation5 + $0xa8] sm:$0xff] }
  0xc7   :  { %9877 = vmatprep.subr.bf16.mxu1 %v9876_v8  ;;  %v9878_v6 = vpack.c.bf16 %v796_v57, %v793_v55  ;;  %v822_v8 = vld [vmem:[#allocation5 + $0xe8] sm:$0xff]  ;;  %v9978_v57 = vpack.c.bf16 %v882_v42, %v879_v41  ;;  %v9890_v63 = vpack.c.bf16 %v814_v54, %v811_v51  ;;  %v832_v42 = vld [vmem:[#allocation5 + $0x138] sm:$0xff]  ;;  %v13455_v1 = vld [vmem:[%s15794_s11] sm:$0xff] }
  0xc8   :  { %663 = vmatmul.mubr.f32.gmra.mrb[22].mxu1 %v13172_v11  ;;  %9811 = vmatpush1.bf16.msra.mxu0 %v9810_v9  ;;  %v9880_v9 = vpack.c.bf16 %v803_v60, %v800_v59  ;;  %v818_v55 = vld [vmem:[#allocation5 + $0xc8] sm:$0xff]  ;;  %v885_v59 = vld [vmem:[#allocation5 + $0x2e0] sm:$0xff]  ;;  %v888_v60 = vld [vmem:[#allocation5 + $0x2f8] sm:$0xff] }
  0xc9   :  { %667 = vmatprep.mubr.f32.mxu1 %v13177_v15  ;;  %9813 = vmatprep.subr.bf16.mxu0 %v9812_v12  ;;  %v799_v12 = vld [vmem:[#allocation5 + $0x30] sm:$0xff] }
  0xca   :  { %v9882_v23 = vpack.c.bf16 %v802_v13, %v799_v12  ;;  %v9982_v12 = vpack.c.bf16 %v888_v60, %v885_v59  ;;  %v891_v13 = vld [vmem:[#allocation5 + $0x310] sm:$0xff]  ;;  %v842_v60 = vld [vmem:[#allocation5 + $0x188] sm:$0xff] }
  0xcb   :  { %v1373_v59 = vld [vmem:[%s15777_s4 + $0x20] sm:$0xff] }
  0xcc   :  { %668 = vmatmul.mubr.f32.gmra.mrb[24].mxu1 %v13186_v20  ;;  %9815 = vmatpush1.bf16.msra.mxu0 %v9814_v19  ;;  %v9972_v19 = vpack.c.bf16 %v822_v8, %v819_v7  ;;  %v840_v7 = vld [vmem:[#allocation5 + $0x178] sm:$0xff] }
  0xcd   :  { %672 = vmatprep.mubr.f32.mxu1 %v13191_v25  ;;  %9955 = vmatprep.subr.bf16.mxu0 %v9954_v21  ;;  %v873_v21 = vld [vmem:[#allocation5 + $0x280] sm:$0xff] }
  0xcf   :  { %422 = vmatmul.mubr.f32.vlgmr.msra.gmra.mrb[0].mxu0 %v13134_v36 }
  0xd0   :  { %673 = vmatmul.mubr.f32.gmra.mrb[26].mxu1 %v13198_v29  ;;  %9957 = vmatpush3.bf16.msra.mxu0 %v9956_v28  ;;  %v9884_v28 = vpack.c.bf16 %v809_v18, %v806_v16  ;;  %v824_v16 = vld [vmem:[#allocation5 + $0xf8] sm:$0xff]  ;;  %v827_v18 = vld [vmem:[#allocation5 + $0x110] sm:$0xff] }
  0xd1   :  { %427 = vmatprep.mubr.f32.mxu0 %v13139_v39  ;;  %677 = vmatprep.mubr.f32.mxu1 %v13203_v33 }
  0xd2   :  { %9959 = vmatprep.subr.bf16.mxu0 %v9958_v34  ;;  %v9974_v34 = vpack.c.bf16 %v876_v22, %v873_v21  ;;  %v823_v22 = vld [vmem:[#allocation5 + $0xf0] sm:$0xff] }
  0xd3   :  { %428 = vmatmul.mubr.f32.gmra.mrb[2].mxu0 %v13146_v48 }
  0xd4   :  { %678 = vmatmul.mubr.f32.gmra.mrb[28].mxu1 %v13212_v40  ;;  %9961 = vmatpush3.bf16.msra.mxu0 %v9960_v38  ;;  %v9976_v38 = vpack.c.bf16 %v828_v27, %v825_v26  ;;  %v9896_v26 = vpack.c.bf16 %v827_v18, %v824_v16  ;;  %v826_v27 = vld [vmem:[#allocation5 + $0x108] sm:$0xff]  ;;  %v847_v16 = vld [vmem:[#allocation5 + $0x1b0] sm:$0xff] }
  0xd5   :  { %433 = vmatprep.mubr.f32.mxu0 %v13151_v52  ;;  %682 = vmatprep.mubr.f32.mxu1 %v13217_v44  ;;  %v850_v18 = vld [vmem:[#allocation5 + $0x1c8] sm:$0xff] }
  0xd6   :  { %9963 = vmatprep.subr.bf16.mxu0 %v9962_v45  ;;  %v9886_v45 = vpack.c.bf16 %v808_v32, %v805_v31  ;;  %v900_v31 = vld [vmem:[#allocation5 + $0x358] sm:$0xff]  ;;  %v830_v32 = vld [vmem:[#allocation5 + $0x128] sm:$0xff] }
  0xd7   :  { %434 = vmatmul.mubr.f32.gmra.mrb[4].mxu0 %v13158_v61 }
  0xd8   :  { %683 = vmatmul.mubr.f32.gmra.mrb[30].mxu1 %v13226_v50  ;;  %9965 = vmatpush3.bf16.msra.mxu0 %v9964_v49  ;;  %v9888_v49 = vpack.c.bf16 %v815_v37, %v812_v35  ;;  %v9898_v35 = vpack.c.bf16 %v826_v27, %v823_v22  ;;  %v829_v37 = vld [vmem:[#allocation5 + $0x120] sm:$0xff]  ;;  %v9914_v22 = vpack.c.bf16 %v850_v18, %v847_v16  ;;  %v856_v27 = vld [vmem:[#allocation5 + $0x1f8] sm:$0xff] }
  0xd9   :  { %439 = vmatprep.mubr.f32.mxu0 %v13163_v3  ;;  %8596 = vmatprep.mubr.msk.f32.mxu1 %vm322_vm3, %v13064_v53  ;;  %v9902_v51 = vpack.c.bf16 %v832_v42, %v829_v37  ;;  %v862_v37 = vld [vmem:[#allocation5 + $0x228] sm:$0xff]  ;;  %v880_v18 = vld [vmem:[#allocation5 + $0x2b8] sm:$0xff] }
  0xda   :  { %9967 = vmatprep.subr.bf16.mxu0 %v9966_v58  ;;  %v821_v58 = vld [vmem:[#allocation5 + $0xe0] sm:$0xff] }
  0xdb   :  { %440 = vmatmul.mubr.f32.gmra.mrb[6].mxu0 %v13172_v11  ;;  %v9892_v8 = vpack.c.bf16 %v821_v58, %v818_v55  ;;  %v1370_v58 = vld [vmem:[%s15777_s4 + $0x8] sm:$0xff] }
  0xdc   :  { %8597 = vmatmul.mubr.msk.f32.vlgmr.msra.gmra.mrb[32].mxu1 %vm322_vm3, %v13072_v4  ;;  %9969 = vmatpush3.bf16.msra.mxu0 %v9968_v62  ;;  %v9980_v62 = vpack.c.bf16 %v834_v47, %v831_v46  ;;  %v906_v46 = vld [vmem:[#allocation5 + $0x388] sm:$0xf]  ;;  %v836_v47 = vld [vmem:[#allocation5 + $0x158] sm:$0xff] }
  0xdd   :  { %9879 = vmatpush1.bf16.msra.mxu1 %v9878_v6  ;;  %445 = vmatprep.mubr.f32.mxu0 %v13177_v15  ;;  %v837_v6 = vld [vmem:[#allocation5 + $0x160] sm:$0xff] }
  0xde   :  { %8599 = vmatprep.mubr.msk.f32.mxu1 %vm322_vm3, %v13080_v17  ;;  %9881 = vmatprep.subr.bf16.mxu1 %v9880_v9  ;;  %v820_v9 = vld [vmem:[#allocation5 + $0xd8] sm:$0xff] }
  0xdf   :  { %446 = vmatmul.mubr.f32.gmra.mrb[8].mxu0 %v13186_v20  ;;  %9971 = vmatprep.subr.bf16.mxu0 %v9970_v14  ;;  %v894_v14 = vld [vmem:[#allocation5 + $0x328] sm:$0xff]  ;;  %v9894_v21 = vpack.c.bf16 %v820_v9, %v817_v2  ;;  %v13270_v2 = vpack.c.bf16 %v1373_v59, %v1370_v58  ;;  %v848_v9 = vld [vmem:[#allocation5 + $0x1b8] sm:$0xff] }
  0xe0   :  { %8600 = vmatmul.mubr.msk.f32.gmra.mrb[34].mxu1 %vm322_vm3, %v13088_v30  ;;  %9973 = vmatpush3.bf16.msra.mxu0 %v9972_v19  ;;  %v9984_v19 = vpack.c.bf16 %v840_v7, %v837_v6  ;;  %v841_v7 = vld [vmem:[#allocation5 + $0x180] sm:$0xff]  ;;  %v874_v59 = vld [vmem:[#allocation5 + $0x288] sm:$0xff] }
  0xe1   :  { %9883 = vmatpush1.bf16.msra.mxu1 %v9882_v23  ;;  %451 = vmatprep.mubr.f32.mxu0 %v13191_v25  ;;  %v9986_v23 = vpack.c.bf16 %v894_v14, %v891_v13  ;;  %15778 = vst [vmem:[#allocation23_spill] sm:$0xff] %v13270_v2 }
  0xe2   :  { %8602 = vmatprep.mubr.msk.f32.mxu1 %vm322_vm3, %v13096_v43  ;;  %9885 = vmatprep.subr.bf16.mxu1 %v9884_v28  ;;  %v897_v28 = vld [vmem:[#allocation5 + $0x340] sm:$0xff] }
  0xe3   :  { %452 = vmatmul.mubr.f32.gmra.mrb[10].mxu0 %v13198_v29  ;;  %9975 = vmatprep.subr.bf16.mxu0 %v9974_v34  ;;  %v833_v34 = vld [vmem:[#allocation5 + $0x140] sm:$0xff] }
  0xe4   :  { %8603 = vmatmul.mubr.msk.f32.gmra.mrb[36].mxu1 %vm322_vm3, %v13103_v56  ;;  %9977 = vmatpush3.bf16.msra.mxu0 %v9976_v38  ;;  %v9990_v38 = vpack.c.bf16 %v900_v31, %v897_v28  ;;  %v9900_v41 = vpack.c.bf16 %v833_v34, %v830_v32  ;;  %v860_v28 = vld [vmem:[#allocation5 + $0x218] sm:$0xff]  ;;  %v863_v31 = vld [vmem:[#allocation5 + $0x230] sm:$0xff] }
  0xe5   :  { %9887 = vmatpush1.bf16.msra.mxu1 %v9886_v45  ;;  %457 = vmatprep.mubr.f32.mxu0 %v13203_v33  ;;  %v903_v45 = vld [vmem:[#allocation5 + $0x370] sm:$0xff]  ;;  %v9920_v34 = vpack.c.bf16 %v863_v31, %v860_v28  ;;  %v1384_v31 = vld [vmem:[%s15777_s4 + $0x78] sm:$0xff] }
  0xe6   :  { %8605 = vmatprep.mubr.msk.f32.mxu1 %vm322_vm3, %v13118_v10  ;;  %9889 = vmatprep.subr.bf16.mxu1 %v9888_v49  ;;  %v839_v49 = vld [vmem:[#allocation5 + $0x170] sm:$0xff]  ;;  %v9994_v54 = vpack.c.bf16 %v906_v46, %v903_v45  ;;  %v865_v46 = vld [vmem:[#allocation5 + $0x240] sm:$0xff] }
  0xe7   :  { %458 = vmatmul.mubr.f32.gmra.mrb[12].mxu0 %v13212_v40  ;;  %9979 = vmatprep.subr.bf16.mxu0 %v9978_v57  ;;  %v9904_v55 = vpack.c.bf16 %v839_v49, %v836_v47  ;;  %v838_v57 = vld [vmem:[#allocation5 + $0x168] sm:$0xff]  ;;  %v868_v47 = vld [vmem:[#allocation5 + $0x258] sm:$0xff]  ;;  %v883_v28 = vld [vmem:[#allocation5 + $0x2d0] sm:$0xff] }
  0xe8   :  { %8606 = vmatmul.mubr.msk.f32.gmra.mrb[38].mxu1 %vm322_vm3, %v13126_v24  ;;  %9981 = vmatpush3.bf16.msra.mxu0 %v9980_v62  ;;  %v845_v62 = vld [vmem:[#allocation5 + $0x1a0] sm:$0xff]  ;;  %v872_v49 = vld [vmem:[#allocation5 + $0x278] sm:$0xff] }
  0xe9   :  { %9891 = vmatpush1.bf16.msra.mxu1 %v9890_v63  ;;  %463 = vmatprep.mubr.f32.mxu0 %v13217_v44  ;;  %v9908_v6 = vpack.c.bf16 %v845_v62, %v842_v60  ;;  %v1376_v60 = vld [vmem:[%s15777_s4 + $0x38] sm:$0xff]  ;;  %v1379_v62 = vld [vmem:[%s15777_s4 + $0x50] sm:$0xff] }
  0xea   :  { %9893 = vmatprep.subr.bf16.mxu1 %v9892_v8  ;;  %9983 = vmatprep.subr.bf16.mxu0 %v9982_v12  ;;  %v844_v8 = vld [vmem:[#allocation5 + $0x198] sm:$0xff]  ;;  %v851_v12 = vld [vmem:[#allocation5 + $0x1d0] sm:$0xff] }
  0xeb   :  { %464 = vmatmul.mubr.f32.gmra.mrb[14].mxu0 %v13226_v50  ;;  %997 = vmatprep.mubr.f32.mxu1 %v13109_v5  ;;  %v9910_v13 = vpack.c.bf16 %v844_v8, %v841_v7  ;;  %v9912_v14 = vpack.c.bf16 %v851_v12, %v848_v9  ;;  %v13302_v9 = vpack.c.bf16 %v1379_v62, %v1376_v60  ;;  %v877_v12 = vld [vmem:[#allocation5 + $0x2a0] sm:$0xff]  ;;  %v1396_v60 = vld [vmem:[%s15777_s4 + $0xd8] sm:$0xff] }
  0xec   :  { %9985 = vmatpush3.bf16.msra.mxu0 %v9984_v19  ;;  %1223 = vmatprep.mubr.f32.mxu0 %v13109_v5  ;;  %v835_v5 = vld [vmem:[#allocation5 + $0x150] sm:$0xff]  ;;  %v854_v19 = vld [vmem:[#allocation5 + $0x1e8] sm:$0xff] }
  0xed   :  { %9895 = vmatpush1.bf16.msra.mxu1 %v9894_v21  ;;  %9987 = vmatprep.subr.bf16.mxu0 %v9986_v23  ;;  %v9906_v63 = vpack.c.bf16 %v838_v57, %v835_v5  ;;  %v857_v21 = vld [vmem:[#allocation5 + $0x200] sm:$0xff]  ;;  %v9926_v5 = vpack.c.bf16 %v868_v47, %v865_v46  ;;  %v1372_v57 = vld [vmem:[%s15777_s4 + $0x18] sm:$0xff]  ;;  %15780 = vst [vmem:[#allocation25_spill] sm:$0xff] %v13302_v9 }
  0xee   :  { %9897 = vmatprep.subr.bf16.mxu1 %v9896_v26  ;;  %v853_v26 = vld [vmem:[#allocation5 + $0x1e0] sm:$0xff]  ;;  %v1400_v62 = vld [vmem:[%s15777_s4 + $0xf8] sm:$0xff] }
  0xef   :  { %1224 = vmatmul.mubr.f32.vlgmr.msra.gmra.mrb[16].mxu0 %v13134_v36  ;;  %v9918_v32 = vpack.c.bf16 %v856_v27, %v853_v26  ;;  %v9934_v26 = vpack.c.bf16 %v880_v18, %v877_v12  ;;  %v1387_v46 = vld [vmem:[%s15777_s4 + $0x90] sm:$0xff] }
  0xf0   :  { %1228 = vmatprep.mubr.f32.mxu0 %v13139_v39  ;;  %9989 = vmatpush3.bf16.msra.mxu0 %v9986_v23  ;;  %v9916_v23 = vpack.c.bf16 %v857_v21, %v854_v19  ;;  %v1385_v19 = vld [vmem:[%s15777_s4 + $0x80] sm:$0xff]  ;;  %v884_v21 = vld [vmem:[#allocation5 + $0x2d8] sm:$0xff]  ;;  %v1399_v18 = vld [vmem:[%s15777_s4 + $0xf0] sm:$0xff] }
  0xf1   :  { %9899 = vmatpush1.bf16.msra.mxu1 %v9898_v35  ;;  %9991 = vmatprep.subr.bf16.mxu0 %v9990_v38  ;;  %v859_v35 = vld [vmem:[#allocation5 + $0x210] sm:$0xff] }
  0xf2   :  { %9901 = vmatprep.subr.bf16.mxu1 %v9900_v41  ;;  %v869_v41 = vld [vmem:[#allocation5 + $0x260] sm:$0xff]  ;;  %v9922_v42 = vpack.c.bf16 %v862_v37, %v859_v35  ;;  %v890_v37 = vld [vmem:[#allocation5 + $0x308] sm:$0xff] }
  0xf3   :  { %1229 = vmatmul.mubr.f32.gmra.mrb[18].mxu0 %v13146_v48  ;;  %v1391_v35 = vld [vmem:[%s15777_s4 + $0xb0] sm:$0xff] }
  0xf4   :  { %1233 = vmatprep.mubr.f32.mxu0 %v13151_v52  ;;  %9993 = vmatpush3.bf16.msra.mxu0 %v9990_v38  ;;  %v866_v38 = vld [vmem:[#allocation5 + $0x248] sm:$0xff] }
  0xf5   :  { %9903 = vmatpush1.bf16.msra.mxu1 %v9902_v51  ;;  %9996 = vmatprep.subr.msk.bf16.mxu0 %vm13053_vm2, %v9994_v54  ;;  %v9924_v45 = vpack.c.bf16 %v869_v41, %v866_v38  ;;  %v875_v51 = vld [vmem:[#allocation5 + $0x290] sm:$0xff]  ;;  %v893_v38 = vld [vmem:[#allocation5 + $0x320] sm:$0xff] }
  0xf6   :  { %9905 = vmatprep.subr.bf16.mxu1 %v9904_v55  ;;  %v1369_v55 = vld [vmem:[%s15777_s4] sm:$0xff]  ;;  %v9928_v58 = vpack.c.bf16 %v875_v51, %v872_v49  ;;  %v9940_v47 = vpack.c.bf16 %v893_v38, %v890_v37  ;;  %v889_v49 = vld [vmem:[#allocation5 + $0x300] sm:$0xff]  ;;  %v892_v51 = vld [vmem:[#allocation5 + $0x318] sm:$0xff] }
  0xf7   :  { %1234 = vmatmul.mubr.f32.gmra.mrb[20].mxu0 %v13158_v61  ;;  %v13300_v7 = vpack.c.bf16 %v1372_v57, %v1369_v55  ;;  %v899_v55 = vld [vmem:[#allocation5 + $0x350] sm:$0xff]  ;;  %v1414_v37 = vld [vmem:[%s15777_s4 + $0x168] sm:$0xff]  ;;  %v1598_v38 = vld [vmem:[#allocation7 + $0x10] sm:$0xff] }
  0xf8   :  { %1238 = vmatprep.mubr.f32.mxu0 %v13163_v3  ;;  %9999 = vmatpush3.bf16.msk.msra.mxu0 %vm13053_vm2, %v9994_v54  ;;  %v871_v54 = vld [vmem:[#allocation5 + $0x270] sm:$0xff] }
  0xf9   :  { %9907 = vmatpush1.bf16.msra.mxu1 %v9906_v63  ;;  %10001 = vmatprep.subr.bf16.mxu0 %v13270_v2  ;;  %v878_v63 = vld [vmem:[#allocation5 + $0x2a8] sm:$0xff]  ;;  %15779 = vst [vmem:[#allocation24_spill] sm:$0xff] %v13300_v7  ;;  %v9930_v8 = vpack.c.bf16 %v874_v59, %v871_v54  ;;  %v896_v54 = vld [vmem:[#allocation5 + $0x338] sm:$0xff]  ;;  %v1393_v59 = vld [vmem:[%s15777_s4 + $0xc0] sm:$0xff] }
  0xfa   :  { %9909 = vmatprep.subr.bf16.mxu1 %v9908_v6  ;;  %v881_v6 = vld [vmem:[#allocation5 + $0x2c0] sm:$0xff]  ;;  %v13386_v12 = vpack.c.bf16 %v1396_v60, %v1393_v59  ;;  %v1628_v60 = vld [vmem:[#allocation7 + $0x100] sm:$0xff] }
  0xfb   :  { %1239 = vmatmul.mubr.f32.gmra.mrb[22].mxu0 %v13172_v11  ;;  %v9932_v16 = vpack.c.bf16 %v881_v6, %v878_v63  ;;  %v9944_v63 = vpack.c.bf16 %v899_v55, %v896_v54  ;;  %v895_v6 = vld [vmem:[#allocation5 + $0x330] sm:$0xff]  ;;  %v12581_v55 = vld [vmem:[%s15776_s1 + $0x10] sm:$0xff] }
  0xfc   :  { %1243 = vmatprep.mubr.f32.mxu0 %v13177_v15  ;;  %15787 = vst [vmem:[#allocation32_spill] sm:$0xff] %v13386_v12  ;;  %v1377_v54 = vld [vmem:[%s15777_s4 + $0x40] sm:$0xff] }
  0xfd   :  { %9911 = vmatpush1.bf16.msra.mxu1 %v9910_v13  ;;  %v1375_v13 = vld [vmem:[%s15777_s4 + $0x30] sm:$0xff] }
  0xfe   :  { %9913 = vmatprep.subr.bf16.mxu1 %v9912_v14  ;;  %v1378_v14 = vld [vmem:[%s15777_s4 + $0x48] sm:$0xff] }
  0xff   :  { %1244 = vmatmul.mubr.f32.gmra.mrb[24].mxu0 %v13186_v20 }
 0x100   :  { %1248 = vmatprep.mubr.f32.mxu0 %v13191_v25 }
 0x101   :  { %9915 = vmatpush1.bf16.msra.mxu1 %v9914_v22  ;;  %v887_v22 = vld [vmem:[#allocation5 + $0x2f0] sm:$0xff] }
 0x102   :  { %9917 = vmatprep.subr.bf16.mxu1 %v9916_v23  ;;  %v13319_v23 = vpack.c.bf16 %v1378_v14, %v1375_v13  ;;  %v902_v13 = vld [vmem:[#allocation5 + $0x368] sm:$0xff]  ;;  %v905_v14 = vld [vmem:[#allocation5 + $0x380] sm:$0xf] }
 0x103   :  { %1249 = vmatmul.mubr.f32.gmra.mrb[26].mxu0 %v13198_v29 }
 0x104   :  { %1253 = vmatprep.mubr.f32.mxu0 %v13203_v33  ;;  %15781 = vst [vmem:[#allocation26_spill] sm:$0xff] %v13319_v23 }
 0x105   :  { %9919 = vmatpush1.bf16.msra.mxu1 %v9918_v32  ;;  %v9936_v32 = vpack.c.bf16 %v887_v22, %v884_v21  ;;  %v901_v21 = vld [vmem:[#allocation5 + $0x360] sm:$0xff]  ;;  %v904_v22 = vld [vmem:[#allocation5 + $0x378] sm:$0xf] }
 0x106   :  { %9921 = vmatprep.subr.bf16.mxu1 %v9920_v34  ;;  %v886_v34 = vld [vmem:[#allocation5 + $0x2e8] sm:$0xff] }
 0x107   :  { %1254 = vmatmul.mubr.f32.gmra.mrb[28].mxu0 %v13212_v40 }
 0x108   :  { %1258 = vmatprep.mubr.f32.mxu0 %v13217_v44 }
 0x109   :  { %9923 = vmatpush1.bf16.msra.mxu1 %v9922_v42  ;;  %v9938_v42 = vpack.c.bf16 %v886_v34, %v883_v28 }
 0x10a   :  { %9925 = vmatprep.subr.bf16.mxu1 %v9924_v45 }
 0x10b   :  { %1259 = vmatmul.mubr.f32.gmra.mrb[30].mxu0 %v13226_v50 }
 0x10c   :  { %8620 = vmatprep.mubr.msk.f32.mxu0 %vm322_vm3, %v13064_v53  ;;  %v1382_v53 = vld [vmem:[%s15777_s4 + $0x68] sm:$0xff] }
 0x10d   :  { %9927 = vmatpush1.bf16.msra.mxu1 %v9926_v5  ;;  %v13324_v27 = vpack.c.bf16 %v1385_v19, %v1382_v53  ;;  %v1397_v5 = vld [vmem:[%s15777_s4 + $0xe0] sm:$0xff]  ;;  %v1406_v53 = vld [vmem:[%s15777_s4 + $0x128] sm:$0xff]  ;;  %v9948_v19 = vpack.c.bf16 %v905_v14, %v902_v13  ;;  %v1634_v14 = vld [vmem:[#allocation7 + $0x130] sm:$0xff] }
 0x10e   :  { %9929 = vmatprep.subr.bf16.mxu1 %v9928_v58  ;;  %v9942_v58 = vpack.c.bf16 %v892_v51, %v889_v49  ;;  %v1371_v49 = vld [vmem:[%s15777_s4 + $0x10] sm:$0xff]  ;;  %v1374_v51 = vld [vmem:[%s15777_s4 + $0x28] sm:$0xff] }
 0x10f   :  { %8621 = vmatmul.mubr.msk.f32.vlgmr.msra.gmra.mrb[32].mxu0 %vm322_vm3, %v13072_v4  ;;  %15782 = vst [vmem:[#allocation27_spill] sm:$0xff] %v13324_v27  ;;  %v1381_v4 = vld [vmem:[%s15777_s4 + $0x60] sm:$0xff] }
 0x110   :  { %10003 = vmatpush1.bf16.msra.mxu0 %v13300_v7  ;;  %8623 = vmatprep.mubr.msk.f32.mxu0 %vm322_vm3, %v13080_v17  ;;  %v1388_v17 = vld [vmem:[%s15777_s4 + $0x98] sm:$0xff]  ;;  %v13341_v41 = vpack.c.bf16 %v1384_v31, %v1381_v4  ;;  %v1405_v4 = vld [vmem:[%s15777_s4 + $0x120] sm:$0xff] }
 0x111   :  { %9931 = vmatpush1.bf16.msra.mxu1 %v9930_v8  ;;  %10005 = vmatprep.subr.bf16.mxu0 %v13302_v9  ;;  %v13346_v45 = vpack.c.bf16 %v1391_v35, %v1388_v17  ;;  %v898_v8 = vld [vmem:[#allocation5 + $0x348] sm:$0xff]  ;;  %v1411_v35 = vld [vmem:[%s15777_s4 + $0x150] sm:$0xff] }
 0x112   :  { %9933 = vmatprep.subr.bf16.mxu1 %v9932_v16  ;;  %15783 = vst [vmem:[#allocation28_spill] sm:$0xff] %v13341_v41  ;;  %v1408_v31 = vld [vmem:[%s15777_s4 + $0x138] sm:$0xff] }
 0x113   :  { %8624 = vmatmul.mubr.msk.f32.gmra.mrb[34].mxu0 %vm322_vm3, %v13088_v30  ;;  %15784 = vst [vmem:[#allocation29_spill] sm:$0xff] %v13346_v45  ;;  %v1390_v30 = vld [vmem:[%s15777_s4 + $0xa8] sm:$0xff]  ;;  %v13429_v34 = vpack.c.bf16 %v1408_v31, %v1405_v4  ;;  %v1395_v4 = vld [vmem:[%s15777_s4 + $0xd0] sm:$0xff] }
 0x114   :  { %10007 = vmatpush1.bf16.msra.mxu0 %v13319_v23  ;;  %8626 = vmatprep.mubr.msk.f32.mxu0 %vm322_vm3, %v13096_v43  ;;  %v1394_v43 = vld [vmem:[%s15777_s4 + $0xc8] sm:$0xff]  ;;  %v13363_v57 = vpack.c.bf16 %v1390_v30, %v1387_v46  ;;  %v1607_v46 = vld [vmem:[#allocation7 + $0x58] sm:$0xff]  ;;  %v1610_v30 = vld [vmem:[#allocation7 + $0x70] sm:$0xff] }
 0x115   :  { %9935 = vmatpush1.bf16.msra.mxu1 %v9934_v26  ;;  %10009 = vmatprep.subr.bf16.mxu0 %v13324_v27  ;;  %15791 = vst [vmem:[#allocation36_spill] sm:$0xff] %v13429_v34  ;;  %v1398_v31 = vld [vmem:[%s15777_s4 + $0xe8] sm:$0xff] }
 0x116   :  { %9937 = vmatprep.subr.bf16.mxu1 %v9936_v32  ;;  %15785 = vst [vmem:[#allocation30_spill] sm:$0xff] %v13363_v57  ;;  %v9951_v32 = vpack.c.bf16 %v904_v22, %v901_v21  ;;  %v1640_v21 = vld [vmem:[#allocation7 + $0x160] sm:$0xff]  ;;  %v1643_v22 = vld [vmem:[#allocation7 + $0x178] sm:$0xff] }
 0x117   :  { %8627 = vmatmul.mubr.msk.f32.gmra.mrb[36].mxu0 %vm322_vm3, %v13103_v56  ;;  %v13374_v56 = vpack.c.bf16 %v1397_v5, %v1394_v43  ;;  %v1622_v43 = vld [vmem:[#allocation7 + $0xd0] sm:$0xff]  ;;  %v1625_v5 = vld [vmem:[#allocation7 + $0xe8] sm:$0xff] }
 0x118   :  { %10011 = vmatpush1.bf16.msra.mxu0 %v13341_v41  ;;  %8629 = vmatprep.mubr.msk.f32.mxu0 %vm322_vm3, %v13118_v10  ;;  %v1403_v10 = vld [vmem:[%s15777_s4 + $0x110] sm:$0xff] }
 0x119   :  { %9939 = vmatpush1.bf16.msra.mxu1 %v9938_v42  ;;  %10013 = vmatprep.subr.bf16.mxu0 %v13346_v45  ;;  %15786 = vst [vmem:[#allocation31_spill] sm:$0xff] %v13374_v56  ;;  %v13389_v16 = vpack.c.bf16 %v1403_v10, %v1400_v62  ;;  %v1601_v42 = vld [vmem:[#allocation7 + $0x28] sm:$0xff]  ;;  %v1631_v62 = vld [vmem:[#allocation7 + $0x118] sm:$0xff]  ;;  %v1383_v10 = vld [vmem:[%s15777_s4 + $0x70] sm:$0xff] }
 0x11a   :  { %9941 = vmatprep.subr.bf16.mxu1 %v9940_v47  ;;  %v1613_v47 = vld [vmem:[#allocation7 + $0x88] sm:$0xff] }
 0x11b   :  { %8630 = vmatmul.mubr.msk.f32.gmra.mrb[38].mxu0 %vm322_vm3, %v13126_v24  ;;  %15788 = vst [vmem:[#allocation33_spill] sm:$0xff] %v13389_v16  ;;  %v1402_v24 = vld [vmem:[%s15777_s4 + $0x108] sm:$0xff] }
 0x11c   :  { %998 = vmatmul.mubr.f32.vlgmr.msra.gmra.mrb[40].mxu1 %v13134_v36  ;;  %10015 = vmatpush1.bf16.msra.mxu0 %v13363_v57  ;;  %v9946_v36 = vpack.c.bf16 %v898_v8, %v895_v6  ;;  %v13407_v26 = vpack.c.bf16 %v1402_v24, %v1399_v18  ;;  %v12582_v6 = vld [vmem:[%s15776_s1 + $0x28] sm:$0xff]  ;;  %v13520_v8 = vpack.c.bf16 %v1631_v62, %v1628_v60  ;;  %v1389_v24 = vld [vmem:[%s15777_s4 + $0xa0] sm:$0xff]  ;;  %v1599_v60 = vld [vmem:[#allocation7 + $0x18] sm:$0xff] }
 0x11d   :  { %9943 = vmatpush1.bf16.msra.mxu1 %v9942_v58  ;;  %1003 = vmatprep.mubr.f32.mxu1 %v13139_v39  ;;  %v1409_v39 = vld [vmem:[%s15777_s4 + $0x140] sm:$0xff]  ;;  %v13501_v58 = vpack.c.bf16 %v1625_v5, %v1622_v43  ;;  %v1637_v18 = vld [vmem:[#allocation7 + $0x148] sm:$0xff]  ;;  %v1603_v62 = vld [vmem:[#allocation7 + $0x38] sm:$0xff] }
 0x11e   :  { %10017 = vmatprep.subr.bf16.mxu0 %v13374_v56  ;;  %9945 = vmatprep.subr.bf16.mxu1 %v9944_v63  ;;  %15789 = vst [vmem:[#allocation34_spill] sm:$0xff] %v13407_v26  ;;  %v13411_v28 = vpack.c.bf16 %v1409_v39, %v1406_v53  ;;  %v1386_v63 = vld [vmem:[%s15777_s4 + $0x88] sm:$0xff]  ;;  %15797 = vst [vmem:[#allocation41_spill] sm:$0xff] %v13520_v8  ;;  %v12583_v53 = vld [vmem:[%s15776_s1 + $0x40] sm:$0xff]  ;;  %v13539_v39 = vpack.c.bf16 %v1637_v18, %v1634_v14 }
 0x11f   :  { %1498 = vmatprep.mubr.f32.mxu0 %v15647_v0  ;;  %v13524_v13 = vpack.c.bf16 %v1386_v63, %v1383_v10  ;;  %v1600_v43 = vld [vmem:[#allocation7 + $0x20] sm:$0xff]  ;;  %v1606_v10 = vld [vmem:[#allocation7 + $0x50] sm:$0xff]  ;;  %v12588_v63 = vld [vmem:[%s15776_s1 + $0xb8] sm:$0xff] }
 0x120   :  { %1004 = vmatmul.mubr.f32.gmra.mrb[42].mxu1 %v13146_v48  ;;  %10019 = vmatpush1.bf16.msra.mxu0 %v13386_v12  ;;  %15790 = vst [vmem:[#allocation35_spill] sm:$0xff] %v13411_v28  ;;  %v1412_v48 = vld [vmem:[%s15777_s4 + $0x158] sm:$0xff]  ;;  %15799 = vst [vmem:[#allocation43_spill] sm:$0xff] %v13539_v39  ;;  %v12587_v5 = vld [vmem:[%s15776_s1 + $0xa0] sm:$0xff]  ;;  %v13637_v14 = vpack.c.bf16 %v1606_v10, %v1603_v62 }
 0x121   :  { %1009 = vmatprep.mubr.f32.mxu1 %v13151_v52  ;;  %10021 = vmatprep.subr.bf16.mxu0 %v13389_v16  ;;  %v1415_v52 = vld [vmem:[%s15777_s4 + $0x170] sm:$0xff]  ;;  %15798 = vst [vmem:[#allocation42_spill] sm:$0xff] %v13524_v13 }
 0x122   :  { %9947 = vmatpush1.bf16.msra.mxu1 %v9946_v36  ;;  %v13433_v17 = vpack.c.bf16 %v1415_v52, %v1412_v48  ;;  %v1392_v36 = vld [vmem:[%s15777_s4 + $0xb8] sm:$0xff]  ;;  %v13558_v52 = vpack.c.bf16 %v1643_v22, %v1640_v21  ;;  %v1602_v18 = vld [vmem:[#allocation7 + $0x30] sm:$0xff] }
 0x123   :  { %9950 = vmatprep.subr.msk.bf16.mxu1 %vm13053_vm2, %v9948_v19  ;;  %v13543_v19 = vpack.c.bf16 %v1392_v36, %v1389_v24  ;;  %v12584_v48 = vld [vmem:[%s15776_s1 + $0x58] sm:$0xff]  ;;  %v1605_v24 = vld [vmem:[#allocation7 + $0x48] sm:$0xff] }
 0x124   :  { %1010 = vmatmul.mubr.f32.gmra.mrb[44].mxu1 %v13158_v61  ;;  %10023 = vmatpush1.bf16.msra.mxu0 %v13407_v26  ;;  %15792 = vst [vmem:[#allocation37_spill] sm:$0xff] %v13433_v17  ;;  %v15687_v61 = vmov 0.0|0.0   ;;  %15801 = vst [vmem:[#allocation45_spill] sm:$0xff] %v13558_v52  ;;  %v1609_v36 = vld [vmem:[#allocation7 + $0x68] sm:$0xff]  ;;  %v13643_v21 = vpack.c.bf16 %v1605_v24, %v1602_v18 }
 0x125   :  { %1015 = vmatprep.mubr.f32.mxu1 %v13163_v3  ;;  %10025 = vmatprep.subr.bf16.mxu0 %v13411_v28  ;;  %v13446_v3 = vpack.c.bf16 %v1414_v37, %v1411_v35  ;;  %15800 = vst [vmem:[#allocation44_spill] sm:$0xff] %v13543_v19  ;;  %v1401_v35 = vld [vmem:[%s15777_s4 + $0x100] sm:$0xff]  ;;  %v1404_v37 = vld [vmem:[%s15777_s4 + $0x118] sm:$0xff]  ;;  %v1629_v18 = vld [vmem:[#allocation7 + $0x108] sm:$0xff] }
 0x126   :  { %9953 = vmatpush1.bf16.msk.msra.mxu1 %vm13053_vm2, %v9951_v32  ;;  %v13562_v32 = vpack.c.bf16 %v1398_v31, %v1395_v4  ;;  %v1608_v4 = vld [vmem:[#allocation7 + $0x60] sm:$0xff]  ;;  %v1611_v31 = vld [vmem:[#allocation7 + $0x78] sm:$0xff]  ;;  %v1633_v24 = vld [vmem:[#allocation7 + $0x128] sm:$0xff] }
 0x127   :  { %10032 = vmatprep.subr.bf16.mxu1 %v15687_v61  ;;  %15793 = vst [vmem:[#allocation38_spill] sm:$0xff] %v13446_v3 }
 0x128   :  { %1016 = vmatmul.mubr.f32.gmra.mrb[46].mxu1 %v13172_v11  ;;  %10027 = vmatpush1.bf16.msra.mxu0 %v13429_v34  ;;  %v13457_v11 = vpack.c.bf16 %v1601_v42, %v1598_v38  ;;  %15802 = vst [vmem:[#allocation46_spill] sm:$0xff] %v13562_v32  ;;  %v12585_v38 = vld [vmem:[%s15776_s1 + $0x70] sm:$0xff]  ;;  %v13579_v42 = vpack.c.bf16 %v1404_v37, %v1401_v35 }
 0x129   :  { %1021 = vmatprep.mubr.f32.mxu1 %v13177_v15  ;;  %10029 = vmatprep.subr.bf16.mxu0 %v13433_v17  ;;  %v1604_v15 = vld [vmem:[#allocation7 + $0x40] sm:$0xff]  ;;  %v1618_v35 = vld [vmem:[#allocation7 + $0xb0] sm:$0xff]  ;;  %v13652_v37 = vpack.c.bf16 %v1611_v31, %v1608_v4 }
 0x12a   :  { %15803 = vst [vmem:[#allocation47_spill] sm:$0xff] %v13579_v42  ;;  %v1632_v31 = vld [vmem:[#allocation7 + $0x120] sm:$0xff] }
 0x12c   :  { %1022 = vmatmul.mubr.f32.gmra.mrb[48].mxu1 %v13186_v20  ;;  %10031 = vmatpush1.bf16.msra.mxu0 %v13446_v3  ;;  %v13464_v20 = vpack.c.bf16 %v1607_v46, %v1604_v15  ;;  %v1407_v15 = vld [vmem:[%s15777_s4 + $0x130] sm:$0xff]  ;;  %v1410_v46 = vld [vmem:[%s15777_s4 + $0x148] sm:$0xff] }
 0x12d   :  { %1027 = vmatprep.mubr.f32.mxu1 %v13191_v25  ;;  %10088 = vmatprep.subr.bf16.mxu0 %v15687_v61  ;;  %v13472_v25 = vpack.c.bf16 %v1613_v47, %v1610_v30  ;;  %v13591_v30 = vld [vmem:[%s15794_s11 + $0x8] sm:$0xff] }
 0x12e   :  { %15804 = vst [vmem:[#allocation48_spill] sm:$0xff] %v13591_v30  ;;  %v12586_v47 = vld [vmem:[%s15776_s1 + $0x88] sm:$0xff] }
 0x12f   :  { %1499 = vmatmul.mubr.f32.vlgmr.msra.gmra.mrb[40].mxu0 %v13455_v1 }
 0x130   :  { %1028 = vmatmul.mubr.f32.gmra.mrb[50].mxu1 %v13198_v29  ;;  %10090 = vmatpush3.bf16.msra.mxu0 %v13457_v11  ;;  %v1616_v29 = vld [vmem:[#allocation7 + $0xa0] sm:$0xff] }
 0x131   :  { %1033 = vmatprep.mubr.f32.mxu1 %v13203_v33  ;;  %10091 = vmatprep.subr.bf16.mxu0 %v15687_v61  ;;  %v1619_v33 = vld [vmem:[#allocation7 + $0xb8] sm:$0xff] }
 0x132   :  { %8699 = vmatprep.mubr.msk.f32.mxu0 %vm12811_vm4, %v15647_v0 }
 0x134   :  { %1034 = vmatmul.mubr.f32.gmra.mrb[52].mxu1 %v13212_v40  ;;  %10093 = vmatpush3.bf16.msra.mxu0 %v13464_v20  ;;  %v13484_v40 = vpack.c.bf16 %v1619_v33, %v1616_v29  ;;  %v13602_v29 = vpack.c.bf16 %v1410_v46, %v1407_v15  ;;  %v1413_v33 = vld [vmem:[%s15777_s4 + $0x160] sm:$0xff]  ;;  %v1614_v15 = vld [vmem:[#allocation7 + $0x90] sm:$0xff]  ;;  %v1617_v46 = vld [vmem:[#allocation7 + $0xa8] sm:$0xff] }
 0x135   :  { %1039 = vmatprep.mubr.f32.mxu1 %v13217_v44  ;;  %10094 = vmatprep.subr.bf16.mxu0 %v15687_v61  ;;  %v13487_v44 = vpack.c.bf16 %v1374_v51, %v1371_v49  ;;  %v1416_v49 = vld [vmem:[%s15777_s4 + $0x178] sm:$0xff]  ;;  %v1597_v51 = vld [vmem:[#allocation7 + $0x8] sm:$0xff] }
 0x136   :  { %15805 = vst [vmem:[#allocation49_spill] sm:$0xff] %v13602_v29 }
 0x137   :  { %15795 = vst [vmem:[#allocation39_spill] sm:$0xff] %v13487_v44 }
 0x138   :  { %1040 = vmatmul.mubr.f32.gmra.mrb[54].mxu1 %v13226_v50  ;;  %10096 = vmatpush3.bf16.msra.mxu0 %v13472_v25  ;;  %v1380_v50 = vld [vmem:[%s15777_s4 + $0x58] sm:$0xff] }
 0x139   :  { %1110 = vmatprep.mubr.f32.mxu1 %v15647_v0  ;;  %10097 = vmatprep.subr.bf16.mxu0 %v15687_v61  ;;  %v13505_v59 = vpack.c.bf16 %v1380_v50, %v1377_v54  ;;  %v13620_v54 = vpack.c.bf16 %v1416_v49, %v1413_v33  ;;  %v13623_v50 = vpack.c.bf16 %v1600_v43, %v1597_v51  ;;  %v1624_v33 = vld [vmem:[#allocation7 + $0xe0] sm:$0xff] }
 0x13a   :  { %v13660_v49 = vpack.c.bf16 %v1617_v46, %v1614_v15  ;;  %v1620_v43 = vld [vmem:[#allocation7 + $0xc0] sm:$0xff]  ;;  %v1639_v15 = vld [vmem:[#allocation7 + $0x158] sm:$0xff]  ;;  %v1642_v46 = vld [vmem:[#allocation7 + $0x170] sm:$0xff] }
 0x13b   :  { %15796 = vst [vmem:[#allocation40_spill] sm:$0xff] %v13505_v59  ;;  %15806 = vst [vmem:[#allocation50_spill] sm:$0xff] %v13620_v54 }
 0x13c   :  { %7669 = vmatmul.mubr.msk.f32.vlgmr.msra.gmra.mrb[40].mxu1 %vm322_vm3, %v12581_v55  ;;  %10099 = vmatpush3.bf16.msra.mxu0 %v13484_v40  ;;  %15807 = vst [vmem:[#allocation51_spill] sm:$0xff] %v13623_v50  ;;  %v1596_v55 = vld [vmem:[#allocation7] sm:$0xff] }
 0x13d   :  { %10034 = vmatpush3.bf16.msra.mxu1 %v13487_v44  ;;  %1116 = vmatprep.mubr.f32.mxu1 %v15647_v0 }
 0x13e   :  { %10035 = vmatprep.subr.bf16.mxu1 %v15687_v61  ;;  %10100 = vmatprep.subr.bf16.mxu0 %v15687_v61 }
 0x140   :  { %7670 = vmatmul.mubr.msk.f32.gmra.mrb[42].mxu1 %vm322_vm3, %v12582_v6  ;;  %10102 = vmatpush3.bf16.msra.mxu0 %v13501_v58  ;;  %v13634_v6 = vpack.c.bf16 %v1599_v60, %v1596_v55  ;;  %v1627_v55 = vld [vmem:[#allocation7 + $0xf8] sm:$0xff]  ;;  %v1630_v60 = vld [vmem:[#allocation7 + $0x110] sm:$0xff] }
 0x141   :  { %10037 = vmatpush3.bf16.msra.mxu1 %v13505_v59  ;;  %1122 = vmatprep.mubr.f32.mxu1 %v15647_v0  ;;  %v13672_v10 = vpack.c.bf16 %v1630_v60, %v1627_v55  ;;  %v1641_v55 = vld [vmem:[#allocation7 + $0x168] sm:$0xff] }
 0x142   :  { %10038 = vmatprep.subr.bf16.mxu1 %v15687_v61  ;;  %10103 = vmatprep.subr.bf16.mxu0 %v15687_v61 }
 0x144   :  { %7671 = vmatmul.mubr.msk.f32.gmra.mrb[44].mxu1 %vm322_vm3, %v12583_v53  ;;  %10105 = vmatpush3.bf16.msra.mxu0 %v13520_v8  ;;  %v1612_v53 = vld [vmem:[#allocation7 + $0x80] sm:$0xff] }
 0x145   :  { %10040 = vmatpush3.bf16.msra.mxu1 %v13524_v13  ;;  %1128 = vmatprep.mubr.f32.mxu1 %v15647_v0  ;;  %v13647_v22 = vpack.c.bf16 %v1612_v53, %v1609_v36  ;;  %v1636_v36 = vld [vmem:[#allocation7 + $0x140] sm:$0xff] }
 0x146   :  { %10041 = vmatprep.subr.bf16.mxu1 %v15687_v61  ;;  %10106 = vmatprep.subr.bf16.mxu0 %v15687_v61  ;;  %v13680_v4 = vpack.c.bf16 %v1636_v36, %v1633_v24 }
 0x148   :  { %7672 = vmatmul.mubr.msk.f32.gmra.mrb[46].mxu1 %vm322_vm3, %v12584_v48  ;;  %10108 = vmatpush3.bf16.msra.mxu0 %v13539_v39  ;;  %v1615_v48 = vld [vmem:[#allocation7 + $0x98] sm:$0xff]  ;;  %15808 = vst [vmem:[#allocation52_spill] sm:$0xff] %v13680_v4 }
 0x149   :  { %10043 = vmatpush3.bf16.msra.mxu1 %v13543_v19  ;;  %1134 = vmatprep.mubr.f32.mxu1 %v15647_v0 }
 0x14a   :  { %10044 = vmatprep.subr.bf16.mxu1 %v15687_v61  ;;  %10109 = vmatprep.subr.bf16.mxu0 %v15687_v61 }
 0x14c   :  { %7673 = vmatmul.mubr.msk.f32.gmra.mrb[48].mxu1 %vm322_vm3, %v12585_v38  ;;  %10111 = vmatpush3.bf16.msra.mxu0 %v13558_v52  ;;  %v13656_v38 = vpack.c.bf16 %v1618_v35, %v1615_v48  ;;  %v1635_v48 = vld [vmem:[#allocation7 + $0x138] sm:$0xff] }
 0x14d   :  { %10046 = vmatpush3.bf16.msra.mxu1 %v13562_v32  ;;  %1140 = vmatprep.mubr.f32.mxu1 %v15647_v0 }
 0x14e   :  { %10047 = vmatprep.subr.bf16.mxu1 %v15687_v61  ;;  %10113 = vmatprep.subr.bf16.mxu0 %v13270_v2 }
 0x14f   :  { %8700 = vmatmul.mubr.f32.vlgmr.msra.gmra.mrb[42].mxu0 %v13591_v30 }
 0x150   :  { %7674 = vmatmul.mubr.msk.f32.gmra.mrb[50].mxu1 %vm322_vm3, %v12586_v47  ;;  %10115 = vmatpush1.bf16.msra.mxu0 %v13300_v7  ;;  %v1621_v47 = vld [vmem:[#allocation7 + $0xc8] sm:$0xff] }
 0x151   :  { %10049 = vmatpush3.bf16.msra.mxu1 %v13579_v42  ;;  %1146 = vmatprep.mubr.f32.mxu1 %v15647_v0  ;;  %v13664_v51 = vpack.c.bf16 %v1624_v33, %v1621_v47  ;;  %v13687_v33 = vpack.c.bf16 %v1635_v48, %v1632_v31 }
 0x152   :  { %10050 = vmatprep.subr.bf16.mxu1 %v15687_v61  ;;  %10117 = vmatprep.subr.bf16.mxu0 %v13302_v9 }
 0x153   :  { %1887 = vmatprep.mubr.f32.mxu0 %v15647_v0  ;;  %15809 = vst [vmem:[#allocation53_spill] sm:$0xff] %v13687_v33 }
 0x154   :  { %7675 = vmatmul.mubr.msk.f32.gmra.mrb[52].mxu1 %vm322_vm3, %v12587_v5  ;;  %10119 = vmatpush1.bf16.msra.mxu0 %v13319_v23  ;;  %v1623_v5 = vld [vmem:[#allocation7 + $0xd8] sm:$0xff] }
 0x155   :  { %10052 = vmatpush3.bf16.msra.mxu1 %v13602_v29  ;;  %1152 = vmatprep.mubr.f32.mxu1 %v15647_v0  ;;  %v13668_v62 = vpack.c.bf16 %v1623_v5, %v1620_v43  ;;  %v13690_v43 = vpack.c.bf16 %v1642_v46, %v1639_v15  ;;  %v1638_v5 = vld [vmem:[#allocation7 + $0x150] sm:$0xff] }
 0x156   :  { %10053 = vmatprep.subr.bf16.mxu1 %v15687_v61  ;;  %10121 = vmatprep.subr.bf16.mxu0 %v13324_v27 }
 0x157   :  { %15810 = vst [vmem:[#allocation54_spill] sm:$0xff] %v13690_v43 }
 0x158   :  { %7676 = vmatmul.mubr.msk.f32.gmra.mrb[54].mxu1 %vm322_vm3, %v12588_v63  ;;  %10123 = vmatpush1.bf16.msra.mxu0 %v13341_v41  ;;  %v1626_v63 = vld [vmem:[#allocation7 + $0xf0] sm:$0xff] }
 0x159   :  { %10055 = vmatpush3.bf16.msra.mxu1 %v13620_v54  ;;  %8664 = vmatprep.mubr.msk.f32.mxu1 %vm12811_vm4, %v15647_v0  ;;  %v13676_v53 = vpack.c.bf16 %v1629_v18, %v1626_v63  ;;  %v13697_v18 = vpack.c.bf16 %v1641_v55, %v1638_v5 }
 0x15a   :  { %10057 = vmatprep.subr.bf16.mxu1 %v13623_v50  ;;  %10125 = vmatprep.subr.bf16.mxu0 %v13346_v45 }
 0x15b   :  { %15811 = vst [vmem:[#allocation55_spill] sm:$0xff] %v13697_v18 }
 0x15c   :  { %8665 = vmatmul.mubr.f32.vlgmr.msra.gmra.mrb[56].mxu1 %v13455_v1  ;;  %10127 = vmatpush1.bf16.msra.mxu0 %v13363_v57 }
 0x15d   :  { %10059 = vmatpush1.bf16.msra.mxu1 %v13634_v6  ;;  %1725 = vmatprep.mubr.f32.mxu1 %v15647_v0 }
 0x15e   :  { %10061 = vmatprep.subr.bf16.mxu1 %v13637_v14  ;;  %10129 = vmatprep.subr.bf16.mxu0 %v13374_v56 }
 0x160   :  { %10131 = vmatpush1.bf16.msra.mxu0 %v13386_v12 }
 0x161   :  { %10063 = vmatpush1.bf16.msra.mxu1 %v13643_v21  ;;  %10133 = vmatprep.subr.bf16.mxu0 %v13389_v16 }
 0x162   :  { %10065 = vmatprep.subr.bf16.mxu1 %v13647_v22 }
 0x164   :  { %10135 = vmatpush1.bf16.msra.mxu0 %v13407_v26 }
 0x165   :  { %10067 = vmatpush1.bf16.msra.mxu1 %v13652_v37  ;;  %10137 = vmatprep.subr.bf16.mxu0 %v13411_v28 }
 0x166   :  { %10069 = vmatprep.subr.bf16.mxu1 %v13656_v38 }
 0x168   :  { %10139 = vmatpush1.bf16.msra.mxu0 %v13429_v34 }
 0x169   :  { %10071 = vmatpush1.bf16.msra.mxu1 %v13660_v49  ;;  %10141 = vmatprep.subr.bf16.mxu0 %v13433_v17  ;;  %v307_v17 = vlaneseq }
 0x16a   :  { %10073 = vmatprep.subr.bf16.mxu1 %v13664_v51 }
 0x16b   :  { %v308_v26 = vshrl.u32 %v307_v17, 7 }
 0x16c   :  { %10143 = vmatpush1.bf16.msra.mxu0 %v13446_v3 }
 0x16d   :  { %10075 = vmatpush1.bf16.msra.mxu1 %v13668_v62  ;;  %10200 = vmatprep.subr.bf16.mxu0 %v15687_v61  ;;  %v13741_v57 = vsub.s32 2, %v308_v26 }
 0x16e   :  { %10077 = vmatprep.subr.bf16.mxu1 %v13672_v10 }
 0x16f   :  { %v13682_v35 = vpop.f32.mrb[0].mxu1  ;;  %15812 = vst [vmem:[#allocation56_spill] sm:$0xff] %v13741_v57 }
 0x170   :  { %v13684_v47 = vpop.f32.mrb[1].mxu1 }
 0x171   :  { %10079 = vmatpush1.bf16.msra.mxu1 %v13676_v53 }
 0x172   :  { %10081 = vmatprep.subr.bf16.mxu1 %v13680_v4 }
 0x173   :  { %v13692_v60 = vpop.f32.mrb[2].mxu1 }
 0x174   :  { %v13694_v63 = vpop.f32.mrb[3].mxu1 }
 0x175   :  { %10083 = vmatpush1.bf16.msra.mxu1 %v13687_v33 }
 0x176   :  { %10085 = vmatprep.subr.bf16.mxu1 %v13690_v43 }
 0x177   :  { %v13700_v24 = vpop.f32.mrb[4].mxu1 }
 0x178   :  { %v13702_v36 = vpop.f32.mrb[5].mxu1 }
 0x179   :  { %10087 = vmatpush1.bf16.msra.mxu1 %v13697_v18 }
 0x17a   :  { %10144 = vmatprep.subr.bf16.mxu1 %v15687_v61 }
 0x17b   :  { %v13706_v31 = vpop.f32.mrb[6].mxu1 }
 0x17c   :  { %1726 = vmatmul.mubr.f32.vlgmr.msra.gmra.mrb[54].mxu1 %v13591_v30  ;;  %v13709_v48 = vpop.f32.mrb[7].mxu1 }
 0x17d   :  { %10146 = vmatpush3.bf16.msra.mxu1 %v13487_v44  ;;  %8734 = vmatprep.mubr.msk.f32.mxu1 %vm12811_vm4, %v15647_v0 }
 0x17e   :  { %10147 = vmatprep.subr.bf16.mxu1 %v15687_v61 }
 0x17f   :  { %v13715_v15 = vpop.f32.mrb[8].mxu1 }
 0x180   :  { %v13717_v46 = vpop.f32.mrb[9].mxu1 }
 0x181   :  { %10149 = vmatpush3.bf16.msra.mxu1 %v13505_v59  ;;  %v13753_v59 = vsub.s32 0, %v308_v26 }
 0x182   :  { %10150 = vmatprep.subr.bf16.mxu1 %v15687_v61 }
 0x183   :  { %v13721_v5 = vpop.f32.mrb[10].mxu1  ;;  %15814 = vst [vmem:[#allocation57_spill] sm:$0xff] %v13753_v59 }
 0x184   :  { %v13723_v55 = vpop.f32.mrb[11].mxu1 }
 0x185   :  { %10152 = vmatpush3.bf16.msra.mxu1 %v13524_v13 }
 0x186   :  { %10153 = vmatprep.subr.bf16.mxu1 %v15687_v61 }
 0x187   :  { %v13727_v3 = vpop.f32.mrb[12].mxu1 }
 0x188   :  { %v13729_v0 = vpop.f32.mrb[13].mxu1 }
 0x189   :  { %10155 = vmatpush3.bf16.msra.mxu1 %v13543_v19  ;;  %v305_v19 = vld [vmem:[%s15813_s14] sm:$0x7] }
 0x18a   :  { %10156 = vmatprep.subr.bf16.mxu1 %v15687_v61 }
 0x18b   :  { %v13733_v34 = vpop.f32.mrb[14].mxu1 }
 0x18c   :  { %v13735_v28 = vpop.f32.mrb[15].mxu1 }
 0x18d   :  { %10158 = vmatpush3.bf16.msra.mxu1 %v13562_v32  ;;  %v318_v32 = vrot.slane %v305_v19, %v13741_v57 }
 0x18e   :  { %10159 = vmatprep.subr.bf16.mxu1 %v15687_v61 }
 0x18f   :  { %v7785_v16 = vpop.f32.mrb[16].mxu1 }
 0x190   :  { %v7786_v12 = vpop.f32.mrb[17].mxu1 }
 0x191   :  { %v13739_v56 = vadd.f32 %v7786_v12, %v7785_v16  ;;  %10161 = vmatpush3.bf16.msra.mxu1 %v13579_v42 }
 0x192   :  { %10162 = vmatprep.subr.bf16.mxu1 %v15687_v61 }
 0x193   :  { %v7788_v45 = vpop.f32.mrb[18].mxu1 }
 0x194   :  { %v7789_v17 = vpop.f32.mrb[19].mxu1 }
 0x195   :  { %v7790_v13 = vadd.f32 %v7789_v17, %v7788_v45  ;;  %10164 = vmatpush3.bf16.msra.mxu1 %v13602_v29  ;;  %v13757_v17 = vsub.s32 1, %v308_v26 }
 0x196   :  { %10165 = vmatprep.subr.bf16.mxu1 %v15687_v61  ;;  %v13760_v61 = vrot.slane %v305_v19, %v13753_v59 }
 0x197   :  { %v7791_v12 = vpop.f32.mrb[20].mxu1  ;;  %v655_v16 = vadd.f32 %v7790_v13, %v318_v32  ;;  %15815 = vst [vmem:[#allocation58_spill] sm:$0xff] %v13757_v17 }
 0x198   :  { %v7792_v41 = vpop.f32.mrb[21].mxu1 }
 0x199   :  { %v7793_v27 = vadd.f32 %v7792_v41, %v7791_v12  ;;  %10167 = vmatpush3.bf16.msra.mxu1 %v13620_v54  ;;  %v13763_v41 = vrot.slane %v305_v19, %v13757_v17 }
 0x19a   :  { %10169 = vmatprep.subr.bf16.mxu1 %v13623_v50 }
 0x19b   :  { %v7794_v42 = vpop.f32.mrb[22].mxu1  ;;  %v13755_v23 = vadd.f32 %v7793_v27, %v318_v32 }
 0x19c   :  { %v7795_v45 = vpop.f32.mrb[23].mxu1 }
 0x19d   :  { %v7796_v9 = vadd.f32 %v7795_v45, %v7794_v42 }
 0x19f   :  { %v7797_v29 = vpop.f32.mrb[24].mxu1  ;;  %v665_v13 = vadd.f32 %v7796_v9, %v318_v32 }
 0x1a0   :  { %v7798_v44 = vpop.f32.mrb[25].mxu1 }
 0x1a1   :  { %v7799_v12 = vadd.f32 %v7798_v44, %v7797_v29  ;;  %v13778_v44 = vld [vmem:[%s15816_s27] sm:$0x7] }
 0x1a2   :  { %v423_v50 = vpop.f32.mrb[0].mxu0 }
 0x1a3   :  { %v424_v54 = vadd.f32 %v423_v50, %v13760_v61  ;;  %v7800_v7 = vpop.f32.mrb[26].mxu1  ;;  %v425_v27 = vpop.f32.mrb[1].mxu0  ;;  %v13766_v30 = vadd.f32 %v7799_v12, %v318_v32 }
 0x1a4   :  { %v426_v26 = vadd.f32 %v425_v27, %v13763_v41  ;;  %v7801_v42 = vpop.f32.mrb[27].mxu1 }
 0x1a5   :  { %v13770_v45 = vadd.f32 %v13682_v35, %v424_v54  ;;  %v7802_v2 = vadd.f32 %v7801_v42, %v7800_v7  ;;  %v13785_v35 = vrot.slane %v13778_v44, %v13753_v59  ;;  %v13790_v42 = vrot.slane %v13778_v44, %v13757_v17 }
 0x1a6   :  { %v13773_v9 = vadd.f32 %v13684_v47, %v426_v26  ;;  %v429_v19 = vpop.f32.mrb[2].mxu0 }
 0x1a7   :  { %v430_v29 = vadd.f32 %v429_v19, %v13760_v61  ;;  %v7803_v50 = vpop.f32.mrb[28].mxu1  ;;  %v431_v12 = vpop.f32.mrb[3].mxu0  ;;  %v675_v52 = vadd.f32 %v7802_v2, %v318_v32 }
 0x1a8   :  { %v432_v27 = vadd.f32 %v431_v12, %v13763_v41  ;;  %v7804_v18 = vpop.f32.mrb[29].mxu1 }
 0x1a9   :  { %v543_v54 = vadd.f32 %v13692_v60, %v430_v29  ;;  %v7805_v7 = vadd.f32 %v7804_v18, %v7803_v50 }
 0x1aa   :  { %v545_v47 = vadd.f32 %v13694_v63, %v432_v27  ;;  %v435_v26 = vpop.f32.mrb[4].mxu0 }
 0x1ab   :  { %v436_v19 = vadd.f32 %v435_v26, %v13760_v61  ;;  %v7806_v2 = vpop.f32.mrb[30].mxu1  ;;  %v437_v43 = vpop.f32.mrb[5].mxu0  ;;  %v680_v12 = vadd.f32 %v7805_v7, %v318_v32  ;;  %v13794_v39 = vadd.f32 %v13785_v35, %v543_v54  ;;  %v650_v7 = vadd.f32 %v13739_v56, %v318_v32 }
 0x1ac   :  { %v438_v60 = vadd.f32 %v437_v43, %v13763_v41  ;;  %v7807_v18 = vpop.f32.mrb[31].mxu1  ;;  %v13798_v29 = vadd.f32 %v13790_v42, %v545_v47 }
 0x1ad   :  { %15817 = vst [vmem:[#allocation59_spill] sm:$0xff] %v13794_v39  ;;  %v549_v63 = vadd.f32 %v13700_v24, %v436_v19  ;;  %v7808_v50 = vadd.f32 %v7807_v18, %v7806_v2 }
 0x1ae   :  { %15818 = vst [vmem:[#allocation60_spill] sm:$0xff] %v13798_v29  ;;  %v551_v27 = vadd.f32 %v13702_v36, %v438_v60  ;;  %v441_v33 = vpop.f32.mrb[6].mxu0 }
 0x1af   :  { %v442_v26 = vadd.f32 %v441_v33, %v13760_v61  ;;  %v8598_v4 = vpop.f32.mrb[32].mxu1  ;;  %v443_v8 = vpop.f32.mrb[7].mxu0  ;;  %v685_v54 = vadd.f32 %v7808_v50, %v318_v32  ;;  %v13805_v39 = vadd.f32 %v13785_v35, %v549_v63 }
 0x1b0   :  { %v13807_v43 = vadd.f32 %v8598_v4, %v655_v16  ;;  %v444_v47 = vadd.f32 %v443_v8, %v13763_v41  ;;  %v754_v29 = vpop.f32.mrb[33].mxu1  ;;  %v13811_v24 = vadd.f32 %v13790_v42, %v551_v27 }
 0x1b1   :  { %15819 = vst [vmem:[#allocation61_spill] sm:$0xff] %v13805_v39  ;;  %v555_v36 = vadd.f32 %v13706_v31, %v442_v26  ;;  %v13814_v19 = vadd.f32 %v754_v29, %v650_v7 }
 0x1b2   :  { %15820 = vst [vmem:[#allocation62_spill] sm:$0xff] %v13811_v24  ;;  %v557_v33 = vadd.f32 %v13709_v48, %v444_v47  ;;  %v447_v2 = vpop.f32.mrb[8].mxu0 }
 0x1b3   :  { %v448_v56 = vadd.f32 %v447_v2, %v13760_v61  ;;  %v8601_v32 = vpop.f32.mrb[34].mxu1  ;;  %v449_v60 = vpop.f32.mrb[9].mxu0  ;;  %v13819_v4 = vadd.f32 %v13785_v35, %v555_v36 }
 0x1b4   :  { %v13821_v16 = vadd.f32 %v8601_v32, %v665_v13  ;;  %v450_v8 = vadd.f32 %v449_v60, %v13763_v41  ;;  %v764_v18 = vpop.f32.mrb[35].mxu1  ;;  %v13825_v63 = vadd.f32 %v13790_v42, %v557_v33 }
 0x1b5   :  { %15821 = vst [vmem:[#allocation63_spill] sm:$0xff] %v13819_v4  ;;  %v561_v31 = vadd.f32 %v13715_v15, %v448_v56  ;;  %v13829_v48 = vadd.f32 %v764_v18, %v13755_v23 }
 0x1b6   :  { %15822 = vst [vmem:[#allocation64_spill] sm:$0xff] %v13821_v16  ;;  %15823 = vst [vmem:[#allocation65_spill] sm:$0xff] %v13825_v63  ;;  %v563_v29 = vadd.f32 %v13717_v46, %v450_v8  ;;  %v453_v50 = vpop.f32.mrb[10].mxu0  ;;  %v15879_v16 = vld [vmem:[#allocation51_spill] sm:$0xff] }
 0x1b7   :  { %15824 = vst [vmem:[#allocation66_spill] sm:$0xff] %v13829_v48  ;;  %v454_v27 = vadd.f32 %v453_v50, %v13760_v61  ;;  %v8604_v26 = vpop.f32.mrb[36].mxu1  ;;  %v455_v7 = vpop.f32.mrb[11].mxu0  ;;  %v13834_v13 = vadd.f32 %v13785_v35, %v561_v31 }
 0x1b8   :  { %v13836_v47 = vadd.f32 %v8604_v26, %v675_v52  ;;  %v456_v36 = vadd.f32 %v455_v7, %v13763_v41  ;;  %v774_v33 = vpop.f32.mrb[37].mxu1  ;;  %v13840_v15 = vadd.f32 %v13790_v42, %v563_v29 }
 0x1b9   :  { %15825 = vst [vmem:[#allocation67_spill] sm:$0xff] %v13834_v13  ;;  %v567_v23 = vadd.f32 %v13721_v5, %v454_v27  ;;  %v13844_v46 = vadd.f32 %v774_v33, %v13766_v30  ;;  %v15877_v13 = vld [vmem:[#allocation38_spill] sm:$0xff] }
 0x1ba   :  { %15826 = vst [vmem:[#allocation68_spill] sm:$0xff] %v13836_v47  ;;  %15827 = vst [vmem:[#allocation69_spill] sm:$0xff] %v13840_v15  ;;  %v569_v2 = vadd.f32 %v13723_v55, %v456_v36  ;;  %v459_v56 = vpop.f32.mrb[12].mxu0  ;;  %v15876_v15 = vld [vmem:[#allocation37_spill] sm:$0xff] }
 0x1bb   :  { %15828 = vst [vmem:[#allocation70_spill] sm:$0xff] %v13844_v46  ;;  %v460_v32 = vadd.f32 %v459_v56, %v13760_v61  ;;  %v8607_v60 = vpop.f32.mrb[38].mxu1  ;;  %v461_v8 = vpop.f32.mrb[13].mxu0  ;;  %v13849_v52 = vadd.f32 %v13785_v35, %v567_v23  ;;  %v15875_v46 = vld [vmem:[#allocation49_spill] sm:$0xff] }
 0x1bc   :  { %v13851_v18 = vadd.f32 %v8607_v60, %v685_v54  ;;  %v462_v31 = vadd.f32 %v461_v8, %v13763_v41  ;;  %v784_v29 = vpop.f32.mrb[39].mxu1  ;;  %v13855_v5 = vadd.f32 %v13790_v42, %v569_v2  ;;  %v13865_v54 = vld [vmem:[%s15627_s8] sm:$0x7]  ;;  %s12743_s8 = scalar_lea.vmem %s7629_s15, 128 }
 0x1bd   :  { %15829 = vst [vmem:[#allocation71_spill] sm:$0xff] %v13849_v52  ;;  %v573_v30 = vadd.f32 %v13727_v3, %v460_v32  ;;  %v13858_v50 = vadd.f32 %v784_v29, %v680_v12  ;;  %v15873_v52 = vld [vmem:[#allocation35_spill] sm:$0xff]  ;;  %p12744_p0 = scmp.ne.s32.totalorder %s7629_s15, %s12743_s8  ;;  %p12749_p2 = scmp.lt.s32.totalorder %s12743_s8, %s12743_s8 }
 0x1be   :  { %15830 = vst [vmem:[#allocation72_spill] sm:$0xff] %v13851_v18  ;;  %15831 = vst [vmem:[#allocation73_spill] sm:$0xff] %v13855_v5  ;;  %v575_v55 = vadd.f32 %v13729_v0, %v462_v31  ;;  %v465_v27 = vpop.f32.mrb[14].mxu0  ;;  %v15872_v5 = vld [vmem:[#allocation47_spill] sm:$0xff] }
 0x1bf   :  { %15832 = vst [vmem:[#allocation74_spill] sm:$0xff] %v13858_v50  ;;  %v466_v26 = vadd.f32 %v465_v27, %v13760_v61  ;;  %v467_v7 = vpop.f32.mrb[15].mxu0  ;;  %v13868_v36 = vadd.f32 %v13785_v35, %v573_v30  ;;  %v920_v61 = vrot.slane %v13865_v54, %v13741_v57  ;;  %p12750_p3 = por %p12749_p2, %p12748_p1 }
 0x1c0   :  { %v468_v33 = vadd.f32 %v467_v7, %v13763_v41  ;;  %v13872_v3 = vadd.f32 %v13790_v42, %v575_v55 }
 0x1c1   :  { %15833 = vst [vmem:[#allocation75_spill] sm:$0xff] %v13868_v36  ;;  %v579_v12 = vadd.f32 %v13733_v34, %v466_v26  ;;  %p12751_p4 = pnand %p12750_p3, %p12744_p0 }
 0x1c2   :  { %15834 = vst [vmem:[#allocation76_spill] sm:$0xff] %v13872_v3  ;;  %v581_v0 = vadd.f32 %v13735_v28, %v468_v33  ;;  %v7855_v23 = vpop.f32.mrb[16].mxu0 }
 0x1c3   :  { %v7856_v2 = vpop.f32.mrb[17].mxu0  ;;  %v13879_v56 = vadd.f32 %v13785_v35, %v579_v12 }
 0x1c4   :  { %v7857_v32 = vadd.f32 %v7856_v2, %v7855_v23  ;;  %v13882_v60 = vadd.f32 %v13790_v42, %v581_v0 }
 0x1c5   :  { %15835 = vst [vmem:[#allocation77_spill] sm:$0xff] %v13879_v56 }
 0x1c6   :  { %15836 = vst [vmem:[#allocation78_spill] sm:$0xff] %v13882_v60  ;;  %v7858_v41 = vpop.f32.mrb[18].mxu0  ;;  %v1226_v8 = vadd.f32 %v7857_v32, %v920_v61 }
 0x1c7   :  { %v7859_v31 = vpop.f32.mrb[19].mxu0 }
 0x1c8   :  { %v7860_v29 = vadd.f32 %v7859_v31, %v7858_v41 }
 0x1ca   :  { %v7861_v30 = vpop.f32.mrb[20].mxu0  ;;  %v1231_v34 = vadd.f32 %v7860_v29, %v920_v61 }
 0x1cb   :  { %v7862_v55 = vpop.f32.mrb[21].mxu0 }
 0x1cc   :  { %v7863_v28 = vadd.f32 %v7862_v55, %v7861_v30 }
 0x1ce   :  { %v7864_v27 = vpop.f32.mrb[22].mxu0  ;;  %v1236_v26 = vadd.f32 %v7863_v28, %v920_v61 }
 0x1cf   :  { %v7865_v7 = vpop.f32.mrb[23].mxu0 }
 0x1d0   :  { %v7866_v33 = vadd.f32 %v7865_v7, %v7864_v27 }
 0x1d2   :  { %v7867_v18 = vpop.f32.mrb[24].mxu0  ;;  %v1241_v50 = vadd.f32 %v7866_v33, %v920_v61 }
 0x1d3   :  { %v7868_v12 = vpop.f32.mrb[25].mxu0 }
 0x1d4   :  { %v7869_v56 = vadd.f32 %v7868_v12, %v7867_v18 }
 0x1d6   :  { %v7870_v23 = vpop.f32.mrb[26].mxu0  ;;  %v1246_v2 = vadd.f32 %v7869_v56, %v920_v61 }
 0x1d7   :  { %v7871_v0 = vpop.f32.mrb[27].mxu0 }
 0x1d8   :  { %v7872_v60 = vadd.f32 %v7871_v0, %v7870_v23 }
 0x1da   :  { %v7873_v3 = vpop.f32.mrb[28].mxu0  ;;  %v1251_v32 = vadd.f32 %v7872_v60, %v920_v61 }
 0x1db   :  { %v7874_v36 = vpop.f32.mrb[29].mxu0 }
 0x1dc   :  { %v7875_v41 = vadd.f32 %v7874_v36, %v7873_v3 }
 0x1de   :  { %v7876_v31 = vpop.f32.mrb[30].mxu0  ;;  %v1256_v29 = vadd.f32 %v7875_v41, %v920_v61 }
 0x1df   :  { %v7877_v47 = vpop.f32.mrb[31].mxu0 }
 0x1e0   :  { %v7878_v30 = vadd.f32 %v7877_v47, %v7876_v31 }
 0x1e2   :  { %v8622_v55 = vpop.f32.mrb[32].mxu0  ;;  %v1261_v3 = vadd.f32 %v7878_v30, %v920_v61 }
 0x1e3   :  { %v13884_v28 = vadd.f32 %v8622_v55, %v1231_v34  ;;  %v1330_v27 = vpop.f32.mrb[33].mxu0 }
 0x1e4   :  { %v13886_v7 = vadd.f32 %v1330_v27, %v1226_v8 }
 0x1e5   :  { %15837 = vst [vmem:[#allocation79_spill] sm:$0xff] %v13884_v28 }
 0x1e6   :  { %15838 = vst [vmem:[#allocation80_spill] sm:$0xff] %v13886_v7  ;;  %v8625_v33 = vpop.f32.mrb[34].mxu0 }
 0x1e7   :  { %v13888_v18 = vadd.f32 %v8625_v33, %v1241_v50  ;;  %v1340_v56 = vpop.f32.mrb[35].mxu0  ;;  %v12018_v50 = vadd.f32 %v13785_v35, %v13770_v45  ;;  %v13908_v45 = vrot.slane %v13778_v44, %v13741_v57  ;;  %v1644_v44 = vld [vmem:[%s15628_s9] sm:$0x7] }
 0x1e8   :  { %v13890_v12 = vadd.f32 %v1340_v56, %v1236_v26  ;;  %v12022_v26 = vadd.f32 %v13790_v42, %v13773_v9 }
 0x1e9   :  { %15839 = vst [vmem:[#allocation81_spill] sm:$0xff] %v13888_v18  ;;  %v15874_v18 = vld [vmem:[#allocation36_spill] sm:$0xff] }
 0x1ea   :  { %15840 = vst [vmem:[#allocation82_spill] sm:$0xff] %v13890_v12  ;;  %v8628_v23 = vpop.f32.mrb[36].mxu0 }
 0x1eb   :  { %v13892_v60 = vadd.f32 %v8628_v23, %v1251_v32  ;;  %v1350_v36 = vpop.f32.mrb[37].mxu0 }
 0x1ec   :  { %v13894_v0 = vadd.f32 %v1350_v36, %v1246_v2 }
 0x1ed   :  { %15841 = vst [vmem:[#allocation83_spill] sm:$0xff] %v13892_v60  ;;  %v15880_v60 = vld [vmem:[#allocation59_spill] sm:$0xff] }
 0x1ee   :  { %15842 = vst [vmem:[#allocation84_spill] sm:$0xff] %v13894_v0  ;;  %v8631_v47 = vpop.f32.mrb[38].mxu0  ;;  %v15878_v0 = vld [vmem:[#allocation50_spill] sm:$0xff] }
 0x1ef   :  { %v13896_v41 = vadd.f32 %v8631_v47, %v1261_v3  ;;  %v1360_v34 = vpop.f32.mrb[39].mxu0 }
 0x1f0   :  { %v13898_v31 = vadd.f32 %v1360_v34, %v1256_v29 }
 0x202   :  { %v1500_v8 = vpop.f32.mrb[40].mxu0 }
 0x203   :  { %v12019_v55 = vadd.f32 %v12018_v50, %v1500_v8  ;;  %v1502_v32 = vpop.f32.mrb[41].mxu0 }
 0x204   :  { %v12023_v27 = vadd.f32 %v12022_v26, %v1502_v32 }
 0x205   :  { %v7686_v33 = vmul.f32 -1.442695, %v12019_v55 }
 0x206   :  { %v7687_v61 = vmul.f32 -1.442695, %v12023_v27 }
 0x207   :  { %12257 = vpow2.f32 %v7686_v33  ;;  %v1649_v33 = vrot.slane %v1644_v44, %v13753_v59 }
 0x208   :  { %12259 = vpow2.f32 %v7687_v61  ;;  %v15845_v61 = vmov 0.0  }
 0x211   :  { %v12258_v2 = vpop.eup %12257 }
 0x212   :  { %v1583_v56 = vadd.f32 1.0, %v12258_v2  ;;  %v12260_v23 = vpop.eup %12259  ;;  %v916_v2 = vrot.slane %v13865_v54, %v13757_v17 }
 0x213   :  { %v1584_v35 = vadd.f32 1.0, %v12260_v23 }
 0x214   :  { %12261 = vrcp.f32 %v1583_v56  ;;  %v1653_v56 = vrot.slane %v1644_v44, %v13757_v17 }
 0x215   :  { %12263 = vrcp.f32 %v1584_v35 }
 0x216   :  { %v13941_v35 = vadd.f32 %v1653_v56, %v916_v2  ;;  %v15853_v2 = vld [vmem:[#allocation23_spill] sm:$0xff]  ;;  %v13968_v56 = vrot.slane %v1644_v44, %v13741_v57  ;;  %v15856_v44 = vld [vmem:[#allocation24_spill] sm:$0xff]  ;;  %v15871_v57 = vld [vmem:[#allocation34_spill] sm:$0xff] }
 0x21e   :  { %v12262_v3 = vpop.eup %12261 }
 0x21f   :  { %v12264_v50 = vpop.eup %12263 }
 0x220   :  { %v1592_v8 = vsub.f32 1.0, %v12264_v50  ;;  %v1594_v55 = vmul.f32 %v12264_v50, %v13455_v1  ;;  %v912_v1 = vrot.slane %v13865_v54, %v13753_v59  ;;  %v15854_v59 = vld [vmem:[#allocation48_spill] sm:$0xff] }
 0x222   :  { %v13904_v30 = vpop.f32.mrb[42].mxu0 }
 0x223   :  { %v8701_v29 = vpop.f32.mrb[43].mxu0 }
 0x224   :  { %v13937_v29 = vadd.f32 %v1649_v33, %v912_v1  ;;  %v15851_v1 = vld [vmem:[#allocation55_spill] sm:$0xff]  ;;  %v15852_v33 = vld [vmem:[#allocation45_spill] sm:$0xff] }
 0x22f   :  { %v1571_v9 = vpop.f32.mrb[56].mxu1 }
 0x230   :  { %v1572_v42 = vadd.f32 %v1571_v9, %v13908_v45  ;;  %v8666_v36 = vpop.f32.mrb[57].mxu1 }
 0x232   :  { %v1589_v47 = vmul.f32 %v12262_v3, %v1572_v42 }
 0x234   :  { %v1590_v34 = vadd.f32 %v1589_v47, %v13814_v19  ;;  %v15844_v19 = vmov 0.0|0.0   ;;  %v15846_v47 = vld [vmem:[#allocation41_spill] sm:$0xff] }
 0x236   :  { %12265 = vtanh.f32 %v1590_v34  ;;  %v15847_v34 = vld [vmem:[#allocation52_spill] sm:$0xff] }
 0x240   :  { %v12266_v26 = vpop.eup %12265 }
 0x241   :  { %v1593_v32 = vmul.f32 %v12266_v26, %v1592_v8  ;;  %v15848_v8 = vld [vmem:[#allocation53_spill] sm:$0xff]  ;;  %v15849_v26 = vld [vmem:[#allocation43_spill] sm:$0xff] }
 0x243   :  { %v13913_v27 = vadd.f32 %v1594_v55, %v1593_v32  ;;  %v15850_v32 = vld [vmem:[#allocation54_spill] sm:$0xff] }
 0x245   :  { %15843 = vst [vmem:[#allocation85_spill] sm:$0xff] %v13913_v27  ;;  %1888 = vmatmul.mubr.f32.vlgmr.msra.gmra.mrb[44].mxu0 %v13913_v27  ;;  %8735 = vmatmul.mubr.f32.vlgmr.msra.gmra.mrb[58].mxu1 %v13913_v27 }
 0x246   :  { %10171 = vmatpush1.bf16.msra.mxu1 %v13634_v6  ;;  %10202 = vmatpush3.bf16.msra.mxu0 %v13457_v11 }
 0x247   :  { %10173 = vmatprep.subr.bf16.mxu1 %v13637_v14  ;;  %10203 = vmatprep.subr.bf16.mxu0 %v15844_v19 }
 0x248   :  { %2049 = vmatprep.mubr.f32.mxu1 %v15845_v61  ;;  %8769 = vmatprep.mubr.msk.f32.mxu0 %vm12811_vm4, %v15845_v61 }
 0x24a   :  { %10175 = vmatpush1.bf16.msra.mxu1 %v13643_v21  ;;  %10205 = vmatpush3.bf16.msra.mxu0 %v13464_v20 }
 0x24b   :  { %10177 = vmatprep.subr.bf16.mxu1 %v13647_v22  ;;  %10206 = vmatprep.subr.bf16.mxu0 %v15844_v19 }
 0x24e   :  { %10179 = vmatpush1.bf16.msra.mxu1 %v13652_v37  ;;  %10208 = vmatpush3.bf16.msra.mxu0 %v13472_v25 }
 0x24f   :  { %v1727_v23 = vpop.f32.mrb[54].mxu1  ;;  %10181 = vmatprep.subr.bf16.mxu1 %v13656_v38  ;;  %10209 = vmatprep.subr.bf16.mxu0 %v15844_v19 }
 0x250   :  { %v12109_v54 = vadd.f32 %v13937_v29, %v1727_v23  ;;  %v1729_v9 = vpop.f32.mrb[55].mxu1 }
 0x251   :  { %v12111_v36 = vadd.f32 %v13941_v35, %v1729_v9  ;;  %v1799_v9 = vadd.f32 %v13904_v30, %v13968_v56  ;;  %v15857_v30 = vld [vmem:[#allocation39_spill] sm:$0xff] }
 0x252   :  { %v7688_v42 = vmul.f32 -1.442695, %v12109_v54  ;;  %10183 = vmatpush1.bf16.msra.mxu1 %v13660_v49  ;;  %10211 = vmatpush3.bf16.msra.mxu0 %v13484_v40 }
 0x253   :  { %10185 = vmatprep.subr.bf16.mxu1 %v13664_v51  ;;  %10212 = vmatprep.subr.bf16.mxu0 %v15844_v19  ;;  %v7689_v3 = vmul.f32 -1.442695, %v12111_v36 }
 0x254   :  { %12267 = vpow2.f32 %v7688_v42 }
 0x255   :  { %12269 = vpow2.f32 %v7689_v3 }
 0x256   :  { %10187 = vmatpush1.bf16.msra.mxu1 %v13668_v62  ;;  %10214 = vmatpush3.bf16.msra.mxu0 %v13501_v58 }
 0x257   :  { %10189 = vmatprep.subr.bf16.mxu1 %v13672_v10  ;;  %10215 = vmatprep.subr.bf16.mxu0 %v15844_v19 }
 0x25a   :  { %10191 = vmatpush1.bf16.msra.mxu1 %v13676_v53  ;;  %10217 = vmatpush3.bf16.msra.mxu0 %v15846_v47 }
 0x25b   :  { %10193 = vmatprep.subr.bf16.mxu1 %v15847_v34  ;;  %10218 = vmatprep.subr.bf16.mxu0 %v15844_v19 }
 0x25e   :  { %v12268_v50 = vpop.eup %12267  ;;  %10195 = vmatpush1.bf16.msra.mxu1 %v15848_v8  ;;  %10220 = vmatpush3.bf16.msra.mxu0 %v15849_v26 }
 0x25f   :  { %v1810_v55 = vadd.f32 1.0, %v12268_v50  ;;  %10197 = vmatprep.subr.bf16.mxu1 %v15850_v32  ;;  %10221 = vmatprep.subr.bf16.mxu0 %v15844_v19  ;;  %v12270_v23 = vpop.eup %12269 }
 0x260   :  { %v1811_v54 = vadd.f32 1.0, %v12270_v23  ;;  %v15858_v23 = vld [vmem:[#allocation25_spill] sm:$0xff] }
 0x261   :  { %12271 = vrcp.f32 %v1810_v55 }
 0x262   :  { %10199 = vmatpush1.bf16.msra.mxu1 %v15851_v1  ;;  %10223 = vmatpush3.bf16.msra.mxu0 %v15852_v33  ;;  %12273 = vrcp.f32 %v1811_v54  ;;  %v15864_v54 = vld [vmem:[#allocation29_spill] sm:$0xff] }
 0x263   :  { %10225 = vmatprep.subr.bf16.mxu0 %v15853_v2  ;;  %10256 = vmatprep.subr.bf16.mxu1 %v15844_v19 }
 0x26b   :  { %v12272_v42 = vpop.eup %12271 }
 0x26c   :  { %v1816_v36 = vmul.f32 %v12272_v42, %v1799_v9  ;;  %v12274_v50 = vpop.eup %12273  ;;  %v15865_v9 = vld [vmem:[#allocation30_spill] sm:$0xff]  ;;  %v15866_v42 = vld [vmem:[#allocation44_spill] sm:$0xff] }
 0x26d   :  { %v1819_v55 = vsub.f32 1.0, %v12274_v50  ;;  %v1821_v7 = vmul.f32 %v12274_v50, %v15854_v59  ;;  %v15859_v59 = vld [vmem:[#allocation26_spill] sm:$0xff] }
 0x26e   :  { %v1817_v3 = vadd.f32 %v1816_v36, %v13896_v41  ;;  %v15863_v41 = vld [vmem:[#allocation42_spill] sm:$0xff]  ;;  %v15867_v36 = vld [vmem:[#allocation31_spill] sm:$0xff] }
 0x26f   :  { %v15869_v50 = vld [vmem:[#allocation46_spill] sm:$0xff] }
 0x270   :  { %12275 = vtanh.f32 %v1817_v3  ;;  %v15868_v3 = vld [vmem:[#allocation32_spill] sm:$0xff] }
 0x27a   :  { %v12276_v17 = vpop.eup %12275 }
 0x27b   :  { %v1820_v28 = vmul.f32 %v12276_v17, %v1819_v55  ;;  %v15860_v17 = vld [vmem:[#allocation40_spill] sm:$0xff]  ;;  %v15870_v55 = vld [vmem:[#allocation33_spill] sm:$0xff] }
 0x27d   :  { %v13974_v12 = vadd.f32 %v1821_v7, %v1820_v28  ;;  %v15861_v28 = vld [vmem:[#allocation27_spill] sm:$0xff]  ;;  %v15862_v7 = vld [vmem:[#allocation28_spill] sm:$0xff] }
 0x27f   :  { %15855 = vst [vmem:[#allocation41_spill] sm:$0xff] %v13974_v12  ;;  %2050 = vmatmul.mubr.f32.vlgmr.msra.gmra.mrb[52].mxu1 %v13974_v12  ;;  %8770 = vmatmul.mubr.f32.vlgmr.msra.gmra.mrb[46].mxu0 %v13974_v12 }
 0x280   :  { %10227 = vmatpush1.bf16.msra.mxu0 %v15856_v44  ;;  %10258 = vmatpush3.bf16.msra.mxu1 %v15857_v30 }
 0x281   :  { %10229 = vmatprep.subr.bf16.mxu0 %v15858_v23  ;;  %10259 = vmatprep.subr.bf16.mxu1 %v15844_v19 }
 0x282   :  { %2211 = vmatprep.mubr.f32.mxu0 %v15845_v61  ;;  %8804 = vmatprep.mubr.msk.f32.mxu1 %vm12811_vm4, %v15845_v61 }
 0x284   :  { %10231 = vmatpush1.bf16.msra.mxu0 %v15859_v59  ;;  %10261 = vmatpush3.bf16.msra.mxu1 %v15860_v17 }
 0x285   :  { %10233 = vmatprep.subr.bf16.mxu0 %v15861_v28  ;;  %10262 = vmatprep.subr.bf16.mxu1 %v15844_v19 }
 0x288   :  { %10235 = vmatpush1.bf16.msra.mxu0 %v15862_v7  ;;  %10264 = vmatpush3.bf16.msra.mxu1 %v15863_v41 }
 0x289   :  { %10237 = vmatprep.subr.bf16.mxu0 %v15864_v54  ;;  %10265 = vmatprep.subr.bf16.mxu1 %v15844_v19 }
 0x28c   :  { %10239 = vmatpush1.bf16.msra.mxu0 %v15865_v9  ;;  %10267 = vmatpush3.bf16.msra.mxu1 %v15866_v42 }
 0x28d   :  { %10241 = vmatprep.subr.bf16.mxu0 %v15867_v36  ;;  %10268 = vmatprep.subr.bf16.mxu1 %v15844_v19 }
 0x290   :  { %10243 = vmatpush1.bf16.msra.mxu0 %v15868_v3  ;;  %10270 = vmatpush3.bf16.msra.mxu1 %v15869_v50 }
 0x291   :  { %10245 = vmatprep.subr.bf16.mxu0 %v15870_v55  ;;  %10271 = vmatprep.subr.bf16.mxu1 %v15844_v19 }
 0x294   :  { %10247 = vmatpush1.bf16.msra.mxu0 %v15871_v57  ;;  %10273 = vmatpush3.bf16.msra.mxu1 %v15872_v5 }
 0x295   :  { %10249 = vmatprep.subr.bf16.mxu0 %v15873_v52  ;;  %10274 = vmatprep.subr.bf16.mxu1 %v15844_v19 }
 0x298   :  { %10251 = vmatpush1.bf16.msra.mxu0 %v15874_v18  ;;  %10276 = vmatpush3.bf16.msra.mxu1 %v15875_v46  ;;  %v15881_v18 = vld [vmem:[#allocation60_spill] sm:$0xff] }
 0x299   :  { %10253 = vmatprep.subr.bf16.mxu0 %v15876_v15  ;;  %10277 = vmatprep.subr.bf16.mxu1 %v15844_v19 }
 0x29c   :  { %10255 = vmatpush1.bf16.msra.mxu0 %v15877_v13  ;;  %10279 = vmatpush3.bf16.msra.mxu1 %v15878_v0 }
 0x29d   :  { %10281 = vmatprep.subr.bf16.mxu1 %v15879_v16  ;;  %10312 = vmatprep.subr.bf16.mxu0 %v15844_v19 }
 0x318   :  { %v1889_v63 = vpop.f32.mrb[44].mxu0  ;;  %v1960_v4 = vpop.f32.mrb[58].mxu1 }
 0x319   :  { %v12027_v48 = vadd.f32 %v15880_v60, %v1889_v63  ;;  %v1891_v24 = vpop.f32.mrb[45].mxu0  ;;  %v8736_v39 = vpop.f32.mrb[59].mxu1  ;;  %v1961_v16 = vadd.f32 %v1960_v4, %v13908_v45 }
 0x31a   :  { %v12031_v46 = vadd.f32 %v15881_v18, %v1891_v24 }
 0x31b   :  { %v7690_v52 = vmul.f32 -1.442695, %v12027_v48 }
 0x31c   :  { %v7691_v15 = vmul.f32 -1.442695, %v12031_v46 }
 0x31d   :  { %12277 = vpow2.f32 %v7690_v52 }
 0x31e   :  { %12279 = vpow2.f32 %v7691_v15 }
 0x327   :  { %v12278_v5 = vpop.eup %12277 }
 0x328   :  { %v1972_v13 = vadd.f32 1.0, %v12278_v5  ;;  %v12280_v0 = vpop.eup %12279 }
 0x329   :  { %v1973_v57 = vadd.f32 1.0, %v12280_v0 }
 0x32a   :  { %12281 = vrcp.f32 %v1972_v13 }
 0x32b   :  { %12283 = vrcp.f32 %v1973_v57 }
 0x334   :  { %v12282_v55 = vpop.eup %12281 }
 0x335   :  { %v1978_v50 = vmul.f32 %v12282_v55, %v1961_v16  ;;  %v12284_v39 = vpop.eup %12283 }
 0x336   :  { %v1981_v60 = vsub.f32 1.0, %v12284_v39  ;;  %v1983_v46 = vmul.f32 %v12284_v39, %v13913_v27 }
 0x337   :  { %v1979_v63 = vadd.f32 %v1978_v50, %v13807_v43 }
 0x339   :  { %12285 = vtanh.f32 %v1979_v63 }
 0x343   :  { %v12286_v24 = vpop.eup %12285 }
 0x344   :  { %v1982_v48 = vmul.f32 %v12286_v24, %v1981_v60 }
 0x346   :  { %v14018_v15 = vadd.f32 %v1983_v46, %v1982_v48 }
 0x348   :  { %15882 = vst [vmem:[#allocation52_spill] sm:$0xff] %v14018_v15  ;;  %2212 = vmatmul.mubr.f32.vlgmr.msra.gmra.mrb[48].mxu0 %v14018_v15  ;;  %8805 = vmatmul.mubr.f32.vlgmr.msra.gmra.mrb[60].mxu1 %v14018_v15 }
 0x349   :  { %10283 = vmatpush1.bf16.msra.mxu1 %v13634_v6  ;;  %10314 = vmatpush3.bf16.msra.mxu0 %v13457_v11 }
 0x34a   :  { %10285 = vmatprep.subr.bf16.mxu1 %v13637_v14  ;;  %10315 = vmatprep.subr.bf16.mxu0 %v15844_v19 }
 0x34b   :  { %2373 = vmatprep.mubr.f32.mxu1 %v15845_v61  ;;  %8839 = vmatprep.mubr.msk.f32.mxu0 %vm12811_vm4, %v15845_v61 }
 0x34d   :  { %10287 = vmatpush1.bf16.msra.mxu1 %v13643_v21  ;;  %10317 = vmatpush3.bf16.msra.mxu0 %v13464_v20 }
 0x34e   :  { %10289 = vmatprep.subr.bf16.mxu1 %v13647_v22  ;;  %10318 = vmatprep.subr.bf16.mxu0 %v15844_v19 }
 0x351   :  { %10291 = vmatpush1.bf16.msra.mxu1 %v13652_v37  ;;  %10320 = vmatpush3.bf16.msra.mxu0 %v13472_v25 }
 0x352   :  { %v2051_v57 = vpop.f32.mrb[52].mxu1  ;;  %v2122_v43 = vpop.f32.mrb[46].mxu0  ;;  %10293 = vmatprep.subr.bf16.mxu1 %v13656_v38  ;;  %10321 = vmatprep.subr.bf16.mxu0 %v15844_v19 }
 0x353   :  { %v12105_v4 = vadd.f32 %v13937_v29, %v2051_v57  ;;  %v2053_v16 = vpop.f32.mrb[53].mxu1  ;;  %v8771_v13 = vpop.f32.mrb[47].mxu0  ;;  %v2123_v39 = vadd.f32 %v2122_v43, %v13968_v56  ;;  %v15885_v43 = vld [vmem:[#allocation33_spill] sm:$0xff] }
 0x354   :  { %v12107_v5 = vadd.f32 %v13941_v35, %v2053_v16 }
 0x355   :  { %v7692_v52 = vmul.f32 -1.442695, %v12105_v4  ;;  %10295 = vmatpush1.bf16.msra.mxu1 %v13660_v49  ;;  %10323 = vmatpush3.bf16.msra.mxu0 %v13484_v40 }
 0x356   :  { %10297 = vmatprep.subr.bf16.mxu1 %v13664_v51  ;;  %10324 = vmatprep.subr.bf16.mxu0 %v15844_v19  ;;  %v7693_v18 = vmul.f32 -1.442695, %v12107_v5  ;;  %v15886_v5 = vld [vmem:[#allocation34_spill] sm:$0xff] }
 0x357   :  { %12287 = vpow2.f32 %v7692_v52 }
 0x358   :  { %12289 = vpow2.f32 %v7693_v18  ;;  %v15887_v18 = vld [vmem:[#allocation47_spill] sm:$0xff] }
 0x359   :  { %10299 = vmatpush1.bf16.msra.mxu1 %v13668_v62  ;;  %10326 = vmatpush3.bf16.msra.mxu0 %v13501_v58 }
 0x35a   :  { %10301 = vmatprep.subr.bf16.mxu1 %v13672_v10  ;;  %10327 = vmatprep.subr.bf16.mxu0 %v15844_v19 }
 0x35d   :  { %10303 = vmatpush1.bf16.msra.mxu1 %v13676_v53  ;;  %10329 = vmatpush3.bf16.msra.mxu0 %v15846_v47 }
 0x35e   :  { %10305 = vmatprep.subr.bf16.mxu1 %v15847_v34  ;;  %10330 = vmatprep.subr.bf16.mxu0 %v15844_v19 }
 0x361   :  { %v12288_v0 = vpop.eup %12287  ;;  %10307 = vmatpush1.bf16.msra.mxu1 %v15848_v8  ;;  %10332 = vmatpush3.bf16.msra.mxu0 %v15849_v26 }
 0x362   :  { %v2134_v50 = vadd.f32 1.0, %v12288_v0  ;;  %10309 = vmatprep.subr.bf16.mxu1 %v15850_v32  ;;  %10333 = vmatprep.subr.bf16.mxu0 %v15844_v19  ;;  %v12290_v55 = vpop.eup %12289  ;;  %v15888_v0 = vld [vmem:[#allocation35_spill] sm:$0xff] }
 0x363   :  { %v2135_v63 = vadd.f32 1.0, %v12290_v55  ;;  %v15890_v55 = vld [vmem:[#allocation49_spill] sm:$0xff] }
 0x364   :  { %12291 = vrcp.f32 %v2134_v50  ;;  %v15889_v50 = vld [vmem:[#allocation36_spill] sm:$0xff] }
 0x365   :  { %10311 = vmatpush1.bf16.msra.mxu1 %v15851_v1  ;;  %10335 = vmatpush3.bf16.msra.mxu0 %v15852_v33  ;;  %12293 = vrcp.f32 %v2135_v63  ;;  %v15891_v63 = vld [vmem:[#allocation37_spill] sm:$0xff] }
 0x366   :  { %10337 = vmatprep.subr.bf16.mxu0 %v15853_v2  ;;  %10368 = vmatprep.subr.bf16.mxu1 %v15844_v19 }
 0x36e   :  { %v12292_v60 = vpop.eup %12291 }
 0x36f   :  { %v2140_v24 = vmul.f32 %v12292_v60, %v2123_v39  ;;  %v12294_v46 = vpop.eup %12293  ;;  %v15892_v39 = vld [vmem:[#allocation38_spill] sm:$0xff] }
 0x370   :  { %v2143_v57 = vsub.f32 1.0, %v12294_v46  ;;  %v2145_v13 = vmul.f32 %v12294_v46, %v13974_v12  ;;  %v15893_v60 = vld [vmem:[#allocation50_spill] sm:$0xff] }
 0x371   :  { %v2141_v48 = vadd.f32 %v2140_v24, %v13898_v31  ;;  %v15884_v31 = vld [vmem:[#allocation46_spill] sm:$0xff]  ;;  %v15894_v24 = vld [vmem:[#allocation51_spill] sm:$0xff] }
 0x372   :  { %v15896_v12 = vld [vmem:[#allocation62_spill] sm:$0xff] }
 0x373   :  { %12295 = vtanh.f32 %v2141_v48 }
 0x37d   :  { %v12296_v4 = vpop.eup %12295 }
 0x37e   :  { %v2144_v16 = vmul.f32 %v12296_v4, %v2143_v57  ;;  %v15895_v57 = vld [vmem:[#allocation61_spill] sm:$0xff] }
 0x380   :  { %v14062_v52 = vadd.f32 %v2145_v13, %v2144_v16 }
 0x382   :  { %15883 = vst [vmem:[#allocation53_spill] sm:$0xff] %v14062_v52  ;;  %2374 = vmatmul.mubr.f32.vlgmr.msra.gmra.mrb[50].mxu1 %v14062_v52  ;;  %8840 = vmatmul.mubr.f32.vlgmr.msra.gmra.mrb[50].mxu0 %v14062_v52 }
 0x383   :  { %10339 = vmatpush1.bf16.msra.mxu0 %v15856_v44  ;;  %10370 = vmatpush3.bf16.msra.mxu1 %v15857_v30 }
 0x384   :  { %10341 = vmatprep.subr.bf16.mxu0 %v15858_v23  ;;  %10371 = vmatprep.subr.bf16.mxu1 %v15844_v19 }
 0x385   :  { %2535 = vmatprep.mubr.f32.mxu0 %v15845_v61  ;;  %8874 = vmatprep.mubr.msk.f32.mxu1 %vm12811_vm4, %v15845_v61 }
 0x387   :  { %10343 = vmatpush1.bf16.msra.mxu0 %v15859_v59  ;;  %10373 = vmatpush3.bf16.msra.mxu1 %v15860_v17 }
 0x388   :  { %10345 = vmatprep.subr.bf16.mxu0 %v15861_v28  ;;  %10374 = vmatprep.subr.bf16.mxu1 %v15844_v19 }
 0x38b   :  { %10347 = vmatpush1.bf16.msra.mxu0 %v15862_v7  ;;  %10376 = vmatpush3.bf16.msra.mxu1 %v15863_v41 }
 0x38c   :  { %10349 = vmatprep.subr.bf16.mxu0 %v15864_v54  ;;  %10377 = vmatprep.subr.bf16.mxu1 %v15844_v19 }
 0x38f   :  { %10351 = vmatpush1.bf16.msra.mxu0 %v15865_v9  ;;  %10379 = vmatpush3.bf16.msra.mxu1 %v15866_v42 }
 0x390   :  { %10353 = vmatprep.subr.bf16.mxu0 %v15867_v36  ;;  %10380 = vmatprep.subr.bf16.mxu1 %v15844_v19 }
 0x393   :  { %10355 = vmatpush1.bf16.msra.mxu0 %v15868_v3  ;;  %10382 = vmatpush3.bf16.msra.mxu1 %v15884_v31 }
 0x394   :  { %10357 = vmatprep.subr.bf16.mxu0 %v15885_v43  ;;  %10383 = vmatprep.subr.bf16.mxu1 %v15844_v19  ;;  %v15897_v43 = vld [vmem:[#allocation66_spill] sm:$0xff] }
 0x397   :  { %10359 = vmatpush1.bf16.msra.mxu0 %v15886_v5  ;;  %10385 = vmatpush3.bf16.msra.mxu1 %v15887_v18 }
 0x398   :  { %10361 = vmatprep.subr.bf16.mxu0 %v15888_v0  ;;  %10386 = vmatprep.subr.bf16.mxu1 %v15844_v19 }
 0x39b   :  { %10363 = vmatpush1.bf16.msra.mxu0 %v15889_v50  ;;  %10388 = vmatpush3.bf16.msra.mxu1 %v15890_v55 }
 0x39c   :  { %10365 = vmatprep.subr.bf16.mxu0 %v15891_v63  ;;  %10389 = vmatprep.subr.bf16.mxu1 %v15844_v19 }
 0x39f   :  { %10367 = vmatpush1.bf16.msra.mxu0 %v15892_v39  ;;  %10391 = vmatpush3.bf16.msra.mxu1 %v15893_v60 }
 0x3a0   :  { %10393 = vmatprep.subr.bf16.mxu1 %v15894_v24  ;;  %10424 = vmatprep.subr.bf16.mxu0 %v15844_v19 }
 0x41b   :  { %v2213_v48 = vpop.f32.mrb[48].mxu0  ;;  %v2284_v46 = vpop.f32.mrb[60].mxu1 }
 0x41c   :  { %v12035_v4 = vadd.f32 %v15895_v57, %v2213_v48  ;;  %v2215_v16 = vpop.f32.mrb[49].mxu0  ;;  %v8806_v13 = vpop.f32.mrb[61].mxu1  ;;  %v2285_v24 = vadd.f32 %v2284_v46, %v13908_v45 }
 0x41d   :  { %v12039_v27 = vadd.f32 %v15896_v12, %v2215_v16 }
 0x41e   :  { %v7694_v55 = vmul.f32 -1.442695, %v12035_v4 }
 0x41f   :  { %v7695_v63 = vmul.f32 -1.442695, %v12039_v27 }
 0x420   :  { %12297 = vpow2.f32 %v7694_v55 }
 0x421   :  { %12299 = vpow2.f32 %v7695_v63 }
 0x42a   :  { %v12298_v50 = vpop.eup %12297 }
 0x42b   :  { %v2296_v39 = vadd.f32 1.0, %v12298_v50  ;;  %v12300_v60 = vpop.eup %12299 }
 0x42c   :  { %v2297_v0 = vadd.f32 1.0, %v12300_v60 }
 0x42d   :  { %12301 = vrcp.f32 %v2296_v39 }
 0x42e   :  { %12303 = vrcp.f32 %v2297_v0 }
 0x437   :  { %v12302_v18 = vpop.eup %12301 }
 0x438   :  { %v2302_v5 = vmul.f32 %v12302_v18, %v2285_v24  ;;  %v12304_v57 = vpop.eup %12303 }
 0x439   :  { %v2305_v13 = vsub.f32 1.0, %v12304_v57  ;;  %v2307_v27 = vmul.f32 %v12304_v57, %v14018_v15 }
 0x43a   :  { %v2303_v48 = vadd.f32 %v2302_v5, %v15897_v43 }
 0x43c   :  { %12305 = vtanh.f32 %v2303_v48 }
 0x446   :  { %v12306_v12 = vpop.eup %12305 }
 0x447   :  { %v2306_v4 = vmul.f32 %v12306_v12, %v2305_v13 }
 0x449   :  { %v14106_v55 = vadd.f32 %v2307_v27, %v2306_v4  ;;  %v15899_v4 = vld [vmem:[#allocation83_spill] sm:$0xff] }
 0x44b   :  { %15898 = vst [vmem:[#allocation43_spill] sm:$0xff] %v14106_v55  ;;  %2536 = vmatmul.mubr.f32.vlgmr.msra.gmra.mrb[52].mxu0 %v14106_v55  ;;  %8875 = vmatmul.mubr.f32.vlgmr.msra.gmra.mrb[62].mxu1 %v14106_v55 }
 0x44c   :  { %10395 = vmatpush1.bf16.msra.mxu1 %v13634_v6  ;;  %10426 = vmatpush3.bf16.msra.mxu0 %v13457_v11 }
 0x44d   :  { %10397 = vmatprep.subr.bf16.mxu1 %v13637_v14  ;;  %10427 = vmatprep.subr.bf16.mxu0 %v15844_v19 }
 0x44e   :  { %2697 = vmatprep.mubr.f32.mxu1 %v15845_v61  ;;  %8909 = vmatprep.mubr.msk.f32.mxu0 %vm12811_vm4, %v15845_v61 }
 0x450   :  { %10399 = vmatpush1.bf16.msra.mxu1 %v13643_v21  ;;  %10429 = vmatpush3.bf16.msra.mxu0 %v13464_v20 }
 0x451   :  { %10401 = vmatprep.subr.bf16.mxu1 %v13647_v22  ;;  %10430 = vmatprep.subr.bf16.mxu0 %v15844_v19 }
 0x454   :  { %10403 = vmatpush1.bf16.msra.mxu1 %v13652_v37  ;;  %10432 = vmatpush3.bf16.msra.mxu0 %v13472_v25 }
 0x455   :  { %v2375_v43 = vpop.f32.mrb[50].mxu1  ;;  %v2446_v5 = vpop.f32.mrb[50].mxu0  ;;  %10405 = vmatprep.subr.bf16.mxu1 %v13656_v38  ;;  %10433 = vmatprep.subr.bf16.mxu0 %v15844_v19 }
 0x456   :  { %v12101_v18 = vadd.f32 %v13937_v29, %v2375_v43  ;;  %v2377_v0 = vpop.f32.mrb[51].mxu1  ;;  %v8841_v50 = vpop.f32.mrb[51].mxu0  ;;  %v2447_v57 = vadd.f32 %v2446_v5, %v13968_v56  ;;  %v15901_v5 = vld [vmem:[#allocation33_spill] sm:$0xff] }
 0x457   :  { %v12103_v39 = vadd.f32 %v13941_v35, %v2377_v0 }
 0x458   :  { %v7696_v63 = vmul.f32 -1.442695, %v12101_v18  ;;  %10407 = vmatpush1.bf16.msra.mxu1 %v13660_v49  ;;  %10435 = vmatpush3.bf16.msra.mxu0 %v13484_v40 }
 0x459   :  { %10409 = vmatprep.subr.bf16.mxu1 %v13664_v51  ;;  %10436 = vmatprep.subr.bf16.mxu0 %v15844_v19  ;;  %v7697_v60 = vmul.f32 -1.442695, %v12103_v39 }
 0x45a   :  { %12307 = vpow2.f32 %v7696_v63 }
 0x45b   :  { %12309 = vpow2.f32 %v7697_v60  ;;  %v15902_v60 = vld [vmem:[#allocation34_spill] sm:$0xff] }
 0x45c   :  { %10411 = vmatpush1.bf16.msra.mxu1 %v13668_v62  ;;  %10438 = vmatpush3.bf16.msra.mxu0 %v13501_v58 }
 0x45d   :  { %10413 = vmatprep.subr.bf16.mxu1 %v13672_v10  ;;  %10439 = vmatprep.subr.bf16.mxu0 %v15844_v19 }
 0x460   :  { %10415 = vmatpush1.bf16.msra.mxu1 %v13676_v53  ;;  %10441 = vmatpush3.bf16.msra.mxu0 %v15846_v47 }
 0x461   :  { %10417 = vmatprep.subr.bf16.mxu1 %v15847_v34  ;;  %10442 = vmatprep.subr.bf16.mxu0 %v15844_v19 }
 0x464   :  { %v12308_v24 = vpop.eup %12307  ;;  %10419 = vmatpush1.bf16.msra.mxu1 %v15848_v8  ;;  %10444 = vmatpush3.bf16.msra.mxu0 %v15849_v26 }
 0x465   :  { %v2458_v46 = vadd.f32 1.0, %v12308_v24  ;;  %10421 = vmatprep.subr.bf16.mxu1 %v15850_v32  ;;  %10445 = vmatprep.subr.bf16.mxu0 %v15844_v19  ;;  %v12310_v16 = vpop.eup %12309  ;;  %v15903_v24 = vld [vmem:[#allocation47_spill] sm:$0xff] }
 0x466   :  { %v2459_v48 = vadd.f32 1.0, %v12310_v16  ;;  %v15905_v16 = vld [vmem:[#allocation36_spill] sm:$0xff] }
 0x467   :  { %12311 = vrcp.f32 %v2458_v46  ;;  %v15904_v46 = vld [vmem:[#allocation35_spill] sm:$0xff] }
 0x468   :  { %10423 = vmatpush1.bf16.msra.mxu1 %v15851_v1  ;;  %10447 = vmatpush3.bf16.msra.mxu0 %v15852_v33  ;;  %12313 = vrcp.f32 %v2459_v48  ;;  %v15906_v48 = vld [vmem:[#allocation49_spill] sm:$0xff] }
 0x469   :  { %10449 = vmatprep.subr.bf16.mxu0 %v15853_v2  ;;  %10480 = vmatprep.subr.bf16.mxu1 %v15844_v19 }
 0x471   :  { %v12312_v13 = vpop.eup %12311 }
 0x472   :  { %v2464_v12 = vmul.f32 %v12312_v13, %v2447_v57  ;;  %v12314_v43 = vpop.eup %12313  ;;  %v15907_v57 = vld [vmem:[#allocation37_spill] sm:$0xff]  ;;  %v15908_v13 = vld [vmem:[#allocation38_spill] sm:$0xff] }
 0x473   :  { %v2467_v18 = vsub.f32 1.0, %v12314_v43  ;;  %v2469_v63 = vmul.f32 %v12314_v43, %v14062_v52  ;;  %v15912_v52 = vld [vmem:[#allocation65_spill] sm:$0xff] }
 0x474   :  { %v2465_v27 = vadd.f32 %v2464_v12, %v15899_v4  ;;  %v15909_v12 = vld [vmem:[#allocation50_spill] sm:$0xff]  ;;  %v15910_v4 = vld [vmem:[#allocation51_spill] sm:$0xff] }
 0x476   :  { %12315 = vtanh.f32 %v2465_v27 }
 0x480   :  { %v12316_v0 = vpop.eup %12315 }
 0x481   :  { %v2468_v50 = vmul.f32 %v12316_v0, %v2467_v18  ;;  %v15911_v18 = vld [vmem:[#allocation63_spill] sm:$0xff] }
 0x483   :  { %v14150_v39 = vadd.f32 %v2469_v63, %v2468_v50 }
 0x485   :  { %15900 = vst [vmem:[#allocation54_spill] sm:$0xff] %v14150_v39  ;;  %2698 = vmatmul.mubr.f32.vlgmr.msra.gmra.mrb[48].mxu1 %v14150_v39  ;;  %8910 = vmatmul.mubr.f32.vlgmr.msra.gmra.mrb[54].mxu0 %v14150_v39 }
 0x486   :  { %10451 = vmatpush1.bf16.msra.mxu0 %v15856_v44  ;;  %10482 = vmatpush3.bf16.msra.mxu1 %v15857_v30 }
 0x487   :  { %10453 = vmatprep.subr.bf16.mxu0 %v15858_v23  ;;  %10483 = vmatprep.subr.bf16.mxu1 %v15844_v19 }
 0x488   :  { %2859 = vmatprep.mubr.f32.mxu0 %v15845_v61  ;;  %8944 = vmatprep.mubr.msk.f32.mxu1 %vm12811_vm4, %v15845_v61 }
 0x48a   :  { %10455 = vmatpush1.bf16.msra.mxu0 %v15859_v59  ;;  %10485 = vmatpush3.bf16.msra.mxu1 %v15860_v17 }
 0x48b   :  { %10457 = vmatprep.subr.bf16.mxu0 %v15861_v28  ;;  %10486 = vmatprep.subr.bf16.mxu1 %v15844_v19 }
 0x48e   :  { %10459 = vmatpush1.bf16.msra.mxu0 %v15862_v7  ;;  %10488 = vmatpush3.bf16.msra.mxu1 %v15863_v41 }
 0x48f   :  { %10461 = vmatprep.subr.bf16.mxu0 %v15864_v54  ;;  %10489 = vmatprep.subr.bf16.mxu1 %v15844_v19 }
 0x492   :  { %10463 = vmatpush1.bf16.msra.mxu0 %v15865_v9  ;;  %10491 = vmatpush3.bf16.msra.mxu1 %v15866_v42 }
 0x493   :  { %10465 = vmatprep.subr.bf16.mxu0 %v15867_v36  ;;  %10492 = vmatprep.subr.bf16.mxu1 %v15844_v19 }
 0x496   :  { %10467 = vmatpush1.bf16.msra.mxu0 %v15868_v3  ;;  %10494 = vmatpush3.bf16.msra.mxu1 %v15884_v31 }
 0x497   :  { %10469 = vmatprep.subr.bf16.mxu0 %v15901_v5  ;;  %10495 = vmatprep.subr.bf16.mxu1 %v15844_v19  ;;  %v15913_v5 = vld [vmem:[#allocation64_spill] sm:$0xff] }
 0x49a   :  { %10471 = vmatpush1.bf16.msra.mxu0 %v15902_v60  ;;  %10497 = vmatpush3.bf16.msra.mxu1 %v15903_v24 }
 0x49b   :  { %10473 = vmatprep.subr.bf16.mxu0 %v15904_v46  ;;  %10498 = vmatprep.subr.bf16.mxu1 %v15844_v19 }
 0x49e   :  { %10475 = vmatpush1.bf16.msra.mxu0 %v15905_v16  ;;  %10500 = vmatpush3.bf16.msra.mxu1 %v15906_v48 }
 0x49f   :  { %10477 = vmatprep.subr.bf16.mxu0 %v15907_v57  ;;  %10501 = vmatprep.subr.bf16.mxu1 %v15844_v19 }
 0x4a2   :  { %10479 = vmatpush1.bf16.msra.mxu0 %v15908_v13  ;;  %10503 = vmatpush3.bf16.msra.mxu1 %v15909_v12 }
 0x4a3   :  { %10505 = vmatprep.subr.bf16.mxu1 %v15910_v4  ;;  %10536 = vmatprep.subr.bf16.mxu0 %v15844_v19 }
 0x51e   :  { %v2537_v27 = vpop.f32.mrb[52].mxu0  ;;  %v2608_v43 = vpop.f32.mrb[62].mxu1 }
 0x51f   :  { %v12043_v0 = vadd.f32 %v15911_v18, %v2537_v27  ;;  %v2539_v50 = vpop.f32.mrb[53].mxu0  ;;  %v8876_v63 = vpop.f32.mrb[63].mxu1  ;;  %v2609_v4 = vadd.f32 %v2608_v43, %v13908_v45 }
 0x520   :  { %v12047_v15 = vadd.f32 %v15912_v52, %v2539_v50 }
 0x521   :  { %v7698_v48 = vmul.f32 -1.442695, %v12043_v0 }
 0x522   :  { %v7699_v57 = vmul.f32 -1.442695, %v12047_v15 }
 0x523   :  { %12317 = vpow2.f32 %v7698_v48 }
 0x524   :  { %12319 = vpow2.f32 %v7699_v57 }
 0x52d   :  { %v12318_v16 = vpop.eup %12317 }
 0x52e   :  { %v2620_v13 = vadd.f32 1.0, %v12318_v16  ;;  %v12320_v12 = vpop.eup %12319 }
 0x52f   :  { %v2621_v46 = vadd.f32 1.0, %v12320_v12 }
 0x530   :  { %12321 = vrcp.f32 %v2620_v13 }
 0x531   :  { %12323 = vrcp.f32 %v2621_v46 }
 0x53a   :  { %v12322_v24 = vpop.eup %12321 }
 0x53b   :  { %v2626_v60 = vmul.f32 %v12322_v24, %v2609_v4  ;;  %v12324_v18 = vpop.eup %12323 }
 0x53c   :  { %v2629_v63 = vsub.f32 1.0, %v12324_v18  ;;  %v2631_v15 = vmul.f32 %v12324_v18, %v14106_v55 }
 0x53d   :  { %v2627_v27 = vadd.f32 %v2626_v60, %v15913_v5 }
 0x53f   :  { %12325 = vtanh.f32 %v2627_v27 }
 0x549   :  { %v12326_v52 = vpop.eup %12325 }
 0x54a   :  { %v2630_v0 = vmul.f32 %v12326_v52, %v2629_v63 }
 0x54c   :  { %v14194_v48 = vadd.f32 %v2631_v15, %v2630_v0  ;;  %v15915_v0 = vld [vmem:[#allocation84_spill] sm:$0xff] }
 0x54e   :  { %15914 = vst [vmem:[#allocation55_spill] sm:$0xff] %v14194_v48  ;;  %2860 = vmatmul.mubr.f32.vlgmr.msra.gmra.mrb[56].mxu0 %v14194_v48  ;;  %8945 = vmatmul.mubr.f32.vlgmr.msra.gmra.mrb[64].mxu1 %v14194_v48 }
 0x54f   :  { %10507 = vmatpush1.bf16.msra.mxu1 %v13634_v6  ;;  %10538 = vmatpush3.bf16.msra.mxu0 %v13457_v11 }
 0x550   :  { %10509 = vmatprep.subr.bf16.mxu1 %v13637_v14  ;;  %10539 = vmatprep.subr.bf16.mxu0 %v15844_v19 }
 0x551   :  { %3021 = vmatprep.mubr.f32.mxu1 %v15845_v61  ;;  %8979 = vmatprep.mubr.msk.f32.mxu0 %vm12811_vm4, %v15845_v61 }
 0x553   :  { %10511 = vmatpush1.bf16.msra.mxu1 %v13643_v21  ;;  %10541 = vmatpush3.bf16.msra.mxu0 %v13464_v20 }
 0x554   :  { %10513 = vmatprep.subr.bf16.mxu1 %v13647_v22  ;;  %10542 = vmatprep.subr.bf16.mxu0 %v15844_v19 }
 0x557   :  { %10515 = vmatpush1.bf16.msra.mxu1 %v13652_v37  ;;  %10544 = vmatpush3.bf16.msra.mxu0 %v13472_v25 }
 0x558   :  { %v2699_v5 = vpop.f32.mrb[48].mxu1  ;;  %v2770_v60 = vpop.f32.mrb[54].mxu0  ;;  %10517 = vmatprep.subr.bf16.mxu1 %v13656_v38  ;;  %10545 = vmatprep.subr.bf16.mxu0 %v15844_v19 }
 0x559   :  { %v12097_v24 = vadd.f32 %v13937_v29, %v2699_v5  ;;  %v2701_v46 = vpop.f32.mrb[49].mxu1  ;;  %v8911_v16 = vpop.f32.mrb[55].mxu0  ;;  %v2771_v18 = vadd.f32 %v2770_v60, %v13968_v56  ;;  %v15917_v60 = vld [vmem:[#allocation33_spill] sm:$0xff] }
 0x55a   :  { %v12099_v13 = vadd.f32 %v13941_v35, %v2701_v46 }
 0x55b   :  { %v7700_v57 = vmul.f32 -1.442695, %v12097_v24  ;;  %10519 = vmatpush1.bf16.msra.mxu1 %v13660_v49  ;;  %10547 = vmatpush3.bf16.msra.mxu0 %v13484_v40 }
 0x55c   :  { %10521 = vmatprep.subr.bf16.mxu1 %v13664_v51  ;;  %10548 = vmatprep.subr.bf16.mxu0 %v15844_v19  ;;  %v7701_v12 = vmul.f32 -1.442695, %v12099_v13 }
 0x55d   :  { %12327 = vpow2.f32 %v7700_v57 }
 0x55e   :  { %12329 = vpow2.f32 %v7701_v12  ;;  %v15918_v12 = vld [vmem:[#allocation34_spill] sm:$0xff] }
 0x55f   :  { %10523 = vmatpush1.bf16.msra.mxu1 %v13668_v62  ;;  %10550 = vmatpush3.bf16.msra.mxu0 %v13501_v58 }
 0x560   :  { %10525 = vmatprep.subr.bf16.mxu1 %v13672_v10  ;;  %10551 = vmatprep.subr.bf16.mxu0 %v15844_v19 }
 0x563   :  { %10527 = vmatpush1.bf16.msra.mxu1 %v13676_v53  ;;  %10553 = vmatpush3.bf16.msra.mxu0 %v15846_v47 }
 0x564   :  { %10529 = vmatprep.subr.bf16.mxu1 %v15847_v34  ;;  %10554 = vmatprep.subr.bf16.mxu0 %v15844_v19 }
 0x567   :  { %v12328_v4 = vpop.eup %12327  ;;  %10531 = vmatpush1.bf16.msra.mxu1 %v15848_v8  ;;  %10556 = vmatpush3.bf16.msra.mxu0 %v15849_v26 }
 0x568   :  { %v2782_v43 = vadd.f32 1.0, %v12328_v4  ;;  %10533 = vmatprep.subr.bf16.mxu1 %v15850_v32  ;;  %10557 = vmatprep.subr.bf16.mxu0 %v15844_v19  ;;  %v12330_v50 = vpop.eup %12329  ;;  %v15919_v4 = vld [vmem:[#allocation47_spill] sm:$0xff] }
 0x569   :  { %v2783_v27 = vadd.f32 1.0, %v12330_v50  ;;  %v15921_v50 = vld [vmem:[#allocation36_spill] sm:$0xff] }
 0x56a   :  { %12331 = vrcp.f32 %v2782_v43  ;;  %v15920_v43 = vld [vmem:[#allocation35_spill] sm:$0xff] }
 0x56b   :  { %10535 = vmatpush1.bf16.msra.mxu1 %v15851_v1  ;;  %10559 = vmatpush3.bf16.msra.mxu0 %v15852_v33  ;;  %12333 = vrcp.f32 %v2783_v27  ;;  %v15922_v27 = vld [vmem:[#allocation49_spill] sm:$0xff] }
 0x56c   :  { %10561 = vmatprep.subr.bf16.mxu0 %v15853_v2  ;;  %10592 = vmatprep.subr.bf16.mxu1 %v15844_v19 }
 0x574   :  { %v12332_v63 = vpop.eup %12331 }
 0x575   :  { %v2788_v52 = vmul.f32 %v12332_v63, %v2771_v18  ;;  %v12334_v5 = vpop.eup %12333  ;;  %v15923_v18 = vld [vmem:[#allocation37_spill] sm:$0xff]  ;;  %v15924_v63 = vld [vmem:[#allocation38_spill] sm:$0xff] }
 0x576   :  { %v2791_v24 = vsub.f32 1.0, %v12334_v5  ;;  %v2793_v57 = vmul.f32 %v12334_v5, %v14150_v39  ;;  %v15928_v39 = vld [vmem:[#allocation69_spill] sm:$0xff] }
 0x577   :  { %v2789_v15 = vadd.f32 %v2788_v52, %v15915_v0  ;;  %v15925_v52 = vld [vmem:[#allocation50_spill] sm:$0xff]  ;;  %v15926_v0 = vld [vmem:[#allocation51_spill] sm:$0xff] }
 0x579   :  { %12335 = vtanh.f32 %v2789_v15 }
 0x583   :  { %v12336_v46 = vpop.eup %12335 }
 0x584   :  { %v2792_v16 = vmul.f32 %v12336_v46, %v2791_v24  ;;  %v15927_v24 = vld [vmem:[#allocation67_spill] sm:$0xff] }
 0x586   :  { %v14238_v13 = vadd.f32 %v2793_v57, %v2792_v16 }
 0x588   :  { %15916 = vst [vmem:[#allocation45_spill] sm:$0xff] %v14238_v13  ;;  %3022 = vmatmul.mubr.f32.vlgmr.msra.gmra.mrb[46].mxu1 %v14238_v13  ;;  %8980 = vmatmul.mubr.f32.vlgmr.msra.gmra.mrb[58].mxu0 %v14238_v13 }
 0x589   :  { %10563 = vmatpush1.bf16.msra.mxu0 %v15856_v44  ;;  %10594 = vmatpush3.bf16.msra.mxu1 %v15857_v30 }
 0x58a   :  { %10565 = vmatprep.subr.bf16.mxu0 %v15858_v23  ;;  %10595 = vmatprep.subr.bf16.mxu1 %v15844_v19 }
 0x58b   :  { %3183 = vmatprep.mubr.f32.mxu0 %v15845_v61  ;;  %9014 = vmatprep.mubr.msk.f32.mxu1 %vm12811_vm4, %v15845_v61 }
 0x58d   :  { %10567 = vmatpush1.bf16.msra.mxu0 %v15859_v59  ;;  %10597 = vmatpush3.bf16.msra.mxu1 %v15860_v17 }
 0x58e   :  { %10569 = vmatprep.subr.bf16.mxu0 %v15861_v28  ;;  %10598 = vmatprep.subr.bf16.mxu1 %v15844_v19 }
 0x591   :  { %10571 = vmatpush1.bf16.msra.mxu0 %v15862_v7  ;;  %10600 = vmatpush3.bf16.msra.mxu1 %v15863_v41 }
 0x592   :  { %10573 = vmatprep.subr.bf16.mxu0 %v15864_v54  ;;  %10601 = vmatprep.subr.bf16.mxu1 %v15844_v19 }
 0x595   :  { %10575 = vmatpush1.bf16.msra.mxu0 %v15865_v9  ;;  %10603 = vmatpush3.bf16.msra.mxu1 %v15866_v42 }
 0x596   :  { %10577 = vmatprep.subr.bf16.mxu0 %v15867_v36  ;;  %10604 = vmatprep.subr.bf16.mxu1 %v15844_v19 }
 0x599   :  { %10579 = vmatpush1.bf16.msra.mxu0 %v15868_v3  ;;  %10606 = vmatpush3.bf16.msra.mxu1 %v15884_v31 }
 0x59a   :  { %10581 = vmatprep.subr.bf16.mxu0 %v15917_v60  ;;  %10607 = vmatprep.subr.bf16.mxu1 %v15844_v19  ;;  %v15929_v60 = vld [vmem:[#allocation70_spill] sm:$0xff] }
 0x59d   :  { %10583 = vmatpush1.bf16.msra.mxu0 %v15918_v12  ;;  %10609 = vmatpush3.bf16.msra.mxu1 %v15919_v4 }
 0x59e   :  { %10585 = vmatprep.subr.bf16.mxu0 %v15920_v43  ;;  %10610 = vmatprep.subr.bf16.mxu1 %v15844_v19 }
 0x5a1   :  { %10587 = vmatpush1.bf16.msra.mxu0 %v15921_v50  ;;  %10612 = vmatpush3.bf16.msra.mxu1 %v15922_v27 }
 0x5a2   :  { %10589 = vmatprep.subr.bf16.mxu0 %v15923_v18  ;;  %10613 = vmatprep.subr.bf16.mxu1 %v15844_v19 }
 0x5a5   :  { %10591 = vmatpush1.bf16.msra.mxu0 %v15924_v63  ;;  %10615 = vmatpush3.bf16.msra.mxu1 %v15925_v52 }
 0x5a6   :  { %10617 = vmatprep.subr.bf16.mxu1 %v15926_v0  ;;  %10648 = vmatprep.subr.bf16.mxu0 %v15844_v19 }
 0x621   :  { %v2861_v15 = vpop.f32.mrb[56].mxu0  ;;  %v2932_v5 = vpop.f32.mrb[64].mxu1 }
 0x622   :  { %v12051_v46 = vadd.f32 %v15927_v24, %v2861_v15  ;;  %v2863_v16 = vpop.f32.mrb[57].mxu0  ;;  %v8946_v57 = vpop.f32.mrb[65].mxu1  ;;  %v2933_v0 = vadd.f32 %v2932_v5, %v13908_v45 }
 0x623   :  { %v12055_v55 = vadd.f32 %v15928_v39, %v2863_v16 }
 0x624   :  { %v7702_v27 = vmul.f32 -1.442695, %v12051_v46 }
 0x625   :  { %v7703_v18 = vmul.f32 -1.442695, %v12055_v55 }
 0x626   :  { %12337 = vpow2.f32 %v7702_v27 }
 0x627   :  { %12339 = vpow2.f32 %v7703_v18 }
 0x630   :  { %v12338_v50 = vpop.eup %12337 }
 0x631   :  { %v2944_v63 = vadd.f32 1.0, %v12338_v50  ;;  %v12340_v52 = vpop.eup %12339 }
 0x632   :  { %v2945_v43 = vadd.f32 1.0, %v12340_v52 }
 0x633   :  { %12341 = vrcp.f32 %v2944_v63 }
 0x634   :  { %12343 = vrcp.f32 %v2945_v43 }
 0x63d   :  { %v12342_v4 = vpop.eup %12341 }
 0x63e   :  { %v2950_v12 = vmul.f32 %v12342_v4, %v2933_v0  ;;  %v12344_v24 = vpop.eup %12343 }
 0x63f   :  { %v2953_v57 = vsub.f32 1.0, %v12344_v24  ;;  %v2955_v55 = vmul.f32 %v12344_v24, %v14194_v48 }
 0x640   :  { %v2951_v15 = vadd.f32 %v2950_v12, %v15929_v60 }
 0x642   :  { %12345 = vtanh.f32 %v2951_v15 }
 0x64c   :  { %v12346_v39 = vpop.eup %12345 }
 0x64d   :  { %v2954_v46 = vmul.f32 %v12346_v39, %v2953_v57 }
 0x64f   :  { %v14282_v27 = vadd.f32 %v2955_v55, %v2954_v46  ;;  %v15930_v46 = vld [vmem:[#allocation81_spill] sm:$0xff] }
 0x651   :  { %3184 = vmatmul.mubr.f32.vlgmr.msra.gmra.mrb[60].mxu0 %v14282_v27  ;;  %9015 = vmatmul.mubr.f32.vlgmr.msra.gmra.mrb[66].mxu1 %v14282_v27 }
 0x652   :  { %10619 = vmatpush1.bf16.msra.mxu1 %v13634_v6  ;;  %10650 = vmatpush3.bf16.msra.mxu0 %v13457_v11 }
 0x653   :  { %10621 = vmatprep.subr.bf16.mxu1 %v13637_v14  ;;  %10651 = vmatprep.subr.bf16.mxu0 %v15844_v19 }
 0x654   :  { %3345 = vmatprep.mubr.f32.mxu1 %v15845_v61  ;;  %9049 = vmatprep.mubr.msk.f32.mxu0 %vm12811_vm4, %v15845_v61 }
 0x656   :  { %10623 = vmatpush1.bf16.msra.mxu1 %v13643_v21  ;;  %10653 = vmatpush3.bf16.msra.mxu0 %v13464_v20 }
 0x657   :  { %10625 = vmatprep.subr.bf16.mxu1 %v13647_v22  ;;  %10654 = vmatprep.subr.bf16.mxu0 %v15844_v19 }
 0x65a   :  { %10627 = vmatpush1.bf16.msra.mxu1 %v13652_v37  ;;  %10656 = vmatpush3.bf16.msra.mxu0 %v13472_v25 }
 0x65b   :  { %v3023_v60 = vpop.f32.mrb[46].mxu1  ;;  %v3094_v12 = vpop.f32.mrb[58].mxu0  ;;  %10629 = vmatprep.subr.bf16.mxu1 %v13656_v38  ;;  %10657 = vmatprep.subr.bf16.mxu0 %v15844_v19 }
 0x65c   :  { %v12093_v4 = vadd.f32 %v13937_v29, %v3023_v60  ;;  %v3025_v43 = vpop.f32.mrb[47].mxu1  ;;  %v8981_v50 = vpop.f32.mrb[59].mxu0  ;;  %v3095_v24 = vadd.f32 %v3094_v12, %v13968_v56  ;;  %v15931_v12 = vld [vmem:[#allocation33_spill] sm:$0xff] }
 0x65d   :  { %v12095_v63 = vadd.f32 %v13941_v35, %v3025_v43 }
 0x65e   :  { %v7704_v18 = vmul.f32 -1.442695, %v12093_v4  ;;  %10631 = vmatpush1.bf16.msra.mxu1 %v13660_v49  ;;  %10659 = vmatpush3.bf16.msra.mxu0 %v13484_v40 }
 0x65f   :  { %10633 = vmatprep.subr.bf16.mxu1 %v13664_v51  ;;  %10660 = vmatprep.subr.bf16.mxu0 %v15844_v19  ;;  %v7705_v52 = vmul.f32 -1.442695, %v12095_v63 }
 0x660   :  { %12347 = vpow2.f32 %v7704_v18 }
 0x661   :  { %12349 = vpow2.f32 %v7705_v52  ;;  %v15932_v52 = vld [vmem:[#allocation34_spill] sm:$0xff] }
 0x662   :  { %10635 = vmatpush1.bf16.msra.mxu1 %v13668_v62  ;;  %10662 = vmatpush3.bf16.msra.mxu0 %v13501_v58 }
 0x663   :  { %10637 = vmatprep.subr.bf16.mxu1 %v13672_v10  ;;  %10663 = vmatprep.subr.bf16.mxu0 %v15844_v19 }
 0x666   :  { %10639 = vmatpush1.bf16.msra.mxu1 %v13676_v53  ;;  %10665 = vmatpush3.bf16.msra.mxu0 %v15846_v47 }
 0x667   :  { %10641 = vmatprep.subr.bf16.mxu1 %v15847_v34  ;;  %10666 = vmatprep.subr.bf16.mxu0 %v15844_v19 }
 0x66a   :  { %v12348_v0 = vpop.eup %12347  ;;  %10643 = vmatpush1.bf16.msra.mxu1 %v15848_v8  ;;  %10668 = vmatpush3.bf16.msra.mxu0 %v15849_v26 }
 0x66b   :  { %v3106_v5 = vadd.f32 1.0, %v12348_v0  ;;  %10645 = vmatprep.subr.bf16.mxu1 %v15850_v32  ;;  %10669 = vmatprep.subr.bf16.mxu0 %v15844_v19  ;;  %v12350_v16 = vpop.eup %12349  ;;  %v15933_v0 = vld [vmem:[#allocation47_spill] sm:$0xff] }
 0x66c   :  { %v3107_v15 = vadd.f32 1.0, %v12350_v16  ;;  %v15935_v16 = vld [vmem:[#allocation36_spill] sm:$0xff] }
 0x66d   :  { %12351 = vrcp.f32 %v3106_v5  ;;  %v15934_v5 = vld [vmem:[#allocation35_spill] sm:$0xff] }
 0x66e   :  { %10647 = vmatpush1.bf16.msra.mxu1 %v15851_v1  ;;  %10671 = vmatpush3.bf16.msra.mxu0 %v15852_v33  ;;  %12353 = vrcp.f32 %v3107_v15  ;;  %v15936_v15 = vld [vmem:[#allocation49_spill] sm:$0xff] }
 0x66f   :  { %10673 = vmatprep.subr.bf16.mxu0 %v15853_v2  ;;  %10704 = vmatprep.subr.bf16.mxu1 %v15844_v19 }
 0x677   :  { %v12352_v57 = vpop.eup %12351 }
 0x678   :  { %v3112_v39 = vmul.f32 %v12352_v57, %v3095_v24  ;;  %v12354_v60 = vpop.eup %12353  ;;  %v15937_v24 = vld [vmem:[#allocation37_spill] sm:$0xff]  ;;  %v15938_v57 = vld [vmem:[#allocation38_spill] sm:$0xff] }
 0x679   :  { %v3115_v4 = vsub.f32 1.0, %v12354_v60  ;;  %v3117_v18 = vmul.f32 %v12354_v60, %v14238_v13  ;;  %v15942_v13 = vld [vmem:[#allocation73_spill] sm:$0xff] }
 0x67a   :  { %v3113_v55 = vadd.f32 %v3112_v39, %v15930_v46  ;;  %v15939_v39 = vld [vmem:[#allocation50_spill] sm:$0xff]  ;;  %v15940_v46 = vld [vmem:[#allocation51_spill] sm:$0xff] }
 0x67c   :  { %12355 = vtanh.f32 %v3113_v55 }
 0x686   :  { %v12356_v43 = vpop.eup %12355 }
 0x687   :  { %v3116_v50 = vmul.f32 %v12356_v43, %v3115_v4  ;;  %v15941_v4 = vld [vmem:[#allocation71_spill] sm:$0xff] }
 0x689   :  { %v14326_v63 = vadd.f32 %v3117_v18, %v3116_v50 }
 0x68b   :  { %3346 = vmatmul.mubr.f32.vlgmr.msra.gmra.mrb[44].mxu1 %v14326_v63  ;;  %9050 = vmatmul.mubr.f32.vlgmr.msra.gmra.mrb[62].mxu0 %v14326_v63 }
 0x68c   :  { %10675 = vmatpush1.bf16.msra.mxu0 %v15856_v44  ;;  %10706 = vmatpush3.bf16.msra.mxu1 %v15857_v30 }
 0x68d   :  { %10677 = vmatprep.subr.bf16.mxu0 %v15858_v23  ;;  %10707 = vmatprep.subr.bf16.mxu1 %v15844_v19 }
 0x68e   :  { %3507 = vmatprep.mubr.f32.mxu0 %v15845_v61  ;;  %9084 = vmatprep.mubr.msk.f32.mxu1 %vm12811_vm4, %v15845_v61 }
 0x690   :  { %10679 = vmatpush1.bf16.msra.mxu0 %v15859_v59  ;;  %10709 = vmatpush3.bf16.msra.mxu1 %v15860_v17 }
 0x691   :  { %10681 = vmatprep.subr.bf16.mxu0 %v15861_v28  ;;  %10710 = vmatprep.subr.bf16.mxu1 %v15844_v19 }
 0x694   :  { %10683 = vmatpush1.bf16.msra.mxu0 %v15862_v7  ;;  %10712 = vmatpush3.bf16.msra.mxu1 %v15863_v41 }
 0x695   :  { %10685 = vmatprep.subr.bf16.mxu0 %v15864_v54  ;;  %10713 = vmatprep.subr.bf16.mxu1 %v15844_v19 }
 0x698   :  { %10687 = vmatpush1.bf16.msra.mxu0 %v15865_v9  ;;  %10715 = vmatpush3.bf16.msra.mxu1 %v15866_v42 }
 0x699   :  { %10689 = vmatprep.subr.bf16.mxu0 %v15867_v36  ;;  %10716 = vmatprep.subr.bf16.mxu1 %v15844_v19 }
 0x69c   :  { %10691 = vmatpush1.bf16.msra.mxu0 %v15868_v3  ;;  %10718 = vmatpush3.bf16.msra.mxu1 %v15884_v31 }
 0x69d   :  { %10693 = vmatprep.subr.bf16.mxu0 %v15931_v12  ;;  %10719 = vmatprep.subr.bf16.mxu1 %v15844_v19  ;;  %v15943_v12 = vld [vmem:[#allocation68_spill] sm:$0xff] }
 0x6a0   :  { %10695 = vmatpush1.bf16.msra.mxu0 %v15932_v52  ;;  %10721 = vmatpush3.bf16.msra.mxu1 %v15933_v0 }
 0x6a1   :  { %10697 = vmatprep.subr.bf16.mxu0 %v15934_v5  ;;  %10722 = vmatprep.subr.bf16.mxu1 %v15844_v19 }
 0x6a4   :  { %10699 = vmatpush1.bf16.msra.mxu0 %v15935_v16  ;;  %10724 = vmatpush3.bf16.msra.mxu1 %v15936_v15 }
 0x6a5   :  { %10701 = vmatprep.subr.bf16.mxu0 %v15937_v24  ;;  %10725 = vmatprep.subr.bf16.mxu1 %v15844_v19 }
 0x6a8   :  { %10703 = vmatpush1.bf16.msra.mxu0 %v15938_v57  ;;  %10727 = vmatpush3.bf16.msra.mxu1 %v15939_v39 }
 0x6a9   :  { %10729 = vmatprep.subr.bf16.mxu1 %v15940_v46  ;;  %10760 = vmatprep.subr.bf16.mxu0 %v15844_v19 }
 0x724   :  { %v3185_v55 = vpop.f32.mrb[60].mxu0  ;;  %v3256_v60 = vpop.f32.mrb[66].mxu1 }
 0x725   :  { %v12059_v43 = vadd.f32 %v15941_v4, %v3185_v55  ;;  %v3187_v50 = vpop.f32.mrb[61].mxu0  ;;  %v9016_v18 = vpop.f32.mrb[67].mxu1  ;;  %v3257_v46 = vadd.f32 %v3256_v60, %v13908_v45 }
 0x726   :  { %v12063_v48 = vadd.f32 %v15942_v13, %v3187_v50 }
 0x727   :  { %v7706_v15 = vmul.f32 -1.442695, %v12059_v43 }
 0x728   :  { %v7707_v24 = vmul.f32 -1.442695, %v12063_v48 }
 0x729   :  { %12357 = vpow2.f32 %v7706_v15 }
 0x72a   :  { %12359 = vpow2.f32 %v7707_v24 }
 0x733   :  { %v12358_v16 = vpop.eup %12357 }
 0x734   :  { %v3268_v57 = vadd.f32 1.0, %v12358_v16  ;;  %v12360_v39 = vpop.eup %12359 }
 0x735   :  { %v3269_v5 = vadd.f32 1.0, %v12360_v39 }
 0x736   :  { %12361 = vrcp.f32 %v3268_v57 }
 0x737   :  { %12363 = vrcp.f32 %v3269_v5 }
 0x740   :  { %v12362_v0 = vpop.eup %12361 }
 0x741   :  { %v3274_v52 = vmul.f32 %v12362_v0, %v3257_v46  ;;  %v12364_v4 = vpop.eup %12363 }
 0x742   :  { %v3277_v18 = vsub.f32 1.0, %v12364_v4  ;;  %v3279_v48 = vmul.f32 %v12364_v4, %v14282_v27 }
 0x743   :  { %v3275_v55 = vadd.f32 %v3274_v52, %v15943_v12 }
 0x745   :  { %12365 = vtanh.f32 %v3275_v55 }
 0x74f   :  { %v12366_v13 = vpop.eup %12365 }
 0x750   :  { %v3278_v43 = vmul.f32 %v12366_v13, %v3277_v18 }
 0x752   :  { %v14370_v15 = vadd.f32 %v3279_v48, %v3278_v43  ;;  %v15944_v43 = vld [vmem:[#allocation82_spill] sm:$0xff] }
 0x754   :  { %3508 = vmatmul.mubr.f32.vlgmr.msra.gmra.mrb[64].mxu0 %v14370_v15  ;;  %9085 = vmatmul.mubr.f32.vlgmr.msra.gmra.mrb[68].mxu1 %v14370_v15 }
 0x755   :  { %10731 = vmatpush1.bf16.msra.mxu1 %v13634_v6  ;;  %10762 = vmatpush3.bf16.msra.mxu0 %v13457_v11 }
 0x756   :  { %10733 = vmatprep.subr.bf16.mxu1 %v13637_v14  ;;  %10763 = vmatprep.subr.bf16.mxu0 %v15844_v19 }
 0x757   :  { %3669 = vmatprep.mubr.f32.mxu1 %v15845_v61  ;;  %9119 = vmatprep.mubr.msk.f32.mxu0 %vm12811_vm4, %v15845_v61 }
 0x759   :  { %10735 = vmatpush1.bf16.msra.mxu1 %v13643_v21  ;;  %10765 = vmatpush3.bf16.msra.mxu0 %v13464_v20 }
 0x75a   :  { %10737 = vmatprep.subr.bf16.mxu1 %v13647_v22  ;;  %10766 = vmatprep.subr.bf16.mxu0 %v15844_v19 }
 0x75d   :  { %10739 = vmatpush1.bf16.msra.mxu1 %v13652_v37  ;;  %10768 = vmatpush3.bf16.msra.mxu0 %v13472_v25 }
 0x75e   :  { %v3347_v12 = vpop.f32.mrb[44].mxu1  ;;  %v3418_v52 = vpop.f32.mrb[62].mxu0  ;;  %10741 = vmatprep.subr.bf16.mxu1 %v13656_v38  ;;  %10769 = vmatprep.subr.bf16.mxu0 %v15844_v19 }
 0x75f   :  { %v12089_v0 = vadd.f32 %v13937_v29, %v3347_v12  ;;  %v3349_v5 = vpop.f32.mrb[45].mxu1  ;;  %v9051_v16 = vpop.f32.mrb[63].mxu0  ;;  %v3419_v4 = vadd.f32 %v3418_v52, %v13968_v56 }
 0x760   :  { %v12091_v57 = vadd.f32 %v13941_v35, %v3349_v5 }
 0x761   :  { %v7708_v24 = vmul.f32 -1.442695, %v12089_v0  ;;  %10743 = vmatpush1.bf16.msra.mxu1 %v13660_v49  ;;  %10771 = vmatpush3.bf16.msra.mxu0 %v13484_v40 }
 0x762   :  { %10745 = vmatprep.subr.bf16.mxu1 %v13664_v51  ;;  %10772 = vmatprep.subr.bf16.mxu0 %v15844_v19  ;;  %v7709_v39 = vmul.f32 -1.442695, %v12091_v57 }
 0x763   :  { %12367 = vpow2.f32 %v7708_v24 }
 0x764   :  { %12369 = vpow2.f32 %v7709_v39  ;;  %v15956_v39 = vld [vmem:[#allocation76_spill] sm:$0xff] }
 0x765   :  { %10747 = vmatpush1.bf16.msra.mxu1 %v13668_v62  ;;  %10774 = vmatpush3.bf16.msra.mxu0 %v13501_v58 }
 0x766   :  { %10749 = vmatprep.subr.bf16.mxu1 %v13672_v10  ;;  %10775 = vmatprep.subr.bf16.mxu0 %v15844_v19 }
 0x769   :  { %10751 = vmatpush1.bf16.msra.mxu1 %v13676_v53  ;;  %10777 = vmatpush3.bf16.msra.mxu0 %v15846_v47 }
 0x76a   :  { %10753 = vmatprep.subr.bf16.mxu1 %v15847_v34  ;;  %10778 = vmatprep.subr.bf16.mxu0 %v15844_v19 }
 0x76d   :  { %v12368_v46 = vpop.eup %12367  ;;  %10755 = vmatpush1.bf16.msra.mxu1 %v15848_v8  ;;  %10780 = vmatpush3.bf16.msra.mxu0 %v15849_v26 }
 0x76e   :  { %v3430_v60 = vadd.f32 1.0, %v12368_v46  ;;  %10757 = vmatprep.subr.bf16.mxu1 %v15850_v32  ;;  %10781 = vmatprep.subr.bf16.mxu0 %v15844_v19  ;;  %v12370_v50 = vpop.eup %12369 }
 0x76f   :  { %v3431_v55 = vadd.f32 1.0, %v12370_v50 }
 0x770   :  { %12371 = vrcp.f32 %v3430_v60 }
 0x771   :  { %10759 = vmatpush1.bf16.msra.mxu1 %v15851_v1  ;;  %10783 = vmatpush3.bf16.msra.mxu0 %v15852_v33  ;;  %12373 = vrcp.f32 %v3431_v55 }
 0x772   :  { %10785 = vmatprep.subr.bf16.mxu0 %v15853_v2  ;;  %10816 = vmatprep.subr.bf16.mxu1 %v15844_v19  ;;  %v15945_v2 = vld [vmem:[#allocation33_spill] sm:$0xff] }
 0x77a   :  { %v12372_v18 = vpop.eup %12371 }
 0x77b   :  { %v3436_v13 = vmul.f32 %v12372_v18, %v3419_v4  ;;  %v12374_v12 = vpop.eup %12373 }
 0x77c   :  { %v3439_v0 = vsub.f32 1.0, %v12374_v12  ;;  %v3441_v24 = vmul.f32 %v12374_v12, %v14326_v63 }
 0x77d   :  { %v3437_v48 = vadd.f32 %v3436_v13, %v15944_v43 }
 0x77f   :  { %12375 = vtanh.f32 %v3437_v48 }
 0x789   :  { %v12376_v5 = vpop.eup %12375 }
 0x78a   :  { %v3440_v16 = vmul.f32 %v12376_v5, %v3439_v0  ;;  %v15957_v0 = vld [vmem:[#allocation74_spill] sm:$0xff] }
 0x78c   :  { %v14414_v57 = vadd.f32 %v3441_v24, %v3440_v16 }
 0x78e   :  { %3670 = vmatmul.mubr.f32.vlgmr.msra.gmra.mrb[42].mxu1 %v14414_v57  ;;  %9120 = vmatmul.mubr.f32.vlgmr.msra.gmra.mrb[66].mxu0 %v14414_v57 }
 0x78f   :  { %10787 = vmatpush1.bf16.msra.mxu0 %v15856_v44  ;;  %10818 = vmatpush3.bf16.msra.mxu1 %v15857_v30  ;;  %v15946_v44 = vld [vmem:[#allocation34_spill] sm:$0xff]  ;;  %v15947_v30 = vld [vmem:[#allocation47_spill] sm:$0xff] }
 0x790   :  { %10789 = vmatprep.subr.bf16.mxu0 %v15858_v23  ;;  %10819 = vmatprep.subr.bf16.mxu1 %v15844_v19  ;;  %v15948_v23 = vld [vmem:[#allocation35_spill] sm:$0xff] }
 0x791   :  { %3831 = vmatprep.mubr.f32.mxu0 %v15845_v61  ;;  %9154 = vmatprep.mubr.msk.f32.mxu1 %vm12811_vm4, %v15845_v61 }
 0x793   :  { %10791 = vmatpush1.bf16.msra.mxu0 %v15859_v59  ;;  %10821 = vmatpush3.bf16.msra.mxu1 %v15860_v17  ;;  %v15949_v59 = vld [vmem:[#allocation36_spill] sm:$0xff]  ;;  %v15950_v17 = vld [vmem:[#allocation49_spill] sm:$0xff] }
 0x794   :  { %10793 = vmatprep.subr.bf16.mxu0 %v15861_v28  ;;  %10822 = vmatprep.subr.bf16.mxu1 %v15844_v19  ;;  %v15951_v28 = vld [vmem:[#allocation37_spill] sm:$0xff] }
 0x797   :  { %10795 = vmatpush1.bf16.msra.mxu0 %v15862_v7  ;;  %10824 = vmatpush3.bf16.msra.mxu1 %v15863_v41  ;;  %v15952_v7 = vld [vmem:[#allocation38_spill] sm:$0xff] }
 0x798   :  { %10797 = vmatprep.subr.bf16.mxu0 %v15864_v54  ;;  %10825 = vmatprep.subr.bf16.mxu1 %v15844_v19  ;;  %v15953_v41 = vld [vmem:[#allocation50_spill] sm:$0xff]  ;;  %v15954_v54 = vld [vmem:[#allocation51_spill] sm:$0xff] }
 0x79b   :  { %10799 = vmatpush1.bf16.msra.mxu0 %v15865_v9  ;;  %10827 = vmatpush3.bf16.msra.mxu1 %v15866_v42 }
 0x79c   :  { %10801 = vmatprep.subr.bf16.mxu0 %v15867_v36  ;;  %10828 = vmatprep.subr.bf16.mxu1 %v15844_v19  ;;  %v15955_v36 = vld [vmem:[#allocation75_spill] sm:$0xff] }
 0x79f   :  { %10803 = vmatpush1.bf16.msra.mxu0 %v15868_v3  ;;  %10830 = vmatpush3.bf16.msra.mxu1 %v15884_v31 }
 0x7a0   :  { %10805 = vmatprep.subr.bf16.mxu0 %v15945_v2  ;;  %10831 = vmatprep.subr.bf16.mxu1 %v15844_v19 }
 0x7a3   :  { %10807 = vmatpush1.bf16.msra.mxu0 %v15946_v44  ;;  %10833 = vmatpush3.bf16.msra.mxu1 %v15947_v30 }
 0x7a4   :  { %10809 = vmatprep.subr.bf16.mxu0 %v15948_v23  ;;  %10834 = vmatprep.subr.bf16.mxu1 %v15844_v19 }
 0x7a7   :  { %10811 = vmatpush1.bf16.msra.mxu0 %v15949_v59  ;;  %10836 = vmatpush3.bf16.msra.mxu1 %v15950_v17 }
 0x7a8   :  { %10813 = vmatprep.subr.bf16.mxu0 %v15951_v28  ;;  %10837 = vmatprep.subr.bf16.mxu1 %v15844_v19  ;;  %v4099_v28 = vld [vmem:[#allocation8] sm:$0xff] }
 0x7ab   :  { %10815 = vmatpush1.bf16.msra.mxu0 %v15952_v7  ;;  %10839 = vmatpush3.bf16.msra.mxu1 %v15953_v41  ;;  %v4102_v41 = vld [vmem:[#allocation8 + $0x18] sm:$0xff] }
 0x7ac   :  { %10841 = vmatprep.subr.bf16.mxu1 %v15954_v54  ;;  %10872 = vmatprep.subr.bf16.mxu0 %v15844_v19  ;;  %v4106_v54 = vld [vmem:[#allocation8 + $0x38] sm:$0xff] }
 0x827   :  { %v3509_v9 = vpop.f32.mrb[64].mxu0  ;;  %v3580_v42 = vpop.f32.mrb[68].mxu1 }
 0x828   :  { %v12067_v3 = vadd.f32 %v15955_v36, %v3509_v9  ;;  %v3511_v31 = vpop.f32.mrb[65].mxu0  ;;  %v9086_v52 = vpop.f32.mrb[69].mxu1  ;;  %v3581_v43 = vadd.f32 %v3580_v42, %v13908_v45  ;;  %v4109_v9 = vld [vmem:[#allocation8 + $0x50] sm:$0xff]  ;;  %v10898_v42 = vpack.c.bf16 %v4102_v41, %v4099_v28  ;;  %v4147_v41 = vld [vmem:[#allocation8 + $0x180] sm:$0xff] }
 0x829   :  { %v12071_v46 = vadd.f32 %v15956_v39, %v3511_v31  ;;  %v10900_v36 = vpack.c.bf16 %v4109_v9, %v4106_v54  ;;  %v4108_v31 = vld [vmem:[#allocation8 + $0x48] sm:$0xff]  ;;  %v4115_v39 = vld [vmem:[#allocation8 + $0x80] sm:$0xff]  ;;  %v4150_v54 = vld [vmem:[#allocation8 + $0x198] sm:$0xff] }
 0x82a   :  { %v7710_v60 = vmul.f32 -1.442695, %v12067_v3  ;;  %v4105_v3 = vld [vmem:[#allocation8 + $0x30] sm:$0xff]  ;;  %v4112_v52 = vld [vmem:[#allocation8 + $0x68] sm:$0xff] }
 0x82b   :  { %v7711_v50 = vmul.f32 -1.442695, %v12071_v46  ;;  %v10902_v46 = vpack.c.bf16 %v4108_v31, %v4105_v3  ;;  %v4158_v3 = vld [vmem:[#allocation8 + $0x1d8] sm:$0xff] }
 0x82c   :  { %12377 = vpow2.f32 %v7710_v60  ;;  %v10904_v60 = vpack.c.bf16 %v4115_v39, %v4112_v52  ;;  %v4154_v52 = vld [vmem:[#allocation8 + $0x1b8] sm:$0xff]  ;;  %v4157_v39 = vld [vmem:[#allocation8 + $0x1d0] sm:$0xff] }
 0x82d   :  { %12379 = vpow2.f32 %v7711_v50  ;;  %v4111_v50 = vld [vmem:[#allocation8 + $0x60] sm:$0xff] }
 0x836   :  { %v12378_v55 = vpop.eup %12377 }
 0x837   :  { %v3592_v4 = vadd.f32 1.0, %v12378_v55  ;;  %v12380_v18 = vpop.eup %12379  ;;  %v4114_v55 = vld [vmem:[#allocation8 + $0x78] sm:$0xff] }
 0x838   :  { %v3593_v13 = vadd.f32 1.0, %v12380_v18  ;;  %v4121_v18 = vld [vmem:[#allocation8 + $0xb0] sm:$0xff] }
 0x839   :  { %12381 = vrcp.f32 %v3592_v4  ;;  %v4118_v4 = vld [vmem:[#allocation8 + $0x98] sm:$0xff] }
 0x83a   :  { %12383 = vrcp.f32 %v3593_v13  ;;  %v10906_v13 = vpack.c.bf16 %v4114_v55, %v4111_v50  ;;  %v4110_v50 = vld [vmem:[#allocation8 + $0x58] sm:$0xff]  ;;  %v4153_v55 = vld [vmem:[#allocation8 + $0x1b0] sm:$0xff] }
 0x843   :  { %v12382_v48 = vpop.eup %12381 }
 0x844   :  { %v3598_v12 = vmul.f32 %v12382_v48, %v3581_v43  ;;  %v12384_v16 = vpop.eup %12383  ;;  %v10908_v43 = vpack.c.bf16 %v4121_v18, %v4118_v4  ;;  %v4117_v48 = vld [vmem:[#allocation8 + $0x90] sm:$0xff]  ;;  %v4156_v4 = vld [vmem:[#allocation8 + $0x1c8] sm:$0xff] }
 0x845   :  { %v3601_v24 = vsub.f32 1.0, %v12384_v16  ;;  %v3603_v30 = vmul.f32 %v12384_v16, %v14370_v15  ;;  %v4127_v16 = vld [vmem:[#allocation8 + $0xe0] sm:$0xff] }
 0x846   :  { %v3599_v5 = vadd.f32 %v3598_v12, %v15957_v0  ;;  %v4120_v12 = vld [vmem:[#allocation8 + $0xa8] sm:$0xff] }
 0x847   :  { %v10910_v0 = vpack.c.bf16 %v4120_v12, %v4117_v48  ;;  %v4164_v48 = vld [vmem:[#allocation8 + $0x208] sm:$0xff] }
 0x848   :  { %12385 = vtanh.f32 %v3599_v5  ;;  %v4124_v5 = vld [vmem:[#allocation8 + $0xc8] sm:$0xff] }
 0x852   :  { %v12386_v2 = vpop.eup %12385 }
 0x853   :  { %v3602_v44 = vmul.f32 %v12386_v2, %v3601_v24  ;;  %v10912_v24 = vpack.c.bf16 %v4127_v16, %v4124_v5  ;;  %v4123_v2 = vld [vmem:[#allocation8 + $0xc0] sm:$0xff]  ;;  %v4113_v16 = vld [vmem:[#allocation8 + $0x70] sm:$0xff] }
 0x854   :  { %v4163_v5 = vld [vmem:[#allocation8 + $0x200] sm:$0xff] }
 0x855   :  { %v14458_v23 = vadd.f32 %v3603_v30, %v3602_v44  ;;  %v4126_v44 = vld [vmem:[#allocation8 + $0xd8] sm:$0xff] }
 0x856   :  { %v10914_v30 = vpack.c.bf16 %v4126_v44, %v4123_v2  ;;  %v4116_v2 = vld [vmem:[#allocation8 + $0x88] sm:$0xff]  ;;  %v4159_v44 = vld [vmem:[#allocation8 + $0x1e0] sm:$0xff] }
 0x857   :  { %3832 = vmatmul.mubr.f32.vlgmr.msra.gmra.mrb[68].mxu0 %v14458_v23  ;;  %9155 = vmatmul.mubr.f32.vlgmr.msra.gmra.mrb[70].mxu1 %v14458_v23 }
 0x858   :  { %10843 = vmatpush1.bf16.msra.mxu1 %v13634_v6  ;;  %10874 = vmatpush3.bf16.msra.mxu0 %v13457_v11 }
 0x859   :  { %10845 = vmatprep.subr.bf16.mxu1 %v13637_v14  ;;  %10875 = vmatprep.subr.bf16.mxu0 %v15844_v19 }
 0x85a   :  { %3993 = vmatprep.mubr.f32.mxu1 %v15845_v61  ;;  %9189 = vmatprep.mubr.msk.f32.mxu0 %vm12811_vm4, %v15845_v61 }
 0x85c   :  { %10847 = vmatpush1.bf16.msra.mxu1 %v13643_v21  ;;  %10877 = vmatpush3.bf16.msra.mxu0 %v13464_v20 }
 0x85d   :  { %10849 = vmatprep.subr.bf16.mxu1 %v13647_v22  ;;  %10878 = vmatprep.subr.bf16.mxu0 %v15844_v19 }
 0x860   :  { %10851 = vmatpush1.bf16.msra.mxu1 %v13652_v37  ;;  %10880 = vmatpush3.bf16.msra.mxu0 %v13472_v25 }
 0x861   :  { %v3671_v11 = vpop.f32.mrb[42].mxu1  ;;  %v3742_v6 = vpop.f32.mrb[66].mxu0  ;;  %10853 = vmatprep.subr.bf16.mxu1 %v13656_v38  ;;  %10881 = vmatprep.subr.bf16.mxu0 %v15844_v19 }
 0x862   :  { %v12085_v14 = vadd.f32 %v13937_v29, %v3671_v11  ;;  %v3673_v59 = vpop.f32.mrb[43].mxu1  ;;  %v9121_v21 = vpop.f32.mrb[67].mxu0  ;;  %v3743_v38 = vadd.f32 %v3742_v6, %v13968_v56  ;;  %v4130_v11 = vld [vmem:[#allocation8 + $0xf8] sm:$0xff]  ;;  %v4133_v6 = vld [vmem:[#allocation8 + $0x110] sm:$0xff] }
 0x863   :  { %v12087_v20 = vadd.f32 %v13941_v35, %v3673_v59  ;;  %v4129_v59 = vld [vmem:[#allocation8 + $0xf0] sm:$0xff]  ;;  %v4132_v21 = vld [vmem:[#allocation8 + $0x108] sm:$0xff] }
 0x864   :  { %v7712_v17 = vmul.f32 -1.442695, %v12085_v14  ;;  %10855 = vmatpush1.bf16.msra.mxu1 %v13660_v49  ;;  %10883 = vmatpush3.bf16.msra.mxu0 %v13484_v40  ;;  %v10916_v14 = vpack.c.bf16 %v4133_v6, %v4130_v11  ;;  %v10970_v11 = vpack.c.bf16 %v4116_v2, %v4113_v16  ;;  %v4191_v2 = vld [vmem:[#allocation8 + $0x2e0] sm:$0xff] }
 0x865   :  { %10857 = vmatprep.subr.bf16.mxu1 %v13664_v51  ;;  %10884 = vmatprep.subr.bf16.mxu0 %v15844_v19  ;;  %v7713_v25 = vmul.f32 -1.442695, %v12087_v20  ;;  %v4136_v20 = vld [vmem:[#allocation8 + $0x128] sm:$0xff] }
 0x866   :  { %12387 = vpow2.f32 %v7712_v17  ;;  %v10918_v17 = vpack.c.bf16 %v4132_v21, %v4129_v59  ;;  %v4170_v59 = vld [vmem:[#allocation8 + $0x238] sm:$0xff] }
 0x867   :  { %12389 = vpow2.f32 %v7713_v25  ;;  %v4139_v25 = vld [vmem:[#allocation8 + $0x140] sm:$0xff] }
 0x868   :  { %10859 = vmatpush1.bf16.msra.mxu1 %v13668_v62  ;;  %10886 = vmatpush3.bf16.msra.mxu0 %v13501_v58  ;;  %v15958_v62 = vld [vmem:[#allocation79_spill] sm:$0xff] }
 0x869   :  { %10861 = vmatprep.subr.bf16.mxu1 %v13672_v10  ;;  %10887 = vmatprep.subr.bf16.mxu0 %v15844_v19 }
 0x86c   :  { %10863 = vmatpush1.bf16.msra.mxu1 %v13676_v53  ;;  %10889 = vmatpush3.bf16.msra.mxu0 %v15846_v47 }
 0x86d   :  { %10865 = vmatprep.subr.bf16.mxu1 %v15847_v34  ;;  %10890 = vmatprep.subr.bf16.mxu0 %v15844_v19 }
 0x870   :  { %v12388_v40 = vpop.eup %12387  ;;  %10867 = vmatpush1.bf16.msra.mxu1 %v15848_v8  ;;  %10892 = vmatpush3.bf16.msra.mxu0 %v15849_v26 }
 0x871   :  { %v3754_v58 = vadd.f32 1.0, %v12388_v40  ;;  %10869 = vmatprep.subr.bf16.mxu1 %v15850_v32  ;;  %10893 = vmatprep.subr.bf16.mxu0 %v15844_v19  ;;  %v12390_v22 = vpop.eup %12389  ;;  %v10920_v40 = vpack.c.bf16 %v4139_v25, %v4136_v20  ;;  %v4169_v20 = vld [vmem:[#allocation8 + $0x230] sm:$0xff]  ;;  %v4119_v25 = vld [vmem:[#allocation8 + $0xa0] sm:$0xff] }
 0x872   :  { %v3755_v37 = vadd.f32 1.0, %v12390_v22  ;;  %v4138_v22 = vld [vmem:[#allocation8 + $0x138] sm:$0xff] }
 0x873   :  { %12391 = vrcp.f32 %v3754_v58  ;;  %v4135_v58 = vld [vmem:[#allocation8 + $0x120] sm:$0xff] }
 0x874   :  { %10871 = vmatpush1.bf16.msra.mxu1 %v15851_v1  ;;  %10895 = vmatpush3.bf16.msra.mxu0 %v15852_v33  ;;  %12393 = vrcp.f32 %v3755_v37  ;;  %v4100_v1 = vld [vmem:[#allocation8 + $0x8] sm:$0xff]  ;;  %v4103_v33 = vld [vmem:[#allocation8 + $0x20] sm:$0xff]  ;;  %v10922_v37 = vpack.c.bf16 %v4138_v22, %v4135_v58  ;;  %v4122_v58 = vld [vmem:[#allocation8 + $0xb8] sm:$0xff] }
 0x875   :  { %v10896_v7 = vpack.c.bf16 %v4103_v33, %v4100_v1  ;;  %v4151_v1 = vld [vmem:[#allocation8 + $0x1a0] sm:$0xff]  ;;  %v4101_v33 = vld [vmem:[#allocation8 + $0x10] sm:$0xff] }
 0x876   :  { %v4165_v22 = vld [vmem:[#allocation8 + $0x210] sm:$0xff] }
 0x877   :  { %10897 = vmatprep.subr.bf16.mxu0 %v10896_v7  ;;  %v4104_v7 = vld [vmem:[#allocation8 + $0x28] sm:$0xff] }
 0x878   :  { %v10962_v9 = vpack.c.bf16 %v4104_v7, %v4101_v33  ;;  %v4174_v33 = vld [vmem:[#allocation8 + $0x258] sm:$0xff] }
 0x87d   :  { %v12392_v49 = vpop.eup %12391 }
 0x87e   :  { %v3760_v51 = vmul.f32 %v12392_v49, %v3743_v38  ;;  %v12394_v53 = vpop.eup %12393  ;;  %v4142_v38 = vld [vmem:[#allocation8 + $0x158] sm:$0xff]  ;;  %v4145_v49 = vld [vmem:[#allocation8 + $0x170] sm:$0xff] }
 0x87f   :  { %v3763_v47 = vsub.f32 1.0, %v12394_v53  ;;  %v3765_v26 = vmul.f32 %v12394_v53, %v14414_v57 }
 0x880   :  { %v3761_v10 = vadd.f32 %v3760_v51, %v15958_v62  ;;  %v10924_v51 = vpack.c.bf16 %v4145_v49, %v4142_v38  ;;  %v4141_v62 = vld [vmem:[#allocation8 + $0x150] sm:$0xff]  ;;  %v10974_v38 = vpack.c.bf16 %v4122_v58, %v4119_v25  ;;  %v4192_v25 = vld [vmem:[#allocation8 + $0x2e8] sm:$0xff] }
 0x882   :  { %12395 = vtanh.f32 %v3761_v10  ;;  %v4144_v10 = vld [vmem:[#allocation8 + $0x168] sm:$0xff] }
 0x883   :  { %v10926_v53 = vpack.c.bf16 %v4144_v10, %v4141_v62  ;;  %v4176_v62 = vld [vmem:[#allocation8 + $0x268] sm:$0xff] }
 0x88c   :  { %v12396_v34 = vpop.eup %12395 }
 0x88d   :  { %v3764_v8 = vmul.f32 %v12396_v34, %v3763_v47  ;;  %v4149_v47 = vld [vmem:[#allocation8 + $0x190] sm:$0xff]  ;;  %v4152_v34 = vld [vmem:[#allocation8 + $0x1a8] sm:$0xff] }
 0x88f   :  { %v14500_v32 = vadd.f32 %v3765_v26, %v3764_v8  ;;  %v10960_v8 = vpack.c.bf16 %v4152_v34, %v4149_v47  ;;  %v4148_v26 = vld [vmem:[#allocation8 + $0x188] sm:$0xff]  ;;  %v4175_v47 = vld [vmem:[#allocation8 + $0x260] sm:$0xff]  ;;  %v4125_v34 = vld [vmem:[#allocation8 + $0xd0] sm:$0xff] }
 0x890   :  { %v10928_v28 = vpack.c.bf16 %v4151_v1, %v4148_v26  ;;  %v4128_v26 = vld [vmem:[#allocation8 + $0xe8] sm:$0xff]  ;;  %v4171_v1 = vld [vmem:[#allocation8 + $0x240] sm:$0xff] }
 0x891   :  { %3994 = vmatmul.mubr.f32.vlgmr.msra.gmra.mrb[40].mxu1 %v14500_v32  ;;  %9190 = vmatmul.mubr.f32.vlgmr.msra.gmra.mrb[70].mxu0 %v14500_v32  ;;  %v10946_v7 = vpack.c.bf16 %v4174_v33, %v4171_v1  ;;  %v15960_v1 = vld [vmem:[#allocation78_spill] sm:$0xff] }
 0x892   :  { %10899 = vmatpush1.bf16.msra.mxu0 %v10898_v42  ;;  %10961 = vmatprep.subr.bf16.mxu1 %v10960_v8  ;;  %v10930_v42 = vpack.c.bf16 %v4150_v54, %v4147_v41  ;;  %v4179_v41 = vld [vmem:[#allocation8 + $0x280] sm:$0xff]  ;;  %v4182_v54 = vld [vmem:[#allocation8 + $0x298] sm:$0xff] }
 0x893   :  { %10901 = vmatprep.subr.bf16.mxu0 %v10900_v36  ;;  %v4155_v36 = vld [vmem:[#allocation8 + $0x1c0] sm:$0xff]  ;;  %10963 = vmatpush3.bf16.msra.mxu1 %v10962_v9  ;;  %v4178_v9 = vld [vmem:[#allocation8 + $0x278] sm:$0xff] }
 0x894   :  { %v10964_v31 = vpack.c.bf16 %v4158_v3, %v4155_v36  ;;  %v4181_v36 = vld [vmem:[#allocation8 + $0x290] sm:$0xff]  ;;  %v4131_v3 = vld [vmem:[#allocation8 + $0x100] sm:$0xff] }
 0x896   :  { %10903 = vmatpush1.bf16.msra.mxu0 %v10902_v46  ;;  %v4107_v46 = vld [vmem:[#allocation8 + $0x40] sm:$0xff]  ;;  %10965 = vmatprep.subr.bf16.mxu1 %v10964_v31  ;;  %v4134_v31 = vld [vmem:[#allocation8 + $0x118] sm:$0xff] }
 0x897   :  { %10905 = vmatprep.subr.bf16.mxu0 %v10904_v60  ;;  %v10932_v60 = vpack.c.bf16 %v4157_v39, %v4154_v52  ;;  %v10966_v18 = vpack.c.bf16 %v4110_v50, %v4107_v46  ;;  %v10948_v52 = vpack.c.bf16 %v4181_v36, %v4178_v9  ;;  %v10982_v39 = vpack.c.bf16 %v4134_v31, %v4131_v3  ;;  %v4177_v46 = vld [vmem:[#allocation8 + $0x270] sm:$0xff] }
 0x898   :  { %v4185_v50 = vld [vmem:[#allocation8 + $0x2b0] sm:$0xff] }
 0x899   :  { %10967 = vmatpush3.bf16.msra.mxu1 %v10966_v18  ;;  %v4184_v18 = vld [vmem:[#allocation8 + $0x2a8] sm:$0xff] }
 0x89a   :  { %10907 = vmatpush1.bf16.msra.mxu0 %v10906_v13  ;;  %v10934_v13 = vpack.c.bf16 %v4156_v4, %v4153_v55  ;;  %v4188_v4 = vld [vmem:[#allocation8 + $0x2c8] sm:$0xff] }
 0x89b   :  { %10909 = vmatprep.subr.bf16.mxu0 %v10908_v43  ;;  %v4161_v43 = vld [vmem:[#allocation8 + $0x1f0] sm:$0xff] }
 0x89c   :  { %v10968_v12 = vpack.c.bf16 %v4164_v48, %v4161_v43  ;;  %v10984_v43 = vpack.c.bf16 %v4188_v4, %v4185_v50 }
 0x89e   :  { %10911 = vmatpush1.bf16.msra.mxu0 %v10910_v0  ;;  %v4160_v0 = vld [vmem:[#allocation8 + $0x1e8] sm:$0xff]  ;;  %10969 = vmatprep.subr.bf16.mxu1 %v10968_v12  ;;  %v4137_v12 = vld [vmem:[#allocation8 + $0x130] sm:$0xff] }
 0x89f   :  { %10913 = vmatprep.subr.bf16.mxu0 %v10912_v24  ;;  %v10936_v24 = vpack.c.bf16 %v4163_v5, %v4160_v0  ;;  %10971 = vmatpush3.bf16.msra.mxu1 %v10970_v11  ;;  %v4140_v0 = vld [vmem:[#allocation8 + $0x148] sm:$0xff]  ;;  %v4183_v5 = vld [vmem:[#allocation8 + $0x2a0] sm:$0xff] }
 0x8a0   :  { %v10986_v16 = vpack.c.bf16 %v4140_v0, %v4137_v12 }
 0x8a2   :  { %10915 = vmatpush1.bf16.msra.mxu0 %v10914_v30  ;;  %v4162_v30 = vld [vmem:[#allocation8 + $0x1f8] sm:$0xff] }
 0x8a3   :  { %10917 = vmatprep.subr.bf16.mxu0 %v10916_v14  ;;  %v10938_v6 = vpack.c.bf16 %v4162_v30, %v4159_v44  ;;  %v4167_v14 = vld [vmem:[#allocation8 + $0x220] sm:$0xff]  ;;  %v4194_v44 = vld [vmem:[#allocation8 + $0x2f8] sm:$0xff] }
 0x8a4   :  { %v10972_v21 = vpack.c.bf16 %v4170_v59, %v4167_v14  ;;  %v10988_v11 = vpack.c.bf16 %v4194_v44, %v4191_v2  ;;  %v4193_v14 = vld [vmem:[#allocation8 + $0x2f0] sm:$0xff]  ;;  %v4143_v59 = vld [vmem:[#allocation8 + $0x160] sm:$0xff] }
 0x8a6   :  { %10919 = vmatpush1.bf16.msra.mxu0 %v10918_v17  ;;  %v4166_v17 = vld [vmem:[#allocation8 + $0x218] sm:$0xff]  ;;  %10973 = vmatprep.subr.bf16.mxu1 %v10972_v21 }
 0x8a7   :  { %10921 = vmatprep.subr.bf16.mxu0 %v10920_v40  ;;  %v10940_v40 = vpack.c.bf16 %v4169_v20, %v4166_v17  ;;  %10975 = vmatpush3.bf16.msra.mxu1 %v10974_v38  ;;  %v4146_v17 = vld [vmem:[#allocation8 + $0x178] sm:$0xff]  ;;  %v4189_v20 = vld [vmem:[#allocation8 + $0x2d0] sm:$0xff] }
 0x8a8   :  { %v10958_v58 = vpack.c.bf16 %v4192_v25, %v4189_v20  ;;  %v4433_v25 = vld [vmem:[#allocation11 + $0x18] sm:$0xff] }
 0x8aa   :  { %10923 = vmatpush1.bf16.msra.mxu0 %v10922_v37  ;;  %v4168_v37 = vld [vmem:[#allocation8 + $0x228] sm:$0xff] }
 0x8ab   :  { %10925 = vmatprep.subr.bf16.mxu0 %v10924_v51  ;;  %v10942_v49 = vpack.c.bf16 %v4168_v37, %v4165_v22  ;;  %v4173_v51 = vld [vmem:[#allocation8 + $0x250] sm:$0xff]  ;;  %v4431_v22 = vld [vmem:[#allocation11 + $0x8] sm:$0xff]  ;;  %v4434_v37 = vld [vmem:[#allocation11 + $0x20] sm:$0xff] }
 0x8ac   :  { %v10976_v10 = vpack.c.bf16 %v4176_v62, %v4173_v51  ;;  %v10992_v38 = vpack.c.bf16 %v4434_v37, %v4431_v22  ;;  %v4483_v51 = vld [vmem:[#allocation11 + $0x1a8] sm:$0xff]  ;;  %v4432_v22 = vld [vmem:[#allocation11 + $0x10] sm:$0xff] }
 0x8ad   :  { %v4435_v37 = vld [vmem:[#allocation11 + $0x28] sm:$0xff] }
 0x8ae   :  { %10927 = vmatpush1.bf16.msra.mxu0 %v10926_v53  ;;  %v4172_v53 = vld [vmem:[#allocation8 + $0x248] sm:$0xff]  ;;  %10977 = vmatprep.subr.bf16.mxu1 %v10976_v10 }
 0x8af   :  { %10929 = vmatprep.subr.bf16.mxu0 %v10928_v28  ;;  %v10944_v8 = vpack.c.bf16 %v4175_v47, %v4172_v53  ;;  %v10978_v28 = vpack.c.bf16 %v4128_v26, %v4125_v34  ;;  %v15959_v47 = vld [vmem:[#allocation77_spill] sm:$0xff] }
 0x8b1   :  { %10979 = vmatpush3.bf16.msra.mxu1 %v10978_v28 }
 0x8b2   :  { %10931 = vmatpush1.bf16.msra.mxu0 %v10930_v42  ;;  %v10980_v42 = vpack.c.bf16 %v4182_v54, %v4179_v41 }
 0x8b3   :  { %10933 = vmatprep.subr.bf16.mxu0 %v10932_v60  ;;  %v4180_v60 = vld [vmem:[#allocation8 + $0x288] sm:$0xff] }
 0x8b4   :  { %10981 = vmatprep.subr.bf16.mxu1 %v10980_v42  ;;  %v10950_v55 = vpack.c.bf16 %v4180_v60, %v4177_v46 }
 0x8b5   :  { %10983 = vmatpush3.bf16.msra.mxu1 %v10982_v39 }
 0x8b6   :  { %10935 = vmatpush1.bf16.msra.mxu0 %v10934_v13  ;;  %v4187_v13 = vld [vmem:[#allocation8 + $0x2c0] sm:$0xff]  ;;  %10985 = vmatprep.subr.bf16.mxu1 %v10984_v43 }
 0x8b7   :  { %10937 = vmatprep.subr.bf16.mxu0 %v10936_v24  ;;  %v10952_v48 = vpack.c.bf16 %v4187_v13, %v4184_v18  ;;  %v4186_v24 = vld [vmem:[#allocation8 + $0x2b8] sm:$0xff] }
 0x8b8   :  { %v10954_v30 = vpack.c.bf16 %v4186_v24, %v4183_v5 }
 0x8b9   :  { %10987 = vmatpush3.bf16.msra.mxu1 %v10986_v16 }
 0x8ba   :  { %10939 = vmatpush1.bf16.msra.mxu0 %v10938_v6  ;;  %v4190_v6 = vld [vmem:[#allocation8 + $0x2d8] sm:$0xff]  ;;  %10989 = vmatprep.subr.bf16.mxu1 %v10988_v11 }
 0x8bb   :  { %10941 = vmatprep.subr.bf16.mxu0 %v10940_v40  ;;  %v10956_v21 = vpack.c.bf16 %v4193_v14, %v4190_v6  ;;  %v10990_v40 = vpack.c.bf16 %v4146_v17, %v4143_v59  ;;  %v15962_v59 = vld [vmem:[#allocation80_spill] sm:$0xff] }
 0x8bd   :  { %10991 = vmatpush3.bf16.msra.mxu1 %v10990_v40 }
 0x8be   :  { %10943 = vmatpush1.bf16.msra.mxu0 %v10942_v49  ;;  %v4480_v49 = vld [vmem:[#allocation11 + $0x190] sm:$0xff]  ;;  %10993 = vmatprep.subr.bf16.mxu1 %v10992_v38  ;;  %v4437_v38 = vld [vmem:[#allocation11 + $0x38] sm:$0xff] }
 0x8bf   :  { %10945 = vmatprep.subr.bf16.mxu0 %v10944_v8  ;;  %v11056_v62 = vpack.c.bf16 %v4483_v51, %v4480_v49  ;;  %v4440_v49 = vld [vmem:[#allocation11 + $0x50] sm:$0xff]  ;;  %v4486_v51 = vld [vmem:[#allocation11 + $0x1c0] sm:$0xff] }
 0x8c2   :  { %10947 = vmatpush1.bf16.msra.mxu0 %v10946_v7 }
 0x8c3   :  { %10949 = vmatprep.subr.bf16.mxu0 %v10948_v52  ;;  %v15961_v52 = vld [vmem:[#allocation72_spill] sm:$0xff] }
 0x8c6   :  { %10951 = vmatpush1.bf16.msra.mxu0 %v10950_v55 }
 0x8c7   :  { %10953 = vmatprep.subr.bf16.mxu0 %v10952_v48 }
 0x8ca   :  { %10955 = vmatpush1.bf16.msra.mxu0 %v10954_v30 }
 0x8cb   :  { %10957 = vmatprep.subr.bf16.mxu0 %v10956_v21 }
 0x8ce   :  { %10959 = vmatpush1.bf16.msra.mxu0 %v10958_v58 }
 0x8cf   :  { %11057 = vmatprep.subr.bf16.mxu0 %v11056_v62 }
 0x92a   :  { %v3833_v10 = vpop.f32.mrb[68].mxu0  ;;  %v3904_v53 = vpop.f32.mrb[70].mxu1 }
 0x92b   :  { %v12075_v34 = vadd.f32 %v15959_v47, %v3833_v10  ;;  %v3835_v8 = vpop.f32.mrb[69].mxu0  ;;  %v9156_v26 = vpop.f32.mrb[71].mxu1  ;;  %v3905_v36 = vadd.f32 %v3904_v53, %v13908_v45  ;;  %v11058_v53 = vpack.c.bf16 %v4435_v37, %v4432_v22  ;;  %v4436_v47 = vld [vmem:[#allocation11 + $0x30] sm:$0xff] }
 0x92c   :  { %v12079_v33 = vadd.f32 %v15960_v1, %v3835_v8  ;;  %v10996_v8 = vpack.c.bf16 %v4440_v49, %v4437_v38  ;;  %v4438_v1 = vld [vmem:[#allocation11 + $0x40] sm:$0xff]  ;;  %v15966_v22 = vld [vmem:[#allocation55_spill] sm:$0xff]  ;;  %v4513_v49 = vld [vmem:[#allocation11 + $0x298] sm:$0xff] }
 0x92d   :  { %v7714_v28 = vmul.f32 -1.442695, %v12075_v34  ;;  %v4439_v34 = vld [vmem:[#allocation11 + $0x48] sm:$0xff]  ;;  %v4464_v37 = vld [vmem:[#allocation11 + $0x110] sm:$0xff]  ;;  %v4510_v38 = vld [vmem:[#allocation11 + $0x280] sm:$0xff] }
 0x92e   :  { %v7715_v7 = vmul.f32 -1.442695, %v12079_v33  ;;  %v4441_v33 = vld [vmem:[#allocation11 + $0x58] sm:$0xff] }
 0x92f   :  { %12397 = vpow2.f32 %v7714_v28  ;;  %v4443_v28 = vld [vmem:[#allocation11 + $0x68] sm:$0xff] }
 0x930   :  { %12399 = vpow2.f32 %v7715_v7  ;;  %v15963_v7 = vld [vmem:[#allocation85_spill] sm:$0xff] }
 0x939   :  { %v12398_v41 = vpop.eup %12397 }
 0x93a   :  { %v3916_v54 = vadd.f32 1.0, %v12398_v41  ;;  %v12400_v9 = vpop.eup %12399  ;;  %v4446_v41 = vld [vmem:[#allocation11 + $0x80] sm:$0xff] }
 0x93b   :  { %v3917_v42 = vadd.f32 1.0, %v12400_v9  ;;  %v4495_v9 = vld [vmem:[#allocation11 + $0x208] sm:$0xff] }
 0x93c   :  { %12401 = vrcp.f32 %v3916_v54  ;;  %v4492_v54 = vld [vmem:[#allocation11 + $0x1f0] sm:$0xff] }
 0x93d   :  { %12403 = vrcp.f32 %v3917_v42  ;;  %v10998_v42 = vpack.c.bf16 %v4439_v34, %v4436_v47  ;;  %v4463_v47 = vld [vmem:[#allocation11 + $0x108] sm:$0xff] }
 0x946   :  { %v12402_v3 = vpop.eup %12401 }
 0x947   :  { %v3922_v31 = vmul.f32 %v12402_v3, %v3905_v36  ;;  %v12404_v46 = vpop.eup %12403  ;;  %v11062_v36 = vpack.c.bf16 %v4441_v33, %v4438_v1  ;;  %v4442_v3 = vld [vmem:[#allocation11 + $0x60] sm:$0xff]  ;;  %v4465_v1 = vld [vmem:[#allocation11 + $0x118] sm:$0xff]  ;;  %v4467_v33 = vld [vmem:[#allocation11 + $0x128] sm:$0xff] }
 0x948   :  { %v3925_v60 = vsub.f32 1.0, %v12404_v46  ;;  %v3927_v4 = vmul.f32 %v12404_v46, %v14458_v23  ;;  %v4444_v46 = vld [vmem:[#allocation11 + $0x70] sm:$0xff] }
 0x949   :  { %v3923_v39 = vadd.f32 %v3922_v31, %v15961_v52  ;;  %v4445_v31 = vld [vmem:[#allocation11 + $0x78] sm:$0xff]  ;;  %v11000_v52 = vpack.c.bf16 %v4446_v41, %v4443_v28  ;;  %v4470_v28 = vld [vmem:[#allocation11 + $0x140] sm:$0xff]  ;;  %v4516_v41 = vld [vmem:[#allocation11 + $0x2b0] sm:$0xff] }
 0x94b   :  { %12405 = vtanh.f32 %v3923_v39  ;;  %v11064_v39 = vpack.c.bf16 %v4495_v9, %v4492_v54  ;;  %v4519_v54 = vld [vmem:[#allocation11 + $0x2c8] sm:$0xff] }
 0x94c   :  { %v15968_v9 = vld [vmem:[#allocation54_spill] sm:$0xff] }
 0x955   :  { %v12406_v50 = vpop.eup %12405 }
 0x956   :  { %v3926_v55 = vmul.f32 %v12406_v50, %v3925_v60  ;;  %v4447_v60 = vld [vmem:[#allocation11 + $0x88] sm:$0xff]  ;;  %v4449_v50 = vld [vmem:[#allocation11 + $0x98] sm:$0xff] }
 0x958   :  { %v14509_v18 = vadd.f32 %v3927_v4, %v3926_v55  ;;  %v15964_v55 = vld [vmem:[#allocation52_spill] sm:$0xff] }
 0x959   :  { %v4452_v4 = vld [vmem:[#allocation11 + $0xb0] sm:$0xff] }
 0x95a   :  { %4092 = vst.msk [vmem:[#allocation15] sm:$0x3] %vm4091_vm5, %v14509_v18 }
 0x964   :  { %v3995_v13 = vpop.f32.mrb[40].mxu1  ;;  %v4066_v45 = vpop.f32.mrb[70].mxu0 }
 0x965   :  { %v12081_v43 = vadd.f32 %v13937_v29, %v3995_v13  ;;  %v3997_v48 = vpop.f32.mrb[41].mxu1  ;;  %v9191_v12 = vpop.f32.mrb[71].mxu0  ;;  %v4067_v11 = vadd.f32 %v4066_v45, %v13968_v56  ;;  %v4489_v56 = vld [vmem:[#allocation11 + $0x1d8] sm:$0xff]  ;;  %v4498_v13 = vld [vmem:[#allocation11 + $0x220] sm:$0xff] }
 0x966   :  { %v12083_v5 = vadd.f32 %v13941_v35, %v3997_v48  ;;  %v4430_v35 = vld [vmem:[#allocation11] sm:$0xff]  ;;  %v11060_v26 = vpack.c.bf16 %v4489_v56, %v4486_v51  ;;  %v4501_v45 = vld [vmem:[#allocation11 + $0x238] sm:$0xff]  ;;  %v11066_v48 = vpack.c.bf16 %v4447_v60, %v4444_v46  ;;  %v4448_v12 = vld [vmem:[#allocation11 + $0x90] sm:$0xff] }
 0x967   :  { %v7716_v0 = vmul.f32 -1.442695, %v12081_v43  ;;  %v10994_v10 = vpack.c.bf16 %v4433_v25, %v4430_v35  ;;  %v11002_v43 = vpack.c.bf16 %v4445_v31, %v4442_v3  ;;  %v4456_v25 = vld [vmem:[#allocation11 + $0xd0] sm:$0xff]  ;;  %v15967_v51 = vld [vmem:[#allocation45_spill] sm:$0xff]  ;;  %v4471_v60 = vld [vmem:[#allocation11 + $0x148] sm:$0xff] }
 0x968   :  { %v7717_v16 = vmul.f32 -1.442695, %v12083_v5  ;;  %v11004_v5 = vpack.c.bf16 %v4452_v4, %v4449_v50  ;;  %v4466_v3 = vld [vmem:[#allocation11 + $0x120] sm:$0xff]  ;;  %v4469_v31 = vld [vmem:[#allocation11 + $0x138] sm:$0xff]  ;;  %v4468_v46 = vld [vmem:[#allocation11 + $0x130] sm:$0xff] }
 0x969   :  { %12407 = vpow2.f32 %v7716_v0  ;;  %v4451_v0 = vld [vmem:[#allocation11 + $0xa8] sm:$0xff]  ;;  %v4473_v50 = vld [vmem:[#allocation11 + $0x158] sm:$0xff]  ;;  %v4476_v4 = vld [vmem:[#allocation11 + $0x170] sm:$0xff] }
 0x96a   :  { %12409 = vpow2.f32 %v7717_v16  ;;  %v11068_v16 = vpack.c.bf16 %v4501_v45, %v4498_v13  ;;  %v4522_v13 = vld [vmem:[#allocation11 + $0x2e0] sm:$0xff]  ;;  %v4525_v45 = vld [vmem:[#allocation11 + $0x2f8] sm:$0xff] }
 0x973   :  { %v12408_v24 = vpop.eup %12407 }
 0x974   :  { %v4078_v2 = vadd.f32 1.0, %v12408_v24  ;;  %v12410_v44 = vpop.eup %12409  ;;  %v4450_v24 = vld [vmem:[#allocation11 + $0xa0] sm:$0xff] }
 0x975   :  { %v4079_v30 = vadd.f32 1.0, %v12410_v44  ;;  %v4455_v44 = vld [vmem:[#allocation11 + $0xc8] sm:$0xff] }
 0x976   :  { %12411 = vrcp.f32 %v4078_v2  ;;  %v4453_v2 = vld [vmem:[#allocation11 + $0xb8] sm:$0xff] }
 0x977   :  { %12413 = vrcp.f32 %v4079_v30  ;;  %v15965_v30 = vld [vmem:[#allocation43_spill] sm:$0xff] }
 0x980   :  { %v12412_v6 = vpop.eup %12411 }
 0x981   :  { %v4084_v14 = vmul.f32 %v12412_v6, %v4067_v11  ;;  %v12414_v21 = vpop.eup %12413  ;;  %v4458_v11 = vld [vmem:[#allocation11 + $0xe0] sm:$0xff]  ;;  %v4504_v6 = vld [vmem:[#allocation11 + $0x250] sm:$0xff] }
 0x982   :  { %v4087_v17 = vsub.f32 1.0, %v12414_v21  ;;  %v4089_v58 = vmul.f32 %v12414_v21, %v14500_v32  ;;  %v4454_v21 = vld [vmem:[#allocation11 + $0xc0] sm:$0xff] }
 0x983   :  { %v4085_v29 = vadd.f32 %v4084_v14, %v15962_v59  ;;  %v4507_v14 = vld [vmem:[#allocation11 + $0x268] sm:$0xff]  ;;  %v11006_v59 = vpack.c.bf16 %v4451_v0, %v4448_v12  ;;  %v11082_v12 = vpack.c.bf16 %v4471_v60, %v4468_v46  ;;  %v4472_v0 = vld [vmem:[#allocation11 + $0x150] sm:$0xff]  ;;  %v4773_v60 = vld [vmem:[#allocation10 + $0x60] sm:$0xff] }
 0x984   :  { %v11072_v35 = vpack.c.bf16 %v4507_v14, %v4504_v6  ;;  %v4482_v6 = vld [vmem:[#allocation11 + $0x1a0] sm:$0xff]  ;;  %v4762_v14 = vld [vmem:[#allocation10 + $0x8] sm:$0xff] }
 0x985   :  { %12415 = vtanh.f32 %v4085_v29  ;;  %v11070_v29 = vpack.c.bf16 %v4453_v2, %v4450_v24  ;;  %v11084_v24 = vpack.c.bf16 %v4525_v45, %v4522_v13  ;;  %v4474_v2 = vld [vmem:[#allocation11 + $0x160] sm:$0xff]  ;;  %v4500_v13 = vld [vmem:[#allocation11 + $0x230] sm:$0xff]  ;;  %v4780_v45 = vld [vmem:[#allocation10 + $0x98] sm:$0xff] }
 0x98f   :  { %v12416_v20 = vpop.eup %12415 }
 0x990   :  { %v4088_v40 = vmul.f32 %v12416_v20, %v4087_v17  ;;  %v4457_v17 = vld [vmem:[#allocation11 + $0xd8] sm:$0xff]  ;;  %v11008_v20 = vpack.c.bf16 %v4458_v11, %v4455_v44  ;;  %v4479_v11 = vld [vmem:[#allocation11 + $0x188] sm:$0xff] }
 0x991   :  { %v11010_v56 = vpack.c.bf16 %v4457_v17, %v4454_v21  ;;  %v4477_v44 = vld [vmem:[#allocation11 + $0x178] sm:$0xff] }
 0x992   :  { %v14518_v62 = vadd.f32 %v4089_v58, %v4088_v40  ;;  %v4459_v40 = vld [vmem:[#allocation11 + $0xe8] sm:$0xff]  ;;  %v4461_v58 = vld [vmem:[#allocation11 + $0xf8] sm:$0xff]  ;;  %v11086_v17 = vpack.c.bf16 %v4477_v44, %v4474_v2  ;;  %v4779_v44 = vld [vmem:[#allocation10 + $0x90] sm:$0xff] }
 0x993   :  { %v11012_v34 = vpack.c.bf16 %v4464_v37, %v4461_v58  ;;  %v4761_v58 = vld [vmem:[#allocation10] sm:$0xff]  ;;  %v4764_v37 = vld [vmem:[#allocation10 + $0x18] sm:$0xff] }
 0x994   :  { %4276 = vmatprep.mubr.f32.mxu0 %v14518_v62  ;;  %4389 = vmatprep.mubr.f32.mxu1 %v14518_v62  ;;  %4094 = vst.msk [vmem:[#allocation15 + $0x2] sm:$0x3] %vm4091_vm5, %v14518_v62 }
 0x995   :  { %4277 = vmatmul.mubr.f32.vlgmr.msra.gmra.mrb[72].mxu0 %v15963_v7  ;;  %4390 = vmatmul.mubr.f32.vlgmr.msra.gmra.mrb[72].mxu1 %v15963_v7 }
 0x996   :  { %10995 = vmatpush1.bf16.msra.mxu1 %v10994_v10  ;;  %4282 = vmatprep.mubr.f32.mxu0 %v14500_v32  ;;  %v11074_v10 = vpack.c.bf16 %v4459_v40, %v4456_v25  ;;  %v11024_v25 = vpack.c.bf16 %v4482_v6, %v4479_v11  ;;  %v4782_v11 = vld [vmem:[#allocation10 + $0xa8] sm:$0xff] }
 0x997   :  { %4394 = vmatprep.mubr.f32.mxu1 %v14500_v32  ;;  %11059 = vmatpush3.bf16.msra.mxu0 %v11058_v53  ;;  %v4460_v53 = vld [vmem:[#allocation11 + $0xf0] sm:$0xff]  ;;  %v4503_v6 = vld [vmem:[#allocation11 + $0x248] sm:$0xff] }
 0x998   :  { %10997 = vmatprep.subr.bf16.mxu1 %v10996_v8  ;;  %11061 = vmatprep.subr.bf16.mxu0 %v11060_v26  ;;  %v11076_v8 = vpack.c.bf16 %v4513_v49, %v4510_v38  ;;  %v4462_v26 = vld [vmem:[#allocation11 + $0x100] sm:$0xff]  ;;  %v4485_v38 = vld [vmem:[#allocation11 + $0x1b8] sm:$0xff]  ;;  %v4488_v49 = vld [vmem:[#allocation11 + $0x1d0] sm:$0xff] }
 0x999   :  { %4283 = vmatmul.mubr.f32.gmra.mrb[74].mxu0 %v15964_v55  ;;  %4395 = vmatmul.mubr.f32.gmra.mrb[74].mxu1 %v15964_v55 }
 0x99a   :  { %10999 = vmatpush1.bf16.msra.mxu1 %v10998_v42  ;;  %4288 = vmatprep.mubr.f32.mxu0 %v14414_v57  ;;  %v11014_v42 = vpack.c.bf16 %v4463_v47, %v4460_v53  ;;  %v14558_v47 = vpack.c.bf16 %v4764_v37, %v4761_v58 }
 0x99b   :  { %4399 = vmatprep.mubr.f32.mxu1 %v14414_v57  ;;  %11063 = vmatpush3.bf16.msra.mxu0 %v11062_v36  ;;  %v11078_v36 = vpack.c.bf16 %v4465_v1, %v4462_v26  ;;  %v11028_v26 = vpack.c.bf16 %v4488_v49, %v4485_v38  ;;  %v4785_v38 = vld [vmem:[#allocation10 + $0xc0] sm:$0xff]  ;;  %v4788_v49 = vld [vmem:[#allocation10 + $0xd8] sm:$0xff] }
 0x99c   :  { %11001 = vmatprep.subr.bf16.mxu1 %v11000_v52  ;;  %11065 = vmatprep.subr.bf16.mxu0 %v11064_v39  ;;  %v11016_v52 = vpack.c.bf16 %v4470_v28, %v4467_v33  ;;  %v11080_v39 = vpack.c.bf16 %v4519_v54, %v4516_v41  ;;  %v4767_v33 = vld [vmem:[#allocation10 + $0x30] sm:$0xff]  ;;  %v4770_v28 = vld [vmem:[#allocation10 + $0x48] sm:$0xff]  ;;  %v4494_v54 = vld [vmem:[#allocation11 + $0x200] sm:$0xff] }
 0x99d   :  { %4289 = vmatmul.mubr.f32.gmra.mrb[76].mxu0 %v15965_v30  ;;  %4400 = vmatmul.mubr.f32.gmra.mrb[76].mxu1 %v15965_v30  ;;  %v4491_v41 = vld [vmem:[#allocation11 + $0x1e8] sm:$0xff] }
 0x99e   :  { %11003 = vmatpush1.bf16.msra.mxu1 %v11002_v43  ;;  %4294 = vmatprep.mubr.f32.mxu0 %v14326_v63  ;;  %v15969_v43 = vld [vmem:[#allocation53_spill] sm:$0xff] }
 0x99f   :  { %4404 = vmatprep.mubr.f32.mxu1 %v14326_v63  ;;  %11067 = vmatpush3.bf16.msra.mxu0 %v11066_v48  ;;  %v11018_v48 = vpack.c.bf16 %v4469_v31, %v4466_v3  ;;  %v14566_v3 = vpack.c.bf16 %v4770_v28, %v4767_v33  ;;  %v4490_v31 = vld [vmem:[#allocation11 + $0x1e0] sm:$0xff]  ;;  %v4508_v33 = vld [vmem:[#allocation11 + $0x270] sm:$0xff]  ;;  %v4511_v28 = vld [vmem:[#allocation11 + $0x288] sm:$0xff] }
 0x9a0   :  { %11005 = vmatprep.subr.bf16.mxu1 %v11004_v5  ;;  %11069 = vmatprep.subr.bf16.mxu0 %v11068_v16  ;;  %v4475_v5 = vld [vmem:[#allocation11 + $0x168] sm:$0xff]  ;;  %v11020_v16 = vpack.c.bf16 %v4476_v4, %v4473_v50  ;;  %v4776_v50 = vld [vmem:[#allocation10 + $0x78] sm:$0xff] }
 0x9a1   :  { %4295 = vmatmul.mubr.f32.gmra.mrb[78].mxu0 %v15966_v22  ;;  %4405 = vmatmul.mubr.f32.gmra.mrb[78].mxu1 %v15966_v22  ;;  %v11022_v21 = vpack.c.bf16 %v4475_v5, %v4472_v0  ;;  %v4497_v4 = vld [vmem:[#allocation11 + $0x218] sm:$0xff]  ;;  %v14574_v0 = vpack.c.bf16 %v4776_v50, %v4773_v60  ;;  %v4496_v5 = vld [vmem:[#allocation11 + $0x210] sm:$0xff]  ;;  %v11046_v60 = vpack.c.bf16 %v4511_v28, %v4508_v33  ;;  %v4769_v28 = vld [vmem:[#allocation10 + $0x40] sm:$0xff] }
 0x9a2   :  { %11007 = vmatpush1.bf16.msra.mxu1 %v11006_v59  ;;  %4300 = vmatprep.mubr.f32.mxu0 %v15967_v51  ;;  %v4765_v59 = vld [vmem:[#allocation10 + $0x20] sm:$0xff] }
 0x9a3   :  { %4409 = vmatprep.mubr.f32.mxu1 %v15967_v51  ;;  %11071 = vmatpush3.bf16.msra.mxu0 %v11070_v29  ;;  %v15970_v29 = vld [vmem:[#allocation41_spill] sm:$0xff]  ;;  %v14552_v40 = vpack.c.bf16 %v4765_v59, %v4762_v14  ;;  %v4786_v59 = vld [vmem:[#allocation10 + $0xc8] sm:$0xff] }
 0x9a4   :  { %11009 = vmatprep.subr.bf16.mxu1 %v11008_v20  ;;  %11073 = vmatprep.subr.bf16.mxu0 %v11072_v35  ;;  %v4478_v20 = vld [vmem:[#allocation11 + $0x180] sm:$0xff]  ;;  %v4481_v35 = vld [vmem:[#allocation11 + $0x198] sm:$0xff] }
 0x9a5   :  { %4301 = vmatmul.mubr.f32.gmra.mrb[80].mxu0 %v14282_v27  ;;  %4410 = vmatmul.mubr.f32.gmra.mrb[80].mxu1 %v14282_v27  ;;  %v11026_v53 = vpack.c.bf16 %v4481_v35, %v4478_v20  ;;  %v4506_v14 = vld [vmem:[#allocation11 + $0x260] sm:$0xff]  ;;  %v14582_v20 = vpack.c.bf16 %v4782_v11, %v4779_v44  ;;  %v4804_v44 = vld [vmem:[#allocation10 + $0x158] sm:$0xff]  ;;  %v4807_v11 = vld [vmem:[#allocation10 + $0x170] sm:$0xff] }
 0x9a6   :  { %11011 = vmatpush1.bf16.msra.mxu1 %v11010_v56  ;;  %4306 = vmatprep.mubr.f32.mxu0 %v15968_v9  ;;  %v4768_v56 = vld [vmem:[#allocation10 + $0x38] sm:$0xff]  ;;  %v4502_v35 = vld [vmem:[#allocation11 + $0x240] sm:$0xff]  ;;  %v11040_v58 = vpack.c.bf16 %v4506_v14, %v4503_v6 }
 0x9a7   :  { %4414 = vmatprep.mubr.f32.mxu1 %v15968_v9  ;;  %11075 = vmatpush3.bf16.msra.mxu0 %v11074_v10  ;;  %v4771_v10 = vld [vmem:[#allocation10 + $0x50] sm:$0xff] }
 0x9a8   :  { %11013 = vmatprep.subr.bf16.mxu1 %v11012_v34  ;;  %11077 = vmatprep.subr.bf16.mxu0 %v11076_v8  ;;  %v4484_v34 = vld [vmem:[#allocation11 + $0x1b0] sm:$0xff]  ;;  %v4487_v8 = vld [vmem:[#allocation11 + $0x1c8] sm:$0xff]  ;;  %v14561_v1 = vpack.c.bf16 %v4771_v10, %v4768_v56  ;;  %v4509_v56 = vld [vmem:[#allocation11 + $0x278] sm:$0xff] }
 0x9a9   :  { %4307 = vmatmul.mubr.f32.gmra.mrb[82].mxu0 %v14370_v15  ;;  %4415 = vmatmul.mubr.f32.gmra.mrb[82].mxu1 %v14370_v15  ;;  %v4512_v10 = vld [vmem:[#allocation11 + $0x290] sm:$0xff] }
 0x9aa   :  { %11015 = vmatpush1.bf16.msra.mxu1 %v11014_v42  ;;  %4312 = vmatprep.mubr.f32.mxu0 %v15969_v43  ;;  %v4774_v42 = vld [vmem:[#allocation10 + $0x68] sm:$0xff] }
 0x9ab   :  { %4419 = vmatprep.mubr.f32.mxu1 %v15969_v43  ;;  %11079 = vmatpush3.bf16.msra.mxu0 %v11078_v36  ;;  %v4777_v36 = vld [vmem:[#allocation10 + $0x80] sm:$0xff] }
 0x9ac   :  { %11017 = vmatprep.subr.bf16.mxu1 %v11016_v52  ;;  %11081 = vmatprep.subr.bf16.mxu0 %v11080_v39  ;;  %v4493_v52 = vld [vmem:[#allocation11 + $0x1f8] sm:$0xff]  ;;  %v11032_v39 = vpack.c.bf16 %v4494_v54, %v4491_v41  ;;  %v14569_v46 = vpack.c.bf16 %v4777_v36, %v4774_v42  ;;  %v11044_v41 = vpack.c.bf16 %v4512_v10, %v4509_v56  ;;  %v4791_v42 = vld [vmem:[#allocation10 + $0xf0] sm:$0xff]  ;;  %v4794_v36 = vld [vmem:[#allocation10 + $0x108] sm:$0xff] }
 0x9ad   :  { %4313 = vmatmul.mubr.f32.gmra.mrb[84].mxu0 %v14458_v23  ;;  %4420 = vmatmul.mubr.f32.gmra.mrb[84].mxu1 %v14458_v23  ;;  %v14598_v50 = vpack.c.bf16 %v4794_v36, %v4791_v42  ;;  %v4763_v56 = vld [vmem:[#allocation10 + $0x10] sm:$0xff]  ;;  %v4766_v10 = vld [vmem:[#allocation10 + $0x28] sm:$0xff]  ;;  %v4772_v42 = vld [vmem:[#allocation10 + $0x58] sm:$0xff] }
 0x9ae   :  { %11019 = vmatpush1.bf16.msra.mxu1 %v11018_v48  ;;  %4318 = vmatprep.mubr.f32.mxu0 %v15970_v29  ;;  %v4783_v48 = vld [vmem:[#allocation10 + $0xb0] sm:$0xff]  ;;  %v14625_v33 = vpack.c.bf16 %v4766_v10, %v4763_v56  ;;  %v4996_v36 = vld [vmem:[#allocation13 + $0x40] sm:$0xff]  ;;  %v5029_v10 = vld [vmem:[#allocation13 + $0x148] sm:$0xff] }
 0x9af   :  { %4424 = vmatprep.mubr.f32.mxu1 %v15970_v29  ;;  %11083 = vmatpush3.bf16.msra.mxu0 %v11082_v12  ;;  %v11034_v12 = vpack.c.bf16 %v4493_v52, %v4490_v31  ;;  %v14577_v2 = vpack.c.bf16 %v4783_v48, %v4780_v45  ;;  %v4518_v31 = vld [vmem:[#allocation11 + $0x2c0] sm:$0xff]  ;;  %v4798_v52 = vld [vmem:[#allocation10 + $0x128] sm:$0xff]  ;;  %15974 = vst [vmem:[#allocation39_spill] sm:$0xff] %v14598_v50  ;;  %v5026_v56 = vld [vmem:[#allocation13 + $0x130] sm:$0xff] }
 0x9b0   :  { %11021 = vmatprep.subr.bf16.mxu1 %v11020_v16  ;;  %11085 = vmatprep.subr.bf16.mxu0 %v11084_v24  ;;  %v4499_v16 = vld [vmem:[#allocation11 + $0x228] sm:$0xff]  ;;  %v11036_v24 = vpack.c.bf16 %v4500_v13, %v4497_v4  ;;  %v4514_v4 = vld [vmem:[#allocation11 + $0x2a0] sm:$0xff]  ;;  %v4517_v13 = vld [vmem:[#allocation11 + $0x2b8] sm:$0xff] }
 0x9b1   :  { %4319 = vmatmul.mubr.f32.gmra.mrb[86].mxu0 %v14509_v18  ;;  %4425 = vmatmul.mubr.f32.gmra.mrb[86].mxu1 %v14509_v18  ;;  %v11050_v6 = vpack.c.bf16 %v4517_v13, %v4514_v4  ;;  %v5002_v4 = vld [vmem:[#allocation13 + $0x70] sm:$0xff]  ;;  %v4781_v13 = vld [vmem:[#allocation10 + $0xa0] sm:$0xff] }
 0x9b2   :  { %11023 = vmatpush1.bf16.msra.mxu1 %v11022_v21  ;;  %4607 = vmatprep.mubr.f32.mxu1 %v14518_v62  ;;  %v4789_v21 = vld [vmem:[#allocation10 + $0xe0] sm:$0xff] }
 0x9b3   :  { %11087 = vmatpush3.bf16.msra.mxu0 %v11086_v17  ;;  %4720 = vmatprep.mubr.f32.mxu0 %v14518_v62  ;;  %v11030_v62 = vpack.c.bf16 %v4487_v8, %v4484_v34  ;;  %v11038_v17 = vpack.c.bf16 %v4499_v16, %v4496_v5  ;;  %v14585_v37 = vpack.c.bf16 %v4789_v21, %v4786_v59  ;;  %v4795_v34 = vld [vmem:[#allocation10 + $0x110] sm:$0xff]  ;;  %v4800_v5 = vld [vmem:[#allocation10 + $0x138] sm:$0xff]  ;;  %v4523_v21 = vld [vmem:[#allocation11 + $0x2e8] sm:$0xff] }
 0x9b4   :  { %11025 = vmatprep.subr.bf16.mxu1 %v11024_v25  ;;  %11089 = vmatprep.subr.bf16.mxu0 %v14552_v40  ;;  %v4505_v25 = vld [vmem:[#allocation11 + $0x258] sm:$0xff]  ;;  %v4520_v59 = vld [vmem:[#allocation11 + $0x2d0] sm:$0xff] }
 0x9b5   :  { %15971 = vst [vmem:[#allocation23_spill] sm:$0xff] %v14585_v37  ;;  %v11042_v8 = vpack.c.bf16 %v4505_v25, %v4502_v35  ;;  %v4521_v16 = vld [vmem:[#allocation11 + $0x2d8] sm:$0xff]  ;;  %v14609_v35 = vpack.c.bf16 %v4807_v11, %v4804_v44  ;;  %v4803_v25 = vld [vmem:[#allocation10 + $0x150] sm:$0xff]  ;;  %v4790_v44 = vld [vmem:[#allocation10 + $0xe8] sm:$0xff] }
 0x9b6   :  { %11027 = vmatpush1.bf16.msra.mxu1 %v11026_v53  ;;  %4721 = vmatmul.mubr.f32.vlgmr.msra.gmra.mrb[88].mxu0 %v15963_v7  ;;  %v4792_v53 = vld [vmem:[#allocation10 + $0xf8] sm:$0xff]  ;;  %v5014_v11 = vld [vmem:[#allocation13 + $0xd0] sm:$0xff] }
 0x9b7   :  { %4725 = vmatprep.mubr.f32.mxu0 %v14500_v32  ;;  %11091 = vmatpush1.bf16.msra.mxu0 %v14558_v47  ;;  %v14593_v54 = vpack.c.bf16 %v4795_v34, %v4792_v53  ;;  %15977 = vst [vmem:[#allocation40_spill] sm:$0xff] %v14609_v35  ;;  %v4990_v53 = vld [vmem:[#allocation13 + $0x10] sm:$0xff]  ;;  %v4993_v34 = vld [vmem:[#allocation13 + $0x28] sm:$0xff] }
 0x9b8   :  { %11029 = vmatprep.subr.bf16.mxu1 %v11028_v26  ;;  %11093 = vmatprep.subr.bf16.mxu0 %v14561_v1  ;;  %v14590_v26 = vpack.c.bf16 %v4788_v49, %v4785_v38  ;;  %v11054_v38 = vpack.c.bf16 %v4523_v21, %v4520_v59  ;;  %v4796_v21 = vld [vmem:[#allocation10 + $0x118] sm:$0xff] }
 0x9b9   :  { %15973 = vst [vmem:[#allocation24_spill] sm:$0xff] %v14593_v54 }
 0x9ba   :  { %11031 = vmatpush1.bf16.msra.mxu1 %v11030_v62  ;;  %4726 = vmatmul.mubr.f32.gmra.mrb[90].mxu0 %v15964_v55  ;;  %15972 = vst [vmem:[#allocation48_spill] sm:$0xff] %v14590_v26  ;;  %v4515_v62 = vld [vmem:[#allocation11 + $0x2a8] sm:$0xff] }
 0x9bb   :  { %4730 = vmatprep.mubr.f32.mxu0 %v14414_v57  ;;  %11095 = vmatpush1.bf16.msra.mxu0 %v14566_v3  ;;  %v11048_v45 = vpack.c.bf16 %v4518_v31, %v4515_v62  ;;  %v4999_v62 = vld [vmem:[#allocation13 + $0x58] sm:$0xff]  ;;  %v14635_v31 = vpack.c.bf16 %v4772_v42, %v4769_v28  ;;  %v5032_v28 = vld [vmem:[#allocation13 + $0x160] sm:$0xff] }
 0x9bc   :  { %11033 = vmatprep.subr.bf16.mxu1 %v11032_v39  ;;  %11097 = vmatprep.subr.bf16.mxu0 %v14569_v46  ;;  %v4801_v39 = vld [vmem:[#allocation10 + $0x140] sm:$0xff]  ;;  %v5035_v42 = vld [vmem:[#allocation13 + $0x178] sm:$0xff] }
 0x9bd   :  { %v14601_v48 = vpack.c.bf16 %v4801_v39, %v4798_v52  ;;  %v4775_v52 = vld [vmem:[#allocation10 + $0x70] sm:$0xff]  ;;  %v14638_v39 = vpack.c.bf16 %v4999_v62, %v4996_v36  ;;  %v14700_v62 = vpack.c.bf16 %v5035_v42, %v5032_v28  ;;  %v5012_v42 = vld [vmem:[#allocation13 + $0xc0] sm:$0xff] }
 0x9be   :  { %11035 = vmatpush1.bf16.msra.mxu1 %v11034_v12  ;;  %4731 = vmatmul.mubr.f32.gmra.mrb[92].mxu0 %v15965_v30  ;;  %v4797_v12 = vld [vmem:[#allocation10 + $0x120] sm:$0xff] }
 0x9bf   :  { %4735 = vmatprep.mubr.f32.mxu0 %v14326_v63  ;;  %11099 = vmatpush1.bf16.msra.mxu0 %v14574_v0  ;;  %15975 = vst [vmem:[#allocation25_spill] sm:$0xff] %v14601_v48  ;;  %v14606_v14 = vpack.c.bf16 %v4800_v5, %v4797_v12  ;;  %v4784_v12 = vld [vmem:[#allocation10 + $0xb8] sm:$0xff] }
 0x9c0   :  { %11037 = vmatprep.subr.bf16.mxu1 %v11036_v24  ;;  %11101 = vmatprep.subr.bf16.mxu0 %v14577_v2  ;;  %v4524_v24 = vld [vmem:[#allocation11 + $0x2f0] sm:$0xff]  ;;  %v5011_v5 = vld [vmem:[#allocation13 + $0xb8] sm:$0xff] }
 0x9c1   :  { %15976 = vst [vmem:[#allocation26_spill] sm:$0xff] %v14606_v14 }
 0x9c2   :  { %11039 = vmatpush1.bf16.msra.mxu1 %v11038_v17  ;;  %4736 = vmatmul.mubr.f32.gmra.mrb[94].mxu0 %v15966_v22  ;;  %v11052_v17 = vpack.c.bf16 %v4524_v24, %v4521_v16  ;;  %v4787_v16 = vld [vmem:[#allocation10 + $0xd0] sm:$0xff] }
 0x9c3   :  { %4740 = vmatprep.mubr.f32.mxu0 %v15967_v51  ;;  %11103 = vmatpush1.bf16.msra.mxu0 %v14582_v20 }
 0x9c4   :  { %11041 = vmatprep.subr.bf16.mxu1 %v11040_v58  ;;  %11105 = vmatprep.subr.bf16.mxu0 %v14585_v37  ;;  %v4806_v58 = vld [vmem:[#allocation10 + $0x168] sm:$0xff] }
 0x9c5   :  { %v14614_v49 = vpack.c.bf16 %v4806_v58, %v4803_v25  ;;  %v5023_v25 = vld [vmem:[#allocation13 + $0x118] sm:$0xff] }
 0x9c6   :  { %11043 = vmatpush1.bf16.msra.mxu1 %v11042_v8  ;;  %4741 = vmatmul.mubr.f32.gmra.mrb[96].mxu0 %v14282_v27  ;;  %v14623_v8 = vld [vmem:[%s15794_s11 + $0x10] sm:$0xff] }
 0x9c7   :  { %4745 = vmatprep.mubr.f32.mxu0 %v15968_v9  ;;  %11107 = vmatpush1.bf16.msra.mxu0 %v14590_v26  ;;  %15978 = vst [vmem:[#allocation27_spill] sm:$0xff] %v14614_v49 }
 0x9c8   :  { %11045 = vmatprep.subr.bf16.mxu1 %v11044_v41  ;;  %11109 = vmatprep.subr.bf16.mxu0 %v14593_v54  ;;  %v14627_v41 = vpack.c.bf16 %v4993_v34, %v4990_v53  ;;  %v14690_v53 = vpack.c.bf16 %v5029_v10, %v5026_v56  ;;  %v4808_v34 = vld [vmem:[#allocation10 + $0x178] sm:$0xff]  ;;  %v5009_v56 = vld [vmem:[#allocation13 + $0xa8] sm:$0xff] }
 0x9c9   :  { %v5013_v10 = vld [vmem:[#allocation13 + $0xc8] sm:$0xff] }
 0x9ca   :  { %11047 = vmatpush1.bf16.msra.mxu1 %v11046_v60  ;;  %4746 = vmatmul.mubr.f32.gmra.mrb[98].mxu0 %v14370_v15  ;;  %v4778_v60 = vld [vmem:[#allocation10 + $0x88] sm:$0xff] }
 0x9cb   :  { %4750 = vmatprep.mubr.f32.mxu0 %v15969_v43  ;;  %11111 = vmatpush1.bf16.msra.mxu0 %v14598_v50 }
 0x9cc   :  { %11049 = vmatprep.subr.bf16.mxu1 %v11048_v45  ;;  %11113 = vmatprep.subr.bf16.mxu0 %v14601_v48 }
 0x9ce   :  { %11051 = vmatpush1.bf16.msra.mxu1 %v11050_v6  ;;  %4751 = vmatmul.mubr.f32.gmra.mrb[100].mxu0 %v14458_v23  ;;  %v5017_v6 = vld [vmem:[#allocation13 + $0xe8] sm:$0xff] }
 0x9cf   :  { %4755 = vmatprep.mubr.f32.mxu0 %v15970_v29  ;;  %11115 = vmatpush1.bf16.msra.mxu0 %v14606_v14  ;;  %v14670_v59 = vpack.c.bf16 %v5017_v6, %v5014_v11  ;;  %v5000_v6 = vld [vmem:[#allocation13 + $0x60] sm:$0xff] }
 0x9d0   :  { %11053 = vmatprep.subr.bf16.mxu1 %v11052_v17  ;;  %11117 = vmatprep.subr.bf16.mxu0 %v14609_v35  ;;  %v5020_v17 = vld [vmem:[#allocation13 + $0x100] sm:$0xff] }
 0x9d1   :  { %v14680_v58 = vpack.c.bf16 %v5023_v25, %v5020_v17  ;;  %v5010_v17 = vld [vmem:[#allocation13 + $0xb0] sm:$0xff] }
 0x9d2   :  { %11055 = vmatpush1.bf16.msra.mxu1 %v11054_v38  ;;  %4756 = vmatmul.mubr.f32.gmra.mrb[102].mxu0 %v14509_v18  ;;  %v4802_v38 = vld [vmem:[#allocation10 + $0x148] sm:$0xff] }
 0x9d3   :  { %11119 = vmatpush1.bf16.msra.mxu0 %v14614_v49  ;;  %4890 = vmatprep.mubr.f32.mxu0 %v15845_v61 }
 0x9d4   :  { %11120 = vmatprep.subr.bf16.mxu1 %v15844_v19  ;;  %11176 = vmatprep.subr.bf16.mxu0 %v15844_v19 }
 0x9d5   :  { %4608 = vmatmul.mubr.f32.vlgmr.msra.gmra.mrb[88].mxu1 %v15963_v7  ;;  %v5005_v7 = vld [vmem:[#allocation13 + $0x88] sm:$0xff] }
 0x9d6   :  { %4613 = vmatprep.mubr.f32.mxu1 %v14500_v32  ;;  %4891 = vmatmul.mubr.f32.vlgmr.msra.gmra.mrb[72].mxu0 %v14623_v8  ;;  %v14647_v32 = vpack.c.bf16 %v4778_v60, %v4775_v52  ;;  %v14650_v45 = vpack.c.bf16 %v5005_v7, %v5002_v4  ;;  %v4988_v60 = vld [vmem:[#allocation13] sm:$0xff]  ;;  %v4991_v4 = vld [vmem:[#allocation13 + $0x18] sm:$0xff] }
 0x9d7   :  { %11122 = vmatpush3.bf16.msra.mxu1 %v14625_v33  ;;  %11178 = vmatpush3.bf16.msra.mxu0 %v14627_v41  ;;  %v14710_v7 = vpack.c.bf16 %v4991_v4, %v4988_v60  ;;  %v5022_v60 = vld [vmem:[#allocation13 + $0x110] sm:$0xff] }
 0x9d8   :  { %11123 = vmatprep.subr.bf16.mxu1 %v15844_v19  ;;  %11179 = vmatprep.subr.bf16.mxu0 %v15844_v19 }
 0x9d9   :  { %4614 = vmatmul.mubr.f32.gmra.mrb[90].mxu1 %v15964_v55  ;;  %9259 = vmatprep.mubr.msk.f32.mxu0 %vm12811_vm4, %v15845_v61  ;;  %v5008_v55 = vld [vmem:[#allocation13 + $0xa0] sm:$0xff] }
 0x9da   :  { %4619 = vmatprep.mubr.f32.mxu1 %v14414_v57  ;;  %v14657_v57 = vpack.c.bf16 %v4784_v12, %v4781_v13  ;;  %v14660_v24 = vpack.c.bf16 %v5011_v5, %v5008_v55  ;;  %v4994_v12 = vld [vmem:[#allocation13 + $0x30] sm:$0xff]  ;;  %v4997_v55 = vld [vmem:[#allocation13 + $0x48] sm:$0xff]  ;;  %v5004_v5 = vld [vmem:[#allocation13 + $0x80] sm:$0xff] }
 0x9db   :  { %11125 = vmatpush3.bf16.msra.mxu1 %v14635_v31  ;;  %11181 = vmatpush3.bf16.msra.mxu0 %v14638_v39 }
 0x9dc   :  { %11126 = vmatprep.subr.bf16.mxu1 %v15844_v19  ;;  %11182 = vmatprep.subr.bf16.mxu0 %v15844_v19 }
 0x9dd   :  { %4620 = vmatmul.mubr.f32.gmra.mrb[92].mxu1 %v15965_v30  ;;  %v4793_v30 = vld [vmem:[#allocation10 + $0x100] sm:$0xff] }
 0x9de   :  { %4625 = vmatprep.mubr.f32.mxu1 %v14326_v63  ;;  %v14667_v63 = vpack.c.bf16 %v4790_v44, %v4787_v16  ;;  %v14720_v16 = vld [vmem:[%s15794_s11 + $0x18] sm:$0xff]  ;;  %v14725_v44 = vpack.c.bf16 %v4997_v55, %v4994_v12  ;;  %v5021_v12 = vld [vmem:[#allocation13 + $0x108] sm:$0xff] }
 0x9df   :  { %11128 = vmatpush3.bf16.msra.mxu1 %v14647_v32  ;;  %11184 = vmatpush3.bf16.msra.mxu0 %v14650_v45  ;;  %v5025_v55 = vld [vmem:[#allocation13 + $0x128] sm:$0xff] }
 0x9e0   :  { %11129 = vmatprep.subr.bf16.mxu1 %v15844_v19  ;;  %11185 = vmatprep.subr.bf16.mxu0 %v15844_v19  ;;  %15979 = vst [vmem:[#allocation28_spill] sm:$0xff] %v14667_v63 }
 0x9e1   :  { %4626 = vmatmul.mubr.f32.gmra.mrb[94].mxu1 %v15966_v22  ;;  %v14677_v22 = vpack.c.bf16 %v4796_v21, %v4793_v30  ;;  %v5003_v30 = vld [vmem:[#allocation13 + $0x78] sm:$0xff] }
 0x9e2   :  { %4631 = vmatprep.mubr.f32.mxu1 %v15967_v51  ;;  %v4799_v51 = vld [vmem:[#allocation10 + $0x130] sm:$0xff]  ;;  %v5007_v21 = vld [vmem:[#allocation13 + $0x98] sm:$0xff]  ;;  %v14735_v25 = vpack.c.bf16 %v5003_v30, %v5000_v6  ;;  %v5024_v30 = vld [vmem:[#allocation13 + $0x120] sm:$0xff] }
 0x9e3   :  { %11131 = vmatpush3.bf16.msra.mxu1 %v14657_v57  ;;  %11187 = vmatpush3.bf16.msra.mxu0 %v14660_v24  ;;  %15980 = vst [vmem:[#allocation42_spill] sm:$0xff] %v14677_v22 }
 0x9e4   :  { %11132 = vmatprep.subr.bf16.mxu1 %v15844_v19  ;;  %11188 = vmatprep.subr.bf16.mxu0 %v15844_v19 }
 0x9e5   :  { %4632 = vmatmul.mubr.f32.gmra.mrb[96].mxu1 %v14282_v27  ;;  %v14687_v27 = vpack.c.bf16 %v4802_v38, %v4799_v51  ;;  %v14738_v51 = vpack.c.bf16 %v5010_v17, %v5007_v21  ;;  %v5006_v38 = vld [vmem:[#allocation13 + $0x90] sm:$0xff]  ;;  %v5027_v21 = vld [vmem:[#allocation13 + $0x138] sm:$0xff] }
 0x9e6   :  { %4637 = vmatprep.mubr.f32.mxu1 %v15968_v9  ;;  %v4805_v9 = vld [vmem:[#allocation10 + $0x160] sm:$0xff]  ;;  %v5031_v17 = vld [vmem:[#allocation13 + $0x158] sm:$0xff] }
 0x9e7   :  { %11134 = vmatpush3.bf16.msra.mxu1 %v14667_v63  ;;  %11190 = vmatpush3.bf16.msra.mxu0 %v14670_v59  ;;  %15981 = vst [vmem:[#allocation29_spill] sm:$0xff] %v14687_v27  ;;  %v14697_v36 = vpack.c.bf16 %v4808_v34, %v4805_v9  ;;  %v5016_v9 = vld [vmem:[#allocation13 + $0xe0] sm:$0xff]  ;;  %v14743_v34 = vpack.c.bf16 %v5009_v56, %v5006_v38  ;;  %v5034_v38 = vld [vmem:[#allocation13 + $0x170] sm:$0xff] }
 0x9e8   :  { %11135 = vmatprep.subr.bf16.mxu1 %v15844_v19  ;;  %11191 = vmatprep.subr.bf16.mxu0 %v15844_v19  ;;  %v14746_v28 = vpack.c.bf16 %v5016_v9, %v5013_v10  ;;  %v14767_v56 = vpack.c.bf16 %v5027_v21, %v5024_v30  ;;  %v14770_v10 = vpack.c.bf16 %v5034_v38, %v5031_v17  ;;  %v5030_v9 = vld [vmem:[#allocation13 + $0x150] sm:$0xff] }
 0x9e9   :  { %4638 = vmatmul.mubr.f32.gmra.mrb[98].mxu1 %v14370_v15  ;;  %v4989_v15 = vld [vmem:[#allocation13 + $0x8] sm:$0xff]  ;;  %15982 = vst [vmem:[#allocation30_spill] sm:$0xff] %v14697_v36  ;;  %v15984_v30 = vld [vmem:[#allocation56_spill] sm:$0xff] }
 0x9ea   :  { %4643 = vmatprep.mubr.f32.mxu1 %v15969_v43  ;;  %v4992_v43 = vld [vmem:[#allocation13 + $0x20] sm:$0xff] }
 0x9eb   :  { %11137 = vmatpush3.bf16.msra.mxu1 %v14677_v22  ;;  %11193 = vmatpush3.bf16.msra.mxu0 %v14680_v58  ;;  %v14703_v52 = vpack.c.bf16 %v4992_v43, %v4989_v15  ;;  %v5015_v15 = vld [vmem:[#allocation13 + $0xd8] sm:$0xff] }
 0x9ec   :  { %11138 = vmatprep.subr.bf16.mxu1 %v15844_v19  ;;  %11194 = vmatprep.subr.bf16.mxu0 %v15844_v19  ;;  %v5019_v43 = vld [vmem:[#allocation13 + $0xf8] sm:$0xff]  ;;  %v14751_v4 = vpack.c.bf16 %v5015_v15, %v5012_v42  ;;  %v5033_v42 = vld [vmem:[#allocation13 + $0x168] sm:$0xff] }
 0x9ed   :  { %4644 = vmatmul.mubr.f32.gmra.mrb[100].mxu1 %v14458_v23  ;;  %15983 = vst [vmem:[#allocation44_spill] sm:$0xff] %v14703_v52  ;;  %v4995_v23 = vld [vmem:[#allocation13 + $0x38] sm:$0xff]  ;;  %v14775_v15 = vpack.c.bf16 %v5033_v42, %v5030_v9 }
 0x9ee   :  { %4649 = vmatprep.mubr.f32.mxu1 %v15970_v29  ;;  %v4998_v29 = vld [vmem:[#allocation13 + $0x50] sm:$0xff] }
 0x9ef   :  { %11140 = vmatpush3.bf16.msra.mxu1 %v14687_v27  ;;  %11196 = vmatpush3.bf16.msra.mxu0 %v14690_v53  ;;  %v14714_v13 = vpack.c.bf16 %v4998_v29, %v4995_v23  ;;  %v14754_v23 = vpack.c.bf16 %v5022_v60, %v5019_v43  ;;  %v5018_v29 = vld [vmem:[#allocation13 + $0xf0] sm:$0xff] }
 0x9f0   :  { %11141 = vmatprep.subr.bf16.mxu1 %v15844_v19  ;;  %11197 = vmatprep.subr.bf16.mxu0 %v15844_v19 }
 0x9f1   :  { %4650 = vmatmul.mubr.f32.gmra.mrb[102].mxu1 %v14509_v18  ;;  %v5001_v18 = vld [vmem:[#allocation13 + $0x68] sm:$0xff] }
 0x9f2   :  { %9224 = vmatprep.mubr.msk.f32.mxu1 %vm12811_vm4, %v15845_v61  ;;  %v14729_v11 = vpack.c.bf16 %v5004_v5, %v5001_v18  ;;  %v5028_v18 = vld [vmem:[#allocation13 + $0x140] sm:$0xff]  ;;  %v14759_v5 = vpack.c.bf16 %v5021_v12, %v5018_v29 }
 0x9f3   :  { %11143 = vmatpush3.bf16.msra.mxu1 %v14697_v36  ;;  %11199 = vmatpush3.bf16.msra.mxu0 %v14700_v62  ;;  %v14762_v6 = vpack.c.bf16 %v5028_v18, %v5025_v55  ;;  %v14808_v12 = vld [vmem:[%s15631_s12] sm:$0x7] }
 0x9f4   :  { %11145 = vmatprep.subr.bf16.mxu1 %v14703_v52  ;;  %11201 = vmatprep.subr.bf16.mxu0 %v14552_v40  ;;  %v14812_v21 = vrot.slane %v14808_v12, %v15984_v30 }
 0x9f6   :  { %9225 = vmatmul.mubr.f32.vlgmr.msra.gmra.mrb[104].mxu1 %v14623_v8  ;;  %9260 = vmatmul.mubr.f32.vlgmr.msra.gmra.mrb[104].mxu0 %v14720_v16 }
 0x9f7   :  { %11147 = vmatpush1.bf16.msra.mxu1 %v14710_v7  ;;  %5117 = vmatprep.mubr.f32.mxu1 %v15845_v61 }
 0x9f8   :  { %11149 = vmatprep.subr.bf16.mxu1 %v14714_v13  ;;  %11203 = vmatpush1.bf16.msra.mxu0 %v14558_v47 }
 0x9f9   :  { %11205 = vmatprep.subr.bf16.mxu0 %v14561_v1  ;;  %5279 = vmatprep.mubr.f32.mxu0 %v15845_v61 }
 0x9fb   :  { %11151 = vmatpush1.bf16.msra.mxu1 %v14725_v44 }
 0x9fc   :  { %11153 = vmatprep.subr.bf16.mxu1 %v14729_v11  ;;  %11207 = vmatpush1.bf16.msra.mxu0 %v14566_v3 }
 0x9fd   :  { %11209 = vmatprep.subr.bf16.mxu0 %v14569_v46 }
 0x9ff   :  { %11155 = vmatpush1.bf16.msra.mxu1 %v14735_v25 }
 0xa00   :  { %11157 = vmatprep.subr.bf16.mxu1 %v14738_v51  ;;  %11211 = vmatpush1.bf16.msra.mxu0 %v14574_v0 }
 0xa01   :  { %11213 = vmatprep.subr.bf16.mxu0 %v14577_v2 }
 0xa03   :  { %11159 = vmatpush1.bf16.msra.mxu1 %v14743_v34 }
 0xa04   :  { %11161 = vmatprep.subr.bf16.mxu1 %v14746_v28  ;;  %11215 = vmatpush1.bf16.msra.mxu0 %v14582_v20 }
 0xa05   :  { %11217 = vmatprep.subr.bf16.mxu0 %v14585_v37 }
 0xa07   :  { %11163 = vmatpush1.bf16.msra.mxu1 %v14751_v4 }
 0xa08   :  { %11165 = vmatprep.subr.bf16.mxu1 %v14754_v23  ;;  %11219 = vmatpush1.bf16.msra.mxu0 %v14590_v26 }
 0xa09   :  { %11221 = vmatprep.subr.bf16.mxu0 %v14593_v54  ;;  %v16001_v54 = vld [vmem:[#allocation58_spill] sm:$0xff] }
 0xa0b   :  { %11167 = vmatpush1.bf16.msra.mxu1 %v14759_v5 }
 0xa0c   :  { %11169 = vmatprep.subr.bf16.mxu1 %v14762_v6  ;;  %11223 = vmatpush1.bf16.msra.mxu0 %v14598_v50 }
 0xa0d   :  { %11225 = vmatprep.subr.bf16.mxu0 %v14601_v48 }
 0xa0f   :  { %11171 = vmatpush1.bf16.msra.mxu1 %v14767_v56 }
 0xa10   :  { %11173 = vmatprep.subr.bf16.mxu1 %v14770_v10  ;;  %11227 = vmatpush1.bf16.msra.mxu0 %v14606_v14 }
 0xa11   :  { %11229 = vmatprep.subr.bf16.mxu0 %v14609_v35 }
 0xa13   :  { %11175 = vmatpush1.bf16.msra.mxu1 %v14775_v15 }
 0xa14   :  { %11232 = vmatprep.subr.bf16.mxu1 %v15844_v19  ;;  %11231 = vmatpush1.bf16.msra.mxu0 %v14614_v49 }
 0xa15   :  { %11288 = vmatprep.subr.bf16.mxu0 %v15844_v19 }
 0xa16   :  { %5118 = vmatmul.mubr.f32.vlgmr.msra.gmra.mrb[102].mxu1 %v14720_v16 }
 0xa17   :  { %11234 = vmatpush3.bf16.msra.mxu1 %v14625_v33  ;;  %9294 = vmatprep.mubr.msk.f32.mxu1 %vm12811_vm4, %v15845_v61 }
 0xa18   :  { %11235 = vmatprep.subr.bf16.mxu1 %v15844_v19 }
 0xa1b   :  { %11237 = vmatpush3.bf16.msra.mxu1 %v14635_v31 }
 0xa1c   :  { %11238 = vmatprep.subr.bf16.mxu1 %v15844_v19 }
 0xa1f   :  { %11240 = vmatpush3.bf16.msra.mxu1 %v14647_v32 }
 0xa20   :  { %11241 = vmatprep.subr.bf16.mxu1 %v15844_v19 }
 0xa23   :  { %11243 = vmatpush3.bf16.msra.mxu1 %v14657_v57 }
 0xa24   :  { %11244 = vmatprep.subr.bf16.mxu1 %v15844_v19 }
 0xa27   :  { %11246 = vmatpush3.bf16.msra.mxu1 %v14667_v63  ;;  %v4204_v63 = vrot.slane %v14808_v12, %v16001_v54 }
 0xa28   :  { %11247 = vmatprep.subr.bf16.mxu1 %v15844_v19 }
 0xa2b   :  { %11249 = vmatpush3.bf16.msra.mxu1 %v14677_v22 }
 0xa2c   :  { %11250 = vmatprep.subr.bf16.mxu1 %v15844_v19 }
 0xa2f   :  { %11252 = vmatpush3.bf16.msra.mxu1 %v14687_v27 }
 0xa30   :  { %11253 = vmatprep.subr.bf16.mxu1 %v15844_v19 }
 0xa33   :  { %11255 = vmatpush3.bf16.msra.mxu1 %v14697_v36 }
 0xa34   :  { %11257 = vmatprep.subr.bf16.mxu1 %v14703_v52 }
 0xa68   :  { %v8197_v43 = vpop.f32.mrb[72].mxu1 }
 0xa69   :  { %v8198_v60 = vpop.f32.mrb[73].mxu1 }
 0xa6a   :  { %v14803_v29 = vadd.f32 %v8198_v60, %v8197_v43 }
 0xa6c   :  { %v8200_v55 = vpop.f32.mrb[74].mxu1 }
 0xa6d   :  { %v8201_v18 = vpop.f32.mrb[75].mxu1 }
 0xa6e   :  { %v8202_v17 = vadd.f32 %v8201_v18, %v8200_v55 }
 0xa70   :  { %v14815_v38 = vadd.f32 %v8202_v17, %v14812_v21  ;;  %v8203_v9 = vpop.f32.mrb[76].mxu1 }
 0xa71   :  { %v8204_v42 = vpop.f32.mrb[77].mxu1 }
 0xa72   :  { %15985 = vst [vmem:[#allocation31_spill] sm:$0xff] %v14815_v38  ;;  %v8205_v52 = vadd.f32 %v8204_v42, %v8203_v9 }
 0xa74   :  { %v14818_v43 = vadd.f32 %v8205_v52, %v14812_v21  ;;  %v8206_v60 = vpop.f32.mrb[78].mxu1 }
 0xa75   :  { %v8207_v36 = vpop.f32.mrb[79].mxu1 }
 0xa76   :  { %15986 = vst [vmem:[#allocation32_spill] sm:$0xff] %v14818_v43  ;;  %v8208_v49 = vadd.f32 %v8207_v36, %v8206_v60 }
 0xa78   :  { %v14821_v35 = vadd.f32 %v8208_v49, %v14812_v21  ;;  %v8209_v27 = vpop.f32.mrb[80].mxu1 }
 0xa79   :  { %v8210_v14 = vpop.f32.mrb[81].mxu1 }
 0xa7a   :  { %15987 = vst [vmem:[#allocation59_spill] sm:$0xff] %v14821_v35  ;;  %v8211_v48 = vadd.f32 %v8210_v14, %v8209_v27 }
 0xa7c   :  { %v14824_v55 = vadd.f32 %v8211_v48, %v14812_v21  ;;  %v8212_v18 = vpop.f32.mrb[82].mxu1  ;;  %v14835_v48 = vld [vmem:[%s15635_s16] sm:$0x7] }
 0xa7d   :  { %v8213_v17 = vpop.f32.mrb[83].mxu1 }
 0xa7e   :  { %15988 = vst [vmem:[#allocation60_spill] sm:$0xff] %v14824_v55  ;;  %v8214_v38 = vadd.f32 %v8213_v17, %v8212_v18 }
 0xa80   :  { %v14827_v9 = vadd.f32 %v8214_v38, %v14812_v21  ;;  %v8215_v52 = vpop.f32.mrb[84].mxu1  ;;  %v14842_v38 = vrot.slane %v14835_v48, %v15984_v30 }
 0xa81   :  { %v8216_v42 = vpop.f32.mrb[85].mxu1 }
 0xa82   :  { %15989 = vst [vmem:[#allocation46_spill] sm:$0xff] %v14827_v9  ;;  %v8217_v43 = vadd.f32 %v8216_v42, %v8215_v52 }
 0xa84   :  { %v14830_v36 = vadd.f32 %v8217_v43, %v14812_v21  ;;  %v8218_v49 = vpop.f32.mrb[86].mxu1 }
 0xa85   :  { %v8219_v60 = vpop.f32.mrb[87].mxu1 }
 0xa86   :  { %15990 = vst [vmem:[#allocation61_spill] sm:$0xff] %v14830_v36  ;;  %v8220_v35 = vadd.f32 %v8219_v60, %v8218_v49 }
 0xa88   :  { %v14838_v14 = vadd.f32 %v8220_v35, %v14812_v21 }
 0xa89   :  { %v8253_v27 = vpop.f32.mrb[88].mxu0 }
 0xa8a   :  { %15991 = vst [vmem:[#allocation62_spill] sm:$0xff] %v14838_v14  ;;  %v8254_v18 = vpop.f32.mrb[89].mxu0 }
 0xa8b   :  { %v8255_v17 = vadd.f32 %v8254_v18, %v8253_v27 }
 0xa8d   :  { %v14845_v43 = vadd.f32 %v8255_v17, %v14842_v38  ;;  %v8256_v52 = vpop.f32.mrb[90].mxu0 }
 0xa8e   :  { %v8257_v42 = vpop.f32.mrb[91].mxu0 }
 0xa8f   :  { %15992 = vst [vmem:[#allocation66_spill] sm:$0xff] %v14845_v43  ;;  %v8258_v49 = vadd.f32 %v8257_v42, %v8256_v52 }
 0xa91   :  { %v14848_v60 = vadd.f32 %v8258_v49, %v14842_v38  ;;  %v8259_v36 = vpop.f32.mrb[92].mxu0 }
 0xa92   :  { %v8260_v9 = vpop.f32.mrb[93].mxu0 }
 0xa93   :  { %15993 = vst [vmem:[#allocation83_spill] sm:$0xff] %v14848_v60  ;;  %v8261_v35 = vadd.f32 %v8260_v9, %v8259_v36  ;;  %v4809_v9 = vld [vmem:[%s15632_s13] sm:$0x7] }
 0xa94   :  { %v4818_v26 = vrot.slane %v4809_v9, %v16001_v54 }
 0xa95   :  { %v14851_v14 = vadd.f32 %v8261_v35, %v14842_v38  ;;  %v8262_v55 = vpop.f32.mrb[94].mxu0 }
 0xa96   :  { %v8263_v22 = vpop.f32.mrb[95].mxu0 }
 0xa97   :  { %15994 = vst [vmem:[#allocation63_spill] sm:$0xff] %v14851_v14  ;;  %v8264_v50 = vadd.f32 %v8263_v22, %v8262_v55 }
 0xa99   :  { %v14854_v27 = vadd.f32 %v8264_v50, %v14842_v38  ;;  %v8265_v18 = vpop.f32.mrb[96].mxu0  ;;  %v15998_v50 = vld [vmem:[#allocation57_spill] sm:$0xff] }
 0xa9a   :  { %v8266_v17 = vpop.f32.mrb[97].mxu0  ;;  %v4200_v35 = vrot.slane %v14808_v12, %v15998_v50 }
 0xa9b   :  { %15995 = vst [vmem:[#allocation65_spill] sm:$0xff] %v14854_v27  ;;  %v8267_v43 = vadd.f32 %v8266_v17, %v8265_v18  ;;  %v4814_v18 = vrot.slane %v4809_v9, %v15998_v50 }
 0xa9d   :  { %v14857_v52 = vadd.f32 %v8267_v43, %v14842_v38  ;;  %v8268_v42 = vpop.f32.mrb[98].mxu0 }
 0xa9e   :  { %v8269_v49 = vpop.f32.mrb[99].mxu0 }
 0xa9f   :  { %15996 = vst [vmem:[#allocation64_spill] sm:$0xff] %v14857_v52  ;;  %v8270_v60 = vadd.f32 %v8269_v49, %v8268_v42  ;;  %v14871_v49 = vadd.f32 %v4814_v18, %v4200_v35 }
 0xaa1   :  { %v14863_v36 = vadd.f32 %v8270_v60, %v14842_v38  ;;  %v8271_v22 = vpop.f32.mrb[100].mxu0  ;;  %16000 = vst [vmem:[#allocation69_spill] sm:$0xff] %v14871_v49 }
 0xaa2   :  { %v8272_v55 = vpop.f32.mrb[101].mxu0 }
 0xaa3   :  { %15997 = vst [vmem:[#allocation84_spill] sm:$0xff] %v14863_v36  ;;  %v8273_v17 = vadd.f32 %v8272_v55, %v8271_v22  ;;  %v14879_v22 = vadd.f32 %v4818_v26, %v4204_v63 }
 0xaa5   :  { %v14869_v43 = vadd.f32 %v8273_v17, %v14842_v38  ;;  %v8274_v14 = vpop.f32.mrb[102].mxu0  ;;  %16002 = vst [vmem:[#allocation70_spill] sm:$0xff] %v14879_v22 }
 0xaa6   :  { %v8275_v42 = vpop.f32.mrb[103].mxu0 }
 0xaa7   :  { %15999 = vst [vmem:[#allocation67_spill] sm:$0xff] %v14869_v43  ;;  %v14873_v27 = vadd.f32 %v8275_v42, %v8274_v14 }
 0xaa9   :  { %v4892_v52 = vpop.f32.mrb[72].mxu0 }
 0xaaa   :  { %v12113_v60 = vadd.f32 %v14871_v49, %v4892_v52  ;;  %v4894_v36 = vpop.f32.mrb[73].mxu0  ;;  %v14883_v52 = vrot.slane %v4809_v9, %v15984_v30 }
 0xaab   :  { %v12115_v55 = vadd.f32 %v14879_v22, %v4894_v36  ;;  %v4392_v36 = vadd.f32 %v14803_v29, %v14812_v21  ;;  %v5036_v29 = vld [vmem:[%s15636_s17] sm:$0x7] }
 0xaac   :  { %v7720_v37 = vmul.f32 -1.442695, %v12113_v60  ;;  %v5041_v21 = vrot.slane %v5036_v29, %v15998_v50 }
 0xaad   :  { %v7721_v17 = vmul.f32 -1.442695, %v12115_v55 }
 0xaae   :  { %12417 = vpow2.f32 %v7720_v37 }
 0xaaf   :  { %12419 = vpow2.f32 %v7721_v17 }
 0xab8   :  { %v12418_v35 = vpop.eup %12417 }
 0xab9   :  { %v4975_v14 = vadd.f32 1.0, %v12418_v35  ;;  %v12420_v18 = vpop.eup %12419 }
 0xaba   :  { %v4976_v42 = vadd.f32 1.0, %v12420_v18 }
 0xabb   :  { %12421 = vrcp.f32 %v4975_v14 }
 0xabc   :  { %12423 = vrcp.f32 %v4976_v42 }
 0xac5   :  { %v12422_v37 = vpop.eup %12421 }
 0xac6   :  { %v12424_v35 = vpop.eup %12423 }
 0xac7   :  { %v4984_v14 = vsub.f32 1.0, %v12424_v35  ;;  %v4986_v18 = vmul.f32 %v12424_v35, %v14623_v8  ;;  %v4531_v8 = vrot.slane %v14835_v48, %v15998_v50 }
 0xac9   :  { %v4963_v43 = vpop.f32.mrb[104].mxu1  ;;  %v14885_v12 = vpop.f32.mrb[104].mxu0  ;;  %v14915_v42 = vadd.f32 %v5041_v21, %v4531_v8  ;;  %v4758_v8 = vadd.f32 %v14873_v27, %v14842_v38  ;;  %v16005_v38 = vld [vmem:[#allocation48_spill] sm:$0xff] }
 0xaca   :  { %v4964_v60 = vadd.f32 %v4963_v43, %v14883_v52  ;;  %v9226_v26 = vpop.f32.mrb[105].mxu1  ;;  %v9261_v63 = vpop.f32.mrb[105].mxu0  ;;  %v4535_v43 = vrot.slane %v14835_v48, %v16001_v54  ;;  %v16006_v27 = vld [vmem:[#allocation28_spill] sm:$0xff] }
 0xacc   :  { %v4981_v55 = vmul.f32 %v12422_v37, %v4964_v60 }
 0xace   :  { %v4982_v17 = vadd.f32 %v4981_v55, %v4392_v36 }
 0xad0   :  { %12425 = vtanh.f32 %v4982_v17  ;;  %v14946_v17 = vrot.slane %v5036_v29, %v15984_v30 }
 0xada   :  { %v12426_v9 = vpop.eup %12425 }
 0xadb   :  { %v4985_v22 = vmul.f32 %v12426_v9, %v4984_v14  ;;  %v5191_v9 = vadd.f32 %v14885_v12, %v14946_v17  ;;  %v16007_v12 = vld [vmem:[#allocation24_spill] sm:$0xff] }
 0xadd   :  { %v14891_v49 = vadd.f32 %v4986_v18, %v4985_v22  ;;  %v5045_v22 = vrot.slane %v5036_v29, %v16001_v54 }
 0xadf   :  { %5280 = vmatmul.mubr.f32.vlgmr.msra.gmra.mrb[74].mxu0 %v14891_v49  ;;  %9295 = vmatmul.mubr.f32.vlgmr.msra.gmra.mrb[106].mxu1 %v14891_v49  ;;  %v14919_v60 = vadd.f32 %v5045_v22, %v4535_v43 }
 0xae0   :  { %11259 = vmatpush1.bf16.msra.mxu1 %v14710_v7  ;;  %11290 = vmatpush3.bf16.msra.mxu0 %v14627_v41 }
 0xae1   :  { %11261 = vmatprep.subr.bf16.mxu1 %v14714_v13  ;;  %11291 = vmatprep.subr.bf16.mxu0 %v15844_v19 }
 0xae2   :  { %5441 = vmatprep.mubr.f32.mxu1 %v15845_v61  ;;  %9329 = vmatprep.mubr.msk.f32.mxu0 %vm12811_vm4, %v15845_v61 }
 0xae4   :  { %11263 = vmatpush1.bf16.msra.mxu1 %v14725_v44  ;;  %11293 = vmatpush3.bf16.msra.mxu0 %v14638_v39 }
 0xae5   :  { %11265 = vmatprep.subr.bf16.mxu1 %v14729_v11  ;;  %11294 = vmatprep.subr.bf16.mxu0 %v15844_v19 }
 0xae8   :  { %11267 = vmatpush1.bf16.msra.mxu1 %v14735_v25  ;;  %11296 = vmatpush3.bf16.msra.mxu0 %v14650_v45 }
 0xae9   :  { %v5119_v50 = vpop.f32.mrb[102].mxu1  ;;  %11269 = vmatprep.subr.bf16.mxu1 %v14738_v51  ;;  %11297 = vmatprep.subr.bf16.mxu0 %v15844_v19 }
 0xaea   :  { %v12173_v48 = vadd.f32 %v14915_v42, %v5119_v50  ;;  %v5121_v54 = vpop.f32.mrb[103].mxu1 }
 0xaeb   :  { %v12175_v63 = vadd.f32 %v14919_v60, %v5121_v54 }
 0xaec   :  { %v7722_v26 = vmul.f32 -1.442695, %v12173_v48  ;;  %11271 = vmatpush1.bf16.msra.mxu1 %v14743_v34  ;;  %11299 = vmatpush3.bf16.msra.mxu0 %v14660_v24 }
 0xaed   :  { %11273 = vmatprep.subr.bf16.mxu1 %v14746_v28  ;;  %11300 = vmatprep.subr.bf16.mxu0 %v15844_v19  ;;  %v7723_v37 = vmul.f32 -1.442695, %v12175_v63  ;;  %v16009_v63 = vld [vmem:[#allocation42_spill] sm:$0xff] }
 0xaee   :  { %12427 = vpow2.f32 %v7722_v26  ;;  %v16008_v26 = vld [vmem:[#allocation39_spill] sm:$0xff] }
 0xaef   :  { %12429 = vpow2.f32 %v7723_v37  ;;  %v16010_v37 = vld [vmem:[#allocation25_spill] sm:$0xff] }
 0xaf0   :  { %11275 = vmatpush1.bf16.msra.mxu1 %v14751_v4  ;;  %11302 = vmatpush3.bf16.msra.mxu0 %v14670_v59 }
 0xaf1   :  { %11277 = vmatprep.subr.bf16.mxu1 %v14754_v23  ;;  %11303 = vmatprep.subr.bf16.mxu0 %v15844_v19 }
 0xaf4   :  { %11279 = vmatpush1.bf16.msra.mxu1 %v14759_v5  ;;  %11305 = vmatpush3.bf16.msra.mxu0 %v14680_v58 }
 0xaf5   :  { %11281 = vmatprep.subr.bf16.mxu1 %v14762_v6  ;;  %11306 = vmatprep.subr.bf16.mxu0 %v15844_v19 }
 0xaf8   :  { %v12428_v36 = vpop.eup %12427  ;;  %11283 = vmatpush1.bf16.msra.mxu1 %v14767_v56  ;;  %11308 = vmatpush3.bf16.msra.mxu0 %v14690_v53 }
 0xaf9   :  { %v5202_v55 = vadd.f32 1.0, %v12428_v36  ;;  %11285 = vmatprep.subr.bf16.mxu1 %v14770_v10  ;;  %11309 = vmatprep.subr.bf16.mxu0 %v15844_v19  ;;  %v12430_v35 = vpop.eup %12429  ;;  %v16011_v36 = vld [vmem:[#allocation26_spill] sm:$0xff] }
 0xafa   :  { %v5203_v14 = vadd.f32 1.0, %v12430_v35  ;;  %v16013_v35 = vld [vmem:[#allocation40_spill] sm:$0xff] }
 0xafb   :  { %12431 = vrcp.f32 %v5202_v55  ;;  %v16012_v55 = vld [vmem:[#allocation29_spill] sm:$0xff] }
 0xafc   :  { %11287 = vmatpush1.bf16.msra.mxu1 %v14775_v15  ;;  %11311 = vmatpush3.bf16.msra.mxu0 %v14700_v62  ;;  %12433 = vrcp.f32 %v5203_v14  ;;  %v16014_v14 = vld [vmem:[#allocation27_spill] sm:$0xff] }
 0xafd   :  { %11313 = vmatprep.subr.bf16.mxu0 %v14552_v40  ;;  %11344 = vmatprep.subr.bf16.mxu1 %v15844_v19 }
 0xb05   :  { %v12432_v18 = vpop.eup %12431 }
 0xb06   :  { %v5208_v21 = vmul.f32 %v12432_v18, %v5191_v9  ;;  %v12434_v22 = vpop.eup %12433  ;;  %v16015_v9 = vld [vmem:[#allocation30_spill] sm:$0xff]  ;;  %v16016_v18 = vld [vmem:[#allocation44_spill] sm:$0xff] }
 0xb07   :  { %v5211_v50 = vsub.f32 1.0, %v12434_v22  ;;  %v5213_v30 = vmul.f32 %v12434_v22, %v14720_v16  ;;  %v16004_v16 = vld [vmem:[#allocation23_spill] sm:$0xff] }
 0xb08   :  { %v5209_v43 = vadd.f32 %v5208_v21, %v4758_v8 }
 0xb0a   :  { %12435 = vtanh.f32 %v5209_v43  ;;  %v16017_v43 = vld [vmem:[#allocation69_spill] sm:$0xff] }
 0xb14   :  { %v12436_v48 = vpop.eup %12435 }
 0xb15   :  { %v5212_v54 = vmul.f32 %v12436_v48, %v5211_v50 }
 0xb17   :  { %v14953_v29 = vadd.f32 %v5213_v30, %v5212_v54  ;;  %v16018_v30 = vld [vmem:[#allocation70_spill] sm:$0xff] }
 0xb19   :  { %16003 = vst [vmem:[#allocation81_spill] sm:$0xff] %v14953_v29  ;;  %5442 = vmatmul.mubr.f32.vlgmr.msra.gmra.mrb[100].mxu1 %v14953_v29  ;;  %9330 = vmatmul.mubr.f32.vlgmr.msra.gmra.mrb[106].mxu0 %v14953_v29 }
 0xb1a   :  { %11315 = vmatpush1.bf16.msra.mxu0 %v14558_v47  ;;  %11346 = vmatpush3.bf16.msra.mxu1 %v14625_v33 }
 0xb1b   :  { %11317 = vmatprep.subr.bf16.mxu0 %v14561_v1  ;;  %11347 = vmatprep.subr.bf16.mxu1 %v15844_v19 }
 0xb1c   :  { %5603 = vmatprep.mubr.f32.mxu0 %v15845_v61  ;;  %9364 = vmatprep.mubr.msk.f32.mxu1 %vm12811_vm4, %v15845_v61 }
 0xb1e   :  { %11319 = vmatpush1.bf16.msra.mxu0 %v14566_v3  ;;  %11349 = vmatpush3.bf16.msra.mxu1 %v14635_v31 }
 0xb1f   :  { %11321 = vmatprep.subr.bf16.mxu0 %v14569_v46  ;;  %11350 = vmatprep.subr.bf16.mxu1 %v15844_v19 }
 0xb22   :  { %11323 = vmatpush1.bf16.msra.mxu0 %v14574_v0  ;;  %11352 = vmatpush3.bf16.msra.mxu1 %v14647_v32 }
 0xb23   :  { %11325 = vmatprep.subr.bf16.mxu0 %v14577_v2  ;;  %11353 = vmatprep.subr.bf16.mxu1 %v15844_v19 }
 0xb26   :  { %11327 = vmatpush1.bf16.msra.mxu0 %v14582_v20  ;;  %11355 = vmatpush3.bf16.msra.mxu1 %v14657_v57 }
 0xb27   :  { %11329 = vmatprep.subr.bf16.mxu0 %v16004_v16  ;;  %11356 = vmatprep.subr.bf16.mxu1 %v15844_v19 }
 0xb2a   :  { %11331 = vmatpush1.bf16.msra.mxu0 %v16005_v38  ;;  %11358 = vmatpush3.bf16.msra.mxu1 %v16006_v27 }
 0xb2b   :  { %11333 = vmatprep.subr.bf16.mxu0 %v16007_v12  ;;  %11359 = vmatprep.subr.bf16.mxu1 %v15844_v19  ;;  %v16019_v12 = vld [vmem:[#allocation31_spill] sm:$0xff] }
 0xb2e   :  { %11335 = vmatpush1.bf16.msra.mxu0 %v16008_v26  ;;  %11361 = vmatpush3.bf16.msra.mxu1 %v16009_v63 }
 0xb2f   :  { %11337 = vmatprep.subr.bf16.mxu0 %v16010_v37  ;;  %11362 = vmatprep.subr.bf16.mxu1 %v15844_v19 }
 0xb32   :  { %11339 = vmatpush1.bf16.msra.mxu0 %v16011_v36  ;;  %11364 = vmatpush3.bf16.msra.mxu1 %v16012_v55 }
 0xb33   :  { %11341 = vmatprep.subr.bf16.mxu0 %v16013_v35  ;;  %11365 = vmatprep.subr.bf16.mxu1 %v15844_v19 }
 0xb36   :  { %11343 = vmatpush1.bf16.msra.mxu0 %v16014_v14  ;;  %11367 = vmatpush3.bf16.msra.mxu1 %v16015_v9 }
 0xb37   :  { %11369 = vmatprep.subr.bf16.mxu1 %v16016_v18  ;;  %11400 = vmatprep.subr.bf16.mxu0 %v15844_v19 }
 0xbb2   :  { %v5281_v8 = vpop.f32.mrb[74].mxu0  ;;  %v5352_v21 = vpop.f32.mrb[106].mxu1 }
 0xbb3   :  { %v12117_v22 = vadd.f32 %v16017_v43, %v5281_v8  ;;  %v5283_v50 = vpop.f32.mrb[75].mxu0  ;;  %v9296_v48 = vpop.f32.mrb[107].mxu1  ;;  %v5353_v18 = vadd.f32 %v5352_v21, %v14883_v52 }
 0xbb4   :  { %v12119_v55 = vadd.f32 %v16018_v30, %v5283_v50 }
 0xbb5   :  { %v7724_v54 = vmul.f32 -1.442695, %v12117_v22 }
 0xbb6   :  { %v7725_v35 = vmul.f32 -1.442695, %v12119_v55 }
 0xbb7   :  { %12437 = vpow2.f32 %v7724_v54 }
 0xbb8   :  { %12439 = vpow2.f32 %v7725_v35 }
 0xbc1   :  { %v12438_v36 = vpop.eup %12437 }
 0xbc2   :  { %v5364_v14 = vadd.f32 1.0, %v12438_v36  ;;  %v12440_v9 = vpop.eup %12439 }
 0xbc3   :  { %v5365_v37 = vadd.f32 1.0, %v12440_v9 }
 0xbc4   :  { %12441 = vrcp.f32 %v5364_v14 }
 0xbc5   :  { %12443 = vrcp.f32 %v5365_v37 }
 0xbce   :  { %v12442_v63 = vpop.eup %12441 }
 0xbcf   :  { %v5370_v26 = vmul.f32 %v12442_v63, %v5353_v18  ;;  %v12444_v48 = vpop.eup %12443 }
 0xbd0   :  { %v5373_v22 = vsub.f32 1.0, %v12444_v48  ;;  %v5375_v55 = vmul.f32 %v12444_v48, %v14891_v49 }
 0xbd1   :  { %v5371_v8 = vadd.f32 %v5370_v26, %v16019_v12 }
 0xbd3   :  { %12445 = vtanh.f32 %v5371_v8 }
 0xbdd   :  { %v12446_v43 = vpop.eup %12445 }
 0xbde   :  { %v5374_v50 = vmul.f32 %v12446_v43, %v5373_v22 }
 0xbe0   :  { %v14997_v35 = vadd.f32 %v5375_v55, %v5374_v50  ;;  %v16020_v50 = vld [vmem:[#allocation67_spill] sm:$0xff] }
 0xbe2   :  { %5604 = vmatmul.mubr.f32.vlgmr.msra.gmra.mrb[76].mxu0 %v14997_v35  ;;  %9365 = vmatmul.mubr.f32.vlgmr.msra.gmra.mrb[108].mxu1 %v14997_v35 }
 0xbe3   :  { %11371 = vmatpush1.bf16.msra.mxu1 %v14710_v7  ;;  %11402 = vmatpush3.bf16.msra.mxu0 %v14627_v41 }
 0xbe4   :  { %11373 = vmatprep.subr.bf16.mxu1 %v14714_v13  ;;  %11403 = vmatprep.subr.bf16.mxu0 %v15844_v19 }
 0xbe5   :  { %5765 = vmatprep.mubr.f32.mxu1 %v15845_v61  ;;  %9399 = vmatprep.mubr.msk.f32.mxu0 %vm12811_vm4, %v15845_v61 }
 0xbe7   :  { %11375 = vmatpush1.bf16.msra.mxu1 %v14725_v44  ;;  %11405 = vmatpush3.bf16.msra.mxu0 %v14638_v39 }
 0xbe8   :  { %11377 = vmatprep.subr.bf16.mxu1 %v14729_v11  ;;  %11406 = vmatprep.subr.bf16.mxu0 %v15844_v19 }
 0xbeb   :  { %11379 = vmatpush1.bf16.msra.mxu1 %v14735_v25  ;;  %11408 = vmatpush3.bf16.msra.mxu0 %v14650_v45 }
 0xbec   :  { %v5443_v49 = vpop.f32.mrb[100].mxu1  ;;  %v5514_v12 = vpop.f32.mrb[106].mxu0  ;;  %11381 = vmatprep.subr.bf16.mxu1 %v14738_v51  ;;  %11409 = vmatprep.subr.bf16.mxu0 %v15844_v19 }
 0xbed   :  { %v12169_v26 = vadd.f32 %v14915_v42, %v5443_v49  ;;  %v5445_v63 = vpop.f32.mrb[101].mxu1  ;;  %v9331_v37 = vpop.f32.mrb[107].mxu0  ;;  %v5515_v8 = vadd.f32 %v5514_v12, %v14946_v17  ;;  %v16021_v12 = vld [vmem:[#allocation24_spill] sm:$0xff] }
 0xbee   :  { %v12171_v14 = vadd.f32 %v14919_v60, %v5445_v63 }
 0xbef   :  { %v7726_v36 = vmul.f32 -1.442695, %v12169_v26  ;;  %11383 = vmatpush1.bf16.msra.mxu1 %v14743_v34  ;;  %11411 = vmatpush3.bf16.msra.mxu0 %v14660_v24 }
 0xbf0   :  { %11385 = vmatprep.subr.bf16.mxu1 %v14746_v28  ;;  %11412 = vmatprep.subr.bf16.mxu0 %v15844_v19  ;;  %v7727_v9 = vmul.f32 -1.442695, %v12171_v14 }
 0xbf1   :  { %12447 = vpow2.f32 %v7726_v36 }
 0xbf2   :  { %12449 = vpow2.f32 %v7727_v9  ;;  %v16022_v9 = vld [vmem:[#allocation39_spill] sm:$0xff] }
 0xbf3   :  { %11387 = vmatpush1.bf16.msra.mxu1 %v14751_v4  ;;  %11414 = vmatpush3.bf16.msra.mxu0 %v14670_v59 }
 0xbf4   :  { %11389 = vmatprep.subr.bf16.mxu1 %v14754_v23  ;;  %11415 = vmatprep.subr.bf16.mxu0 %v15844_v19 }
 0xbf7   :  { %11391 = vmatpush1.bf16.msra.mxu1 %v14759_v5  ;;  %11417 = vmatpush3.bf16.msra.mxu0 %v14680_v58 }
 0xbf8   :  { %11393 = vmatprep.subr.bf16.mxu1 %v14762_v6  ;;  %11418 = vmatprep.subr.bf16.mxu0 %v15844_v19 }
 0xbfb   :  { %v12448_v18 = vpop.eup %12447  ;;  %11395 = vmatpush1.bf16.msra.mxu1 %v14767_v56  ;;  %11420 = vmatpush3.bf16.msra.mxu0 %v14690_v53 }
 0xbfc   :  { %v5526_v21 = vadd.f32 1.0, %v12448_v18  ;;  %11397 = vmatprep.subr.bf16.mxu1 %v14770_v10  ;;  %11421 = vmatprep.subr.bf16.mxu0 %v15844_v19  ;;  %v12450_v43 = vpop.eup %12449  ;;  %v16023_v18 = vld [vmem:[#allocation42_spill] sm:$0xff] }
 0xbfd   :  { %v5527_v54 = vadd.f32 1.0, %v12450_v43  ;;  %v16025_v43 = vld [vmem:[#allocation26_spill] sm:$0xff] }
 0xbfe   :  { %12451 = vrcp.f32 %v5526_v21  ;;  %v16024_v21 = vld [vmem:[#allocation25_spill] sm:$0xff] }
 0xbff   :  { %11399 = vmatpush1.bf16.msra.mxu1 %v14775_v15  ;;  %11423 = vmatpush3.bf16.msra.mxu0 %v14700_v62  ;;  %12453 = vrcp.f32 %v5527_v54  ;;  %v16026_v54 = vld [vmem:[#allocation29_spill] sm:$0xff] }
 0xc00   :  { %11425 = vmatprep.subr.bf16.mxu0 %v14552_v40  ;;  %11456 = vmatprep.subr.bf16.mxu1 %v15844_v19 }
 0xc08   :  { %v12452_v48 = vpop.eup %12451 }
 0xc09   :  { %v5532_v22 = vmul.f32 %v12452_v48, %v5515_v8  ;;  %v12454_v49 = vpop.eup %12453  ;;  %v16027_v8 = vld [vmem:[#allocation40_spill] sm:$0xff]  ;;  %v16028_v48 = vld [vmem:[#allocation27_spill] sm:$0xff] }
 0xc0a   :  { %v5535_v26 = vsub.f32 1.0, %v12454_v49  ;;  %v5537_v36 = vmul.f32 %v12454_v49, %v14953_v29 }
 0xc0b   :  { %v5533_v55 = vadd.f32 %v5532_v22, %v16020_v50  ;;  %v16029_v22 = vld [vmem:[#allocation30_spill] sm:$0xff]  ;;  %v16030_v50 = vld [vmem:[#allocation44_spill] sm:$0xff] }
 0xc0d   :  { %12455 = vtanh.f32 %v5533_v55 }
 0xc17   :  { %v12456_v63 = vpop.eup %12455 }
 0xc18   :  { %v5536_v37 = vmul.f32 %v12456_v63, %v5535_v26  ;;  %v16031_v26 = vld [vmem:[#allocation69_spill] sm:$0xff] }
 0xc1a   :  { %v15041_v14 = vadd.f32 %v5537_v36, %v5536_v37 }
 0xc1c   :  { %5766 = vmatmul.mubr.f32.vlgmr.msra.gmra.mrb[98].mxu1 %v15041_v14  ;;  %9400 = vmatmul.mubr.f32.vlgmr.msra.gmra.mrb[108].mxu0 %v15041_v14 }
 0xc1d   :  { %11427 = vmatpush1.bf16.msra.mxu0 %v14558_v47  ;;  %11458 = vmatpush3.bf16.msra.mxu1 %v14625_v33 }
 0xc1e   :  { %11429 = vmatprep.subr.bf16.mxu0 %v14561_v1  ;;  %11459 = vmatprep.subr.bf16.mxu1 %v15844_v19 }
 0xc1f   :  { %5927 = vmatprep.mubr.f32.mxu0 %v15845_v61  ;;  %9434 = vmatprep.mubr.msk.f32.mxu1 %vm12811_vm4, %v15845_v61 }
 0xc21   :  { %11431 = vmatpush1.bf16.msra.mxu0 %v14566_v3  ;;  %11461 = vmatpush3.bf16.msra.mxu1 %v14635_v31 }
 0xc22   :  { %11433 = vmatprep.subr.bf16.mxu0 %v14569_v46  ;;  %11462 = vmatprep.subr.bf16.mxu1 %v15844_v19 }
 0xc25   :  { %11435 = vmatpush1.bf16.msra.mxu0 %v14574_v0  ;;  %11464 = vmatpush3.bf16.msra.mxu1 %v14647_v32 }
 0xc26   :  { %11437 = vmatprep.subr.bf16.mxu0 %v14577_v2  ;;  %11465 = vmatprep.subr.bf16.mxu1 %v15844_v19 }
 0xc29   :  { %11439 = vmatpush1.bf16.msra.mxu0 %v14582_v20  ;;  %11467 = vmatpush3.bf16.msra.mxu1 %v14657_v57 }
 0xc2a   :  { %11441 = vmatprep.subr.bf16.mxu0 %v16004_v16  ;;  %11468 = vmatprep.subr.bf16.mxu1 %v15844_v19 }
 0xc2d   :  { %11443 = vmatpush1.bf16.msra.mxu0 %v16005_v38  ;;  %11470 = vmatpush3.bf16.msra.mxu1 %v16006_v27 }
 0xc2e   :  { %11445 = vmatprep.subr.bf16.mxu0 %v16021_v12  ;;  %11471 = vmatprep.subr.bf16.mxu1 %v15844_v19  ;;  %v16032_v12 = vld [vmem:[#allocation32_spill] sm:$0xff] }
 0xc31   :  { %11447 = vmatpush1.bf16.msra.mxu0 %v16022_v9  ;;  %11473 = vmatpush3.bf16.msra.mxu1 %v16023_v18 }
 0xc32   :  { %11449 = vmatprep.subr.bf16.mxu0 %v16024_v21  ;;  %11474 = vmatprep.subr.bf16.mxu1 %v15844_v19 }
 0xc35   :  { %11451 = vmatpush1.bf16.msra.mxu0 %v16025_v43  ;;  %11476 = vmatpush3.bf16.msra.mxu1 %v16026_v54 }
 0xc36   :  { %11453 = vmatprep.subr.bf16.mxu0 %v16027_v8  ;;  %11477 = vmatprep.subr.bf16.mxu1 %v15844_v19 }
 0xc39   :  { %11455 = vmatpush1.bf16.msra.mxu0 %v16028_v48  ;;  %11479 = vmatpush3.bf16.msra.mxu1 %v16029_v22 }
 0xc3a   :  { %11481 = vmatprep.subr.bf16.mxu1 %v16030_v50  ;;  %11512 = vmatprep.subr.bf16.mxu0 %v15844_v19 }
 0xcb5   :  { %v5605_v55 = vpop.f32.mrb[76].mxu0  ;;  %v5676_v49 = vpop.f32.mrb[108].mxu1 }
 0xcb6   :  { %v12121_v63 = vadd.f32 %v16031_v26, %v5605_v55  ;;  %v5607_v37 = vpop.f32.mrb[77].mxu0  ;;  %v9366_v36 = vpop.f32.mrb[109].mxu1  ;;  %v5677_v50 = vadd.f32 %v5676_v49, %v14883_v52 }
 0xcb7   :  { %v12123_v54 = vadd.f32 %v16018_v30, %v5607_v37 }
 0xcb8   :  { %v7728_v29 = vmul.f32 -1.442695, %v12121_v63 }
 0xcb9   :  { %v7729_v8 = vmul.f32 -1.442695, %v12123_v54 }
 0xcba   :  { %12457 = vpow2.f32 %v7728_v29 }
 0xcbb   :  { %12459 = vpow2.f32 %v7729_v8 }
 0xcc4   :  { %v12458_v43 = vpop.eup %12457 }
 0xcc5   :  { %v5688_v48 = vadd.f32 1.0, %v12458_v43  ;;  %v12460_v22 = vpop.eup %12459 }
 0xcc6   :  { %v5689_v21 = vadd.f32 1.0, %v12460_v22 }
 0xcc7   :  { %12461 = vrcp.f32 %v5688_v48 }
 0xcc8   :  { %12463 = vrcp.f32 %v5689_v21 }
 0xcd1   :  { %v12462_v18 = vpop.eup %12461 }
 0xcd2   :  { %v5694_v9 = vmul.f32 %v12462_v18, %v5677_v50  ;;  %v12464_v36 = vpop.eup %12463 }
 0xcd3   :  { %v5697_v63 = vsub.f32 1.0, %v12464_v36  ;;  %v5699_v29 = vmul.f32 %v12464_v36, %v14997_v35 }
 0xcd4   :  { %v5695_v55 = vadd.f32 %v5694_v9, %v16032_v12 }
 0xcd6   :  { %12465 = vtanh.f32 %v5695_v55 }
 0xce0   :  { %v12466_v26 = vpop.eup %12465 }
 0xce1   :  { %v5698_v37 = vmul.f32 %v12466_v26, %v5697_v63 }
 0xce3   :  { %v15085_v54 = vadd.f32 %v5699_v29, %v5698_v37  ;;  %v16033_v37 = vld [vmem:[#allocation84_spill] sm:$0xff] }
 0xce5   :  { %5928 = vmatmul.mubr.f32.vlgmr.msra.gmra.mrb[78].mxu0 %v15085_v54  ;;  %9435 = vmatmul.mubr.f32.vlgmr.msra.gmra.mrb[110].mxu1 %v15085_v54 }
 0xce6   :  { %11483 = vmatpush1.bf16.msra.mxu1 %v14710_v7  ;;  %11514 = vmatpush3.bf16.msra.mxu0 %v14627_v41 }
 0xce7   :  { %11485 = vmatprep.subr.bf16.mxu1 %v14714_v13  ;;  %11515 = vmatprep.subr.bf16.mxu0 %v15844_v19 }
 0xce8   :  { %6089 = vmatprep.mubr.f32.mxu1 %v15845_v61  ;;  %9469 = vmatprep.mubr.msk.f32.mxu0 %vm12811_vm4, %v15845_v61 }
 0xcea   :  { %11487 = vmatpush1.bf16.msra.mxu1 %v14725_v44  ;;  %11517 = vmatpush3.bf16.msra.mxu0 %v14638_v39 }
 0xceb   :  { %11489 = vmatprep.subr.bf16.mxu1 %v14729_v11  ;;  %11518 = vmatprep.subr.bf16.mxu0 %v15844_v19 }
 0xcee   :  { %11491 = vmatpush1.bf16.msra.mxu1 %v14735_v25  ;;  %11520 = vmatpush3.bf16.msra.mxu0 %v14650_v45 }
 0xcef   :  { %v5767_v35 = vpop.f32.mrb[98].mxu1  ;;  %v5838_v12 = vpop.f32.mrb[108].mxu0  ;;  %11493 = vmatprep.subr.bf16.mxu1 %v14738_v51  ;;  %11521 = vmatprep.subr.bf16.mxu0 %v15844_v19 }
 0xcf0   :  { %v12165_v9 = vadd.f32 %v14915_v42, %v5767_v35  ;;  %v5769_v18 = vpop.f32.mrb[99].mxu1  ;;  %v9401_v21 = vpop.f32.mrb[109].mxu0  ;;  %v5839_v55 = vadd.f32 %v5838_v12, %v14946_v17  ;;  %v16035_v12 = vld [vmem:[#allocation39_spill] sm:$0xff] }
 0xcf1   :  { %v12167_v8 = vadd.f32 %v14919_v60, %v5769_v18 }
 0xcf2   :  { %v7730_v43 = vmul.f32 -1.442695, %v12165_v9  ;;  %11495 = vmatpush1.bf16.msra.mxu1 %v14743_v34  ;;  %11523 = vmatpush3.bf16.msra.mxu0 %v14660_v24 }
 0xcf3   :  { %11497 = vmatprep.subr.bf16.mxu1 %v14746_v28  ;;  %11524 = vmatprep.subr.bf16.mxu0 %v15844_v19  ;;  %v7731_v48 = vmul.f32 -1.442695, %v12167_v8 }
 0xcf4   :  { %12467 = vpow2.f32 %v7730_v43 }
 0xcf5   :  { %12469 = vpow2.f32 %v7731_v48  ;;  %v16036_v48 = vld [vmem:[#allocation42_spill] sm:$0xff] }
 0xcf6   :  { %11499 = vmatpush1.bf16.msra.mxu1 %v14751_v4  ;;  %11526 = vmatpush3.bf16.msra.mxu0 %v14670_v59 }
 0xcf7   :  { %11501 = vmatprep.subr.bf16.mxu1 %v14754_v23  ;;  %11527 = vmatprep.subr.bf16.mxu0 %v15844_v19 }
 0xcfa   :  { %11503 = vmatpush1.bf16.msra.mxu1 %v14759_v5  ;;  %11529 = vmatpush3.bf16.msra.mxu0 %v14680_v58 }
 0xcfb   :  { %11505 = vmatprep.subr.bf16.mxu1 %v14762_v6  ;;  %11530 = vmatprep.subr.bf16.mxu0 %v15844_v19 }
 0xcfe   :  { %v12468_v22 = vpop.eup %12467  ;;  %11507 = vmatpush1.bf16.msra.mxu1 %v14767_v56  ;;  %11532 = vmatpush3.bf16.msra.mxu0 %v14690_v53 }
 0xcff   :  { %v5850_v50 = vadd.f32 1.0, %v12468_v22  ;;  %11509 = vmatprep.subr.bf16.mxu1 %v14770_v10  ;;  %11533 = vmatprep.subr.bf16.mxu0 %v15844_v19  ;;  %v12470_v49 = vpop.eup %12469  ;;  %v16037_v22 = vld [vmem:[#allocation25_spill] sm:$0xff] }
 0xd00   :  { %v5851_v26 = vadd.f32 1.0, %v12470_v49  ;;  %v16039_v49 = vld [vmem:[#allocation29_spill] sm:$0xff] }
 0xd01   :  { %12471 = vrcp.f32 %v5850_v50  ;;  %v16038_v50 = vld [vmem:[#allocation26_spill] sm:$0xff] }
 0xd02   :  { %11511 = vmatpush1.bf16.msra.mxu1 %v14775_v15  ;;  %11535 = vmatpush3.bf16.msra.mxu0 %v14700_v62  ;;  %12473 = vrcp.f32 %v5851_v26  ;;  %v16040_v26 = vld [vmem:[#allocation40_spill] sm:$0xff] }
 0xd03   :  { %11537 = vmatprep.subr.bf16.mxu0 %v14552_v40  ;;  %11568 = vmatprep.subr.bf16.mxu1 %v15844_v19 }
 0xd0b   :  { %v12472_v36 = vpop.eup %12471 }
 0xd0c   :  { %v5856_v63 = vmul.f32 %v12472_v36, %v5839_v55  ;;  %v12474_v35 = vpop.eup %12473  ;;  %v16041_v55 = vld [vmem:[#allocation27_spill] sm:$0xff]  ;;  %v16042_v36 = vld [vmem:[#allocation30_spill] sm:$0xff] }
 0xd0d   :  { %v5859_v9 = vsub.f32 1.0, %v12474_v35  ;;  %v5861_v43 = vmul.f32 %v12474_v35, %v15041_v14  ;;  %v16034_v14 = vld [vmem:[#allocation24_spill] sm:$0xff]  ;;  %v16044_v35 = vld [vmem:[#allocation69_spill] sm:$0xff] }
 0xd0e   :  { %v5857_v29 = vadd.f32 %v5856_v63, %v16033_v37  ;;  %v16043_v63 = vld [vmem:[#allocation44_spill] sm:$0xff] }
 0xd10   :  { %12475 = vtanh.f32 %v5857_v29 }
 0xd1a   :  { %v12476_v18 = vpop.eup %12475 }
 0xd1b   :  { %v5860_v21 = vmul.f32 %v12476_v18, %v5859_v9 }
 0xd1d   :  { %v15129_v8 = vadd.f32 %v5861_v43, %v5860_v21 }
 0xd1f   :  { %6090 = vmatmul.mubr.f32.vlgmr.msra.gmra.mrb[96].mxu1 %v15129_v8  ;;  %9470 = vmatmul.mubr.f32.vlgmr.msra.gmra.mrb[110].mxu0 %v15129_v8 }
 0xd20   :  { %11539 = vmatpush1.bf16.msra.mxu0 %v14558_v47  ;;  %11570 = vmatpush3.bf16.msra.mxu1 %v14625_v33 }
 0xd21   :  { %11541 = vmatprep.subr.bf16.mxu0 %v14561_v1  ;;  %11571 = vmatprep.subr.bf16.mxu1 %v15844_v19 }
 0xd22   :  { %6251 = vmatprep.mubr.f32.mxu0 %v15845_v61  ;;  %9504 = vmatprep.mubr.msk.f32.mxu1 %vm12811_vm4, %v15845_v61 }
 0xd24   :  { %11543 = vmatpush1.bf16.msra.mxu0 %v14566_v3  ;;  %11573 = vmatpush3.bf16.msra.mxu1 %v14635_v31 }
 0xd25   :  { %11545 = vmatprep.subr.bf16.mxu0 %v14569_v46  ;;  %11574 = vmatprep.subr.bf16.mxu1 %v15844_v19 }
 0xd28   :  { %11547 = vmatpush1.bf16.msra.mxu0 %v14574_v0  ;;  %11576 = vmatpush3.bf16.msra.mxu1 %v14647_v32 }
 0xd29   :  { %11549 = vmatprep.subr.bf16.mxu0 %v14577_v2  ;;  %11577 = vmatprep.subr.bf16.mxu1 %v15844_v19 }
 0xd2c   :  { %11551 = vmatpush1.bf16.msra.mxu0 %v14582_v20  ;;  %11579 = vmatpush3.bf16.msra.mxu1 %v14657_v57 }
 0xd2d   :  { %11553 = vmatprep.subr.bf16.mxu0 %v16004_v16  ;;  %11580 = vmatprep.subr.bf16.mxu1 %v15844_v19 }
 0xd30   :  { %11555 = vmatpush1.bf16.msra.mxu0 %v16005_v38  ;;  %11582 = vmatpush3.bf16.msra.mxu1 %v16006_v27 }
 0xd31   :  { %11557 = vmatprep.subr.bf16.mxu0 %v16034_v14  ;;  %11583 = vmatprep.subr.bf16.mxu1 %v15844_v19  ;;  %v16045_v14 = vld [vmem:[#allocation59_spill] sm:$0xff] }
 0xd34   :  { %11559 = vmatpush1.bf16.msra.mxu0 %v16035_v12  ;;  %11585 = vmatpush3.bf16.msra.mxu1 %v16036_v48 }
 0xd35   :  { %11561 = vmatprep.subr.bf16.mxu0 %v16037_v22  ;;  %11586 = vmatprep.subr.bf16.mxu1 %v15844_v19 }
 0xd38   :  { %11563 = vmatpush1.bf16.msra.mxu0 %v16038_v50  ;;  %11588 = vmatpush3.bf16.msra.mxu1 %v16039_v49 }
 0xd39   :  { %11565 = vmatprep.subr.bf16.mxu0 %v16040_v26  ;;  %11589 = vmatprep.subr.bf16.mxu1 %v15844_v19 }
 0xd3c   :  { %11567 = vmatpush1.bf16.msra.mxu0 %v16041_v55  ;;  %11591 = vmatpush3.bf16.msra.mxu1 %v16042_v36 }
 0xd3d   :  { %11593 = vmatprep.subr.bf16.mxu1 %v16043_v63  ;;  %11624 = vmatprep.subr.bf16.mxu0 %v15844_v19 }
 0xdb8   :  { %v5929_v37 = vpop.f32.mrb[78].mxu0  ;;  %v6000_v29 = vpop.f32.mrb[110].mxu1 }
 0xdb9   :  { %v12125_v9 = vadd.f32 %v16044_v35, %v5929_v37  ;;  %v5931_v18 = vpop.f32.mrb[79].mxu0  ;;  %v9436_v21 = vpop.f32.mrb[111].mxu1  ;;  %v6001_v63 = vadd.f32 %v6000_v29, %v14883_v52 }
 0xdba   :  { %v12127_v49 = vadd.f32 %v16018_v30, %v5931_v18 }
 0xdbb   :  { %v7732_v43 = vmul.f32 -1.442695, %v12125_v9 }
 0xdbc   :  { %v7733_v26 = vmul.f32 -1.442695, %v12127_v49 }
 0xdbd   :  { %12477 = vpow2.f32 %v7732_v43 }
 0xdbe   :  { %12479 = vpow2.f32 %v7733_v26 }
 0xdc7   :  { %v12478_v50 = vpop.eup %12477 }
 0xdc8   :  { %v6012_v55 = vadd.f32 1.0, %v12478_v50  ;;  %v12480_v36 = vpop.eup %12479 }
 0xdc9   :  { %v6013_v22 = vadd.f32 1.0, %v12480_v36 }
 0xdca   :  { %12481 = vrcp.f32 %v6012_v55 }
 0xdcb   :  { %12483 = vrcp.f32 %v6013_v22 }
 0xdd4   :  { %v12482_v48 = vpop.eup %12481 }
 0xdd5   :  { %v6018_v12 = vmul.f32 %v12482_v48, %v6001_v63  ;;  %v12484_v21 = vpop.eup %12483 }
 0xdd6   :  { %v6021_v9 = vsub.f32 1.0, %v12484_v21  ;;  %v6023_v49 = vmul.f32 %v12484_v21, %v15085_v54 }
 0xdd7   :  { %v6019_v37 = vadd.f32 %v6018_v12, %v16045_v14 }
 0xdd9   :  { %12485 = vtanh.f32 %v6019_v37 }
 0xde3   :  { %v12486_v35 = vpop.eup %12485 }
 0xde4   :  { %v6022_v18 = vmul.f32 %v12486_v35, %v6021_v9 }
 0xde6   :  { %v15173_v26 = vadd.f32 %v6023_v49, %v6022_v18  ;;  %v16046_v18 = vld [vmem:[#allocation64_spill] sm:$0xff] }
 0xde8   :  { %6252 = vmatmul.mubr.f32.vlgmr.msra.gmra.mrb[80].mxu0 %v15173_v26  ;;  %9505 = vmatmul.mubr.f32.vlgmr.msra.gmra.mrb[112].mxu1 %v15173_v26 }
 0xde9   :  { %11595 = vmatpush1.bf16.msra.mxu1 %v14710_v7  ;;  %11626 = vmatpush3.bf16.msra.mxu0 %v14627_v41 }
 0xdea   :  { %11597 = vmatprep.subr.bf16.mxu1 %v14714_v13  ;;  %11627 = vmatprep.subr.bf16.mxu0 %v15844_v19 }
 0xdeb   :  { %6413 = vmatprep.mubr.f32.mxu1 %v15845_v61  ;;  %9539 = vmatprep.mubr.msk.f32.mxu0 %vm12811_vm4, %v15845_v61 }
 0xded   :  { %11599 = vmatpush1.bf16.msra.mxu1 %v14725_v44  ;;  %11629 = vmatpush3.bf16.msra.mxu0 %v14638_v39 }
 0xdee   :  { %11601 = vmatprep.subr.bf16.mxu1 %v14729_v11  ;;  %11630 = vmatprep.subr.bf16.mxu0 %v15844_v19 }
 0xdf1   :  { %11603 = vmatpush1.bf16.msra.mxu1 %v14735_v25  ;;  %11632 = vmatpush3.bf16.msra.mxu0 %v14650_v45 }
 0xdf2   :  { %v6091_v54 = vpop.f32.mrb[96].mxu1  ;;  %v6162_v14 = vpop.f32.mrb[110].mxu0  ;;  %11605 = vmatprep.subr.bf16.mxu1 %v14738_v51  ;;  %11633 = vmatprep.subr.bf16.mxu0 %v15844_v19 }
 0xdf3   :  { %v12161_v12 = vadd.f32 %v14915_v42, %v6091_v54  ;;  %v6093_v48 = vpop.f32.mrb[97].mxu1  ;;  %v9471_v22 = vpop.f32.mrb[111].mxu0  ;;  %v6163_v37 = vadd.f32 %v6162_v14, %v14946_v17  ;;  %v16048_v14 = vld [vmem:[#allocation39_spill] sm:$0xff] }
 0xdf4   :  { %v12163_v55 = vadd.f32 %v14919_v60, %v6093_v48 }
 0xdf5   :  { %v7734_v50 = vmul.f32 -1.442695, %v12161_v12  ;;  %11607 = vmatpush1.bf16.msra.mxu1 %v14743_v34  ;;  %11635 = vmatpush3.bf16.msra.mxu0 %v14660_v24 }
 0xdf6   :  { %11609 = vmatprep.subr.bf16.mxu1 %v14746_v28  ;;  %11636 = vmatprep.subr.bf16.mxu0 %v15844_v19  ;;  %v7735_v36 = vmul.f32 -1.442695, %v12163_v55 }
 0xdf7   :  { %12487 = vpow2.f32 %v7734_v50 }
 0xdf8   :  { %12489 = vpow2.f32 %v7735_v36  ;;  %v16049_v36 = vld [vmem:[#allocation42_spill] sm:$0xff] }
 0xdf9   :  { %11611 = vmatpush1.bf16.msra.mxu1 %v14751_v4  ;;  %11638 = vmatpush3.bf16.msra.mxu0 %v14670_v59 }
 0xdfa   :  { %11613 = vmatprep.subr.bf16.mxu1 %v14754_v23  ;;  %11639 = vmatprep.subr.bf16.mxu0 %v15844_v19 }
 0xdfd   :  { %11615 = vmatpush1.bf16.msra.mxu1 %v14759_v5  ;;  %11641 = vmatpush3.bf16.msra.mxu0 %v14680_v58 }
 0xdfe   :  { %11617 = vmatprep.subr.bf16.mxu1 %v14762_v6  ;;  %11642 = vmatprep.subr.bf16.mxu0 %v15844_v19 }
 0xe01   :  { %v12488_v63 = vpop.eup %12487  ;;  %11619 = vmatpush1.bf16.msra.mxu1 %v14767_v56  ;;  %11644 = vmatpush3.bf16.msra.mxu0 %v14690_v53 }
 0xe02   :  { %v6174_v29 = vadd.f32 1.0, %v12488_v63  ;;  %11621 = vmatprep.subr.bf16.mxu1 %v14770_v10  ;;  %11645 = vmatprep.subr.bf16.mxu0 %v15844_v19  ;;  %v12490_v35 = vpop.eup %12489  ;;  %v16050_v63 = vld [vmem:[#allocation25_spill] sm:$0xff] }
 0xe03   :  { %v6175_v43 = vadd.f32 1.0, %v12490_v35  ;;  %v16052_v35 = vld [vmem:[#allocation29_spill] sm:$0xff] }
 0xe04   :  { %12491 = vrcp.f32 %v6174_v29  ;;  %v16051_v29 = vld [vmem:[#allocation26_spill] sm:$0xff] }
 0xe05   :  { %11623 = vmatpush1.bf16.msra.mxu1 %v14775_v15  ;;  %11647 = vmatpush3.bf16.msra.mxu0 %v14700_v62  ;;  %12493 = vrcp.f32 %v6175_v43  ;;  %v16053_v43 = vld [vmem:[#allocation40_spill] sm:$0xff] }
 0xe06   :  { %11649 = vmatprep.subr.bf16.mxu0 %v14552_v40  ;;  %11680 = vmatprep.subr.bf16.mxu1 %v15844_v19 }
 0xe0e   :  { %v12492_v21 = vpop.eup %12491 }
 0xe0f   :  { %v6180_v9 = vmul.f32 %v12492_v21, %v6163_v37  ;;  %v12494_v54 = vpop.eup %12493  ;;  %v16054_v37 = vld [vmem:[#allocation27_spill] sm:$0xff]  ;;  %v16055_v21 = vld [vmem:[#allocation30_spill] sm:$0xff] }
 0xe10   :  { %v6183_v12 = vsub.f32 1.0, %v12494_v54  ;;  %v6185_v50 = vmul.f32 %v12494_v54, %v15129_v8  ;;  %v16047_v8 = vld [vmem:[#allocation24_spill] sm:$0xff]  ;;  %v16057_v54 = vld [vmem:[#allocation69_spill] sm:$0xff] }
 0xe11   :  { %v6181_v49 = vadd.f32 %v6180_v9, %v16046_v18  ;;  %v16056_v9 = vld [vmem:[#allocation44_spill] sm:$0xff] }
 0xe13   :  { %12495 = vtanh.f32 %v6181_v49 }
 0xe1d   :  { %v12496_v48 = vpop.eup %12495 }
 0xe1e   :  { %v6184_v22 = vmul.f32 %v12496_v48, %v6183_v12 }
 0xe20   :  { %v15217_v55 = vadd.f32 %v6185_v50, %v6184_v22 }
 0xe22   :  { %6414 = vmatmul.mubr.f32.vlgmr.msra.gmra.mrb[94].mxu1 %v15217_v55  ;;  %9540 = vmatmul.mubr.f32.vlgmr.msra.gmra.mrb[112].mxu0 %v15217_v55 }
 0xe23   :  { %11651 = vmatpush1.bf16.msra.mxu0 %v14558_v47  ;;  %11682 = vmatpush3.bf16.msra.mxu1 %v14625_v33 }
 0xe24   :  { %11653 = vmatprep.subr.bf16.mxu0 %v14561_v1  ;;  %11683 = vmatprep.subr.bf16.mxu1 %v15844_v19 }
 0xe25   :  { %6575 = vmatprep.mubr.f32.mxu0 %v15845_v61  ;;  %9574 = vmatprep.mubr.msk.f32.mxu1 %vm12811_vm4, %v15845_v61 }
 0xe27   :  { %11655 = vmatpush1.bf16.msra.mxu0 %v14566_v3  ;;  %11685 = vmatpush3.bf16.msra.mxu1 %v14635_v31 }
 0xe28   :  { %11657 = vmatprep.subr.bf16.mxu0 %v14569_v46  ;;  %11686 = vmatprep.subr.bf16.mxu1 %v15844_v19 }
 0xe2b   :  { %11659 = vmatpush1.bf16.msra.mxu0 %v14574_v0  ;;  %11688 = vmatpush3.bf16.msra.mxu1 %v14647_v32 }
 0xe2c   :  { %11661 = vmatprep.subr.bf16.mxu0 %v14577_v2  ;;  %11689 = vmatprep.subr.bf16.mxu1 %v15844_v19 }
 0xe2f   :  { %11663 = vmatpush1.bf16.msra.mxu0 %v14582_v20  ;;  %11691 = vmatpush3.bf16.msra.mxu1 %v14657_v57 }
 0xe30   :  { %11665 = vmatprep.subr.bf16.mxu0 %v16004_v16  ;;  %11692 = vmatprep.subr.bf16.mxu1 %v15844_v19 }
 0xe33   :  { %11667 = vmatpush1.bf16.msra.mxu0 %v16005_v38  ;;  %11694 = vmatpush3.bf16.msra.mxu1 %v16006_v27 }
 0xe34   :  { %11669 = vmatprep.subr.bf16.mxu0 %v16047_v8  ;;  %11695 = vmatprep.subr.bf16.mxu1 %v15844_v19  ;;  %v16058_v8 = vld [vmem:[#allocation60_spill] sm:$0xff] }
 0xe37   :  { %11671 = vmatpush1.bf16.msra.mxu0 %v16048_v14  ;;  %11697 = vmatpush3.bf16.msra.mxu1 %v16049_v36 }
 0xe38   :  { %11673 = vmatprep.subr.bf16.mxu0 %v16050_v63  ;;  %11698 = vmatprep.subr.bf16.mxu1 %v15844_v19 }
 0xe3b   :  { %11675 = vmatpush1.bf16.msra.mxu0 %v16051_v29  ;;  %11700 = vmatpush3.bf16.msra.mxu1 %v16052_v35 }
 0xe3c   :  { %11677 = vmatprep.subr.bf16.mxu0 %v16053_v43  ;;  %11701 = vmatprep.subr.bf16.mxu1 %v15844_v19 }
 0xe3f   :  { %11679 = vmatpush1.bf16.msra.mxu0 %v16054_v37  ;;  %11703 = vmatpush3.bf16.msra.mxu1 %v16055_v21 }
 0xe40   :  { %11705 = vmatprep.subr.bf16.mxu1 %v16056_v9  ;;  %11736 = vmatprep.subr.bf16.mxu0 %v15844_v19 }
 0xebb   :  { %v6253_v18 = vpop.f32.mrb[80].mxu0  ;;  %v6324_v49 = vpop.f32.mrb[112].mxu1 }
 0xebc   :  { %v12129_v12 = vadd.f32 %v16057_v54, %v6253_v18  ;;  %v6255_v48 = vpop.f32.mrb[81].mxu0  ;;  %v9506_v22 = vpop.f32.mrb[113].mxu1  ;;  %v6325_v9 = vadd.f32 %v6324_v49, %v14883_v52 }
 0xebd   :  { %v12131_v35 = vadd.f32 %v16018_v30, %v6255_v48 }
 0xebe   :  { %v7736_v50 = vmul.f32 -1.442695, %v12129_v12 }
 0xebf   :  { %v7737_v43 = vmul.f32 -1.442695, %v12131_v35 }
 0xec0   :  { %12497 = vpow2.f32 %v7736_v50 }
 0xec1   :  { %12499 = vpow2.f32 %v7737_v43 }
 0xeca   :  { %v12498_v29 = vpop.eup %12497 }
 0xecb   :  { %v6336_v37 = vadd.f32 1.0, %v12498_v29  ;;  %v12500_v21 = vpop.eup %12499 }
 0xecc   :  { %v6337_v63 = vadd.f32 1.0, %v12500_v21 }
 0xecd   :  { %12501 = vrcp.f32 %v6336_v37 }
 0xece   :  { %12503 = vrcp.f32 %v6337_v63 }
 0xed7   :  { %v12502_v36 = vpop.eup %12501 }
 0xed8   :  { %v6342_v14 = vmul.f32 %v12502_v36, %v6325_v9  ;;  %v12504_v22 = vpop.eup %12503 }
 0xed9   :  { %v6345_v12 = vsub.f32 1.0, %v12504_v22  ;;  %v6347_v35 = vmul.f32 %v12504_v22, %v15173_v26 }
 0xeda   :  { %v6343_v18 = vadd.f32 %v6342_v14, %v16058_v8 }
 0xedc   :  { %12505 = vtanh.f32 %v6343_v18 }
 0xee6   :  { %v12506_v54 = vpop.eup %12505 }
 0xee7   :  { %v6346_v48 = vmul.f32 %v12506_v54, %v6345_v12 }
 0xee9   :  { %v15261_v43 = vadd.f32 %v6347_v35, %v6346_v48  ;;  %v16059_v48 = vld [vmem:[#allocation65_spill] sm:$0xff] }
 0xeeb   :  { %6576 = vmatmul.mubr.f32.vlgmr.msra.gmra.mrb[82].mxu0 %v15261_v43  ;;  %9575 = vmatmul.mubr.f32.vlgmr.msra.gmra.mrb[114].mxu1 %v15261_v43 }
 0xeec   :  { %11707 = vmatpush1.bf16.msra.mxu1 %v14710_v7  ;;  %11738 = vmatpush3.bf16.msra.mxu0 %v14627_v41 }
 0xeed   :  { %11709 = vmatprep.subr.bf16.mxu1 %v14714_v13  ;;  %11739 = vmatprep.subr.bf16.mxu0 %v15844_v19 }
 0xeee   :  { %6737 = vmatprep.mubr.f32.mxu1 %v15845_v61  ;;  %9609 = vmatprep.mubr.msk.f32.mxu0 %vm12811_vm4, %v15845_v61 }
 0xef0   :  { %11711 = vmatpush1.bf16.msra.mxu1 %v14725_v44  ;;  %11741 = vmatpush3.bf16.msra.mxu0 %v14638_v39 }
 0xef1   :  { %11713 = vmatprep.subr.bf16.mxu1 %v14729_v11  ;;  %11742 = vmatprep.subr.bf16.mxu0 %v15844_v19 }
 0xef4   :  { %11715 = vmatpush1.bf16.msra.mxu1 %v14735_v25  ;;  %11744 = vmatpush3.bf16.msra.mxu0 %v14650_v45 }
 0xef5   :  { %v6415_v26 = vpop.f32.mrb[94].mxu1  ;;  %v6486_v8 = vpop.f32.mrb[112].mxu0  ;;  %11717 = vmatprep.subr.bf16.mxu1 %v14738_v51  ;;  %11745 = vmatprep.subr.bf16.mxu0 %v15844_v19 }
 0xef6   :  { %v12157_v14 = vadd.f32 %v14915_v42, %v6415_v26  ;;  %v6417_v36 = vpop.f32.mrb[95].mxu1  ;;  %v9541_v63 = vpop.f32.mrb[113].mxu0  ;;  %v6487_v18 = vadd.f32 %v6486_v8, %v14946_v17  ;;  %v16061_v8 = vld [vmem:[#allocation39_spill] sm:$0xff] }
 0xef7   :  { %v12159_v37 = vadd.f32 %v14919_v60, %v6417_v36 }
 0xef8   :  { %v7738_v29 = vmul.f32 -1.442695, %v12157_v14  ;;  %11719 = vmatpush1.bf16.msra.mxu1 %v14743_v34  ;;  %11747 = vmatpush3.bf16.msra.mxu0 %v14660_v24 }
 0xef9   :  { %11721 = vmatprep.subr.bf16.mxu1 %v14746_v28  ;;  %11748 = vmatprep.subr.bf16.mxu0 %v15844_v19  ;;  %v7739_v21 = vmul.f32 -1.442695, %v12159_v37 }
 0xefa   :  { %12507 = vpow2.f32 %v7738_v29 }
 0xefb   :  { %12509 = vpow2.f32 %v7739_v21  ;;  %v16062_v21 = vld [vmem:[#allocation42_spill] sm:$0xff] }
 0xefc   :  { %11723 = vmatpush1.bf16.msra.mxu1 %v14751_v4  ;;  %11750 = vmatpush3.bf16.msra.mxu0 %v14670_v59 }
 0xefd   :  { %11725 = vmatprep.subr.bf16.mxu1 %v14754_v23  ;;  %11751 = vmatprep.subr.bf16.mxu0 %v15844_v19 }
 0xf00   :  { %11727 = vmatpush1.bf16.msra.mxu1 %v14759_v5  ;;  %11753 = vmatpush3.bf16.msra.mxu0 %v14680_v58 }
 0xf01   :  { %11729 = vmatprep.subr.bf16.mxu1 %v14762_v6  ;;  %11754 = vmatprep.subr.bf16.mxu0 %v15844_v19 }
 0xf04   :  { %v12508_v9 = vpop.eup %12507  ;;  %11731 = vmatpush1.bf16.msra.mxu1 %v14767_v56  ;;  %11756 = vmatpush3.bf16.msra.mxu0 %v14690_v53 }
 0xf05   :  { %v6498_v49 = vadd.f32 1.0, %v12508_v9  ;;  %11733 = vmatprep.subr.bf16.mxu1 %v14770_v10  ;;  %11757 = vmatprep.subr.bf16.mxu0 %v15844_v19  ;;  %v12510_v54 = vpop.eup %12509  ;;  %v16063_v9 = vld [vmem:[#allocation25_spill] sm:$0xff] }
 0xf06   :  { %v6499_v50 = vadd.f32 1.0, %v12510_v54  ;;  %v16065_v54 = vld [vmem:[#allocation29_spill] sm:$0xff] }
 0xf07   :  { %12511 = vrcp.f32 %v6498_v49  ;;  %v16064_v49 = vld [vmem:[#allocation26_spill] sm:$0xff] }
 0xf08   :  { %11735 = vmatpush1.bf16.msra.mxu1 %v14775_v15  ;;  %11759 = vmatpush3.bf16.msra.mxu0 %v14700_v62  ;;  %12513 = vrcp.f32 %v6499_v50  ;;  %v16066_v50 = vld [vmem:[#allocation40_spill] sm:$0xff] }
 0xf09   :  { %11761 = vmatprep.subr.bf16.mxu0 %v14552_v40  ;;  %11792 = vmatprep.subr.bf16.mxu1 %v15844_v19 }
 0xf11   :  { %v12512_v22 = vpop.eup %12511 }
 0xf12   :  { %v6504_v12 = vmul.f32 %v12512_v22, %v6487_v18  ;;  %v12514_v26 = vpop.eup %12513  ;;  %v16067_v18 = vld [vmem:[#allocation27_spill] sm:$0xff]  ;;  %v16068_v22 = vld [vmem:[#allocation30_spill] sm:$0xff] }
 0xf13   :  { %v6507_v14 = vsub.f32 1.0, %v12514_v26  ;;  %v6509_v29 = vmul.f32 %v12514_v26, %v15217_v55  ;;  %v16060_v55 = vld [vmem:[#allocation24_spill] sm:$0xff]  ;;  %v16070_v26 = vld [vmem:[#allocation69_spill] sm:$0xff] }
 0xf14   :  { %v6505_v35 = vadd.f32 %v6504_v12, %v16059_v48  ;;  %v16069_v12 = vld [vmem:[#allocation44_spill] sm:$0xff] }
 0xf16   :  { %12515 = vtanh.f32 %v6505_v35 }
 0xf20   :  { %v12516_v36 = vpop.eup %12515 }
 0xf21   :  { %v6508_v63 = vmul.f32 %v12516_v36, %v6507_v14 }
 0xf23   :  { %v15305_v37 = vadd.f32 %v6509_v29, %v6508_v63 }
 0xf25   :  { %6738 = vmatmul.mubr.f32.vlgmr.msra.gmra.mrb[92].mxu1 %v15305_v37  ;;  %9610 = vmatmul.mubr.f32.vlgmr.msra.gmra.mrb[114].mxu0 %v15305_v37 }
 0xf26   :  { %11763 = vmatpush1.bf16.msra.mxu0 %v14558_v47  ;;  %11794 = vmatpush3.bf16.msra.mxu1 %v14625_v33 }
 0xf27   :  { %11765 = vmatprep.subr.bf16.mxu0 %v14561_v1  ;;  %11795 = vmatprep.subr.bf16.mxu1 %v15844_v19 }
 0xf28   :  { %6899 = vmatprep.mubr.f32.mxu0 %v15845_v61  ;;  %9644 = vmatprep.mubr.msk.f32.mxu1 %vm12811_vm4, %v15845_v61 }
 0xf2a   :  { %11767 = vmatpush1.bf16.msra.mxu0 %v14566_v3  ;;  %11797 = vmatpush3.bf16.msra.mxu1 %v14635_v31 }
 0xf2b   :  { %11769 = vmatprep.subr.bf16.mxu0 %v14569_v46  ;;  %11798 = vmatprep.subr.bf16.mxu1 %v15844_v19 }
 0xf2e   :  { %11771 = vmatpush1.bf16.msra.mxu0 %v14574_v0  ;;  %11800 = vmatpush3.bf16.msra.mxu1 %v14647_v32 }
 0xf2f   :  { %11773 = vmatprep.subr.bf16.mxu0 %v14577_v2  ;;  %11801 = vmatprep.subr.bf16.mxu1 %v15844_v19 }
 0xf32   :  { %11775 = vmatpush1.bf16.msra.mxu0 %v14582_v20  ;;  %11803 = vmatpush3.bf16.msra.mxu1 %v14657_v57 }
 0xf33   :  { %11777 = vmatprep.subr.bf16.mxu0 %v16004_v16  ;;  %11804 = vmatprep.subr.bf16.mxu1 %v15844_v19 }
 0xf36   :  { %11779 = vmatpush1.bf16.msra.mxu0 %v16005_v38  ;;  %11806 = vmatpush3.bf16.msra.mxu1 %v16006_v27 }
 0xf37   :  { %11781 = vmatprep.subr.bf16.mxu0 %v16060_v55  ;;  %11807 = vmatprep.subr.bf16.mxu1 %v15844_v19  ;;  %v16071_v55 = vld [vmem:[#allocation46_spill] sm:$0xff] }
 0xf3a   :  { %11783 = vmatpush1.bf16.msra.mxu0 %v16061_v8  ;;  %11809 = vmatpush3.bf16.msra.mxu1 %v16062_v21 }
 0xf3b   :  { %11785 = vmatprep.subr.bf16.mxu0 %v16063_v9  ;;  %11810 = vmatprep.subr.bf16.mxu1 %v15844_v19 }
 0xf3e   :  { %11787 = vmatpush1.bf16.msra.mxu0 %v16064_v49  ;;  %11812 = vmatpush3.bf16.msra.mxu1 %v16065_v54 }
 0xf3f   :  { %11789 = vmatprep.subr.bf16.mxu0 %v16066_v50  ;;  %11813 = vmatprep.subr.bf16.mxu1 %v15844_v19 }
 0xf42   :  { %11791 = vmatpush1.bf16.msra.mxu0 %v16067_v18  ;;  %11815 = vmatpush3.bf16.msra.mxu1 %v16068_v22 }
 0xf43   :  { %11817 = vmatprep.subr.bf16.mxu1 %v16069_v12  ;;  %11848 = vmatprep.subr.bf16.mxu0 %v15844_v19 }
 0xfbe   :  { %v6577_v48 = vpop.f32.mrb[82].mxu0  ;;  %v6648_v35 = vpop.f32.mrb[114].mxu1 }
 0xfbf   :  { %v12133_v14 = vadd.f32 %v16070_v26, %v6577_v48  ;;  %v6579_v36 = vpop.f32.mrb[83].mxu0  ;;  %v9576_v63 = vpop.f32.mrb[115].mxu1  ;;  %v6649_v12 = vadd.f32 %v6648_v35, %v14883_v52 }
 0xfc0   :  { %v12135_v54 = vadd.f32 %v16018_v30, %v6579_v36 }
 0xfc1   :  { %v7740_v29 = vmul.f32 -1.442695, %v12133_v14 }
 0xfc2   :  { %v7741_v50 = vmul.f32 -1.442695, %v12135_v54 }
 0xfc3   :  { %12517 = vpow2.f32 %v7740_v29 }
 0xfc4   :  { %12519 = vpow2.f32 %v7741_v50 }
 0xfcd   :  { %v12518_v49 = vpop.eup %12517 }
 0xfce   :  { %v6660_v18 = vadd.f32 1.0, %v12518_v49  ;;  %v12520_v22 = vpop.eup %12519 }
 0xfcf   :  { %v6661_v9 = vadd.f32 1.0, %v12520_v22 }
 0xfd0   :  { %12521 = vrcp.f32 %v6660_v18 }
 0xfd1   :  { %12523 = vrcp.f32 %v6661_v9 }
 0xfda   :  { %v12522_v21 = vpop.eup %12521 }
 0xfdb   :  { %v6666_v8 = vmul.f32 %v12522_v21, %v6649_v12  ;;  %v12524_v63 = vpop.eup %12523 }
 0xfdc   :  { %v6669_v14 = vsub.f32 1.0, %v12524_v63  ;;  %v6671_v54 = vmul.f32 %v12524_v63, %v15261_v43 }
 0xfdd   :  { %v6667_v48 = vadd.f32 %v6666_v8, %v16071_v55 }
 0xfdf   :  { %12525 = vtanh.f32 %v6667_v48 }
 0xfe9   :  { %v12526_v26 = vpop.eup %12525 }
 0xfea   :  { %v6670_v36 = vmul.f32 %v12526_v26, %v6669_v14 }
 0xfec   :  { %v15349_v50 = vadd.f32 %v6671_v54, %v6670_v36  ;;  %v16072_v36 = vld [vmem:[#allocation63_spill] sm:$0xff] }
 0xfee   :  { %6900 = vmatmul.mubr.f32.vlgmr.msra.gmra.mrb[84].mxu0 %v15349_v50  ;;  %9645 = vmatmul.mubr.f32.vlgmr.msra.gmra.mrb[116].mxu1 %v15349_v50 }
 0xfef   :  { %11819 = vmatpush1.bf16.msra.mxu1 %v14710_v7  ;;  %11850 = vmatpush3.bf16.msra.mxu0 %v14627_v41 }
 0xff0   :  { %11821 = vmatprep.subr.bf16.mxu1 %v14714_v13  ;;  %11851 = vmatprep.subr.bf16.mxu0 %v15844_v19 }
 0xff1   :  { %7061 = vmatprep.mubr.f32.mxu1 %v15845_v61  ;;  %9679 = vmatprep.mubr.msk.f32.mxu0 %vm12811_vm4, %v15845_v61 }
 0xff3   :  { %11823 = vmatpush1.bf16.msra.mxu1 %v14725_v44  ;;  %11853 = vmatpush3.bf16.msra.mxu0 %v14638_v39 }
 0xff4   :  { %11825 = vmatprep.subr.bf16.mxu1 %v14729_v11  ;;  %11854 = vmatprep.subr.bf16.mxu0 %v15844_v19 }
 0xff7   :  { %11827 = vmatpush1.bf16.msra.mxu1 %v14735_v25  ;;  %11856 = vmatpush3.bf16.msra.mxu0 %v14650_v45 }
 0xff8   :  { %v6739_v43 = vpop.f32.mrb[92].mxu1  ;;  %v6810_v55 = vpop.f32.mrb[114].mxu0  ;;  %11829 = vmatprep.subr.bf16.mxu1 %v14738_v51  ;;  %11857 = vmatprep.subr.bf16.mxu0 %v15844_v19 }
 0xff9   :  { %v12153_v8 = vadd.f32 %v14915_v42, %v6739_v43  ;;  %v6741_v21 = vpop.f32.mrb[93].mxu1  ;;  %v9611_v9 = vpop.f32.mrb[115].mxu0  ;;  %v6811_v48 = vadd.f32 %v6810_v55, %v14946_v17 }
 0xffa   :  { %v12155_v18 = vadd.f32 %v14919_v60, %v6741_v21 }
 0xffb   :  { %v7742_v49 = vmul.f32 -1.442695, %v12153_v8  ;;  %11831 = vmatpush1.bf16.msra.mxu1 %v14743_v34  ;;  %11859 = vmatpush3.bf16.msra.mxu0 %v14660_v24 }
 0xffc   :  { %11833 = vmatprep.subr.bf16.mxu1 %v14746_v28  ;;  %11860 = vmatprep.subr.bf16.mxu0 %v15844_v19  ;;  %v7743_v22 = vmul.f32 -1.442695, %v12155_v18 }
 0xffd   :  { %12527 = vpow2.f32 %v7742_v49 }
 0xffe   :  { %12529 = vpow2.f32 %v7743_v22 }
 0xfff   :  { %11835 = vmatpush1.bf16.msra.mxu1 %v14751_v4  ;;  %11862 = vmatpush3.bf16.msra.mxu0 %v14670_v59 }
0x1000   :  { %11837 = vmatprep.subr.bf16.mxu1 %v14754_v23  ;;  %11863 = vmatprep.subr.bf16.mxu0 %v15844_v19 }
0x1003   :  { %11839 = vmatpush1.bf16.msra.mxu1 %v14759_v5  ;;  %11865 = vmatpush3.bf16.msra.mxu0 %v14680_v58 }
0x1004   :  { %11841 = vmatprep.subr.bf16.mxu1 %v14762_v6  ;;  %11866 = vmatprep.subr.bf16.mxu0 %v15844_v19 }
0x1007   :  { %v12528_v12 = vpop.eup %12527  ;;  %11843 = vmatpush1.bf16.msra.mxu1 %v14767_v56  ;;  %11868 = vmatpush3.bf16.msra.mxu0 %v14690_v53 }
0x1008   :  { %v6822_v35 = vadd.f32 1.0, %v12528_v12  ;;  %11845 = vmatprep.subr.bf16.mxu1 %v14770_v10  ;;  %11869 = vmatprep.subr.bf16.mxu0 %v15844_v19  ;;  %v12530_v26 = vpop.eup %12529 }
0x1009   :  { %v6823_v29 = vadd.f32 1.0, %v12530_v26 }
0x100a   :  { %12531 = vrcp.f32 %v6822_v35 }
0x100b   :  { %11847 = vmatpush1.bf16.msra.mxu1 %v14775_v15  ;;  %11871 = vmatpush3.bf16.msra.mxu0 %v14700_v62  ;;  %12533 = vrcp.f32 %v6823_v29 }
0x100c   :  { %11873 = vmatprep.subr.bf16.mxu0 %v14552_v40  ;;  %11904 = vmatprep.subr.bf16.mxu1 %v15844_v19  ;;  %v16073_v40 = vld [vmem:[#allocation24_spill] sm:$0xff] }
0x1014   :  { %v12532_v63 = vpop.eup %12531 }
0x1015   :  { %v6828_v14 = vmul.f32 %v12532_v63, %v6811_v48  ;;  %v12534_v43 = vpop.eup %12533 }
0x1016   :  { %v6831_v8 = vsub.f32 1.0, %v12534_v43  ;;  %v6833_v49 = vmul.f32 %v12534_v43, %v15305_v37 }
0x1017   :  { %v6829_v54 = vadd.f32 %v6828_v14, %v16072_v36 }
0x1019   :  { %12535 = vtanh.f32 %v6829_v54  ;;  %v16084_v54 = vld [vmem:[#allocation61_spill] sm:$0xff] }
0x1023   :  { %v12536_v21 = vpop.eup %12535 }
0x1024   :  { %v6832_v9 = vmul.f32 %v12536_v21, %v6831_v8 }
0x1026   :  { %v15393_v18 = vadd.f32 %v6833_v49, %v6832_v9 }
0x1028   :  { %7062 = vmatmul.mubr.f32.vlgmr.msra.gmra.mrb[90].mxu1 %v15393_v18  ;;  %9680 = vmatmul.mubr.f32.vlgmr.msra.gmra.mrb[116].mxu0 %v15393_v18 }
0x1029   :  { %11875 = vmatpush1.bf16.msra.mxu0 %v14558_v47  ;;  %11906 = vmatpush3.bf16.msra.mxu1 %v14625_v33  ;;  %v16074_v47 = vld [vmem:[#allocation39_spill] sm:$0xff]  ;;  %v16081_v33 = vld [vmem:[#allocation30_spill] sm:$0xff] }
0x102a   :  { %11877 = vmatprep.subr.bf16.mxu0 %v14561_v1  ;;  %11907 = vmatprep.subr.bf16.mxu1 %v15844_v19  ;;  %v16075_v1 = vld [vmem:[#allocation42_spill] sm:$0xff] }
0x102b   :  { %7223 = vmatprep.mubr.f32.mxu0 %v15845_v61  ;;  %9714 = vmatprep.mubr.msk.f32.mxu1 %vm12811_vm4, %v15845_v61 }
0x102d   :  { %11879 = vmatpush1.bf16.msra.mxu0 %v14566_v3  ;;  %11909 = vmatpush3.bf16.msra.mxu1 %v14635_v31  ;;  %v16076_v3 = vld [vmem:[#allocation25_spill] sm:$0xff]  ;;  %v16082_v31 = vld [vmem:[#allocation44_spill] sm:$0xff] }
0x102e   :  { %11881 = vmatprep.subr.bf16.mxu0 %v14569_v46  ;;  %11910 = vmatprep.subr.bf16.mxu1 %v15844_v19  ;;  %v16077_v46 = vld [vmem:[#allocation26_spill] sm:$0xff] }
0x1031   :  { %11883 = vmatpush1.bf16.msra.mxu0 %v14574_v0  ;;  %11912 = vmatpush3.bf16.msra.mxu1 %v14647_v32  ;;  %v16078_v0 = vld [vmem:[#allocation29_spill] sm:$0xff] }
0x1032   :  { %11885 = vmatprep.subr.bf16.mxu0 %v14577_v2  ;;  %11913 = vmatprep.subr.bf16.mxu1 %v15844_v19  ;;  %v16079_v2 = vld [vmem:[#allocation40_spill] sm:$0xff] }
0x1035   :  { %11887 = vmatpush1.bf16.msra.mxu0 %v14582_v20  ;;  %11915 = vmatpush3.bf16.msra.mxu1 %v14657_v57  ;;  %v16080_v20 = vld [vmem:[#allocation27_spill] sm:$0xff] }
0x1036   :  { %11889 = vmatprep.subr.bf16.mxu0 %v16004_v16  ;;  %11916 = vmatprep.subr.bf16.mxu1 %v15844_v19  ;;  %v16083_v16 = vld [vmem:[#allocation69_spill] sm:$0xff] }
0x1039   :  { %11891 = vmatpush1.bf16.msra.mxu0 %v16005_v38  ;;  %11918 = vmatpush3.bf16.msra.mxu1 %v16006_v27 }
0x103a   :  { %11893 = vmatprep.subr.bf16.mxu0 %v16073_v40  ;;  %11919 = vmatprep.subr.bf16.mxu1 %v15844_v19 }
0x103d   :  { %11895 = vmatpush1.bf16.msra.mxu0 %v16074_v47  ;;  %11921 = vmatpush3.bf16.msra.mxu1 %v16075_v1  ;;  %v7506_v1 = vld [vmem:[%s15637_s18 + $0x88] sm:$0xff] }
0x103e   :  { %11897 = vmatprep.subr.bf16.mxu0 %v16076_v3  ;;  %11922 = vmatprep.subr.bf16.mxu1 %v15844_v19 }
0x1041   :  { %11899 = vmatpush1.bf16.msra.mxu0 %v16077_v46  ;;  %11924 = vmatpush3.bf16.msra.mxu1 %v16078_v0  ;;  %v7490_v46 = vld [vmem:[%s15637_s18 + $0x8] sm:$0xff] }
0x1042   :  { %11901 = vmatprep.subr.bf16.mxu0 %v16079_v2  ;;  %11925 = vmatprep.subr.bf16.mxu1 %v15844_v19  ;;  %v7507_v2 = vld [vmem:[%s15637_s18 + $0x90] sm:$0xff] }
0x1045   :  { %11903 = vmatpush1.bf16.msra.mxu0 %v16080_v20  ;;  %11927 = vmatpush3.bf16.msra.mxu1 %v16081_v33  ;;  %v7508_v20 = vld [vmem:[%s15637_s18 + $0x98] sm:$0xff] }
0x1046   :  { %11929 = vmatprep.subr.bf16.mxu1 %v16082_v31  ;;  %11960 = vmatprep.subr.bf16.mxu0 %v15844_v19  ;;  %v11988_v33 = vpack.c.bf16 %v7508_v20, %v7507_v2  ;;  %v7491_v31 = vld [vmem:[%s15637_s18 + $0x10] sm:$0xff]  ;;  %v16087_v20 = vld [vmem:[#allocation62_spill] sm:$0xff] }
0x10c1   :  { %v6901_v32 = vpop.f32.mrb[84].mxu0  ;;  %v6972_v57 = vpop.f32.mrb[116].mxu1 }
0x10c2   :  { %v12137_v38 = vadd.f32 %v16083_v16, %v6901_v32  ;;  %v6903_v27 = vpop.f32.mrb[85].mxu0  ;;  %v9646_v37 = vpop.f32.mrb[117].mxu1  ;;  %v6973_v63 = vadd.f32 %v6972_v57, %v14883_v52  ;;  %v7492_v32 = vld [vmem:[%s15637_s18 + $0x18] sm:$0xff] }
0x10c3   :  { %v12139_v22 = vadd.f32 %v16018_v30, %v6903_v27  ;;  %v11990_v57 = vpack.c.bf16 %v7492_v32, %v7491_v31  ;;  %v7510_v27 = vld [vmem:[%s15637_s18 + $0xa8] sm:$0xff] }
0x10c4   :  { %v7744_v55 = vmul.f32 -1.442695, %v12137_v38  ;;  %v7509_v38 = vld [vmem:[%s15637_s18 + $0xa0] sm:$0xff] }
0x10c5   :  { %v7745_v12 = vmul.f32 -1.442695, %v12139_v22  ;;  %v11992_v37 = vpack.c.bf16 %v7510_v27, %v7509_v38  ;;  %v7494_v22 = vld [vmem:[%s15637_s18 + $0x28] sm:$0xff] }
0x10c6   :  { %12537 = vpow2.f32 %v7744_v55  ;;  %v7493_v55 = vld [vmem:[%s15637_s18 + $0x20] sm:$0xff] }
0x10c7   :  { %12539 = vpow2.f32 %v7745_v12  ;;  %v11994_v12 = vpack.c.bf16 %v7494_v22, %v7493_v55 }
0x10d0   :  { %v12538_v35 = vpop.eup %12537 }
0x10d1   :  { %v6984_v26 = vadd.f32 1.0, %v12538_v35  ;;  %v12540_v29 = vpop.eup %12539  ;;  %v7511_v35 = vld [vmem:[%s15637_s18 + $0xb0] sm:$0xff] }
0x10d2   :  { %v6985_v48 = vadd.f32 1.0, %v12540_v29 }
0x10d3   :  { %12541 = vrcp.f32 %v6984_v26  ;;  %v7512_v26 = vld [vmem:[%s15637_s18 + $0xb8] sm:$0xff] }
0x10d4   :  { %12543 = vrcp.f32 %v6985_v48  ;;  %v11996_v29 = vpack.c.bf16 %v7512_v26, %v7511_v35  ;;  %v7495_v48 = vld [vmem:[%s15637_s18 + $0x30] sm:$0xff] }
0x10dd   :  { %v12542_v14 = vpop.eup %12541 }
0x10de   :  { %v6990_v36 = vmul.f32 %v12542_v14, %v6973_v63  ;;  %v12544_v8 = vpop.eup %12543  ;;  %v7496_v63 = vld [vmem:[%s15637_s18 + $0x38] sm:$0xff] }
0x10df   :  { %v6993_v21 = vsub.f32 1.0, %v12544_v8  ;;  %v6995_v40 = vmul.f32 %v12544_v8, %v15349_v50  ;;  %v11998_v14 = vpack.c.bf16 %v7496_v63, %v7495_v48  ;;  %v7497_v8 = vld [vmem:[%s15637_s18 + $0x40] sm:$0xff] }
0x10e0   :  { %v6991_v43 = vadd.f32 %v6990_v36, %v16084_v54  ;;  %v7513_v36 = vld [vmem:[%s15637_s18 + $0xc0] sm:$0xff]  ;;  %v7514_v54 = vld [vmem:[%s15637_s18 + $0xc8] sm:$0xff] }
0x10e2   :  { %12545 = vtanh.f32 %v6991_v43  ;;  %v12000_v43 = vpack.c.bf16 %v7514_v54, %v7513_v36 }
0x10ec   :  { %v12546_v9 = vpop.eup %12545 }
0x10ed   :  { %v6994_v49 = vmul.f32 %v12546_v9, %v6993_v21  ;;  %v7498_v21 = vld [vmem:[%s15637_s18 + $0x48] sm:$0xff] }
0x10ee   :  { %v12002_v9 = vpack.c.bf16 %v7498_v21, %v7497_v8  ;;  %v16088_v8 = vld [vmem:[#allocation66_spill] sm:$0xff] }
0x10ef   :  { %v15437_v47 = vadd.f32 %v6995_v40, %v6994_v49  ;;  %v7515_v49 = vld [vmem:[%s15637_s18 + $0xd0] sm:$0xff]  ;;  %v7516_v40 = vld [vmem:[%s15637_s18 + $0xd8] sm:$0xff] }
0x10f1   :  { %7224 = vmatmul.mubr.f32.vlgmr.msra.gmra.mrb[86].mxu0 %v15437_v47  ;;  %9715 = vmatmul.mubr.f32.vlgmr.msra.gmra.mrb[118].mxu1 %v15437_v47 }
0x10f2   :  { %11931 = vmatpush1.bf16.msra.mxu1 %v14710_v7  ;;  %11962 = vmatpush3.bf16.msra.mxu0 %v14627_v41 }
0x10f3   :  { %11933 = vmatprep.subr.bf16.mxu1 %v14714_v13  ;;  %11963 = vmatprep.subr.bf16.mxu0 %v15844_v19 }
0x10f4   :  { %7385 = vmatprep.mubr.f32.mxu1 %v15845_v61  ;;  %9749 = vmatprep.mubr.msk.f32.mxu0 %vm12811_vm4, %v15845_v61 }
0x10f6   :  { %11935 = vmatpush1.bf16.msra.mxu1 %v14725_v44  ;;  %11965 = vmatpush3.bf16.msra.mxu0 %v14638_v39 }
0x10f7   :  { %11937 = vmatprep.subr.bf16.mxu1 %v14729_v11  ;;  %11966 = vmatprep.subr.bf16.mxu0 %v15844_v19 }
0x10fa   :  { %11939 = vmatpush1.bf16.msra.mxu1 %v14735_v25  ;;  %11968 = vmatpush3.bf16.msra.mxu0 %v14650_v45 }
0x10fb   :  { %v7063_v41 = vpop.f32.mrb[90].mxu1  ;;  %v7134_v7 = vpop.f32.mrb[116].mxu0  ;;  %11941 = vmatprep.subr.bf16.mxu1 %v14738_v51  ;;  %11969 = vmatprep.subr.bf16.mxu0 %v15844_v19 }
0x10fc   :  { %v12149_v61 = vadd.f32 %v14915_v42, %v7063_v41  ;;  %v7065_v13 = vpop.f32.mrb[91].mxu1  ;;  %v9681_v44 = vpop.f32.mrb[117].mxu0  ;;  %v7135_v25 = vadd.f32 %v7134_v7, %v14946_v17  ;;  %v7499_v41 = vld [vmem:[%s15637_s18 + $0x50] sm:$0xff]  ;;  %v12004_v7 = vpack.c.bf16 %v7516_v40, %v7515_v49 }
0x10fd   :  { %v12151_v39 = vadd.f32 %v14919_v60, %v7065_v13  ;;  %v7517_v13 = vld [vmem:[%s15637_s18 + $0xe0] sm:$0xff]  ;;  %v7518_v44 = vld [vmem:[%s15637_s18 + $0xe8] sm:$0xff] }
0x10fe   :  { %v7746_v50 = vmul.f32 -1.442695, %v12149_v61  ;;  %11943 = vmatpush1.bf16.msra.mxu1 %v14743_v34  ;;  %11971 = vmatpush3.bf16.msra.mxu0 %v14660_v24  ;;  %v7500_v61 = vld [vmem:[%s15637_s18 + $0x58] sm:$0xff] }
0x10ff   :  { %11945 = vmatprep.subr.bf16.mxu1 %v14746_v28  ;;  %11972 = vmatprep.subr.bf16.mxu0 %v15844_v19  ;;  %v7747_v45 = vmul.f32 -1.442695, %v12151_v39  ;;  %v16085_v28 = vld [vmem:[#allocation83_spill] sm:$0xff]  ;;  %v12008_v39 = vpack.c.bf16 %v7518_v44, %v7517_v13 }
0x1100   :  { %12547 = vpow2.f32 %v7746_v50  ;;  %v12006_v50 = vpack.c.bf16 %v7500_v61, %v7499_v41 }
0x1101   :  { %12549 = vpow2.f32 %v7747_v45  ;;  %v7501_v45 = vld [vmem:[%s15637_s18 + $0x60] sm:$0xff] }
0x1102   :  { %11947 = vmatpush1.bf16.msra.mxu1 %v14751_v4  ;;  %11974 = vmatpush3.bf16.msra.mxu0 %v14670_v59 }
0x1103   :  { %11949 = vmatprep.subr.bf16.mxu1 %v14754_v23  ;;  %11975 = vmatprep.subr.bf16.mxu0 %v15844_v19 }
0x1106   :  { %11951 = vmatpush1.bf16.msra.mxu1 %v14759_v5  ;;  %11977 = vmatpush3.bf16.msra.mxu0 %v14680_v58 }
0x1107   :  { %11953 = vmatprep.subr.bf16.mxu1 %v14762_v6  ;;  %11978 = vmatprep.subr.bf16.mxu0 %v15844_v19 }
0x110a   :  { %v12548_v24 = vpop.eup %12547  ;;  %11955 = vmatpush1.bf16.msra.mxu1 %v14767_v56  ;;  %11980 = vmatpush3.bf16.msra.mxu0 %v14690_v53 }
0x110b   :  { %v7146_v59 = vadd.f32 1.0, %v12548_v24  ;;  %11957 = vmatprep.subr.bf16.mxu1 %v14770_v10  ;;  %11981 = vmatprep.subr.bf16.mxu0 %v15844_v19  ;;  %v12550_v58 = vpop.eup %12549  ;;  %v16086_v10 = vld [vmem:[#allocation81_spill] sm:$0xff]  ;;  %v7502_v24 = vld [vmem:[%s15637_s18 + $0x68] sm:$0xff] }
0x110c   :  { %v7147_v11 = vadd.f32 1.0, %v12550_v58  ;;  %v7520_v58 = vld [vmem:[%s15637_s18 + $0xf8] sm:$0xff] }
0x110d   :  { %12551 = vrcp.f32 %v7146_v59  ;;  %v7519_v59 = vld [vmem:[%s15637_s18 + $0xf0] sm:$0xff] }
0x110e   :  { %11959 = vmatpush1.bf16.msra.mxu1 %v14775_v15  ;;  %11983 = vmatpush3.bf16.msra.mxu0 %v14700_v62  ;;  %12553 = vrcp.f32 %v7147_v11  ;;  %v7488_v62 = vmax.f32 %v16086_v10, 0.0  ;;  %v7505_v15 = vld [vmem:[%s15637_s18 + $0x80] sm:$0xff]  ;;  %v12010_v11 = vpack.c.bf16 %v7502_v24, %v7501_v45 }
0x110f   :  { %v11984_v3 = vpack.c.bf16 %v7506_v1, %v7505_v15 }
0x1111   :  { %11985 = vmatprep.subr.bf16.mxu0 %v11984_v3 }
0x1117   :  { %v12552_v51 = vpop.eup %12551 }
0x1118   :  { %v7152_v34 = vmul.f32 %v12552_v51, %v7135_v25  ;;  %v12554_v53 = vpop.eup %12553  ;;  %v12012_v25 = vpack.c.bf16 %v7520_v58, %v7519_v59  ;;  %v7503_v51 = vld [vmem:[%s15637_s18 + $0x70] sm:$0xff] }
0x1119   :  { %v7155_v23 = vsub.f32 1.0, %v12554_v53  ;;  %v7157_v19 = vmul.f32 %v12554_v53, %v15393_v18  ;;  %v7489_v18 = vld [vmem:[%s15637_s18] sm:$0xff] }
0x111a   :  { %v7153_v4 = vadd.f32 %v7152_v34, %v16085_v28  ;;  %v11986_v0 = vpack.c.bf16 %v7490_v46, %v7489_v18  ;;  %v7504_v34 = vld [vmem:[%s15637_s18 + $0x78] sm:$0xff] }
0x111b   :  { %v12014_v28 = vpack.c.bf16 %v7504_v34, %v7503_v51 }
0x111c   :  { %12555 = vtanh.f32 %v7153_v4 }
0x1126   :  { %v12556_v5 = vpop.eup %12555 }
0x1127   :  { %v7156_v6 = vmul.f32 %v12556_v5, %v7155_v23 }
0x1129   :  { %v15479_v56 = vadd.f32 %v7157_v19, %v7156_v6 }
0x112b   :  { %7386 = vmatmul.mubr.f32.vlgmr.msra.gmra.mrb[88].mxu1 %v15479_v56  ;;  %9750 = vmatmul.mubr.f32.vlgmr.msra.gmra.mrb[118].mxu0 %v15479_v56 }
0x112c   :  { %7592 = vmatprep.mubr.f32.mxu0 %v7488_v62  ;;  %11987 = vmatpush3.bf16.msra.mxu0 %v11986_v0 }
0x112d   :  { %11989 = vmatprep.subr.bf16.mxu0 %v11988_v33 }
0x1130   :  { %11991 = vmatpush3.bf16.msra.mxu0 %v11990_v57 }
0x1131   :  { %11993 = vmatprep.subr.bf16.mxu0 %v11992_v37 }
0x1134   :  { %11995 = vmatpush3.bf16.msra.mxu0 %v11994_v12 }
0x1135   :  { %11997 = vmatprep.subr.bf16.mxu0 %v11996_v29 }
0x1138   :  { %11999 = vmatpush3.bf16.msra.mxu0 %v11998_v14 }
0x1139   :  { %12001 = vmatprep.subr.bf16.mxu0 %v12000_v43 }
0x113c   :  { %12003 = vmatpush3.bf16.msra.mxu0 %v12002_v9 }
0x113d   :  { %12005 = vmatprep.subr.bf16.mxu0 %v12004_v7 }
0x1140   :  { %12007 = vmatpush3.bf16.msra.mxu0 %v12006_v50 }
0x1141   :  { %12009 = vmatprep.subr.bf16.mxu0 %v12008_v39 }
0x1144   :  { %12011 = vmatpush3.bf16.msra.mxu0 %v12010_v11 }
0x1145   :  { %12013 = vmatprep.subr.bf16.mxu0 %v12012_v25 }
0x1148   :  { %12015 = vmatpush3.bf16.msra.mxu0 %v12014_v28 }
0x11c4   :  { %v7225_v4 = vpop.f32.mrb[86].mxu0  ;;  %v7296_v53 = vpop.f32.mrb[118].mxu1 }
0x11c5   :  { %v12141_v23 = vadd.f32 %v16083_v16, %v7225_v4  ;;  %v7227_v5 = vpop.f32.mrb[87].mxu0  ;;  %v9716_v6 = vpop.f32.mrb[119].mxu1  ;;  %v7297_v46 = vadd.f32 %v7296_v53, %v14883_v52 }
0x11c6   :  { %v12143_v10 = vadd.f32 %v16018_v30, %v7227_v5 }
0x11c7   :  { %v7748_v19 = vmul.f32 -1.442695, %v12141_v23 }
0x11c8   :  { %v7749_v62 = vmul.f32 -1.442695, %v12143_v10 }
0x11c9   :  { %12557 = vpow2.f32 %v7748_v19 }
0x11ca   :  { %12559 = vpow2.f32 %v7749_v62 }
0x11d3   :  { %v12558_v15 = vpop.eup %12557 }
0x11d4   :  { %v7308_v1 = vadd.f32 1.0, %v12558_v15  ;;  %v12560_v3 = vpop.eup %12559 }
0x11d5   :  { %v7309_v18 = vadd.f32 1.0, %v12560_v3 }
0x11d6   :  { %12561 = vrcp.f32 %v7308_v1 }
0x11d7   :  { %12563 = vrcp.f32 %v7309_v18 }
0x11e0   :  { %v12562_v0 = vpop.eup %12561 }
0x11e1   :  { %v7314_v2 = vmul.f32 %v12562_v0, %v7297_v46  ;;  %v12564_v33 = vpop.eup %12563 }
0x11e2   :  { %v7317_v31 = vsub.f32 1.0, %v12564_v33  ;;  %v7319_v57 = vmul.f32 %v12564_v33, %v15437_v47 }
0x11e3   :  { %v7315_v16 = vadd.f32 %v7314_v2, %v16087_v20 }
0x11e5   :  { %12565 = vtanh.f32 %v7315_v16 }
0x11ef   :  { %v12566_v32 = vpop.eup %12565 }
0x11f0   :  { %v7318_v30 = vmul.f32 %v12566_v32, %v7317_v31 }
0x11f2   :  { %v7320_v38 = vadd.f32 %v7319_v57, %v7318_v30 }
0x11f4   :  { %7484 = vst.msk [vmem:[#allocation15 + $0x4] sm:$0x3] %vm4091_vm5, %v7320_v38  ;;  %v7487_v27 = vmax.f32 %v7320_v38, 0.0 }
0x11f6   :  { %7593 = vmatmul.mubr.f32.vlgmr.msra.gmra.mrb[120].mxu0 %v7487_v27 }
0x11fe   :  { %v7387_v37 = vpop.f32.mrb[88].mxu1  ;;  %v7458_v55 = vpop.f32.mrb[118].mxu0 }
0x11ff   :  { %v12145_v52 = vadd.f32 %v14915_v42, %v7387_v37  ;;  %v7389_v22 = vpop.f32.mrb[89].mxu1  ;;  %v9751_v12 = vpop.f32.mrb[119].mxu0  ;;  %v7459_v36 = vadd.f32 %v7458_v55, %v14946_v17  ;;  %v7752_v17 = vld [vmem:[%s15638_s19] ss:$0 sm:$0xff] }
0x1200   :  { %v12147_v26 = vadd.f32 %v14919_v60, %v7389_v22 }
0x1201   :  { %v7750_v35 = vmul.f32 -1.442695, %v12145_v52 }
0x1202   :  { %v7751_v29 = vmul.f32 -1.442695, %v12147_v26 }
0x1203   :  { %12567 = vpow2.f32 %v7750_v35 }
0x1204   :  { %12569 = vpow2.f32 %v7751_v29 }
0x120d   :  { %v12568_v48 = vpop.eup %12567 }
0x120e   :  { %v7470_v63 = vadd.f32 1.0, %v12568_v48  ;;  %v12570_v47 = vpop.eup %12569 }
0x120f   :  { %v7471_v14 = vadd.f32 1.0, %v12570_v47 }
0x1210   :  { %12571 = vrcp.f32 %v7470_v63 }
0x1211   :  { %12573 = vrcp.f32 %v7471_v14 }
0x121a   :  { %v12572_v54 = vpop.eup %12571 }
0x121b   :  { %v7476_v43 = vmul.f32 %v12572_v54, %v7459_v36  ;;  %v12574_v21 = vpop.eup %12573 }
0x121c   :  { %v7479_v9 = vsub.f32 1.0, %v12574_v21  ;;  %v7481_v40 = vmul.f32 %v12574_v21, %v15479_v56 }
0x121d   :  { %v7477_v42 = vadd.f32 %v7476_v43, %v16088_v8 }
0x121f   :  { %12575 = vtanh.f32 %v7477_v42 }
0x1229   :  { %v12576_v49 = vpop.eup %12575 }
0x122a   :  { %v7480_v60 = vmul.f32 %v12576_v49, %v7479_v9 }
0x122c   :  { %v7482_v41 = vadd.f32 %v7481_v40, %v7480_v60 }
0x122e   :  { %7486 = vst.msk [vmem:[#allocation15 + $0x6] sm:$0x3] %vm4091_vm5, %v7482_v41 }
0x12c9   :  { %v8581_v7 = vpop.f32.mrb[120].mxu0 }
0x12ca   :  { %v8582_v61 = vpop.f32.mrb[121].mxu0 }
0x12cb   :  { %v8583_v13 = vadd.f32 %v8582_v61, %v8581_v7 }
0x12cd   :  { %v7595_v44 = vadd.f32 %v8583_v13, %v7752_v17 }
0x12cf   :  { %v7599_v50 = vsel %vm7598_vm6, %v7595_v44, -inf }
0x12d0   :  { %7600 = vmax.xlane.f32.xlu0 %v7599_v50 }
0x135d   :  { %v7601_v39 = vpop.xlane.xlu0 %7600 }
0x135e   :  { %v7602_v45 = vsub.f32 %v7595_v44, %v7601_v39 }
0x1360   :  { %v7603_v24 = vmul.f32 1.442695, %v7602_v45 }
0x1362   :  { %12577 = vpow2.f32 %v7603_v24 }
0x136c   :  { %v12578_v59 = vpop.eup %12577 }
0x136d   :  { %v7605_v56 = vsel %vm7598_vm6, %v12578_v59, 0.0 }
0x136e   :  { %7606 = vadd.xlane.f32.xlu0 %v7605_v56 }
0x136f   :  { %12754 = shalt.err (!%p12751_p4)
}
0x1370   :  { %s12755_s9 = scalar_lea.hbm %s15640_s21, 128 }
0x1371   :  { %p12756_p5 = scmp.ne.s32.totalorder %s15640_s21, %s12755_s9  ;;  %p12759_p6 = scmp.lt.u32.totalorder %s12755_s9, %s15640_s21 }
0x1373   :  { %p12761_p7 = pnand %p12759_p6, %p12756_p5 }
0x1375   :  { %12764 = shalt.err (!%p12761_p7)
}
0x1376   :  { %s12813_s28 = smov 32   ;;  %s12814_s12 = smov 2   ;;  %vm7611_vm7 = vcmask 9216  }
0x1377   :  { %7634 = dma.vmem_to_hbm [thread:$0]  %s7629_s15, 128, %s15640_s21, [#allocation16], %s12813_s28, %s12813_s28, %s12814_s12  }
0x1378   :  { %s12815_s10 = smov [#allocation14]  }
0x1379   :  { %s7619_s13 = sshll.u32 %s12815_s10, 4  ;;  %s7620_s13 = int_to_ptr.vmem [resolvable:$true] %s7619_s13 }
0x137a   :  { %s12765_s29 = scalar_lea.vmem %s7620_s13, 32  ;;  %p12770_p9 = scmp.lt.s32.totalorder %s7620_s13, %s7620_s13 }
0x137b   :  { %p12766_p8 = scmp.ne.s32.totalorder %s7620_s13, %s12765_s29  ;;  %p12771_p10 = scmp.lt.s32.totalorder %s12765_s29, %s12765_s29 }
0x137d   :  { %p12772_p11 = por %p12771_p10, %p12770_p9 }
0x137f   :  { %p12773_p12 = pnand %p12772_p11, %p12766_p8 }
0x13fb   :  { %v7607_v58 = vpop.xlane.xlu0 %7606 }
0x13fc   :  { %12579 = vlog2.f32 %v7607_v58 }
0x1406   :  { %v12580_v11 = vpop.eup %12579 }
0x1407   :  { %v7609_v25 = vmul.f32 0.6931472, %v12580_v11 }
0x1409   :  { %v7610_v51 = vsub.f32 %v7602_v45, %v7609_v25 }
0x140b   :  { %7612 = vst.msk [vmem:[#allocation14] sm:$0x3] %vm7611_vm7, %v7610_v51 }
0x140c   :  { %12776 = shalt.err (!%p12773_p12)
}
0x140d   :  { %s12777_s21 = scalar_lea.hbm %s15639_s20, 32 }
0x140e   :  { %p12778_p13 = scmp.ne.s32.totalorder %s15639_s20, %s12777_s21  ;;  %p12781_p0 = scmp.lt.u32.totalorder %s12777_s21, %s15639_s20 }
0x1410   :  { %p12783_p1 = pnand %p12781_p0, %p12778_p13 }
0x1412   :  { %12786 = shalt.err (!%p12783_p1)
}
0x1413   :  { %7622 = dma.vmem_to_hbm [thread:$0]  %s7620_s13, 32, %s15639_s20, [#allocation4]  }
0x1414   :  { %12795 = dma.done.wait [#allocation4], 32  }
0x1415   :  { %12796 = vsyncadd [#allocation4], 4294967264 }
0x1416   :  { %12797 = dma.done.wait [#allocation16], 128  }
0x1417   :  { %12798 = vsyncadd [#allocation16], 4294967168 }
0x1418   :  { %7641 = vsyncpa [#allocation3], 1 }
0x1419   :  { %7642 = vsyncpa [#allocation6], 1 }
0x141a   :  { %7643 = vsyncpa [#allocation9], 1 }
0x141b   :  { %7644 = vsyncpa [#allocation12], 1 }
0x141c   :  { %7645 = vsyncpa [#allocation4], 1 }
0x141d   :  { %7646 = vsyncpa [#allocation16], 1 }

</bundles_post_ra>
